<compile_context>
chip_gen: v6e
topology: v6e:2x2x1
jax: 0.10.0
libtpu: 0.0.40
codegen_flags: <defaults>
</compile_context>

<pallas_src>
import jax
import jax.numpy as jnp
from jax import lax
from jax.experimental import pallas as pl
from jax.experimental.pallas import tpu as pltpu

# ------------------------- configuration (small) -----------------------------
BATCH = 2
NB_INIT = 1
NB_FUTURE = 7
SEQ = NB_INIT + NB_FUTURE            # 8  (== chunk_size)
HID = 32                             # nb_hidden_dim == Mamba2 d_model
IN_DIM = 6 * 6                       # nb_input_dim
OUT_DIM = 6 * 6                      # nb_output_dim
N_LAYER = 8
D_STATE = 32
D_CONV = 4
EXPAND = 2
HEADDIM = 8
D_INNER = EXPAND * HID               # 64
N_HEADS = D_INNER // HEADDIM         # 8
CONV_DIM = D_INNER + 2 * D_STATE     # 128
D_IN_PROJ = 2 * D_INNER + 2 * D_STATE + N_HEADS  # 200 (original torch layout)
D_IN_PROJ_PAD = 256                  # lane-aligned layout [xBC | z | dt | pad]
HS = N_HEADS * SEQ                   # 64 (stacked per-head decay columns)
EPS = 1e-5


# --------------------------- constant matrices --------------------------------
def _build_constants():
    l_col = jnp.arange(SEQ)[:, None]
    s_row = jnp.arange(SEQ)[None, :]
    tril = (l_col >= s_row).astype(jnp.float32)                       # (SEQ, SEQ)

    # causal depthwise-conv shift matrices, stacked on rows (block k = tap k)
    shift_blocks = [(l_col - s_row == (D_CONV - 1 - k)).astype(jnp.float32)
                    for k in range(D_CONV)]
    shifts = jnp.concatenate(shift_blocks, axis=0)                    # (D_CONV*SEQ, SEQ)

    col = jnp.arange(HS)[None, :]
    col_h = col // SEQ                                                # head index of column
    col_s = col % SEQ                                                 # time index of column
    kh = (jnp.arange(N_HEADS)[:, None] == col_h).astype(jnp.float32)        # (N_HEADS, HS)
    trilT = (col_s >= jnp.arange(SEQ)[:, None]).astype(jnp.float32)         # (SEQ, HS)
    maskls = (jnp.arange(SEQ)[:, None] >= col_s).astype(jnp.float32)        # (SEQ, HS)
    ks = (jnp.arange(SEQ)[:, None] == col_s).astype(jnp.float32)            # (SEQ, HS)
    rsel = (jnp.arange(HS)[:, None] % SEQ == jnp.arange(SEQ)[None, :]).astype(jnp.float32)  # (HS, SEQ)
    hmask = ((jnp.arange(HS)[:, None] // SEQ) ==
             (jnp.arange(D_INNER)[None, :] // HEADDIM)).astype(jnp.float32)  # (HS, D_INNER)
    e_exp = (jnp.arange(N_HEADS)[:, None] ==
             (jnp.arange(D_INNER)[None, :] // HEADDIM)).astype(jnp.float32)  # (N_HEADS, D_INNER)
    return dict(tril=tril, shifts=shifts, kh=kh, trilT=trilT, maskls=maskls,
                ks=ks, rsel=rsel, hmask=hmask, E=e_exp)


# ------------------------------- fused kernel ---------------------------------
def _fused_kernel(t_ref, s_ref, states_ref,
                  emb_ref, w_in_ref, b_in_ref,
                  w_t_ref, b_t_ref, w_s_ref, b_s_ref,
                  tril_ref, shifts_ref, kh_ref, trilT_ref, maskls_ref,
                  ks_ref, rsel_ref, hmask_ref, e_ref,
                  norm_w_ref, inproj_ref, convw_ref, convb_ref,
                  dtb_ref, alog_ref, dpar_ref, mixn_ref, outp_ref,
                  w_out_ref, b_out_ref,
                  o_ref):
    b = pl.program_id(0)
    tval = t_ref[b, 0]                                                # SMEM scalar
    sval = s_ref[b, 0]
    t_e = tval * w_t_ref[...] + b_t_ref[...]                          # (1, 4*HID)
    s_e = sval * w_s_ref[...] + b_s_ref[...]                          # (1, 4*HID)

    # constant matrices, loaded once per grid step (VMEM resident across steps)
    tril = tril_ref[...]
    shifts = shifts_ref[...]
    kh = kh_ref[...]
    trilT = trilT_ref[...]
    maskls = maskls_ref[...]
    ks = ks_ref[...]
    rsel = rsel_ref[...]
    hmask = hmask_ref[...]
    E = e_ref[...]

    # ---- embedding: concat([states_emb, input_layer(states)]) via padded adds
    st = states_ref[0]                                                # (SEQ, IN_DIM)
    x = (emb_ref[...] + b_in_ref[...]
         + jnp.dot(st, w_in_ref[...], preferred_element_type=jnp.float32))   # (SEQ, HID)
    x = (x * t_e[:, :HID] * s_e[:, :HID]
         + t_e[:, HID:2 * HID] + s_e[:, HID:2 * HID])

    # ---- 8 Mamba2 blocks, unrolled; weights are indexed statically -----------
    for i in range(N_LAYER):
        # pre RMSNorm
        xn = x * lax.rsqrt(jnp.mean(x * x, axis=-1, keepdims=True) + EPS) * norm_w_ref[i]

        # in_proj (bias free); columns laid out [xBC(128) | z(64) | dt(8) | pad]
        zxbcdt = jnp.dot(xn, inproj_ref[i], preferred_element_type=jnp.float32)  # (SEQ, 256)
        xBC = zxbcdt[:, :CONV_DIM]                                    # (SEQ, 128)
        z = zxbcdt[:, CONV_DIM:CONV_DIM + D_INNER]                    # (SEQ, 64)
        dt = zxbcdt[:, CONV_DIM + D_INNER:CONV_DIM + D_INNER + N_HEADS] + dtb_ref[i]
        # softplus (clamped exp, exact passthrough for large dt)
        dt = jnp.where(dt > 20.0, dt,
                       jnp.log(1.0 + jnp.exp(jnp.minimum(dt, 20.0))))

        # causal depthwise conv1d (left pad d_conv-1) + SiLU
        cw = convw_ref[i]                                             # (D_CONV, CONV_DIM)
        conv = jnp.zeros((SEQ, CONV_DIM), jnp.float32) + convb_ref[i]
        for k in range(D_CONV):
            conv = conv + (jnp.dot(shifts[k * SEQ:(k + 1) * SEQ, :], xBC,
                                   preferred_element_type=jnp.float32)
                           * cw[k:k + 1, :])
        xBC = conv * (1.0 / (1.0 + jnp.exp(-conv)))
        xc = xBC[:, :D_INNER]                                         # (SEQ, D_INNER)
        Bm = xBC[:, D_INNER:D_INNER + D_STATE]                        # (SEQ, D_STATE)
        Cm = xBC[:, D_INNER + D_STATE:]                               # (SEQ, D_STATE)

        # SSD diagonal block (seq_len == chunk_size -> exact).  Safe segsum:
        # decay[l, (h,s)] = exp(cum[l,h] - cum[s,h]) for l >= s, else 0,
        # built entirely with 2D matmuls against constant selection matrices.
        A = -jnp.exp(alog_ref[i])                                     # (1, N_HEADS)
        A_dt = A * dt                                                 # (SEQ, N_HEADS)
        AK = jnp.dot(A_dt, kh, preferred_element_type=jnp.float32)    # (SEQ, HS): A_dt[s',h] at col (h,s)
        T1 = jnp.dot(tril, AK, preferred_element_type=jnp.float32)    # cum[l,h] at col (h,s)
        T2 = jnp.sum(trilT * AK, axis=0, keepdims=True)               # cum[s,h] at col (h,s)
        Ldec = jnp.exp(jnp.where(maskls > 0.5, T1 - T2, -1e30))       # (SEQ, HS)

        CB = lax.dot_general(Cm, Bm, (((1,), (1,)), ((), ())),
                             preferred_element_type=jnp.float32)      # (SEQ, SEQ)
        CBe = jnp.dot(CB, ks, preferred_element_type=jnp.float32)     # CB[l,s] at col (h,s)
        Wm = CBe * Ldec                                               # (SEQ, HS)

        dt_e = jnp.dot(dt, E, preferred_element_type=jnp.float32)     # (SEQ, D_INNER)
        d_e = jnp.dot(dpar_ref[i], E, preferred_element_type=jnp.float32)  # (1, D_INNER)
        xdt = xc * dt_e
        # G[(h,s), (h',p)] = xdt[s, (h',p)] * [h == h']
        G = jnp.dot(rsel, xdt, preferred_element_type=jnp.float32) * hmask  # (HS, D_INNER)
        y = jnp.dot(Wm, G, preferred_element_type=jnp.float32) + xc * d_e   # + D skip

        # gated RMSNorm + out_proj + residual
        yg = y * (z * (1.0 / (1.0 + jnp.exp(-z))))                    # y * silu(z)
        yn = yg * lax.rsqrt(jnp.mean(yg * yg, axis=-1, keepdims=True) + EPS) * mixn_ref[i]
        x = x + jnp.dot(yn, outp_ref[i], preferred_element_type=jnp.float32)
        # TODO(synk): Mamba2 also returns an InferenceCache (conv_state, ssm_state);
        # it is unused by RewardGuidanceModel.forward and is not produced here.

    # ---- output modulation + projection --------------------------------------
    xo = (x * t_e[:, 2 * HID:3 * HID] * s_e[:, 2 * HID:3 * HID]
          + t_e[:, 3 * HID:] + s_e[:, 3 * HID:])
    o_ref[0] = (jnp.dot(xo, w_out_ref[...], preferred_element_type=jnp.float32)
                + b_out_ref[...])


# --------------------------- pallas_call wrapper -------------------------------
def _full(shape):
    n = len(shape)
    return pl.BlockSpec(shape, lambda b, n=n: (0,) * n)


_SMEM_SPEC = pl.BlockSpec(memory_space=pltpu.MemorySpace.SMEM)


@jax.jit
def reward_guidance_forward(params, init_states, future_states, time_flags, shortcut_value):
    bsz = init_states.shape[0]
    states = jnp.concatenate(
        [init_states.reshape(bsz, NB_INIT, -1),
         future_states.reshape(bsz, NB_FUTURE, -1)], axis=1).astype(jnp.float32)
    t = time_flags.reshape(bsz, 1).astype(jnp.float32)
    s = jnp.broadcast_to(
        jnp.asarray(shortcut_value, jnp.float32).reshape(-1, 1), (bsz, 1))

    c = params["consts"]
    L = params["layers"]

    in_specs = [
        _SMEM_SPEC, _SMEM_SPEC,                                       # t, s scalars
        pl.BlockSpec((1, SEQ, IN_DIM), lambda b: (b, 0, 0)),          # states
        _full((SEQ, HID)), _full((IN_DIM, HID)), _full((1, HID)),     # emb / input layer (padded)
        _full((1, 4 * HID)), _full((1, 4 * HID)),                     # time emb w, b
        _full((1, 4 * HID)), _full((1, 4 * HID)),                     # shortcut emb w, b
        _full((SEQ, SEQ)), _full((D_CONV * SEQ, SEQ)),                # tril, conv shifts
        _full((N_HEADS, HS)), _full((SEQ, HS)), _full((SEQ, HS)),     # kh, trilT, maskls
        _full((SEQ, HS)), _full((HS, SEQ)), _full((HS, D_INNER)),     # ks, rsel, hmask
        _full((N_HEADS, D_INNER)),                                    # E
        _full((N_LAYER, 1, HID)), _full((N_LAYER, HID, D_IN_PROJ_PAD)),
        _full((N_LAYER, D_CONV, CONV_DIM)), _full((N_LAYER, 1, CONV_DIM)),
        _full((N_LAYER, 1, N_HEADS)), _full((N_LAYER, 1, N_HEADS)),
        _full((N_LAYER, 1, N_HEADS)), _full((N_LAYER, 1, D_INNER)),
        _full((N_LAYER, D_INNER, HID)),
        _full((HID, OUT_DIM)), _full((1, OUT_DIM)),
    ]

    out = pl.pallas_call(
        _fused_kernel,
        out_shape=jax.ShapeDtypeStruct((bsz, SEQ, OUT_DIM), jnp.float32),
        grid=(bsz,),
        in_specs=in_specs,
        out_specs=pl.BlockSpec((1, SEQ, OUT_DIM), lambda b: (b, 0, 0)),
        compiler_params=pltpu.CompilerParams(
            dimension_semantics=("parallel",)),   # v7x: one batch element per TC
    )(t, s, states,
      params["states_emb_pad"], params["input_wT_pad"], params["input_b_pad"],
      params["time_wT"], params["time_b"], params["shortcut_wT"], params["shortcut_b"],
      c["tril"], c["shifts"], c["kh"], c["trilT"], c["maskls"],
      c["ks"], c["rsel"], c["hmask"], c["E"],
      L["norm_w"], L["in_proj_wT"], L["conv_w"], L["conv_b"],
      L["dt_bias"], L["A_log"], L["D"], L["mixer_norm_w"], L["out_proj_wT"],
      params["output_wT"], params["output_b"])

    out = out[:, -NB_FUTURE:, :]
    return out.reshape(bsz, NB_FUTURE, -1, 6)


# ------------------------------ parameter init ---------------------------------
def _linear_init(key, fan_in, fan_out, bias=True):
    bound = 1.0 / (fan_in ** 0.5)
    kw, kb = jax.random.split(key)
    w = jax.random.uniform(kw, (fan_out, fan_in), jnp.float32, -bound, bound)
    b = (jax.random.uniform(kb, (fan_out,), jnp.float32, -bound, bound)
         if bias else None)
    return w, b


def init_params(key):
    keys = jax.random.split(key, 8 + N_LAYER)
    w_in, b_in = _linear_init(keys[0], IN_DIM, HID // 2)
    w_out, b_out = _linear_init(keys[1], HID, OUT_DIM)
    w_t, b_t = _linear_init(keys[2], 1, 4 * HID)
    w_s, b_s = _linear_init(keys[3], 1, 4 * HID)
    states_emb = jax.random.normal(keys[4], (SEQ, HID // 2), jnp.float32)
    # TODO(synk): reward_layer is declared in __init__ but never used in forward(); omitted.

    # fold the embedding concat into one add (lane-disjoint padded tensors)
    emb_pad = jnp.zeros((SEQ, HID), jnp.float32).at[:, :HID // 2].set(states_emb)
    w_in_pad = jnp.zeros((IN_DIM, HID), jnp.float32).at[:, HID // 2:].set(w_in.T)
    b_in_pad = jnp.zeros((1, HID), jnp.float32).at[0, HID // 2:].set(b_in)

    layers = []
    for i in range(N_LAYER):
        lk = jax.random.split(keys[8 + i], 6)
        in_w, _ = _linear_init(lk[0], HID, D_IN_PROJ, bias=False)     # (200, 32), rows [z|xBC|dt]
        out_w, _ = _linear_init(lk[1], D_INNER, HID, bias=False)
        cbound = 1.0 / (D_CONV ** 0.5)
        kcw, kcb = jax.random.split(lk[2])
        conv_w = jax.random.uniform(kcw, (CONV_DIM, D_CONV), jnp.float32, -cbound, cbound)
        conv_b = jax.random.uniform(kcb, (CONV_DIM,), jnp.float32, -cbound, cbound)
        dt_bias = jax.random.uniform(lk[3], (N_HEADS,), jnp.float32, -0.5, 0.5)
        a_log = jnp.log(jax.random.uniform(lk[4], (N_HEADS,), jnp.float32, 1.0, 2.0))
        d_par = 1.0 + 0.1 * jax.random.normal(lk[5], (N_HEADS,), jnp.float32)

        # reorder + pad in_proj columns to the lane-aligned layout [xBC | z | dt | 0]
        wT = in_w.T                                                   # (HID, 200)
        w2 = jnp.zeros((HID, D_IN_PROJ_PAD), jnp.float32)
        w2 = w2.at[:, :CONV_DIM].set(wT[:, D_INNER:D_INNER + CONV_DIM])
        w2 = w2.at[:, CONV_DIM:CONV_DIM + D_INNER].set(wT[:, :D_INNER])
        w2 = w2.at[:, CONV_DIM + D_INNER:CONV_DIM + D_INNER + N_HEADS].set(
            wT[:, D_INNER + CONV_DIM:])

        layers.append(dict(
            norm_w=jnp.ones((1, HID), jnp.float32),
            in_proj_wT=w2,                              # (HID, 256)
            conv_w=conv_w.T,                            # (D_CONV, CONV_DIM)
            conv_b=conv_b.reshape(1, CONV_DIM),
            dt_bias=dt_bias.reshape(1, N_HEADS),
            A_log=a_log.reshape(1, N_HEADS),
            D=d_par.reshape(1, N_HEADS),
            mixer_norm_w=jnp.ones((1, D_INNER), jnp.float32),
            out_proj_wT=out_w.T,                        # (D_INNER, HID)
        ))
    layers_stacked = jax.tree_util.tree_map(lambda *xs: jnp.stack(xs, axis=0), *layers)
    return dict(
        states_emb_pad=emb_pad, input_wT_pad=w_in_pad, input_b_pad=b_in_pad,
        output_wT=w_out.T, output_b=b_out.reshape(1, OUT_DIM),
        time_wT=w_t.T, time_b=b_t.reshape(1, 4 * HID),
        shortcut_wT=w_s.T, shortcut_b=b_s.reshape(1, 4 * HID),
        layers=layers_stacked,
        consts=_build_constants(),
    )


if __name__ == "__main__":
    key = jax.random.PRNGKey(0)
    kp, k1, k2, k3, k4 = jax.random.split(key, 5)
    params = init_params(kp)
    init_states = jax.random.normal(k1, (BATCH, NB_INIT, 6, 6), jnp.float32)
    future_states = jax.random.normal(k2, (BATCH, NB_FUTURE, 6, 6), jnp.float32)
    time_flags = jax.random.uniform(k3, (BATCH, 1), jnp.float32)
    shortcut_value = jax.random.uniform(k4, (BATCH, 1), jnp.float32)

    out = reward_guidance_forward(params, init_states, future_states, time_flags, shortcut_value)
    out = jax.block_until_ready(out)
    assert out.shape == (BATCH, NB_FUTURE, OUT_DIM // 6, 6), out.shape
    assert bool(jnp.all(jnp.isfinite(out)))
    print("KERNEL_OK")
</pallas_src>

<mosaic_0001>
module attributes {stable_mosaic.version = 11 : i64} {
  func.func @_fused_kernel(%arg0: i32, %arg1: memref<2x1xf32, #tpu.memory_space<smem>>, %arg2: memref<2x1xf32, #tpu.memory_space<smem>>, %arg3: memref<1x8x36xf32, #tpu.memory_space<vmem>>, %arg4: memref<8x32xf32, #tpu.memory_space<vmem>>, %arg5: memref<36x32xf32, #tpu.memory_space<vmem>>, %arg6: memref<1x32xf32, #tpu.memory_space<vmem>>, %arg7: memref<1x128xf32, #tpu.memory_space<vmem>>, %arg8: memref<1x128xf32, #tpu.memory_space<vmem>>, %arg9: memref<1x128xf32, #tpu.memory_space<vmem>>, %arg10: memref<1x128xf32, #tpu.memory_space<vmem>>, %arg11: memref<8x8xf32, #tpu.memory_space<vmem>>, %arg12: memref<32x8xf32, #tpu.memory_space<vmem>>, %arg13: memref<8x64xf32, #tpu.memory_space<vmem>>, %arg14: memref<8x64xf32, #tpu.memory_space<vmem>>, %arg15: memref<8x64xf32, #tpu.memory_space<vmem>>, %arg16: memref<8x64xf32, #tpu.memory_space<vmem>>, %arg17: memref<64x8xf32, #tpu.memory_space<vmem>>, %arg18: memref<64x64xf32, #tpu.memory_space<vmem>>, %arg19: memref<8x64xf32, #tpu.memory_space<vmem>>, %arg20: memref<8x1x32xf32, #tpu.memory_space<vmem>>, %arg21: memref<8x32x256xf32, #tpu.memory_space<vmem>>, %arg22: memref<8x4x128xf32, #tpu.memory_space<vmem>>, %arg23: memref<8x1x128xf32, #tpu.memory_space<vmem>>, %arg24: memref<8x1x8xf32, #tpu.memory_space<vmem>>, %arg25: memref<8x1x8xf32, #tpu.memory_space<vmem>>, %arg26: memref<8x1x8xf32, #tpu.memory_space<vmem>>, %arg27: memref<8x1x64xf32, #tpu.memory_space<vmem>>, %arg28: memref<8x64x32xf32, #tpu.memory_space<vmem>>, %arg29: memref<32x36xf32, #tpu.memory_space<vmem>>, %arg30: memref<1x36xf32, #tpu.memory_space<vmem>>, %arg31: memref<1x8x36xf32, #tpu.memory_space<vmem>>) attributes {dimension_semantics = [#tpu.dimension_semantics<parallel>], iteration_bounds = array<i64: 2>, scalar_prefetch = 0 : i64, scratch_operands = 0 : i64, tpu.core_type = #tpu.core_type<tc>, window_params = [{transform_indices = @transform_0, window_bounds = array<i64: 2, 1>}, {transform_indices = @transform_1, window_bounds = array<i64: 2, 1>}, {transform_indices = @transform_2, window_bounds = array<i64: 1, 8, 36>}, {pipeline_mode = #tpu.pipeline_mode<synchronous>, transform_indices = @transform_3, window_bounds = array<i64: 8, 32>}, {pipeline_mode = #tpu.pipeline_mode<synchronous>, transform_indices = @transform_4, window_bounds = array<i64: 36, 32>}, {pipeline_mode = #tpu.pipeline_mode<synchronous>, transform_indices = @transform_5, window_bounds = array<i64: 1, 32>}, {pipeline_mode = #tpu.pipeline_mode<synchronous>, transform_indices = @transform_6, window_bounds = array<i64: 1, 128>}, {pipeline_mode = #tpu.pipeline_mode<synchronous>, transform_indices = @transform_7, window_bounds = array<i64: 1, 128>}, {pipeline_mode = #tpu.pipeline_mode<synchronous>, transform_indices = @transform_8, window_bounds = array<i64: 1, 128>}, {pipeline_mode = #tpu.pipeline_mode<synchronous>, transform_indices = @transform_9, window_bounds = array<i64: 1, 128>}, {pipeline_mode = #tpu.pipeline_mode<synchronous>, transform_indices = @transform_10, window_bounds = array<i64: 8, 8>}, {pipeline_mode = #tpu.pipeline_mode<synchronous>, transform_indices = @transform_11, window_bounds = array<i64: 32, 8>}, {pipeline_mode = #tpu.pipeline_mode<synchronous>, transform_indices = @transform_12, window_bounds = array<i64: 8, 64>}, {pipeline_mode = #tpu.pipeline_mode<synchronous>, transform_indices = @transform_13, window_bounds = array<i64: 8, 64>}, {pipeline_mode = #tpu.pipeline_mode<synchronous>, transform_indices = @transform_14, window_bounds = array<i64: 8, 64>}, {pipeline_mode = #tpu.pipeline_mode<synchronous>, transform_indices = @transform_15, window_bounds = array<i64: 8, 64>}, {pipeline_mode = #tpu.pipeline_mode<synchronous>, transform_indices = @transform_16, window_bounds = array<i64: 64, 8>}, {pipeline_mode = #tpu.pipeline_mode<synchronous>, transform_indices = @transform_17, window_bounds = array<i64: 64, 64>}, {pipeline_mode = #tpu.pipeline_mode<synchronous>, transform_indices = @transform_18, window_bounds = array<i64: 8, 64>}, {pipeline_mode = #tpu.pipeline_mode<synchronous>, transform_indices = @transform_19, window_bounds = array<i64: 8, 1, 32>}, {pipeline_mode = #tpu.pipeline_mode<synchronous>, transform_indices = @transform_20, window_bounds = array<i64: 8, 32, 256>}, {pipeline_mode = #tpu.pipeline_mode<synchronous>, transform_indices = @transform_21, window_bounds = array<i64: 8, 4, 128>}, {pipeline_mode = #tpu.pipeline_mode<synchronous>, transform_indices = @transform_22, window_bounds = array<i64: 8, 1, 128>}, {pipeline_mode = #tpu.pipeline_mode<synchronous>, transform_indices = @transform_23, window_bounds = array<i64: 8, 1, 8>}, {pipeline_mode = #tpu.pipeline_mode<synchronous>, transform_indices = @transform_24, window_bounds = array<i64: 8, 1, 8>}, {pipeline_mode = #tpu.pipeline_mode<synchronous>, transform_indices = @transform_25, window_bounds = array<i64: 8, 1, 8>}, {pipeline_mode = #tpu.pipeline_mode<synchronous>, transform_indices = @transform_26, window_bounds = array<i64: 8, 1, 64>}, {pipeline_mode = #tpu.pipeline_mode<synchronous>, transform_indices = @transform_27, window_bounds = array<i64: 8, 64, 32>}, {pipeline_mode = #tpu.pipeline_mode<synchronous>, transform_indices = @transform_28, window_bounds = array<i64: 32, 36>}, {pipeline_mode = #tpu.pipeline_mode<synchronous>, transform_indices = @transform_29, window_bounds = array<i64: 1, 36>}, {transform_indices = @transform_30, window_bounds = array<i64: 1, 8, 36>}]} {
    %0 = arith.index_cast %arg0 : i32 to index
    %c0 = arith.constant 0 : index
    %1 = memref.load %arg1[%0, %c0] : memref<2x1xf32, #tpu.memory_space<smem>>
    %2 = arith.index_cast %arg0 : i32 to index
    %c0_0 = arith.constant 0 : index
    %3 = memref.load %arg2[%2, %c0_0] : memref<2x1xf32, #tpu.memory_space<smem>>
    %c0_1 = arith.constant 0 : index
    %c0_2 = arith.constant 0 : index
    %4 = vector.load %arg7[%c0_1, %c0_2] : memref<1x128xf32, #tpu.memory_space<vmem>>, vector<1x128xf32>
    %5 = vector.broadcast %1 : f32 to vector<1x128xf32>
    %6 = arith.mulf %5, %4 : vector<1x128xf32>
    %c0_3 = arith.constant 0 : index
    %c0_4 = arith.constant 0 : index
    %7 = vector.load %arg8[%c0_3, %c0_4] : memref<1x128xf32, #tpu.memory_space<vmem>>, vector<1x128xf32>
    %8 = arith.addf %6, %7 : vector<1x128xf32>
    %c0_5 = arith.constant 0 : index
    %c0_6 = arith.constant 0 : index
    %9 = vector.load %arg9[%c0_5, %c0_6] : memref<1x128xf32, #tpu.memory_space<vmem>>, vector<1x128xf32>
    %10 = vector.broadcast %3 : f32 to vector<1x128xf32>
    %11 = arith.mulf %10, %9 : vector<1x128xf32>
    %c0_7 = arith.constant 0 : index
    %c0_8 = arith.constant 0 : index
    %12 = vector.load %arg10[%c0_7, %c0_8] : memref<1x128xf32, #tpu.memory_space<vmem>>, vector<1x128xf32>
    %13 = arith.addf %11, %12 : vector<1x128xf32>
    %c0_9 = arith.constant 0 : index
    %c0_10 = arith.constant 0 : index
    %14 = vector.load %arg11[%c0_9, %c0_10] : memref<8x8xf32, #tpu.memory_space<vmem>>, vector<8x8xf32>
    %c0_11 = arith.constant 0 : index
    %c0_12 = arith.constant 0 : index
    %15 = vector.load %arg12[%c0_11, %c0_12] : memref<32x8xf32, #tpu.memory_space<vmem>>, vector<32x8xf32>
    %c0_13 = arith.constant 0 : index
    %c0_14 = arith.constant 0 : index
    %16 = vector.load %arg13[%c0_13, %c0_14] : memref<8x64xf32, #tpu.memory_space<vmem>>, vector<8x64xf32>
    %c0_15 = arith.constant 0 : index
    %c0_16 = arith.constant 0 : index
    %17 = vector.load %arg14[%c0_15, %c0_16] : memref<8x64xf32, #tpu.memory_space<vmem>>, vector<8x64xf32>
    %c0_17 = arith.constant 0 : index
    %c0_18 = arith.constant 0 : index
    %18 = vector.load %arg15[%c0_17, %c0_18] : memref<8x64xf32, #tpu.memory_space<vmem>>, vector<8x64xf32>
    %c0_19 = arith.constant 0 : index
    %c0_20 = arith.constant 0 : index
    %19 = vector.load %arg16[%c0_19, %c0_20] : memref<8x64xf32, #tpu.memory_space<vmem>>, vector<8x64xf32>
    %c0_21 = arith.constant 0 : index
    %c0_22 = arith.constant 0 : index
    %20 = vector.load %arg17[%c0_21, %c0_22] : memref<64x8xf32, #tpu.memory_space<vmem>>, vector<64x8xf32>
    %c0_23 = arith.constant 0 : index
    %c0_24 = arith.constant 0 : index
    %21 = vector.load %arg18[%c0_23, %c0_24] : memref<64x64xf32, #tpu.memory_space<vmem>>, vector<64x64xf32>
    %c0_25 = arith.constant 0 : index
    %c0_26 = arith.constant 0 : index
    %22 = vector.load %arg19[%c0_25, %c0_26] : memref<8x64xf32, #tpu.memory_space<vmem>>, vector<8x64xf32>
    %c0_27 = arith.constant 0 : index
    %c0_28 = arith.constant 0 : index
    %c0_29 = arith.constant 0 : index
    %23 = vector.load %arg3[%c0_27, %c0_28, %c0_29] : memref<1x8x36xf32, #tpu.memory_space<vmem>>, vector<1x8x36xf32>
    %24 = vector.shape_cast %23 : vector<1x8x36xf32> to vector<8x36xf32>
    %c0_30 = arith.constant 0 : index
    %c0_31 = arith.constant 0 : index
    %25 = vector.load %arg4[%c0_30, %c0_31] : memref<8x32xf32, #tpu.memory_space<vmem>>, vector<8x32xf32>
    %c0_32 = arith.constant 0 : index
    %c0_33 = arith.constant 0 : index
    %26 = vector.load %arg6[%c0_32, %c0_33] : memref<1x32xf32, #tpu.memory_space<vmem>>, vector<1x32xf32>
    %27 = vector.broadcast %26 : vector<1x32xf32> to vector<8x32xf32>
    %28 = arith.addf %25, %27 : vector<8x32xf32>
    %c0_34 = arith.constant 0 : index
    %c0_35 = arith.constant 0 : index
    %29 = vector.load %arg5[%c0_34, %c0_35] : memref<36x32xf32, #tpu.memory_space<vmem>>, vector<36x32xf32>
    %cst = arith.constant dense<0.000000e+00> : vector<8x32xf32>
    %30 = tpu.matmul %24, %29, %cst {dimension_numbers = #tpu.dot_dimension_numbers<[1], [0], [0], [1], [0, 0, 1, 1], [], []>} : vector<8x36xf32>, vector<36x32xf32>, vector<8x32xf32> -> vector<8x32xf32>
    %31 = arith.addf %28, %30 : vector<8x32xf32>
    %32 = vector.extract_strided_slice %8 {offsets = [0, 0], sizes = [1, 32], strides = [1, 1]} : vector<1x128xf32> to vector<1x32xf32>
    %33 = vector.broadcast %32 : vector<1x32xf32> to vector<8x32xf32>
    %34 = arith.mulf %31, %33 : vector<8x32xf32>
    %35 = vector.extract_strided_slice %13 {offsets = [0, 0], sizes = [1, 32], strides = [1, 1]} : vector<1x128xf32> to vector<1x32xf32>
    %36 = vector.broadcast %35 : vector<1x32xf32> to vector<8x32xf32>
    %37 = arith.mulf %34, %36 : vector<8x32xf32>
    %38 = vector.extract_strided_slice %8 {offsets = [0, 32], sizes = [1, 32], strides = [1, 1]} : vector<1x128xf32> to vector<1x32xf32>
    %39 = vector.broadcast %38 : vector<1x32xf32> to vector<8x32xf32>
    %40 = arith.addf %37, %39 : vector<8x32xf32>
    %41 = vector.extract_strided_slice %13 {offsets = [0, 32], sizes = [1, 32], strides = [1, 1]} : vector<1x128xf32> to vector<1x32xf32>
    %42 = vector.broadcast %41 : vector<1x32xf32> to vector<8x32xf32>
    %43 = arith.addf %40, %42 : vector<8x32xf32>
    %44 = arith.mulf %43, %43 : vector<8x32xf32>
    %cst_36 = arith.constant dense<0.000000e+00> : vector<8xf32>
    %45 = vector.multi_reduction <add>, %44, %cst_36 [1] : vector<8x32xf32> to vector<8xf32>
    %46 = vector.shape_cast %45 : vector<8xf32> to vector<8x1xf32>
    %cst_37 = arith.constant 3.200000e+01 : f32
    %47 = vector.broadcast %cst_37 : f32 to vector<8x1xf32>
    %48 = arith.divf %46, %47 : vector<8x1xf32>
    %cst_38 = arith.constant 9.99999974E-6 : f32
    %49 = vector.broadcast %cst_38 : f32 to vector<8x1xf32>
    %50 = arith.addf %48, %49 : vector<8x1xf32>
    %51 = math.rsqrt %50 : vector<8x1xf32>
    %52 = vector.broadcast %51 : vector<8x1xf32> to vector<8x32xf32>
    %53 = arith.mulf %43, %52 : vector<8x32xf32>
    %c0_39 = arith.constant 0 : index
    %c0_40 = arith.constant 0 : index
    %c0_41 = arith.constant 0 : index
    %54 = vector.load %arg20[%c0_39, %c0_40, %c0_41] : memref<8x1x32xf32, #tpu.memory_space<vmem>>, vector<1x1x32xf32>
    %55 = vector.shape_cast %54 : vector<1x1x32xf32> to vector<1x32xf32>
    %56 = vector.broadcast %55 : vector<1x32xf32> to vector<8x32xf32>
    %57 = arith.mulf %53, %56 : vector<8x32xf32>
    %c0_42 = arith.constant 0 : index
    %c0_43 = arith.constant 0 : index
    %c0_44 = arith.constant 0 : index
    %58 = vector.load %arg21[%c0_42, %c0_43, %c0_44] : memref<8x32x256xf32, #tpu.memory_space<vmem>>, vector<1x32x256xf32>
    %59 = vector.shape_cast %58 : vector<1x32x256xf32> to vector<32x256xf32>
    %cst_45 = arith.constant dense<0.000000e+00> : vector<8x256xf32>
    %60 = tpu.matmul %57, %59, %cst_45 {dimension_numbers = #tpu.dot_dimension_numbers<[1], [0], [0], [1], [0, 0, 1, 1], [], []>} : vector<8x32xf32>, vector<32x256xf32>, vector<8x256xf32> -> vector<8x256xf32>
    %61 = vector.extract_strided_slice %60 {offsets = [0, 0], sizes = [8, 128], strides = [1, 1]} : vector<8x256xf32> to vector<8x128xf32>
    %62 = vector.extract_strided_slice %60 {offsets = [0, 128], sizes = [8, 64], strides = [1, 1]} : vector<8x256xf32> to vector<8x64xf32>
    %63 = vector.extract_strided_slice %60 {offsets = [0, 192], sizes = [8, 8], strides = [1, 1]} : vector<8x256xf32> to vector<8x8xf32>
    %c0_46 = arith.constant 0 : index
    %c0_47 = arith.constant 0 : index
    %c0_48 = arith.constant 0 : index
    %64 = vector.load %arg24[%c0_46, %c0_47, %c0_48] : memref<8x1x8xf32, #tpu.memory_space<vmem>>, vector<1x1x8xf32>
    %65 = vector.shape_cast %64 : vector<1x1x8xf32> to vector<1x8xf32>
    %66 = vector.broadcast %65 : vector<1x8xf32> to vector<8x8xf32>
    %67 = arith.addf %63, %66 : vector<8x8xf32>
    %cst_49 = arith.constant 2.000000e+01 : f32
    %68 = vector.broadcast %cst_49 : f32 to vector<8x8xf32>
    %69 = arith.cmpf ogt, %67, %68 : vector<8x8xf32>
    %cst_50 = arith.constant 2.000000e+01 : f32
    %70 = vector.broadcast %cst_50 : f32 to vector<8x8xf32>
    %71 = arith.minimumf %67, %70 : vector<8x8xf32>
    %72 = math.exp %71 : vector<8x8xf32>
    %cst_51 = arith.constant 1.000000e+00 : f32
    %73 = vector.broadcast %cst_51 : f32 to vector<8x8xf32>
    %74 = arith.addf %73, %72 : vector<8x8xf32>
    %75 = math.log %74 : vector<8x8xf32>
    %76 = arith.select %69, %67, %75 : vector<8x8xi1>, vector<8x8xf32>
    %c0_52 = arith.constant 0 : index
    %c0_53 = arith.constant 0 : index
    %c0_54 = arith.constant 0 : index
    %77 = vector.load %arg22[%c0_52, %c0_53, %c0_54] : memref<8x4x128xf32, #tpu.memory_space<vmem>>, vector<1x4x128xf32>
    %78 = vector.shape_cast %77 : vector<1x4x128xf32> to vector<4x128xf32>
    %cst_55 = arith.constant 0.000000e+00 : f32
    %79 = vector.broadcast %cst_55 : f32 to vector<8x128xf32>
    %c0_56 = arith.constant 0 : index
    %c0_57 = arith.constant 0 : index
    %c0_58 = arith.constant 0 : index
    %80 = vector.load %arg23[%c0_56, %c0_57, %c0_58] : memref<8x1x128xf32, #tpu.memory_space<vmem>>, vector<1x1x128xf32>
    %81 = vector.shape_cast %80 : vector<1x1x128xf32> to vector<1x128xf32>
    %82 = vector.broadcast %81 : vector<1x128xf32> to vector<8x128xf32>
    %83 = arith.addf %79, %82 : vector<8x128xf32>
    %84 = vector.extract_strided_slice %15 {offsets = [0, 0], sizes = [8, 8], strides = [1, 1]} : vector<32x8xf32> to vector<8x8xf32>
    %cst_59 = arith.constant dense<0.000000e+00> : vector<8x128xf32>
    %85 = tpu.matmul %84, %61, %cst_59 {dimension_numbers = #tpu.dot_dimension_numbers<[1], [0], [0], [1], [0, 0, 1, 1], [], []>} : vector<8x8xf32>, vector<8x128xf32>, vector<8x128xf32> -> vector<8x128xf32>
    %86 = vector.extract_strided_slice %78 {offsets = [0, 0], sizes = [1, 128], strides = [1, 1]} : vector<4x128xf32> to vector<1x128xf32>
    %87 = vector.broadcast %86 : vector<1x128xf32> to vector<8x128xf32>
    %88 = arith.mulf %85, %87 : vector<8x128xf32>
    %89 = arith.addf %83, %88 : vector<8x128xf32>
    %90 = vector.extract_strided_slice %15 {offsets = [8, 0], sizes = [8, 8], strides = [1, 1]} : vector<32x8xf32> to vector<8x8xf32>
    %cst_60 = arith.constant dense<0.000000e+00> : vector<8x128xf32>
    %91 = tpu.matmul %90, %61, %cst_60 {dimension_numbers = #tpu.dot_dimension_numbers<[1], [0], [0], [1], [0, 0, 1, 1], [], []>} : vector<8x8xf32>, vector<8x128xf32>, vector<8x128xf32> -> vector<8x128xf32>
    %92 = vector.extract_strided_slice %78 {offsets = [1, 0], sizes = [1, 128], strides = [1, 1]} : vector<4x128xf32> to vector<1x128xf32>
    %93 = vector.broadcast %92 : vector<1x128xf32> to vector<8x128xf32>
    %94 = arith.mulf %91, %93 : vector<8x128xf32>
    %95 = arith.addf %89, %94 : vector<8x128xf32>
    %96 = vector.extract_strided_slice %15 {offsets = [16, 0], sizes = [8, 8], strides = [1, 1]} : vector<32x8xf32> to vector<8x8xf32>
    %cst_61 = arith.constant dense<0.000000e+00> : vector<8x128xf32>
    %97 = tpu.matmul %96, %61, %cst_61 {dimension_numbers = #tpu.dot_dimension_numbers<[1], [0], [0], [1], [0, 0, 1, 1], [], []>} : vector<8x8xf32>, vector<8x128xf32>, vector<8x128xf32> -> vector<8x128xf32>
    %98 = vector.extract_strided_slice %78 {offsets = [2, 0], sizes = [1, 128], strides = [1, 1]} : vector<4x128xf32> to vector<1x128xf32>
    %99 = vector.broadcast %98 : vector<1x128xf32> to vector<8x128xf32>
    %100 = arith.mulf %97, %99 : vector<8x128xf32>
    %101 = arith.addf %95, %100 : vector<8x128xf32>
    %102 = vector.extract_strided_slice %15 {offsets = [24, 0], sizes = [8, 8], strides = [1, 1]} : vector<32x8xf32> to vector<8x8xf32>
    %cst_62 = arith.constant dense<0.000000e+00> : vector<8x128xf32>
    %103 = tpu.matmul %102, %61, %cst_62 {dimension_numbers = #tpu.dot_dimension_numbers<[1], [0], [0], [1], [0, 0, 1, 1], [], []>} : vector<8x8xf32>, vector<8x128xf32>, vector<8x128xf32> -> vector<8x128xf32>
    %104 = vector.extract_strided_slice %78 {offsets = [3, 0], sizes = [1, 128], strides = [1, 1]} : vector<4x128xf32> to vector<1x128xf32>
    %105 = vector.broadcast %104 : vector<1x128xf32> to vector<8x128xf32>
    %106 = arith.mulf %103, %105 : vector<8x128xf32>
    %107 = arith.addf %101, %106 : vector<8x128xf32>
    %cst_63 = arith.constant 0.000000e+00 : f32
    %108 = vector.broadcast %cst_63 : f32 to vector<8x128xf32>
    %109 = arith.subf %108, %107 : vector<8x128xf32>
    %110 = math.exp %109 : vector<8x128xf32>
    %cst_64 = arith.constant 1.000000e+00 : f32
    %111 = vector.broadcast %cst_64 : f32 to vector<8x128xf32>
    %112 = arith.addf %111, %110 : vector<8x128xf32>
    %cst_65 = arith.constant 1.000000e+00 : f32
    %113 = vector.broadcast %cst_65 : f32 to vector<8x128xf32>
    %114 = arith.divf %113, %112 : vector<8x128xf32>
    %115 = arith.mulf %107, %114 : vector<8x128xf32>
    %116 = vector.extract_strided_slice %115 {offsets = [0, 0], sizes = [8, 64], strides = [1, 1]} : vector<8x128xf32> to vector<8x64xf32>
    %117 = vector.extract_strided_slice %115 {offsets = [0, 64], sizes = [8, 32], strides = [1, 1]} : vector<8x128xf32> to vector<8x32xf32>
    %118 = vector.extract_strided_slice %115 {offsets = [0, 96], sizes = [8, 32], strides = [1, 1]} : vector<8x128xf32> to vector<8x32xf32>
    %c0_66 = arith.constant 0 : index
    %c0_67 = arith.constant 0 : index
    %c0_68 = arith.constant 0 : index
    %119 = vector.load %arg25[%c0_66, %c0_67, %c0_68] : memref<8x1x8xf32, #tpu.memory_space<vmem>>, vector<1x1x8xf32>
    %120 = vector.shape_cast %119 : vector<1x1x8xf32> to vector<1x8xf32>
    %121 = math.exp %120 : vector<1x8xf32>
    %cst_69 = arith.constant 0.000000e+00 : f32
    %122 = vector.broadcast %cst_69 : f32 to vector<1x8xf32>
    %123 = arith.subf %122, %121 : vector<1x8xf32>
    %124 = vector.broadcast %123 : vector<1x8xf32> to vector<8x8xf32>
    %125 = arith.mulf %124, %76 : vector<8x8xf32>
    %cst_70 = arith.constant dense<0.000000e+00> : vector<8x64xf32>
    %126 = tpu.matmul %125, %16, %cst_70 {dimension_numbers = #tpu.dot_dimension_numbers<[1], [0], [0], [1], [0, 0, 1, 1], [], []>} : vector<8x8xf32>, vector<8x64xf32>, vector<8x64xf32> -> vector<8x64xf32>
    %cst_71 = arith.constant dense<0.000000e+00> : vector<8x64xf32>
    %127 = tpu.matmul %14, %126, %cst_71 {dimension_numbers = #tpu.dot_dimension_numbers<[1], [0], [0], [1], [0, 0, 1, 1], [], []>} : vector<8x8xf32>, vector<8x64xf32>, vector<8x64xf32> -> vector<8x64xf32>
    %128 = arith.mulf %17, %126 : vector<8x64xf32>
    %cst_72 = arith.constant dense<0.000000e+00> : vector<64xf32>
    %129 = vector.multi_reduction <add>, %128, %cst_72 [0] : vector<8x64xf32> to vector<64xf32>
    %130 = vector.shape_cast %129 : vector<64xf32> to vector<1x64xf32>
    %cst_73 = arith.constant 5.000000e-01 : f32
    %131 = vector.broadcast %cst_73 : f32 to vector<8x64xf32>
    %132 = arith.cmpf ogt, %18, %131 : vector<8x64xf32>
    %133 = vector.broadcast %130 : vector<1x64xf32> to vector<8x64xf32>
    %134 = arith.subf %127, %133 : vector<8x64xf32>
    %cst_74 = arith.constant -1.000000e+30 : f32
    %135 = vector.broadcast %cst_74 : f32 to vector<8x64xf32>
    %136 = arith.select %132, %134, %135 : vector<8x64xi1>, vector<8x64xf32>
    %137 = math.exp %136 : vector<8x64xf32>
    %cst_75 = arith.constant dense<0.000000e+00> : vector<8x8xf32>
    %138 = tpu.matmul %118, %117, %cst_75 {dimension_numbers = #tpu.dot_dimension_numbers<[1], [1], [0], [0], [0, 0, 1, 0], [], []>} : vector<8x32xf32>, vector<8x32xf32>, vector<8x8xf32> -> vector<8x8xf32>
    %cst_76 = arith.constant dense<0.000000e+00> : vector<8x64xf32>
    %139 = tpu.matmul %138, %19, %cst_76 {dimension_numbers = #tpu.dot_dimension_numbers<[1], [0], [0], [1], [0, 0, 1, 1], [], []>} : vector<8x8xf32>, vector<8x64xf32>, vector<8x64xf32> -> vector<8x64xf32>
    %140 = arith.mulf %139, %137 : vector<8x64xf32>
    %cst_77 = arith.constant dense<0.000000e+00> : vector<8x64xf32>
    %141 = tpu.matmul %76, %22, %cst_77 {dimension_numbers = #tpu.dot_dimension_numbers<[1], [0], [0], [1], [0, 0, 1, 1], [], []>} : vector<8x8xf32>, vector<8x64xf32>, vector<8x64xf32> -> vector<8x64xf32>
    %c0_78 = arith.constant 0 : index
    %c0_79 = arith.constant 0 : index
    %c0_80 = arith.constant 0 : index
    %142 = vector.load %arg26[%c0_78, %c0_79, %c0_80] : memref<8x1x8xf32, #tpu.memory_space<vmem>>, vector<1x1x8xf32>
    %143 = vector.shape_cast %142 : vector<1x1x8xf32> to vector<1x8xf32>
    %cst_81 = arith.constant dense<0.000000e+00> : vector<1x64xf32>
    %144 = tpu.matmul %143, %22, %cst_81 {dimension_numbers = #tpu.dot_dimension_numbers<[1], [0], [0], [1], [0, 0, 1, 1], [], []>} : vector<1x8xf32>, vector<8x64xf32>, vector<1x64xf32> -> vector<1x64xf32>
    %145 = arith.mulf %116, %141 : vector<8x64xf32>
    %cst_82 = arith.constant dense<0.000000e+00> : vector<64x64xf32>
    %146 = tpu.matmul %20, %145, %cst_82 {dimension_numbers = #tpu.dot_dimension_numbers<[1], [0], [0], [1], [0, 0, 1, 1], [], []>} : vector<64x8xf32>, vector<8x64xf32>, vector<64x64xf32> -> vector<64x64xf32>
    %147 = arith.mulf %146, %21 : vector<64x64xf32>
    %cst_83 = arith.constant dense<0.000000e+00> : vector<8x64xf32>
    %148 = tpu.matmul %140, %147, %cst_83 {dimension_numbers = #tpu.dot_dimension_numbers<[1], [0], [0], [1], [0, 0, 1, 1], [], []>} : vector<8x64xf32>, vector<64x64xf32>, vector<8x64xf32> -> vector<8x64xf32>
    %149 = vector.broadcast %144 : vector<1x64xf32> to vector<8x64xf32>
    %150 = arith.mulf %116, %149 : vector<8x64xf32>
    %151 = arith.addf %148, %150 : vector<8x64xf32>
    %cst_84 = arith.constant 0.000000e+00 : f32
    %152 = vector.broadcast %cst_84 : f32 to vector<8x64xf32>
    %153 = arith.subf %152, %62 : vector<8x64xf32>
    %154 = math.exp %153 : vector<8x64xf32>
    %cst_85 = arith.constant 1.000000e+00 : f32
    %155 = vector.broadcast %cst_85 : f32 to vector<8x64xf32>
    %156 = arith.addf %155, %154 : vector<8x64xf32>
    %cst_86 = arith.constant 1.000000e+00 : f32
    %157 = vector.broadcast %cst_86 : f32 to vector<8x64xf32>
    %158 = arith.divf %157, %156 : vector<8x64xf32>
    %159 = arith.mulf %62, %158 : vector<8x64xf32>
    %160 = arith.mulf %151, %159 : vector<8x64xf32>
    %161 = arith.mulf %160, %160 : vector<8x64xf32>
    %cst_87 = arith.constant dense<0.000000e+00> : vector<8xf32>
    %162 = vector.multi_reduction <add>, %161, %cst_87 [1] : vector<8x64xf32> to vector<8xf32>
    %163 = vector.shape_cast %162 : vector<8xf32> to vector<8x1xf32>
    %cst_88 = arith.constant 6.400000e+01 : f32
    %164 = vector.broadcast %cst_88 : f32 to vector<8x1xf32>
    %165 = arith.divf %163, %164 : vector<8x1xf32>
    %cst_89 = arith.constant 9.99999974E-6 : f32
    %166 = vector.broadcast %cst_89 : f32 to vector<8x1xf32>
    %167 = arith.addf %165, %166 : vector<8x1xf32>
    %168 = math.rsqrt %167 : vector<8x1xf32>
    %169 = vector.broadcast %168 : vector<8x1xf32> to vector<8x64xf32>
    %170 = arith.mulf %160, %169 : vector<8x64xf32>
    %c0_90 = arith.constant 0 : index
    %c0_91 = arith.constant 0 : index
    %c0_92 = arith.constant 0 : index
    %171 = vector.load %arg27[%c0_90, %c0_91, %c0_92] : memref<8x1x64xf32, #tpu.memory_space<vmem>>, vector<1x1x64xf32>
    %172 = vector.shape_cast %171 : vector<1x1x64xf32> to vector<1x64xf32>
    %173 = vector.broadcast %172 : vector<1x64xf32> to vector<8x64xf32>
    %174 = arith.mulf %170, %173 : vector<8x64xf32>
    %c0_93 = arith.constant 0 : index
    %c0_94 = arith.constant 0 : index
    %c0_95 = arith.constant 0 : index
    %175 = vector.load %arg28[%c0_93, %c0_94, %c0_95] : memref<8x64x32xf32, #tpu.memory_space<vmem>>, vector<1x64x32xf32>
    %176 = vector.shape_cast %175 : vector<1x64x32xf32> to vector<64x32xf32>
    %cst_96 = arith.constant dense<0.000000e+00> : vector<8x32xf32>
    %177 = tpu.matmul %174, %176, %cst_96 {dimension_numbers = #tpu.dot_dimension_numbers<[1], [0], [0], [1], [0, 0, 1, 1], [], []>} : vector<8x64xf32>, vector<64x32xf32>, vector<8x32xf32> -> vector<8x32xf32>
    %178 = arith.addf %43, %177 : vector<8x32xf32>
    %179 = arith.mulf %178, %178 : vector<8x32xf32>
    %cst_97 = arith.constant dense<0.000000e+00> : vector<8xf32>
    %180 = vector.multi_reduction <add>, %179, %cst_97 [1] : vector<8x32xf32> to vector<8xf32>
    %181 = vector.shape_cast %180 : vector<8xf32> to vector<8x1xf32>
    %cst_98 = arith.constant 3.200000e+01 : f32
    %182 = vector.broadcast %cst_98 : f32 to vector<8x1xf32>
    %183 = arith.divf %181, %182 : vector<8x1xf32>
    %cst_99 = arith.constant 9.99999974E-6 : f32
    %184 = vector.broadcast %cst_99 : f32 to vector<8x1xf32>
    %185 = arith.addf %183, %184 : vector<8x1xf32>
    %186 = math.rsqrt %185 : vector<8x1xf32>
    %187 = vector.broadcast %186 : vector<8x1xf32> to vector<8x32xf32>
    %188 = arith.mulf %178, %187 : vector<8x32xf32>
    %c1 = arith.constant 1 : index
    %c0_100 = arith.constant 0 : index
    %c0_101 = arith.constant 0 : index
    %189 = vector.load %arg20[%c1, %c0_100, %c0_101] : memref<8x1x32xf32, #tpu.memory_space<vmem>>, vector<1x1x32xf32>
    %190 = vector.shape_cast %189 : vector<1x1x32xf32> to vector<1x32xf32>
    %191 = vector.broadcast %190 : vector<1x32xf32> to vector<8x32xf32>
    %192 = arith.mulf %188, %191 : vector<8x32xf32>
    %c1_102 = arith.constant 1 : index
    %c0_103 = arith.constant 0 : index
    %c0_104 = arith.constant 0 : index
    %193 = vector.load %arg21[%c1_102, %c0_103, %c0_104] : memref<8x32x256xf32, #tpu.memory_space<vmem>>, vector<1x32x256xf32>
    %194 = vector.shape_cast %193 : vector<1x32x256xf32> to vector<32x256xf32>
    %cst_105 = arith.constant dense<0.000000e+00> : vector<8x256xf32>
    %195 = tpu.matmul %192, %194, %cst_105 {dimension_numbers = #tpu.dot_dimension_numbers<[1], [0], [0], [1], [0, 0, 1, 1], [], []>} : vector<8x32xf32>, vector<32x256xf32>, vector<8x256xf32> -> vector<8x256xf32>
    %196 = vector.extract_strided_slice %195 {offsets = [0, 0], sizes = [8, 128], strides = [1, 1]} : vector<8x256xf32> to vector<8x128xf32>
    %197 = vector.extract_strided_slice %195 {offsets = [0, 128], sizes = [8, 64], strides = [1, 1]} : vector<8x256xf32> to vector<8x64xf32>
    %198 = vector.extract_strided_slice %195 {offsets = [0, 192], sizes = [8, 8], strides = [1, 1]} : vector<8x256xf32> to vector<8x8xf32>
    %c1_106 = arith.constant 1 : index
    %c0_107 = arith.constant 0 : index
    %c0_108 = arith.constant 0 : index
    %199 = vector.load %arg24[%c1_106, %c0_107, %c0_108] : memref<8x1x8xf32, #tpu.memory_space<vmem>>, vector<1x1x8xf32>
    %200 = vector.shape_cast %199 : vector<1x1x8xf32> to vector<1x8xf32>
    %201 = vector.broadcast %200 : vector<1x8xf32> to vector<8x8xf32>
    %202 = arith.addf %198, %201 : vector<8x8xf32>
    %cst_109 = arith.constant 2.000000e+01 : f32
    %203 = vector.broadcast %cst_109 : f32 to vector<8x8xf32>
    %204 = arith.cmpf ogt, %202, %203 : vector<8x8xf32>
    %cst_110 = arith.constant 2.000000e+01 : f32
    %205 = vector.broadcast %cst_110 : f32 to vector<8x8xf32>
    %206 = arith.minimumf %202, %205 : vector<8x8xf32>
    %207 = math.exp %206 : vector<8x8xf32>
    %cst_111 = arith.constant 1.000000e+00 : f32
    %208 = vector.broadcast %cst_111 : f32 to vector<8x8xf32>
    %209 = arith.addf %208, %207 : vector<8x8xf32>
    %210 = math.log %209 : vector<8x8xf32>
    %211 = arith.select %204, %202, %210 : vector<8x8xi1>, vector<8x8xf32>
    %c1_112 = arith.constant 1 : index
    %c0_113 = arith.constant 0 : index
    %c0_114 = arith.constant 0 : index
    %212 = vector.load %arg22[%c1_112, %c0_113, %c0_114] : memref<8x4x128xf32, #tpu.memory_space<vmem>>, vector<1x4x128xf32>
    %213 = vector.shape_cast %212 : vector<1x4x128xf32> to vector<4x128xf32>
    %cst_115 = arith.constant 0.000000e+00 : f32
    %214 = vector.broadcast %cst_115 : f32 to vector<8x128xf32>
    %c1_116 = arith.constant 1 : index
    %c0_117 = arith.constant 0 : index
    %c0_118 = arith.constant 0 : index
    %215 = vector.load %arg23[%c1_116, %c0_117, %c0_118] : memref<8x1x128xf32, #tpu.memory_space<vmem>>, vector<1x1x128xf32>
    %216 = vector.shape_cast %215 : vector<1x1x128xf32> to vector<1x128xf32>
    %217 = vector.broadcast %216 : vector<1x128xf32> to vector<8x128xf32>
    %218 = arith.addf %214, %217 : vector<8x128xf32>
    %219 = vector.extract_strided_slice %15 {offsets = [0, 0], sizes = [8, 8], strides = [1, 1]} : vector<32x8xf32> to vector<8x8xf32>
    %cst_119 = arith.constant dense<0.000000e+00> : vector<8x128xf32>
    %220 = tpu.matmul %219, %196, %cst_119 {dimension_numbers = #tpu.dot_dimension_numbers<[1], [0], [0], [1], [0, 0, 1, 1], [], []>} : vector<8x8xf32>, vector<8x128xf32>, vector<8x128xf32> -> vector<8x128xf32>
    %221 = vector.extract_strided_slice %213 {offsets = [0, 0], sizes = [1, 128], strides = [1, 1]} : vector<4x128xf32> to vector<1x128xf32>
    %222 = vector.broadcast %221 : vector<1x128xf32> to vector<8x128xf32>
    %223 = arith.mulf %220, %222 : vector<8x128xf32>
    %224 = arith.addf %218, %223 : vector<8x128xf32>
    %225 = vector.extract_strided_slice %15 {offsets = [8, 0], sizes = [8, 8], strides = [1, 1]} : vector<32x8xf32> to vector<8x8xf32>
    %cst_120 = arith.constant dense<0.000000e+00> : vector<8x128xf32>
    %226 = tpu.matmul %225, %196, %cst_120 {dimension_numbers = #tpu.dot_dimension_numbers<[1], [0], [0], [1], [0, 0, 1, 1], [], []>} : vector<8x8xf32>, vector<8x128xf32>, vector<8x128xf32> -> vector<8x128xf32>
    %227 = vector.extract_strided_slice %213 {offsets = [1, 0], sizes = [1, 128], strides = [1, 1]} : vector<4x128xf32> to vector<1x128xf32>
    %228 = vector.broadcast %227 : vector<1x128xf32> to vector<8x128xf32>
    %229 = arith.mulf %226, %228 : vector<8x128xf32>
    %230 = arith.addf %224, %229 : vector<8x128xf32>
    %231 = vector.extract_strided_slice %15 {offsets = [16, 0], sizes = [8, 8], strides = [1, 1]} : vector<32x8xf32> to vector<8x8xf32>
    %cst_121 = arith.constant dense<0.000000e+00> : vector<8x128xf32>
    %232 = tpu.matmul %231, %196, %cst_121 {dimension_numbers = #tpu.dot_dimension_numbers<[1], [0], [0], [1], [0, 0, 1, 1], [], []>} : vector<8x8xf32>, vector<8x128xf32>, vector<8x128xf32> -> vector<8x128xf32>
    %233 = vector.extract_strided_slice %213 {offsets = [2, 0], sizes = [1, 128], strides = [1, 1]} : vector<4x128xf32> to vector<1x128xf32>
    %234 = vector.broadcast %233 : vector<1x128xf32> to vector<8x128xf32>
    %235 = arith.mulf %232, %234 : vector<8x128xf32>
    %236 = arith.addf %230, %235 : vector<8x128xf32>
    %237 = vector.extract_strided_slice %15 {offsets = [24, 0], sizes = [8, 8], strides = [1, 1]} : vector<32x8xf32> to vector<8x8xf32>
    %cst_122 = arith.constant dense<0.000000e+00> : vector<8x128xf32>
    %238 = tpu.matmul %237, %196, %cst_122 {dimension_numbers = #tpu.dot_dimension_numbers<[1], [0], [0], [1], [0, 0, 1, 1], [], []>} : vector<8x8xf32>, vector<8x128xf32>, vector<8x128xf32> -> vector<8x128xf32>
    %239 = vector.extract_strided_slice %213 {offsets = [3, 0], sizes = [1, 128], strides = [1, 1]} : vector<4x128xf32> to vector<1x128xf32>
    %240 = vector.broadcast %239 : vector<1x128xf32> to vector<8x128xf32>
    %241 = arith.mulf %238, %240 : vector<8x128xf32>
    %242 = arith.addf %236, %241 : vector<8x128xf32>
    %cst_123 = arith.constant 0.000000e+00 : f32
    %243 = vector.broadcast %cst_123 : f32 to vector<8x128xf32>
    %244 = arith.subf %243, %242 : vector<8x128xf32>
    %245 = math.exp %244 : vector<8x128xf32>
    %cst_124 = arith.constant 1.000000e+00 : f32
    %246 = vector.broadcast %cst_124 : f32 to vector<8x128xf32>
    %247 = arith.addf %246, %245 : vector<8x128xf32>
    %cst_125 = arith.constant 1.000000e+00 : f32
    %248 = vector.broadcast %cst_125 : f32 to vector<8x128xf32>
    %249 = arith.divf %248, %247 : vector<8x128xf32>
    %250 = arith.mulf %242, %249 : vector<8x128xf32>
    %251 = vector.extract_strided_slice %250 {offsets = [0, 0], sizes = [8, 64], strides = [1, 1]} : vector<8x128xf32> to vector<8x64xf32>
    %252 = vector.extract_strided_slice %250 {offsets = [0, 64], sizes = [8, 32], strides = [1, 1]} : vector<8x128xf32> to vector<8x32xf32>
    %253 = vector.extract_strided_slice %250 {offsets = [0, 96], sizes = [8, 32], strides = [1, 1]} : vector<8x128xf32> to vector<8x32xf32>
    %c1_126 = arith.constant 1 : index
    %c0_127 = arith.constant 0 : index
    %c0_128 = arith.constant 0 : index
    %254 = vector.load %arg25[%c1_126, %c0_127, %c0_128] : memref<8x1x8xf32, #tpu.memory_space<vmem>>, vector<1x1x8xf32>
    %255 = vector.shape_cast %254 : vector<1x1x8xf32> to vector<1x8xf32>
    %256 = math.exp %255 : vector<1x8xf32>
    %cst_129 = arith.constant 0.000000e+00 : f32
    %257 = vector.broadcast %cst_129 : f32 to vector<1x8xf32>
    %258 = arith.subf %257, %256 : vector<1x8xf32>
    %259 = vector.broadcast %258 : vector<1x8xf32> to vector<8x8xf32>
    %260 = arith.mulf %259, %211 : vector<8x8xf32>
    %cst_130 = arith.constant dense<0.000000e+00> : vector<8x64xf32>
    %261 = tpu.matmul %260, %16, %cst_130 {dimension_numbers = #tpu.dot_dimension_numbers<[1], [0], [0], [1], [0, 0, 1, 1], [], []>} : vector<8x8xf32>, vector<8x64xf32>, vector<8x64xf32> -> vector<8x64xf32>
    %cst_131 = arith.constant dense<0.000000e+00> : vector<8x64xf32>
    %262 = tpu.matmul %14, %261, %cst_131 {dimension_numbers = #tpu.dot_dimension_numbers<[1], [0], [0], [1], [0, 0, 1, 1], [], []>} : vector<8x8xf32>, vector<8x64xf32>, vector<8x64xf32> -> vector<8x64xf32>
    %263 = arith.mulf %17, %261 : vector<8x64xf32>
    %cst_132 = arith.constant dense<0.000000e+00> : vector<64xf32>
    %264 = vector.multi_reduction <add>, %263, %cst_132 [0] : vector<8x64xf32> to vector<64xf32>
    %265 = vector.shape_cast %264 : vector<64xf32> to vector<1x64xf32>
    %cst_133 = arith.constant 5.000000e-01 : f32
    %266 = vector.broadcast %cst_133 : f32 to vector<8x64xf32>
    %267 = arith.cmpf ogt, %18, %266 : vector<8x64xf32>
    %268 = vector.broadcast %265 : vector<1x64xf32> to vector<8x64xf32>
    %269 = arith.subf %262, %268 : vector<8x64xf32>
    %cst_134 = arith.constant -1.000000e+30 : f32
    %270 = vector.broadcast %cst_134 : f32 to vector<8x64xf32>
    %271 = arith.select %267, %269, %270 : vector<8x64xi1>, vector<8x64xf32>
    %272 = math.exp %271 : vector<8x64xf32>
    %cst_135 = arith.constant dense<0.000000e+00> : vector<8x8xf32>
    %273 = tpu.matmul %253, %252, %cst_135 {dimension_numbers = #tpu.dot_dimension_numbers<[1], [1], [0], [0], [0, 0, 1, 0], [], []>} : vector<8x32xf32>, vector<8x32xf32>, vector<8x8xf32> -> vector<8x8xf32>
    %cst_136 = arith.constant dense<0.000000e+00> : vector<8x64xf32>
    %274 = tpu.matmul %273, %19, %cst_136 {dimension_numbers = #tpu.dot_dimension_numbers<[1], [0], [0], [1], [0, 0, 1, 1], [], []>} : vector<8x8xf32>, vector<8x64xf32>, vector<8x64xf32> -> vector<8x64xf32>
    %275 = arith.mulf %274, %272 : vector<8x64xf32>
    %cst_137 = arith.constant dense<0.000000e+00> : vector<8x64xf32>
    %276 = tpu.matmul %211, %22, %cst_137 {dimension_numbers = #tpu.dot_dimension_numbers<[1], [0], [0], [1], [0, 0, 1, 1], [], []>} : vector<8x8xf32>, vector<8x64xf32>, vector<8x64xf32> -> vector<8x64xf32>
    %c1_138 = arith.constant 1 : index
    %c0_139 = arith.constant 0 : index
    %c0_140 = arith.constant 0 : index
    %277 = vector.load %arg26[%c1_138, %c0_139, %c0_140] : memref<8x1x8xf32, #tpu.memory_space<vmem>>, vector<1x1x8xf32>
    %278 = vector.shape_cast %277 : vector<1x1x8xf32> to vector<1x8xf32>
    %cst_141 = arith.constant dense<0.000000e+00> : vector<1x64xf32>
    %279 = tpu.matmul %278, %22, %cst_141 {dimension_numbers = #tpu.dot_dimension_numbers<[1], [0], [0], [1], [0, 0, 1, 1], [], []>} : vector<1x8xf32>, vector<8x64xf32>, vector<1x64xf32> -> vector<1x64xf32>
    %280 = arith.mulf %251, %276 : vector<8x64xf32>
    %cst_142 = arith.constant dense<0.000000e+00> : vector<64x64xf32>
    %281 = tpu.matmul %20, %280, %cst_142 {dimension_numbers = #tpu.dot_dimension_numbers<[1], [0], [0], [1], [0, 0, 1, 1], [], []>} : vector<64x8xf32>, vector<8x64xf32>, vector<64x64xf32> -> vector<64x64xf32>
    %282 = arith.mulf %281, %21 : vector<64x64xf32>
    %cst_143 = arith.constant dense<0.000000e+00> : vector<8x64xf32>
    %283 = tpu.matmul %275, %282, %cst_143 {dimension_numbers = #tpu.dot_dimension_numbers<[1], [0], [0], [1], [0, 0, 1, 1], [], []>} : vector<8x64xf32>, vector<64x64xf32>, vector<8x64xf32> -> vector<8x64xf32>
    %284 = vector.broadcast %279 : vector<1x64xf32> to vector<8x64xf32>
    %285 = arith.mulf %251, %284 : vector<8x64xf32>
    %286 = arith.addf %283, %285 : vector<8x64xf32>
    %cst_144 = arith.constant 0.000000e+00 : f32
    %287 = vector.broadcast %cst_144 : f32 to vector<8x64xf32>
    %288 = arith.subf %287, %197 : vector<8x64xf32>
    %289 = math.exp %288 : vector<8x64xf32>
    %cst_145 = arith.constant 1.000000e+00 : f32
    %290 = vector.broadcast %cst_145 : f32 to vector<8x64xf32>
    %291 = arith.addf %290, %289 : vector<8x64xf32>
    %cst_146 = arith.constant 1.000000e+00 : f32
    %292 = vector.broadcast %cst_146 : f32 to vector<8x64xf32>
    %293 = arith.divf %292, %291 : vector<8x64xf32>
    %294 = arith.mulf %197, %293 : vector<8x64xf32>
    %295 = arith.mulf %286, %294 : vector<8x64xf32>
    %296 = arith.mulf %295, %295 : vector<8x64xf32>
    %cst_147 = arith.constant dense<0.000000e+00> : vector<8xf32>
    %297 = vector.multi_reduction <add>, %296, %cst_147 [1] : vector<8x64xf32> to vector<8xf32>
    %298 = vector.shape_cast %297 : vector<8xf32> to vector<8x1xf32>
    %cst_148 = arith.constant 6.400000e+01 : f32
    %299 = vector.broadcast %cst_148 : f32 to vector<8x1xf32>
    %300 = arith.divf %298, %299 : vector<8x1xf32>
    %cst_149 = arith.constant 9.99999974E-6 : f32
    %301 = vector.broadcast %cst_149 : f32 to vector<8x1xf32>
    %302 = arith.addf %300, %301 : vector<8x1xf32>
    %303 = math.rsqrt %302 : vector<8x1xf32>
    %304 = vector.broadcast %303 : vector<8x1xf32> to vector<8x64xf32>
    %305 = arith.mulf %295, %304 : vector<8x64xf32>
    %c1_150 = arith.constant 1 : index
    %c0_151 = arith.constant 0 : index
    %c0_152 = arith.constant 0 : index
    %306 = vector.load %arg27[%c1_150, %c0_151, %c0_152] : memref<8x1x64xf32, #tpu.memory_space<vmem>>, vector<1x1x64xf32>
    %307 = vector.shape_cast %306 : vector<1x1x64xf32> to vector<1x64xf32>
    %308 = vector.broadcast %307 : vector<1x64xf32> to vector<8x64xf32>
    %309 = arith.mulf %305, %308 : vector<8x64xf32>
    %c1_153 = arith.constant 1 : index
    %c0_154 = arith.constant 0 : index
    %c0_155 = arith.constant 0 : index
    %310 = vector.load %arg28[%c1_153, %c0_154, %c0_155] : memref<8x64x32xf32, #tpu.memory_space<vmem>>, vector<1x64x32xf32>
    %311 = vector.shape_cast %310 : vector<1x64x32xf32> to vector<64x32xf32>
    %cst_156 = arith.constant dense<0.000000e+00> : vector<8x32xf32>
    %312 = tpu.matmul %309, %311, %cst_156 {dimension_numbers = #tpu.dot_dimension_numbers<[1], [0], [0], [1], [0, 0, 1, 1], [], []>} : vector<8x64xf32>, vector<64x32xf32>, vector<8x32xf32> -> vector<8x32xf32>
    %313 = arith.addf %178, %312 : vector<8x32xf32>
    %314 = arith.mulf %313, %313 : vector<8x32xf32>
    %cst_157 = arith.constant dense<0.000000e+00> : vector<8xf32>
    %315 = vector.multi_reduction <add>, %314, %cst_157 [1] : vector<8x32xf32> to vector<8xf32>
    %316 = vector.shape_cast %315 : vector<8xf32> to vector<8x1xf32>
    %cst_158 = arith.constant 3.200000e+01 : f32
    %317 = vector.broadcast %cst_158 : f32 to vector<8x1xf32>
    %318 = arith.divf %316, %317 : vector<8x1xf32>
    %cst_159 = arith.constant 9.99999974E-6 : f32
    %319 = vector.broadcast %cst_159 : f32 to vector<8x1xf32>
    %320 = arith.addf %318, %319 : vector<8x1xf32>
    %321 = math.rsqrt %320 : vector<8x1xf32>
    %322 = vector.broadcast %321 : vector<8x1xf32> to vector<8x32xf32>
    %323 = arith.mulf %313, %322 : vector<8x32xf32>
    %c2 = arith.constant 2 : index
    %c0_160 = arith.constant 0 : index
    %c0_161 = arith.constant 0 : index
    %324 = vector.load %arg20[%c2, %c0_160, %c0_161] : memref<8x1x32xf32, #tpu.memory_space<vmem>>, vector<1x1x32xf32>
    %325 = vector.shape_cast %324 : vector<1x1x32xf32> to vector<1x32xf32>
    %326 = vector.broadcast %325 : vector<1x32xf32> to vector<8x32xf32>
    %327 = arith.mulf %323, %326 : vector<8x32xf32>
    %c2_162 = arith.constant 2 : index
    %c0_163 = arith.constant 0 : index
    %c0_164 = arith.constant 0 : index
    %328 = vector.load %arg21[%c2_162, %c0_163, %c0_164] : memref<8x32x256xf32, #tpu.memory_space<vmem>>, vector<1x32x256xf32>
    %329 = vector.shape_cast %328 : vector<1x32x256xf32> to vector<32x256xf32>
    %cst_165 = arith.constant dense<0.000000e+00> : vector<8x256xf32>
    %330 = tpu.matmul %327, %329, %cst_165 {dimension_numbers = #tpu.dot_dimension_numbers<[1], [0], [0], [1], [0, 0, 1, 1], [], []>} : vector<8x32xf32>, vector<32x256xf32>, vector<8x256xf32> -> vector<8x256xf32>
    %331 = vector.extract_strided_slice %330 {offsets = [0, 0], sizes = [8, 128], strides = [1, 1]} : vector<8x256xf32> to vector<8x128xf32>
    %332 = vector.extract_strided_slice %330 {offsets = [0, 128], sizes = [8, 64], strides = [1, 1]} : vector<8x256xf32> to vector<8x64xf32>
    %333 = vector.extract_strided_slice %330 {offsets = [0, 192], sizes = [8, 8], strides = [1, 1]} : vector<8x256xf32> to vector<8x8xf32>
    %c2_166 = arith.constant 2 : index
    %c0_167 = arith.constant 0 : index
    %c0_168 = arith.constant 0 : index
    %334 = vector.load %arg24[%c2_166, %c0_167, %c0_168] : memref<8x1x8xf32, #tpu.memory_space<vmem>>, vector<1x1x8xf32>
    %335 = vector.shape_cast %334 : vector<1x1x8xf32> to vector<1x8xf32>
    %336 = vector.broadcast %335 : vector<1x8xf32> to vector<8x8xf32>
    %337 = arith.addf %333, %336 : vector<8x8xf32>
    %cst_169 = arith.constant 2.000000e+01 : f32
    %338 = vector.broadcast %cst_169 : f32 to vector<8x8xf32>
    %339 = arith.cmpf ogt, %337, %338 : vector<8x8xf32>
    %cst_170 = arith.constant 2.000000e+01 : f32
    %340 = vector.broadcast %cst_170 : f32 to vector<8x8xf32>
    %341 = arith.minimumf %337, %340 : vector<8x8xf32>
    %342 = math.exp %341 : vector<8x8xf32>
    %cst_171 = arith.constant 1.000000e+00 : f32
    %343 = vector.broadcast %cst_171 : f32 to vector<8x8xf32>
    %344 = arith.addf %343, %342 : vector<8x8xf32>
    %345 = math.log %344 : vector<8x8xf32>
    %346 = arith.select %339, %337, %345 : vector<8x8xi1>, vector<8x8xf32>
    %c2_172 = arith.constant 2 : index
    %c0_173 = arith.constant 0 : index
    %c0_174 = arith.constant 0 : index
    %347 = vector.load %arg22[%c2_172, %c0_173, %c0_174] : memref<8x4x128xf32, #tpu.memory_space<vmem>>, vector<1x4x128xf32>
    %348 = vector.shape_cast %347 : vector<1x4x128xf32> to vector<4x128xf32>
    %cst_175 = arith.constant 0.000000e+00 : f32
    %349 = vector.broadcast %cst_175 : f32 to vector<8x128xf32>
    %c2_176 = arith.constant 2 : index
    %c0_177 = arith.constant 0 : index
    %c0_178 = arith.constant 0 : index
    %350 = vector.load %arg23[%c2_176, %c0_177, %c0_178] : memref<8x1x128xf32, #tpu.memory_space<vmem>>, vector<1x1x128xf32>
    %351 = vector.shape_cast %350 : vector<1x1x128xf32> to vector<1x128xf32>
    %352 = vector.broadcast %351 : vector<1x128xf32> to vector<8x128xf32>
    %353 = arith.addf %349, %352 : vector<8x128xf32>
    %354 = vector.extract_strided_slice %15 {offsets = [0, 0], sizes = [8, 8], strides = [1, 1]} : vector<32x8xf32> to vector<8x8xf32>
    %cst_179 = arith.constant dense<0.000000e+00> : vector<8x128xf32>
    %355 = tpu.matmul %354, %331, %cst_179 {dimension_numbers = #tpu.dot_dimension_numbers<[1], [0], [0], [1], [0, 0, 1, 1], [], []>} : vector<8x8xf32>, vector<8x128xf32>, vector<8x128xf32> -> vector<8x128xf32>
    %356 = vector.extract_strided_slice %348 {offsets = [0, 0], sizes = [1, 128], strides = [1, 1]} : vector<4x128xf32> to vector<1x128xf32>
    %357 = vector.broadcast %356 : vector<1x128xf32> to vector<8x128xf32>
    %358 = arith.mulf %355, %357 : vector<8x128xf32>
    %359 = arith.addf %353, %358 : vector<8x128xf32>
    %360 = vector.extract_strided_slice %15 {offsets = [8, 0], sizes = [8, 8], strides = [1, 1]} : vector<32x8xf32> to vector<8x8xf32>
    %cst_180 = arith.constant dense<0.000000e+00> : vector<8x128xf32>
    %361 = tpu.matmul %360, %331, %cst_180 {dimension_numbers = #tpu.dot_dimension_numbers<[1], [0], [0], [1], [0, 0, 1, 1], [], []>} : vector<8x8xf32>, vector<8x128xf32>, vector<8x128xf32> -> vector<8x128xf32>
    %362 = vector.extract_strided_slice %348 {offsets = [1, 0], sizes = [1, 128], strides = [1, 1]} : vector<4x128xf32> to vector<1x128xf32>
    %363 = vector.broadcast %362 : vector<1x128xf32> to vector<8x128xf32>
    %364 = arith.mulf %361, %363 : vector<8x128xf32>
    %365 = arith.addf %359, %364 : vector<8x128xf32>
    %366 = vector.extract_strided_slice %15 {offsets = [16, 0], sizes = [8, 8], strides = [1, 1]} : vector<32x8xf32> to vector<8x8xf32>
    %cst_181 = arith.constant dense<0.000000e+00> : vector<8x128xf32>
    %367 = tpu.matmul %366, %331, %cst_181 {dimension_numbers = #tpu.dot_dimension_numbers<[1], [0], [0], [1], [0, 0, 1, 1], [], []>} : vector<8x8xf32>, vector<8x128xf32>, vector<8x128xf32> -> vector<8x128xf32>
    %368 = vector.extract_strided_slice %348 {offsets = [2, 0], sizes = [1, 128], strides = [1, 1]} : vector<4x128xf32> to vector<1x128xf32>
    %369 = vector.broadcast %368 : vector<1x128xf32> to vector<8x128xf32>
    %370 = arith.mulf %367, %369 : vector<8x128xf32>
    %371 = arith.addf %365, %370 : vector<8x128xf32>
    %372 = vector.extract_strided_slice %15 {offsets = [24, 0], sizes = [8, 8], strides = [1, 1]} : vector<32x8xf32> to vector<8x8xf32>
    %cst_182 = arith.constant dense<0.000000e+00> : vector<8x128xf32>
    %373 = tpu.matmul %372, %331, %cst_182 {dimension_numbers = #tpu.dot_dimension_numbers<[1], [0], [0], [1], [0, 0, 1, 1], [], []>} : vector<8x8xf32>, vector<8x128xf32>, vector<8x128xf32> -> vector<8x128xf32>
    %374 = vector.extract_strided_slice %348 {offsets = [3, 0], sizes = [1, 128], strides = [1, 1]} : vector<4x128xf32> to vector<1x128xf32>
    %375 = vector.broadcast %374 : vector<1x128xf32> to vector<8x128xf32>
    %376 = arith.mulf %373, %375 : vector<8x128xf32>
    %377 = arith.addf %371, %376 : vector<8x128xf32>
    %cst_183 = arith.constant 0.000000e+00 : f32
    %378 = vector.broadcast %cst_183 : f32 to vector<8x128xf32>
    %379 = arith.subf %378, %377 : vector<8x128xf32>
    %380 = math.exp %379 : vector<8x128xf32>
    %cst_184 = arith.constant 1.000000e+00 : f32
    %381 = vector.broadcast %cst_184 : f32 to vector<8x128xf32>
    %382 = arith.addf %381, %380 : vector<8x128xf32>
    %cst_185 = arith.constant 1.000000e+00 : f32
    %383 = vector.broadcast %cst_185 : f32 to vector<8x128xf32>
    %384 = arith.divf %383, %382 : vector<8x128xf32>
    %385 = arith.mulf %377, %384 : vector<8x128xf32>
    %386 = vector.extract_strided_slice %385 {offsets = [0, 0], sizes = [8, 64], strides = [1, 1]} : vector<8x128xf32> to vector<8x64xf32>
    %387 = vector.extract_strided_slice %385 {offsets = [0, 64], sizes = [8, 32], strides = [1, 1]} : vector<8x128xf32> to vector<8x32xf32>
    %388 = vector.extract_strided_slice %385 {offsets = [0, 96], sizes = [8, 32], strides = [1, 1]} : vector<8x128xf32> to vector<8x32xf32>
    %c2_186 = arith.constant 2 : index
    %c0_187 = arith.constant 0 : index
    %c0_188 = arith.constant 0 : index
    %389 = vector.load %arg25[%c2_186, %c0_187, %c0_188] : memref<8x1x8xf32, #tpu.memory_space<vmem>>, vector<1x1x8xf32>
    %390 = vector.shape_cast %389 : vector<1x1x8xf32> to vector<1x8xf32>
    %391 = math.exp %390 : vector<1x8xf32>
    %cst_189 = arith.constant 0.000000e+00 : f32
    %392 = vector.broadcast %cst_189 : f32 to vector<1x8xf32>
    %393 = arith.subf %392, %391 : vector<1x8xf32>
    %394 = vector.broadcast %393 : vector<1x8xf32> to vector<8x8xf32>
    %395 = arith.mulf %394, %346 : vector<8x8xf32>
    %cst_190 = arith.constant dense<0.000000e+00> : vector<8x64xf32>
    %396 = tpu.matmul %395, %16, %cst_190 {dimension_numbers = #tpu.dot_dimension_numbers<[1], [0], [0], [1], [0, 0, 1, 1], [], []>} : vector<8x8xf32>, vector<8x64xf32>, vector<8x64xf32> -> vector<8x64xf32>
    %cst_191 = arith.constant dense<0.000000e+00> : vector<8x64xf32>
    %397 = tpu.matmul %14, %396, %cst_191 {dimension_numbers = #tpu.dot_dimension_numbers<[1], [0], [0], [1], [0, 0, 1, 1], [], []>} : vector<8x8xf32>, vector<8x64xf32>, vector<8x64xf32> -> vector<8x64xf32>
    %398 = arith.mulf %17, %396 : vector<8x64xf32>
    %cst_192 = arith.constant dense<0.000000e+00> : vector<64xf32>
    %399 = vector.multi_reduction <add>, %398, %cst_192 [0] : vector<8x64xf32> to vector<64xf32>
    %400 = vector.shape_cast %399 : vector<64xf32> to vector<1x64xf32>
    %cst_193 = arith.constant 5.000000e-01 : f32
    %401 = vector.broadcast %cst_193 : f32 to vector<8x64xf32>
    %402 = arith.cmpf ogt, %18, %401 : vector<8x64xf32>
    %403 = vector.broadcast %400 : vector<1x64xf32> to vector<8x64xf32>
    %404 = arith.subf %397, %403 : vector<8x64xf32>
    %cst_194 = arith.constant -1.000000e+30 : f32
    %405 = vector.broadcast %cst_194 : f32 to vector<8x64xf32>
    %406 = arith.select %402, %404, %405 : vector<8x64xi1>, vector<8x64xf32>
    %407 = math.exp %406 : vector<8x64xf32>
    %cst_195 = arith.constant dense<0.000000e+00> : vector<8x8xf32>
    %408 = tpu.matmul %388, %387, %cst_195 {dimension_numbers = #tpu.dot_dimension_numbers<[1], [1], [0], [0], [0, 0, 1, 0], [], []>} : vector<8x32xf32>, vector<8x32xf32>, vector<8x8xf32> -> vector<8x8xf32>
    %cst_196 = arith.constant dense<0.000000e+00> : vector<8x64xf32>
    %409 = tpu.matmul %408, %19, %cst_196 {dimension_numbers = #tpu.dot_dimension_numbers<[1], [0], [0], [1], [0, 0, 1, 1], [], []>} : vector<8x8xf32>, vector<8x64xf32>, vector<8x64xf32> -> vector<8x64xf32>
    %410 = arith.mulf %409, %407 : vector<8x64xf32>
    %cst_197 = arith.constant dense<0.000000e+00> : vector<8x64xf32>
    %411 = tpu.matmul %346, %22, %cst_197 {dimension_numbers = #tpu.dot_dimension_numbers<[1], [0], [0], [1], [0, 0, 1, 1], [], []>} : vector<8x8xf32>, vector<8x64xf32>, vector<8x64xf32> -> vector<8x64xf32>
    %c2_198 = arith.constant 2 : index
    %c0_199 = arith.constant 0 : index
    %c0_200 = arith.constant 0 : index
    %412 = vector.load %arg26[%c2_198, %c0_199, %c0_200] : memref<8x1x8xf32, #tpu.memory_space<vmem>>, vector<1x1x8xf32>
    %413 = vector.shape_cast %412 : vector<1x1x8xf32> to vector<1x8xf32>
    %cst_201 = arith.constant dense<0.000000e+00> : vector<1x64xf32>
    %414 = tpu.matmul %413, %22, %cst_201 {dimension_numbers = #tpu.dot_dimension_numbers<[1], [0], [0], [1], [0, 0, 1, 1], [], []>} : vector<1x8xf32>, vector<8x64xf32>, vector<1x64xf32> -> vector<1x64xf32>
    %415 = arith.mulf %386, %411 : vector<8x64xf32>
    %cst_202 = arith.constant dense<0.000000e+00> : vector<64x64xf32>
    %416 = tpu.matmul %20, %415, %cst_202 {dimension_numbers = #tpu.dot_dimension_numbers<[1], [0], [0], [1], [0, 0, 1, 1], [], []>} : vector<64x8xf32>, vector<8x64xf32>, vector<64x64xf32> -> vector<64x64xf32>
    %417 = arith.mulf %416, %21 : vector<64x64xf32>
    %cst_203 = arith.constant dense<0.000000e+00> : vector<8x64xf32>
    %418 = tpu.matmul %410, %417, %cst_203 {dimension_numbers = #tpu.dot_dimension_numbers<[1], [0], [0], [1], [0, 0, 1, 1], [], []>} : vector<8x64xf32>, vector<64x64xf32>, vector<8x64xf32> -> vector<8x64xf32>
    %419 = vector.broadcast %414 : vector<1x64xf32> to vector<8x64xf32>
    %420 = arith.mulf %386, %419 : vector<8x64xf32>
    %421 = arith.addf %418, %420 : vector<8x64xf32>
    %cst_204 = arith.constant 0.000000e+00 : f32
    %422 = vector.broadcast %cst_204 : f32 to vector<8x64xf32>
    %423 = arith.subf %422, %332 : vector<8x64xf32>
    %424 = math.exp %423 : vector<8x64xf32>
    %cst_205 = arith.constant 1.000000e+00 : f32
    %425 = vector.broadcast %cst_205 : f32 to vector<8x64xf32>
    %426 = arith.addf %425, %424 : vector<8x64xf32>
    %cst_206 = arith.constant 1.000000e+00 : f32
    %427 = vector.broadcast %cst_206 : f32 to vector<8x64xf32>
    %428 = arith.divf %427, %426 : vector<8x64xf32>
    %429 = arith.mulf %332, %428 : vector<8x64xf32>
    %430 = arith.mulf %421, %429 : vector<8x64xf32>
    %431 = arith.mulf %430, %430 : vector<8x64xf32>
    %cst_207 = arith.constant dense<0.000000e+00> : vector<8xf32>
    %432 = vector.multi_reduction <add>, %431, %cst_207 [1] : vector<8x64xf32> to vector<8xf32>
    %433 = vector.shape_cast %432 : vector<8xf32> to vector<8x1xf32>
    %cst_208 = arith.constant 6.400000e+01 : f32
    %434 = vector.broadcast %cst_208 : f32 to vector<8x1xf32>
    %435 = arith.divf %433, %434 : vector<8x1xf32>
    %cst_209 = arith.constant 9.99999974E-6 : f32
    %436 = vector.broadcast %cst_209 : f32 to vector<8x1xf32>
    %437 = arith.addf %435, %436 : vector<8x1xf32>
    %438 = math.rsqrt %437 : vector<8x1xf32>
    %439 = vector.broadcast %438 : vector<8x1xf32> to vector<8x64xf32>
    %440 = arith.mulf %430, %439 : vector<8x64xf32>
    %c2_210 = arith.constant 2 : index
    %c0_211 = arith.constant 0 : index
    %c0_212 = arith.constant 0 : index
    %441 = vector.load %arg27[%c2_210, %c0_211, %c0_212] : memref<8x1x64xf32, #tpu.memory_space<vmem>>, vector<1x1x64xf32>
    %442 = vector.shape_cast %441 : vector<1x1x64xf32> to vector<1x64xf32>
    %443 = vector.broadcast %442 : vector<1x64xf32> to vector<8x64xf32>
    %444 = arith.mulf %440, %443 : vector<8x64xf32>
    %c2_213 = arith.constant 2 : index
    %c0_214 = arith.constant 0 : index
    %c0_215 = arith.constant 0 : index
    %445 = vector.load %arg28[%c2_213, %c0_214, %c0_215] : memref<8x64x32xf32, #tpu.memory_space<vmem>>, vector<1x64x32xf32>
    %446 = vector.shape_cast %445 : vector<1x64x32xf32> to vector<64x32xf32>
    %cst_216 = arith.constant dense<0.000000e+00> : vector<8x32xf32>
    %447 = tpu.matmul %444, %446, %cst_216 {dimension_numbers = #tpu.dot_dimension_numbers<[1], [0], [0], [1], [0, 0, 1, 1], [], []>} : vector<8x64xf32>, vector<64x32xf32>, vector<8x32xf32> -> vector<8x32xf32>
    %448 = arith.addf %313, %447 : vector<8x32xf32>
    %449 = arith.mulf %448, %448 : vector<8x32xf32>
    %cst_217 = arith.constant dense<0.000000e+00> : vector<8xf32>
    %450 = vector.multi_reduction <add>, %449, %cst_217 [1] : vector<8x32xf32> to vector<8xf32>
    %451 = vector.shape_cast %450 : vector<8xf32> to vector<8x1xf32>
    %cst_218 = arith.constant 3.200000e+01 : f32
    %452 = vector.broadcast %cst_218 : f32 to vector<8x1xf32>
    %453 = arith.divf %451, %452 : vector<8x1xf32>
    %cst_219 = arith.constant 9.99999974E-6 : f32
    %454 = vector.broadcast %cst_219 : f32 to vector<8x1xf32>
    %455 = arith.addf %453, %454 : vector<8x1xf32>
    %456 = math.rsqrt %455 : vector<8x1xf32>
    %457 = vector.broadcast %456 : vector<8x1xf32> to vector<8x32xf32>
    %458 = arith.mulf %448, %457 : vector<8x32xf32>
    %c3 = arith.constant 3 : index
    %c0_220 = arith.constant 0 : index
    %c0_221 = arith.constant 0 : index
    %459 = vector.load %arg20[%c3, %c0_220, %c0_221] : memref<8x1x32xf32, #tpu.memory_space<vmem>>, vector<1x1x32xf32>
    %460 = vector.shape_cast %459 : vector<1x1x32xf32> to vector<1x32xf32>
    %461 = vector.broadcast %460 : vector<1x32xf32> to vector<8x32xf32>
    %462 = arith.mulf %458, %461 : vector<8x32xf32>
    %c3_222 = arith.constant 3 : index
    %c0_223 = arith.constant 0 : index
    %c0_224 = arith.constant 0 : index
    %463 = vector.load %arg21[%c3_222, %c0_223, %c0_224] : memref<8x32x256xf32, #tpu.memory_space<vmem>>, vector<1x32x256xf32>
    %464 = vector.shape_cast %463 : vector<1x32x256xf32> to vector<32x256xf32>
    %cst_225 = arith.constant dense<0.000000e+00> : vector<8x256xf32>
    %465 = tpu.matmul %462, %464, %cst_225 {dimension_numbers = #tpu.dot_dimension_numbers<[1], [0], [0], [1], [0, 0, 1, 1], [], []>} : vector<8x32xf32>, vector<32x256xf32>, vector<8x256xf32> -> vector<8x256xf32>
    %466 = vector.extract_strided_slice %465 {offsets = [0, 0], sizes = [8, 128], strides = [1, 1]} : vector<8x256xf32> to vector<8x128xf32>
    %467 = vector.extract_strided_slice %465 {offsets = [0, 128], sizes = [8, 64], strides = [1, 1]} : vector<8x256xf32> to vector<8x64xf32>
    %468 = vector.extract_strided_slice %465 {offsets = [0, 192], sizes = [8, 8], strides = [1, 1]} : vector<8x256xf32> to vector<8x8xf32>
    %c3_226 = arith.constant 3 : index
    %c0_227 = arith.constant 0 : index
    %c0_228 = arith.constant 0 : index
    %469 = vector.load %arg24[%c3_226, %c0_227, %c0_228] : memref<8x1x8xf32, #tpu.memory_space<vmem>>, vector<1x1x8xf32>
    %470 = vector.shape_cast %469 : vector<1x1x8xf32> to vector<1x8xf32>
    %471 = vector.broadcast %470 : vector<1x8xf32> to vector<8x8xf32>
    %472 = arith.addf %468, %471 : vector<8x8xf32>
    %cst_229 = arith.constant 2.000000e+01 : f32
    %473 = vector.broadcast %cst_229 : f32 to vector<8x8xf32>
    %474 = arith.cmpf ogt, %472, %473 : vector<8x8xf32>
    %cst_230 = arith.constant 2.000000e+01 : f32
    %475 = vector.broadcast %cst_230 : f32 to vector<8x8xf32>
    %476 = arith.minimumf %472, %475 : vector<8x8xf32>
    %477 = math.exp %476 : vector<8x8xf32>
    %cst_231 = arith.constant 1.000000e+00 : f32
    %478 = vector.broadcast %cst_231 : f32 to vector<8x8xf32>
    %479 = arith.addf %478, %477 : vector<8x8xf32>
    %480 = math.log %479 : vector<8x8xf32>
    %481 = arith.select %474, %472, %480 : vector<8x8xi1>, vector<8x8xf32>
    %c3_232 = arith.constant 3 : index
    %c0_233 = arith.constant 0 : index
    %c0_234 = arith.constant 0 : index
    %482 = vector.load %arg22[%c3_232, %c0_233, %c0_234] : memref<8x4x128xf32, #tpu.memory_space<vmem>>, vector<1x4x128xf32>
    %483 = vector.shape_cast %482 : vector<1x4x128xf32> to vector<4x128xf32>
    %cst_235 = arith.constant 0.000000e+00 : f32
    %484 = vector.broadcast %cst_235 : f32 to vector<8x128xf32>
    %c3_236 = arith.constant 3 : index
    %c0_237 = arith.constant 0 : index
    %c0_238 = arith.constant 0 : index
    %485 = vector.load %arg23[%c3_236, %c0_237, %c0_238] : memref<8x1x128xf32, #tpu.memory_space<vmem>>, vector<1x1x128xf32>
    %486 = vector.shape_cast %485 : vector<1x1x128xf32> to vector<1x128xf32>
    %487 = vector.broadcast %486 : vector<1x128xf32> to vector<8x128xf32>
    %488 = arith.addf %484, %487 : vector<8x128xf32>
    %489 = vector.extract_strided_slice %15 {offsets = [0, 0], sizes = [8, 8], strides = [1, 1]} : vector<32x8xf32> to vector<8x8xf32>
    %cst_239 = arith.constant dense<0.000000e+00> : vector<8x128xf32>
    %490 = tpu.matmul %489, %466, %cst_239 {dimension_numbers = #tpu.dot_dimension_numbers<[1], [0], [0], [1], [0, 0, 1, 1], [], []>} : vector<8x8xf32>, vector<8x128xf32>, vector<8x128xf32> -> vector<8x128xf32>
    %491 = vector.extract_strided_slice %483 {offsets = [0, 0], sizes = [1, 128], strides = [1, 1]} : vector<4x128xf32> to vector<1x128xf32>
    %492 = vector.broadcast %491 : vector<1x128xf32> to vector<8x128xf32>
    %493 = arith.mulf %490, %492 : vector<8x128xf32>
    %494 = arith.addf %488, %493 : vector<8x128xf32>
    %495 = vector.extract_strided_slice %15 {offsets = [8, 0], sizes = [8, 8], strides = [1, 1]} : vector<32x8xf32> to vector<8x8xf32>
    %cst_240 = arith.constant dense<0.000000e+00> : vector<8x128xf32>
    %496 = tpu.matmul %495, %466, %cst_240 {dimension_numbers = #tpu.dot_dimension_numbers<[1], [0], [0], [1], [0, 0, 1, 1], [], []>} : vector<8x8xf32>, vector<8x128xf32>, vector<8x128xf32> -> vector<8x128xf32>
    %497 = vector.extract_strided_slice %483 {offsets = [1, 0], sizes = [1, 128], strides = [1, 1]} : vector<4x128xf32> to vector<1x128xf32>
    %498 = vector.broadcast %497 : vector<1x128xf32> to vector<8x128xf32>
    %499 = arith.mulf %496, %498 : vector<8x128xf32>
    %500 = arith.addf %494, %499 : vector<8x128xf32>
    %501 = vector.extract_strided_slice %15 {offsets = [16, 0], sizes = [8, 8], strides = [1, 1]} : vector<32x8xf32> to vector<8x8xf32>
    %cst_241 = arith.constant dense<0.000000e+00> : vector<8x128xf32>
    %502 = tpu.matmul %501, %466, %cst_241 {dimension_numbers = #tpu.dot_dimension_numbers<[1], [0], [0], [1], [0, 0, 1, 1], [], []>} : vector<8x8xf32>, vector<8x128xf32>, vector<8x128xf32> -> vector<8x128xf32>
    %503 = vector.extract_strided_slice %483 {offsets = [2, 0], sizes = [1, 128], strides = [1, 1]} : vector<4x128xf32> to vector<1x128xf32>
    %504 = vector.broadcast %503 : vector<1x128xf32> to vector<8x128xf32>
    %505 = arith.mulf %502, %504 : vector<8x128xf32>
    %506 = arith.addf %500, %505 : vector<8x128xf32>
    %507 = vector.extract_strided_slice %15 {offsets = [24, 0], sizes = [8, 8], strides = [1, 1]} : vector<32x8xf32> to vector<8x8xf32>
    %cst_242 = arith.constant dense<0.000000e+00> : vector<8x128xf32>
    %508 = tpu.matmul %507, %466, %cst_242 {dimension_numbers = #tpu.dot_dimension_numbers<[1], [0], [0], [1], [0, 0, 1, 1], [], []>} : vector<8x8xf32>, vector<8x128xf32>, vector<8x128xf32> -> vector<8x128xf32>
    %509 = vector.extract_strided_slice %483 {offsets = [3, 0], sizes = [1, 128], strides = [1, 1]} : vector<4x128xf32> to vector<1x128xf32>
    %510 = vector.broadcast %509 : vector<1x128xf32> to vector<8x128xf32>
    %511 = arith.mulf %508, %510 : vector<8x128xf32>
    %512 = arith.addf %506, %511 : vector<8x128xf32>
    %cst_243 = arith.constant 0.000000e+00 : f32
    %513 = vector.broadcast %cst_243 : f32 to vector<8x128xf32>
    %514 = arith.subf %513, %512 : vector<8x128xf32>
    %515 = math.exp %514 : vector<8x128xf32>
    %cst_244 = arith.constant 1.000000e+00 : f32
    %516 = vector.broadcast %cst_244 : f32 to vector<8x128xf32>
    %517 = arith.addf %516, %515 : vector<8x128xf32>
    %cst_245 = arith.constant 1.000000e+00 : f32
    %518 = vector.broadcast %cst_245 : f32 to vector<8x128xf32>
    %519 = arith.divf %518, %517 : vector<8x128xf32>
    %520 = arith.mulf %512, %519 : vector<8x128xf32>
    %521 = vector.extract_strided_slice %520 {offsets = [0, 0], sizes = [8, 64], strides = [1, 1]} : vector<8x128xf32> to vector<8x64xf32>
    %522 = vector.extract_strided_slice %520 {offsets = [0, 64], sizes = [8, 32], strides = [1, 1]} : vector<8x128xf32> to vector<8x32xf32>
    %523 = vector.extract_strided_slice %520 {offsets = [0, 96], sizes = [8, 32], strides = [1, 1]} : vector<8x128xf32> to vector<8x32xf32>
    %c3_246 = arith.constant 3 : index
    %c0_247 = arith.constant 0 : index
    %c0_248 = arith.constant 0 : index
    %524 = vector.load %arg25[%c3_246, %c0_247, %c0_248] : memref<8x1x8xf32, #tpu.memory_space<vmem>>, vector<1x1x8xf32>
    %525 = vector.shape_cast %524 : vector<1x1x8xf32> to vector<1x8xf32>
    %526 = math.exp %525 : vector<1x8xf32>
    %cst_249 = arith.constant 0.000000e+00 : f32
    %527 = vector.broadcast %cst_249 : f32 to vector<1x8xf32>
    %528 = arith.subf %527, %526 : vector<1x8xf32>
    %529 = vector.broadcast %528 : vector<1x8xf32> to vector<8x8xf32>
    %530 = arith.mulf %529, %481 : vector<8x8xf32>
    %cst_250 = arith.constant dense<0.000000e+00> : vector<8x64xf32>
    %531 = tpu.matmul %530, %16, %cst_250 {dimension_numbers = #tpu.dot_dimension_numbers<[1], [0], [0], [1], [0, 0, 1, 1], [], []>} : vector<8x8xf32>, vector<8x64xf32>, vector<8x64xf32> -> vector<8x64xf32>
    %cst_251 = arith.constant dense<0.000000e+00> : vector<8x64xf32>
    %532 = tpu.matmul %14, %531, %cst_251 {dimension_numbers = #tpu.dot_dimension_numbers<[1], [0], [0], [1], [0, 0, 1, 1], [], []>} : vector<8x8xf32>, vector<8x64xf32>, vector<8x64xf32> -> vector<8x64xf32>
    %533 = arith.mulf %17, %531 : vector<8x64xf32>
    %cst_252 = arith.constant dense<0.000000e+00> : vector<64xf32>
    %534 = vector.multi_reduction <add>, %533, %cst_252 [0] : vector<8x64xf32> to vector<64xf32>
    %535 = vector.shape_cast %534 : vector<64xf32> to vector<1x64xf32>
    %cst_253 = arith.constant 5.000000e-01 : f32
    %536 = vector.broadcast %cst_253 : f32 to vector<8x64xf32>
    %537 = arith.cmpf ogt, %18, %536 : vector<8x64xf32>
    %538 = vector.broadcast %535 : vector<1x64xf32> to vector<8x64xf32>
    %539 = arith.subf %532, %538 : vector<8x64xf32>
    %cst_254 = arith.constant -1.000000e+30 : f32
    %540 = vector.broadcast %cst_254 : f32 to vector<8x64xf32>
    %541 = arith.select %537, %539, %540 : vector<8x64xi1>, vector<8x64xf32>
    %542 = math.exp %541 : vector<8x64xf32>
    %cst_255 = arith.constant dense<0.000000e+00> : vector<8x8xf32>
    %543 = tpu.matmul %523, %522, %cst_255 {dimension_numbers = #tpu.dot_dimension_numbers<[1], [1], [0], [0], [0, 0, 1, 0], [], []>} : vector<8x32xf32>, vector<8x32xf32>, vector<8x8xf32> -> vector<8x8xf32>
    %cst_256 = arith.constant dense<0.000000e+00> : vector<8x64xf32>
    %544 = tpu.matmul %543, %19, %cst_256 {dimension_numbers = #tpu.dot_dimension_numbers<[1], [0], [0], [1], [0, 0, 1, 1], [], []>} : vector<8x8xf32>, vector<8x64xf32>, vector<8x64xf32> -> vector<8x64xf32>
    %545 = arith.mulf %544, %542 : vector<8x64xf32>
    %cst_257 = arith.constant dense<0.000000e+00> : vector<8x64xf32>
    %546 = tpu.matmul %481, %22, %cst_257 {dimension_numbers = #tpu.dot_dimension_numbers<[1], [0], [0], [1], [0, 0, 1, 1], [], []>} : vector<8x8xf32>, vector<8x64xf32>, vector<8x64xf32> -> vector<8x64xf32>
    %c3_258 = arith.constant 3 : index
    %c0_259 = arith.constant 0 : index
    %c0_260 = arith.constant 0 : index
    %547 = vector.load %arg26[%c3_258, %c0_259, %c0_260] : memref<8x1x8xf32, #tpu.memory_space<vmem>>, vector<1x1x8xf32>
    %548 = vector.shape_cast %547 : vector<1x1x8xf32> to vector<1x8xf32>
    %cst_261 = arith.constant dense<0.000000e+00> : vector<1x64xf32>
    %549 = tpu.matmul %548, %22, %cst_261 {dimension_numbers = #tpu.dot_dimension_numbers<[1], [0], [0], [1], [0, 0, 1, 1], [], []>} : vector<1x8xf32>, vector<8x64xf32>, vector<1x64xf32> -> vector<1x64xf32>
    %550 = arith.mulf %521, %546 : vector<8x64xf32>
    %cst_262 = arith.constant dense<0.000000e+00> : vector<64x64xf32>
    %551 = tpu.matmul %20, %550, %cst_262 {dimension_numbers = #tpu.dot_dimension_numbers<[1], [0], [0], [1], [0, 0, 1, 1], [], []>} : vector<64x8xf32>, vector<8x64xf32>, vector<64x64xf32> -> vector<64x64xf32>
    %552 = arith.mulf %551, %21 : vector<64x64xf32>
    %cst_263 = arith.constant dense<0.000000e+00> : vector<8x64xf32>
    %553 = tpu.matmul %545, %552, %cst_263 {dimension_numbers = #tpu.dot_dimension_numbers<[1], [0], [0], [1], [0, 0, 1, 1], [], []>} : vector<8x64xf32>, vector<64x64xf32>, vector<8x64xf32> -> vector<8x64xf32>
    %554 = vector.broadcast %549 : vector<1x64xf32> to vector<8x64xf32>
    %555 = arith.mulf %521, %554 : vector<8x64xf32>
    %556 = arith.addf %553, %555 : vector<8x64xf32>
    %cst_264 = arith.constant 0.000000e+00 : f32
    %557 = vector.broadcast %cst_264 : f32 to vector<8x64xf32>
    %558 = arith.subf %557, %467 : vector<8x64xf32>
    %559 = math.exp %558 : vector<8x64xf32>
    %cst_265 = arith.constant 1.000000e+00 : f32
    %560 = vector.broadcast %cst_265 : f32 to vector<8x64xf32>
    %561 = arith.addf %560, %559 : vector<8x64xf32>
    %cst_266 = arith.constant 1.000000e+00 : f32
    %562 = vector.broadcast %cst_266 : f32 to vector<8x64xf32>
    %563 = arith.divf %562, %561 : vector<8x64xf32>
    %564 = arith.mulf %467, %563 : vector<8x64xf32>
    %565 = arith.mulf %556, %564 : vector<8x64xf32>
    %566 = arith.mulf %565, %565 : vector<8x64xf32>
    %cst_267 = arith.constant dense<0.000000e+00> : vector<8xf32>
    %567 = vector.multi_reduction <add>, %566, %cst_267 [1] : vector<8x64xf32> to vector<8xf32>
    %568 = vector.shape_cast %567 : vector<8xf32> to vector<8x1xf32>
    %cst_268 = arith.constant 6.400000e+01 : f32
    %569 = vector.broadcast %cst_268 : f32 to vector<8x1xf32>
    %570 = arith.divf %568, %569 : vector<8x1xf32>
    %cst_269 = arith.constant 9.99999974E-6 : f32
    %571 = vector.broadcast %cst_269 : f32 to vector<8x1xf32>
    %572 = arith.addf %570, %571 : vector<8x1xf32>
    %573 = math.rsqrt %572 : vector<8x1xf32>
    %574 = vector.broadcast %573 : vector<8x1xf32> to vector<8x64xf32>
    %575 = arith.mulf %565, %574 : vector<8x64xf32>
    %c3_270 = arith.constant 3 : index
    %c0_271 = arith.constant 0 : index
    %c0_272 = arith.constant 0 : index
    %576 = vector.load %arg27[%c3_270, %c0_271, %c0_272] : memref<8x1x64xf32, #tpu.memory_space<vmem>>, vector<1x1x64xf32>
    %577 = vector.shape_cast %576 : vector<1x1x64xf32> to vector<1x64xf32>
    %578 = vector.broadcast %577 : vector<1x64xf32> to vector<8x64xf32>
    %579 = arith.mulf %575, %578 : vector<8x64xf32>
    %c3_273 = arith.constant 3 : index
    %c0_274 = arith.constant 0 : index
    %c0_275 = arith.constant 0 : index
    %580 = vector.load %arg28[%c3_273, %c0_274, %c0_275] : memref<8x64x32xf32, #tpu.memory_space<vmem>>, vector<1x64x32xf32>
    %581 = vector.shape_cast %580 : vector<1x64x32xf32> to vector<64x32xf32>
    %cst_276 = arith.constant dense<0.000000e+00> : vector<8x32xf32>
    %582 = tpu.matmul %579, %581, %cst_276 {dimension_numbers = #tpu.dot_dimension_numbers<[1], [0], [0], [1], [0, 0, 1, 1], [], []>} : vector<8x64xf32>, vector<64x32xf32>, vector<8x32xf32> -> vector<8x32xf32>
    %583 = arith.addf %448, %582 : vector<8x32xf32>
    %584 = arith.mulf %583, %583 : vector<8x32xf32>
    %cst_277 = arith.constant dense<0.000000e+00> : vector<8xf32>
    %585 = vector.multi_reduction <add>, %584, %cst_277 [1] : vector<8x32xf32> to vector<8xf32>
    %586 = vector.shape_cast %585 : vector<8xf32> to vector<8x1xf32>
    %cst_278 = arith.constant 3.200000e+01 : f32
    %587 = vector.broadcast %cst_278 : f32 to vector<8x1xf32>
    %588 = arith.divf %586, %587 : vector<8x1xf32>
    %cst_279 = arith.constant 9.99999974E-6 : f32
    %589 = vector.broadcast %cst_279 : f32 to vector<8x1xf32>
    %590 = arith.addf %588, %589 : vector<8x1xf32>
    %591 = math.rsqrt %590 : vector<8x1xf32>
    %592 = vector.broadcast %591 : vector<8x1xf32> to vector<8x32xf32>
    %593 = arith.mulf %583, %592 : vector<8x32xf32>
    %c4 = arith.constant 4 : index
    %c0_280 = arith.constant 0 : index
    %c0_281 = arith.constant 0 : index
    %594 = vector.load %arg20[%c4, %c0_280, %c0_281] : memref<8x1x32xf32, #tpu.memory_space<vmem>>, vector<1x1x32xf32>
    %595 = vector.shape_cast %594 : vector<1x1x32xf32> to vector<1x32xf32>
    %596 = vector.broadcast %595 : vector<1x32xf32> to vector<8x32xf32>
    %597 = arith.mulf %593, %596 : vector<8x32xf32>
    %c4_282 = arith.constant 4 : index
    %c0_283 = arith.constant 0 : index
    %c0_284 = arith.constant 0 : index
    %598 = vector.load %arg21[%c4_282, %c0_283, %c0_284] : memref<8x32x256xf32, #tpu.memory_space<vmem>>, vector<1x32x256xf32>
    %599 = vector.shape_cast %598 : vector<1x32x256xf32> to vector<32x256xf32>
    %cst_285 = arith.constant dense<0.000000e+00> : vector<8x256xf32>
    %600 = tpu.matmul %597, %599, %cst_285 {dimension_numbers = #tpu.dot_dimension_numbers<[1], [0], [0], [1], [0, 0, 1, 1], [], []>} : vector<8x32xf32>, vector<32x256xf32>, vector<8x256xf32> -> vector<8x256xf32>
    %601 = vector.extract_strided_slice %600 {offsets = [0, 0], sizes = [8, 128], strides = [1, 1]} : vector<8x256xf32> to vector<8x128xf32>
    %602 = vector.extract_strided_slice %600 {offsets = [0, 128], sizes = [8, 64], strides = [1, 1]} : vector<8x256xf32> to vector<8x64xf32>
    %603 = vector.extract_strided_slice %600 {offsets = [0, 192], sizes = [8, 8], strides = [1, 1]} : vector<8x256xf32> to vector<8x8xf32>
    %c4_286 = arith.constant 4 : index
    %c0_287 = arith.constant 0 : index
    %c0_288 = arith.constant 0 : index
    %604 = vector.load %arg24[%c4_286, %c0_287, %c0_288] : memref<8x1x8xf32, #tpu.memory_space<vmem>>, vector<1x1x8xf32>
    %605 = vector.shape_cast %604 : vector<1x1x8xf32> to vector<1x8xf32>
    %606 = vector.broadcast %605 : vector<1x8xf32> to vector<8x8xf32>
    %607 = arith.addf %603, %606 : vector<8x8xf32>
    %cst_289 = arith.constant 2.000000e+01 : f32
    %608 = vector.broadcast %cst_289 : f32 to vector<8x8xf32>
    %609 = arith.cmpf ogt, %607, %608 : vector<8x8xf32>
    %cst_290 = arith.constant 2.000000e+01 : f32
    %610 = vector.broadcast %cst_290 : f32 to vector<8x8xf32>
    %611 = arith.minimumf %607, %610 : vector<8x8xf32>
    %612 = math.exp %611 : vector<8x8xf32>
    %cst_291 = arith.constant 1.000000e+00 : f32
    %613 = vector.broadcast %cst_291 : f32 to vector<8x8xf32>
    %614 = arith.addf %613, %612 : vector<8x8xf32>
    %615 = math.log %614 : vector<8x8xf32>
    %616 = arith.select %609, %607, %615 : vector<8x8xi1>, vector<8x8xf32>
    %c4_292 = arith.constant 4 : index
    %c0_293 = arith.constant 0 : index
    %c0_294 = arith.constant 0 : index
    %617 = vector.load %arg22[%c4_292, %c0_293, %c0_294] : memref<8x4x128xf32, #tpu.memory_space<vmem>>, vector<1x4x128xf32>
    %618 = vector.shape_cast %617 : vector<1x4x128xf32> to vector<4x128xf32>
    %cst_295 = arith.constant 0.000000e+00 : f32
    %619 = vector.broadcast %cst_295 : f32 to vector<8x128xf32>
    %c4_296 = arith.constant 4 : index
    %c0_297 = arith.constant 0 : index
    %c0_298 = arith.constant 0 : index
    %620 = vector.load %arg23[%c4_296, %c0_297, %c0_298] : memref<8x1x128xf32, #tpu.memory_space<vmem>>, vector<1x1x128xf32>
    %621 = vector.shape_cast %620 : vector<1x1x128xf32> to vector<1x128xf32>
    %622 = vector.broadcast %621 : vector<1x128xf32> to vector<8x128xf32>
    %623 = arith.addf %619, %622 : vector<8x128xf32>
    %624 = vector.extract_strided_slice %15 {offsets = [0, 0], sizes = [8, 8], strides = [1, 1]} : vector<32x8xf32> to vector<8x8xf32>
    %cst_299 = arith.constant dense<0.000000e+00> : vector<8x128xf32>
    %625 = tpu.matmul %624, %601, %cst_299 {dimension_numbers = #tpu.dot_dimension_numbers<[1], [0], [0], [1], [0, 0, 1, 1], [], []>} : vector<8x8xf32>, vector<8x128xf32>, vector<8x128xf32> -> vector<8x128xf32>
    %626 = vector.extract_strided_slice %618 {offsets = [0, 0], sizes = [1, 128], strides = [1, 1]} : vector<4x128xf32> to vector<1x128xf32>
    %627 = vector.broadcast %626 : vector<1x128xf32> to vector<8x128xf32>
    %628 = arith.mulf %625, %627 : vector<8x128xf32>
    %629 = arith.addf %623, %628 : vector<8x128xf32>
    %630 = vector.extract_strided_slice %15 {offsets = [8, 0], sizes = [8, 8], strides = [1, 1]} : vector<32x8xf32> to vector<8x8xf32>
    %cst_300 = arith.constant dense<0.000000e+00> : vector<8x128xf32>
    %631 = tpu.matmul %630, %601, %cst_300 {dimension_numbers = #tpu.dot_dimension_numbers<[1], [0], [0], [1], [0, 0, 1, 1], [], []>} : vector<8x8xf32>, vector<8x128xf32>, vector<8x128xf32> -> vector<8x128xf32>
    %632 = vector.extract_strided_slice %618 {offsets = [1, 0], sizes = [1, 128], strides = [1, 1]} : vector<4x128xf32> to vector<1x128xf32>
    %633 = vector.broadcast %632 : vector<1x128xf32> to vector<8x128xf32>
    %634 = arith.mulf %631, %633 : vector<8x128xf32>
    %635 = arith.addf %629, %634 : vector<8x128xf32>
    %636 = vector.extract_strided_slice %15 {offsets = [16, 0], sizes = [8, 8], strides = [1, 1]} : vector<32x8xf32> to vector<8x8xf32>
    %cst_301 = arith.constant dense<0.000000e+00> : vector<8x128xf32>
    %637 = tpu.matmul %636, %601, %cst_301 {dimension_numbers = #tpu.dot_dimension_numbers<[1], [0], [0], [1], [0, 0, 1, 1], [], []>} : vector<8x8xf32>, vector<8x128xf32>, vector<8x128xf32> -> vector<8x128xf32>
    %638 = vector.extract_strided_slice %618 {offsets = [2, 0], sizes = [1, 128], strides = [1, 1]} : vector<4x128xf32> to vector<1x128xf32>
    %639 = vector.broadcast %638 : vector<1x128xf32> to vector<8x128xf32>
    %640 = arith.mulf %637, %639 : vector<8x128xf32>
    %641 = arith.addf %635, %640 : vector<8x128xf32>
    %642 = vector.extract_strided_slice %15 {offsets = [24, 0], sizes = [8, 8], strides = [1, 1]} : vector<32x8xf32> to vector<8x8xf32>
    %cst_302 = arith.constant dense<0.000000e+00> : vector<8x128xf32>
    %643 = tpu.matmul %642, %601, %cst_302 {dimension_numbers = #tpu.dot_dimension_numbers<[1], [0], [0], [1], [0, 0, 1, 1], [], []>} : vector<8x8xf32>, vector<8x128xf32>, vector<8x128xf32> -> vector<8x128xf32>
    %644 = vector.extract_strided_slice %618 {offsets = [3, 0], sizes = [1, 128], strides = [1, 1]} : vector<4x128xf32> to vector<1x128xf32>
    %645 = vector.broadcast %644 : vector<1x128xf32> to vector<8x128xf32>
    %646 = arith.mulf %643, %645 : vector<8x128xf32>
    %647 = arith.addf %641, %646 : vector<8x128xf32>
    %cst_303 = arith.constant 0.000000e+00 : f32
    %648 = vector.broadcast %cst_303 : f32 to vector<8x128xf32>
    %649 = arith.subf %648, %647 : vector<8x128xf32>
    %650 = math.exp %649 : vector<8x128xf32>
    %cst_304 = arith.constant 1.000000e+00 : f32
    %651 = vector.broadcast %cst_304 : f32 to vector<8x128xf32>
    %652 = arith.addf %651, %650 : vector<8x128xf32>
    %cst_305 = arith.constant 1.000000e+00 : f32
    %653 = vector.broadcast %cst_305 : f32 to vector<8x128xf32>
    %654 = arith.divf %653, %652 : vector<8x128xf32>
    %655 = arith.mulf %647, %654 : vector<8x128xf32>
    %656 = vector.extract_strided_slice %655 {offsets = [0, 0], sizes = [8, 64], strides = [1, 1]} : vector<8x128xf32> to vector<8x64xf32>
    %657 = vector.extract_strided_slice %655 {offsets = [0, 64], sizes = [8, 32], strides = [1, 1]} : vector<8x128xf32> to vector<8x32xf32>
    %658 = vector.extract_strided_slice %655 {offsets = [0, 96], sizes = [8, 32], strides = [1, 1]} : vector<8x128xf32> to vector<8x32xf32>
    %c4_306 = arith.constant 4 : index
    %c0_307 = arith.constant 0 : index
    %c0_308 = arith.constant 0 : index
    %659 = vector.load %arg25[%c4_306, %c0_307, %c0_308] : memref<8x1x8xf32, #tpu.memory_space<vmem>>, vector<1x1x8xf32>
    %660 = vector.shape_cast %659 : vector<1x1x8xf32> to vector<1x8xf32>
    %661 = math.exp %660 : vector<1x8xf32>
    %cst_309 = arith.constant 0.000000e+00 : f32
    %662 = vector.broadcast %cst_309 : f32 to vector<1x8xf32>
    %663 = arith.subf %662, %661 : vector<1x8xf32>
    %664 = vector.broadcast %663 : vector<1x8xf32> to vector<8x8xf32>
    %665 = arith.mulf %664, %616 : vector<8x8xf32>
    %cst_310 = arith.constant dense<0.000000e+00> : vector<8x64xf32>
    %666 = tpu.matmul %665, %16, %cst_310 {dimension_numbers = #tpu.dot_dimension_numbers<[1], [0], [0], [1], [0, 0, 1, 1], [], []>} : vector<8x8xf32>, vector<8x64xf32>, vector<8x64xf32> -> vector<8x64xf32>
    %cst_311 = arith.constant dense<0.000000e+00> : vector<8x64xf32>
    %667 = tpu.matmul %14, %666, %cst_311 {dimension_numbers = #tpu.dot_dimension_numbers<[1], [0], [0], [1], [0, 0, 1, 1], [], []>} : vector<8x8xf32>, vector<8x64xf32>, vector<8x64xf32> -> vector<8x64xf32>
    %668 = arith.mulf %17, %666 : vector<8x64xf32>
    %cst_312 = arith.constant dense<0.000000e+00> : vector<64xf32>
    %669 = vector.multi_reduction <add>, %668, %cst_312 [0] : vector<8x64xf32> to vector<64xf32>
    %670 = vector.shape_cast %669 : vector<64xf32> to vector<1x64xf32>
    %cst_313 = arith.constant 5.000000e-01 : f32
    %671 = vector.broadcast %cst_313 : f32 to vector<8x64xf32>
    %672 = arith.cmpf ogt, %18, %671 : vector<8x64xf32>
    %673 = vector.broadcast %670 : vector<1x64xf32> to vector<8x64xf32>
    %674 = arith.subf %667, %673 : vector<8x64xf32>
    %cst_314 = arith.constant -1.000000e+30 : f32
    %675 = vector.broadcast %cst_314 : f32 to vector<8x64xf32>
    %676 = arith.select %672, %674, %675 : vector<8x64xi1>, vector<8x64xf32>
    %677 = math.exp %676 : vector<8x64xf32>
    %cst_315 = arith.constant dense<0.000000e+00> : vector<8x8xf32>
    %678 = tpu.matmul %658, %657, %cst_315 {dimension_numbers = #tpu.dot_dimension_numbers<[1], [1], [0], [0], [0, 0, 1, 0], [], []>} : vector<8x32xf32>, vector<8x32xf32>, vector<8x8xf32> -> vector<8x8xf32>
    %cst_316 = arith.constant dense<0.000000e+00> : vector<8x64xf32>
    %679 = tpu.matmul %678, %19, %cst_316 {dimension_numbers = #tpu.dot_dimension_numbers<[1], [0], [0], [1], [0, 0, 1, 1], [], []>} : vector<8x8xf32>, vector<8x64xf32>, vector<8x64xf32> -> vector<8x64xf32>
    %680 = arith.mulf %679, %677 : vector<8x64xf32>
    %cst_317 = arith.constant dense<0.000000e+00> : vector<8x64xf32>
    %681 = tpu.matmul %616, %22, %cst_317 {dimension_numbers = #tpu.dot_dimension_numbers<[1], [0], [0], [1], [0, 0, 1, 1], [], []>} : vector<8x8xf32>, vector<8x64xf32>, vector<8x64xf32> -> vector<8x64xf32>
    %c4_318 = arith.constant 4 : index
    %c0_319 = arith.constant 0 : index
    %c0_320 = arith.constant 0 : index
    %682 = vector.load %arg26[%c4_318, %c0_319, %c0_320] : memref<8x1x8xf32, #tpu.memory_space<vmem>>, vector<1x1x8xf32>
    %683 = vector.shape_cast %682 : vector<1x1x8xf32> to vector<1x8xf32>
    %cst_321 = arith.constant dense<0.000000e+00> : vector<1x64xf32>
    %684 = tpu.matmul %683, %22, %cst_321 {dimension_numbers = #tpu.dot_dimension_numbers<[1], [0], [0], [1], [0, 0, 1, 1], [], []>} : vector<1x8xf32>, vector<8x64xf32>, vector<1x64xf32> -> vector<1x64xf32>
    %685 = arith.mulf %656, %681 : vector<8x64xf32>
    %cst_322 = arith.constant dense<0.000000e+00> : vector<64x64xf32>
    %686 = tpu.matmul %20, %685, %cst_322 {dimension_numbers = #tpu.dot_dimension_numbers<[1], [0], [0], [1], [0, 0, 1, 1], [], []>} : vector<64x8xf32>, vector<8x64xf32>, vector<64x64xf32> -> vector<64x64xf32>
    %687 = arith.mulf %686, %21 : vector<64x64xf32>
    %cst_323 = arith.constant dense<0.000000e+00> : vector<8x64xf32>
    %688 = tpu.matmul %680, %687, %cst_323 {dimension_numbers = #tpu.dot_dimension_numbers<[1], [0], [0], [1], [0, 0, 1, 1], [], []>} : vector<8x64xf32>, vector<64x64xf32>, vector<8x64xf32> -> vector<8x64xf32>
    %689 = vector.broadcast %684 : vector<1x64xf32> to vector<8x64xf32>
    %690 = arith.mulf %656, %689 : vector<8x64xf32>
    %691 = arith.addf %688, %690 : vector<8x64xf32>
    %cst_324 = arith.constant 0.000000e+00 : f32
    %692 = vector.broadcast %cst_324 : f32 to vector<8x64xf32>
    %693 = arith.subf %692, %602 : vector<8x64xf32>
    %694 = math.exp %693 : vector<8x64xf32>
    %cst_325 = arith.constant 1.000000e+00 : f32
    %695 = vector.broadcast %cst_325 : f32 to vector<8x64xf32>
    %696 = arith.addf %695, %694 : vector<8x64xf32>
    %cst_326 = arith.constant 1.000000e+00 : f32
    %697 = vector.broadcast %cst_326 : f32 to vector<8x64xf32>
    %698 = arith.divf %697, %696 : vector<8x64xf32>
    %699 = arith.mulf %602, %698 : vector<8x64xf32>
    %700 = arith.mulf %691, %699 : vector<8x64xf32>
    %701 = arith.mulf %700, %700 : vector<8x64xf32>
    %cst_327 = arith.constant dense<0.000000e+00> : vector<8xf32>
    %702 = vector.multi_reduction <add>, %701, %cst_327 [1] : vector<8x64xf32> to vector<8xf32>
    %703 = vector.shape_cast %702 : vector<8xf32> to vector<8x1xf32>
    %cst_328 = arith.constant 6.400000e+01 : f32
    %704 = vector.broadcast %cst_328 : f32 to vector<8x1xf32>
    %705 = arith.divf %703, %704 : vector<8x1xf32>
    %cst_329 = arith.constant 9.99999974E-6 : f32
    %706 = vector.broadcast %cst_329 : f32 to vector<8x1xf32>
    %707 = arith.addf %705, %706 : vector<8x1xf32>
    %708 = math.rsqrt %707 : vector<8x1xf32>
    %709 = vector.broadcast %708 : vector<8x1xf32> to vector<8x64xf32>
    %710 = arith.mulf %700, %709 : vector<8x64xf32>
    %c4_330 = arith.constant 4 : index
    %c0_331 = arith.constant 0 : index
    %c0_332 = arith.constant 0 : index
    %711 = vector.load %arg27[%c4_330, %c0_331, %c0_332] : memref<8x1x64xf32, #tpu.memory_space<vmem>>, vector<1x1x64xf32>
    %712 = vector.shape_cast %711 : vector<1x1x64xf32> to vector<1x64xf32>
    %713 = vector.broadcast %712 : vector<1x64xf32> to vector<8x64xf32>
    %714 = arith.mulf %710, %713 : vector<8x64xf32>
    %c4_333 = arith.constant 4 : index
    %c0_334 = arith.constant 0 : index
    %c0_335 = arith.constant 0 : index
    %715 = vector.load %arg28[%c4_333, %c0_334, %c0_335] : memref<8x64x32xf32, #tpu.memory_space<vmem>>, vector<1x64x32xf32>
    %716 = vector.shape_cast %715 : vector<1x64x32xf32> to vector<64x32xf32>
    %cst_336 = arith.constant dense<0.000000e+00> : vector<8x32xf32>
    %717 = tpu.matmul %714, %716, %cst_336 {dimension_numbers = #tpu.dot_dimension_numbers<[1], [0], [0], [1], [0, 0, 1, 1], [], []>} : vector<8x64xf32>, vector<64x32xf32>, vector<8x32xf32> -> vector<8x32xf32>
    %718 = arith.addf %583, %717 : vector<8x32xf32>
    %719 = arith.mulf %718, %718 : vector<8x32xf32>
    %cst_337 = arith.constant dense<0.000000e+00> : vector<8xf32>
    %720 = vector.multi_reduction <add>, %719, %cst_337 [1] : vector<8x32xf32> to vector<8xf32>
    %721 = vector.shape_cast %720 : vector<8xf32> to vector<8x1xf32>
    %cst_338 = arith.constant 3.200000e+01 : f32
    %722 = vector.broadcast %cst_338 : f32 to vector<8x1xf32>
    %723 = arith.divf %721, %722 : vector<8x1xf32>
    %cst_339 = arith.constant 9.99999974E-6 : f32
    %724 = vector.broadcast %cst_339 : f32 to vector<8x1xf32>
    %725 = arith.addf %723, %724 : vector<8x1xf32>
    %726 = math.rsqrt %725 : vector<8x1xf32>
    %727 = vector.broadcast %726 : vector<8x1xf32> to vector<8x32xf32>
    %728 = arith.mulf %718, %727 : vector<8x32xf32>
    %c5 = arith.constant 5 : index
    %c0_340 = arith.constant 0 : index
    %c0_341 = arith.constant 0 : index
    %729 = vector.load %arg20[%c5, %c0_340, %c0_341] : memref<8x1x32xf32, #tpu.memory_space<vmem>>, vector<1x1x32xf32>
    %730 = vector.shape_cast %729 : vector<1x1x32xf32> to vector<1x32xf32>
    %731 = vector.broadcast %730 : vector<1x32xf32> to vector<8x32xf32>
    %732 = arith.mulf %728, %731 : vector<8x32xf32>
    %c5_342 = arith.constant 5 : index
    %c0_343 = arith.constant 0 : index
    %c0_344 = arith.constant 0 : index
    %733 = vector.load %arg21[%c5_342, %c0_343, %c0_344] : memref<8x32x256xf32, #tpu.memory_space<vmem>>, vector<1x32x256xf32>
    %734 = vector.shape_cast %733 : vector<1x32x256xf32> to vector<32x256xf32>
    %cst_345 = arith.constant dense<0.000000e+00> : vector<8x256xf32>
    %735 = tpu.matmul %732, %734, %cst_345 {dimension_numbers = #tpu.dot_dimension_numbers<[1], [0], [0], [1], [0, 0, 1, 1], [], []>} : vector<8x32xf32>, vector<32x256xf32>, vector<8x256xf32> -> vector<8x256xf32>
    %736 = vector.extract_strided_slice %735 {offsets = [0, 0], sizes = [8, 128], strides = [1, 1]} : vector<8x256xf32> to vector<8x128xf32>
    %737 = vector.extract_strided_slice %735 {offsets = [0, 128], sizes = [8, 64], strides = [1, 1]} : vector<8x256xf32> to vector<8x64xf32>
    %738 = vector.extract_strided_slice %735 {offsets = [0, 192], sizes = [8, 8], strides = [1, 1]} : vector<8x256xf32> to vector<8x8xf32>
    %c5_346 = arith.constant 5 : index
    %c0_347 = arith.constant 0 : index
    %c0_348 = arith.constant 0 : index
    %739 = vector.load %arg24[%c5_346, %c0_347, %c0_348] : memref<8x1x8xf32, #tpu.memory_space<vmem>>, vector<1x1x8xf32>
    %740 = vector.shape_cast %739 : vector<1x1x8xf32> to vector<1x8xf32>
    %741 = vector.broadcast %740 : vector<1x8xf32> to vector<8x8xf32>
    %742 = arith.addf %738, %741 : vector<8x8xf32>
    %cst_349 = arith.constant 2.000000e+01 : f32
    %743 = vector.broadcast %cst_349 : f32 to vector<8x8xf32>
    %744 = arith.cmpf ogt, %742, %743 : vector<8x8xf32>
    %cst_350 = arith.constant 2.000000e+01 : f32
    %745 = vector.broadcast %cst_350 : f32 to vector<8x8xf32>
    %746 = arith.minimumf %742, %745 : vector<8x8xf32>
    %747 = math.exp %746 : vector<8x8xf32>
    %cst_351 = arith.constant 1.000000e+00 : f32
    %748 = vector.broadcast %cst_351 : f32 to vector<8x8xf32>
    %749 = arith.addf %748, %747 : vector<8x8xf32>
    %750 = math.log %749 : vector<8x8xf32>
    %751 = arith.select %744, %742, %750 : vector<8x8xi1>, vector<8x8xf32>
    %c5_352 = arith.constant 5 : index
    %c0_353 = arith.constant 0 : index
    %c0_354 = arith.constant 0 : index
    %752 = vector.load %arg22[%c5_352, %c0_353, %c0_354] : memref<8x4x128xf32, #tpu.memory_space<vmem>>, vector<1x4x128xf32>
    %753 = vector.shape_cast %752 : vector<1x4x128xf32> to vector<4x128xf32>
    %cst_355 = arith.constant 0.000000e+00 : f32
    %754 = vector.broadcast %cst_355 : f32 to vector<8x128xf32>
    %c5_356 = arith.constant 5 : index
    %c0_357 = arith.constant 0 : index
    %c0_358 = arith.constant 0 : index
    %755 = vector.load %arg23[%c5_356, %c0_357, %c0_358] : memref<8x1x128xf32, #tpu.memory_space<vmem>>, vector<1x1x128xf32>
    %756 = vector.shape_cast %755 : vector<1x1x128xf32> to vector<1x128xf32>
    %757 = vector.broadcast %756 : vector<1x128xf32> to vector<8x128xf32>
    %758 = arith.addf %754, %757 : vector<8x128xf32>
    %759 = vector.extract_strided_slice %15 {offsets = [0, 0], sizes = [8, 8], strides = [1, 1]} : vector<32x8xf32> to vector<8x8xf32>
    %cst_359 = arith.constant dense<0.000000e+00> : vector<8x128xf32>
    %760 = tpu.matmul %759, %736, %cst_359 {dimension_numbers = #tpu.dot_dimension_numbers<[1], [0], [0], [1], [0, 0, 1, 1], [], []>} : vector<8x8xf32>, vector<8x128xf32>, vector<8x128xf32> -> vector<8x128xf32>
    %761 = vector.extract_strided_slice %753 {offsets = [0, 0], sizes = [1, 128], strides = [1, 1]} : vector<4x128xf32> to vector<1x128xf32>
    %762 = vector.broadcast %761 : vector<1x128xf32> to vector<8x128xf32>
    %763 = arith.mulf %760, %762 : vector<8x128xf32>
    %764 = arith.addf %758, %763 : vector<8x128xf32>
    %765 = vector.extract_strided_slice %15 {offsets = [8, 0], sizes = [8, 8], strides = [1, 1]} : vector<32x8xf32> to vector<8x8xf32>
    %cst_360 = arith.constant dense<0.000000e+00> : vector<8x128xf32>
    %766 = tpu.matmul %765, %736, %cst_360 {dimension_numbers = #tpu.dot_dimension_numbers<[1], [0], [0], [1], [0, 0, 1, 1], [], []>} : vector<8x8xf32>, vector<8x128xf32>, vector<8x128xf32> -> vector<8x128xf32>
    %767 = vector.extract_strided_slice %753 {offsets = [1, 0], sizes = [1, 128], strides = [1, 1]} : vector<4x128xf32> to vector<1x128xf32>
    %768 = vector.broadcast %767 : vector<1x128xf32> to vector<8x128xf32>
    %769 = arith.mulf %766, %768 : vector<8x128xf32>
    %770 = arith.addf %764, %769 : vector<8x128xf32>
    %771 = vector.extract_strided_slice %15 {offsets = [16, 0], sizes = [8, 8], strides = [1, 1]} : vector<32x8xf32> to vector<8x8xf32>
    %cst_361 = arith.constant dense<0.000000e+00> : vector<8x128xf32>
    %772 = tpu.matmul %771, %736, %cst_361 {dimension_numbers = #tpu.dot_dimension_numbers<[1], [0], [0], [1], [0, 0, 1, 1], [], []>} : vector<8x8xf32>, vector<8x128xf32>, vector<8x128xf32> -> vector<8x128xf32>
    %773 = vector.extract_strided_slice %753 {offsets = [2, 0], sizes = [1, 128], strides = [1, 1]} : vector<4x128xf32> to vector<1x128xf32>
    %774 = vector.broadcast %773 : vector<1x128xf32> to vector<8x128xf32>
    %775 = arith.mulf %772, %774 : vector<8x128xf32>
    %776 = arith.addf %770, %775 : vector<8x128xf32>
    %777 = vector.extract_strided_slice %15 {offsets = [24, 0], sizes = [8, 8], strides = [1, 1]} : vector<32x8xf32> to vector<8x8xf32>
    %cst_362 = arith.constant dense<0.000000e+00> : vector<8x128xf32>
    %778 = tpu.matmul %777, %736, %cst_362 {dimension_numbers = #tpu.dot_dimension_numbers<[1], [0], [0], [1], [0, 0, 1, 1], [], []>} : vector<8x8xf32>, vector<8x128xf32>, vector<8x128xf32> -> vector<8x128xf32>
    %779 = vector.extract_strided_slice %753 {offsets = [3, 0], sizes = [1, 128], strides = [1, 1]} : vector<4x128xf32> to vector<1x128xf32>
    %780 = vector.broadcast %779 : vector<1x128xf32> to vector<8x128xf32>
    %781 = arith.mulf %778, %780 : vector<8x128xf32>
    %782 = arith.addf %776, %781 : vector<8x128xf32>
    %cst_363 = arith.constant 0.000000e+00 : f32
    %783 = vector.broadcast %cst_363 : f32 to vector<8x128xf32>
    %784 = arith.subf %783, %782 : vector<8x128xf32>
    %785 = math.exp %784 : vector<8x128xf32>
    %cst_364 = arith.constant 1.000000e+00 : f32
    %786 = vector.broadcast %cst_364 : f32 to vector<8x128xf32>
    %787 = arith.addf %786, %785 : vector<8x128xf32>
    %cst_365 = arith.constant 1.000000e+00 : f32
    %788 = vector.broadcast %cst_365 : f32 to vector<8x128xf32>
    %789 = arith.divf %788, %787 : vector<8x128xf32>
    %790 = arith.mulf %782, %789 : vector<8x128xf32>
    %791 = vector.extract_strided_slice %790 {offsets = [0, 0], sizes = [8, 64], strides = [1, 1]} : vector<8x128xf32> to vector<8x64xf32>
    %792 = vector.extract_strided_slice %790 {offsets = [0, 64], sizes = [8, 32], strides = [1, 1]} : vector<8x128xf32> to vector<8x32xf32>
    %793 = vector.extract_strided_slice %790 {offsets = [0, 96], sizes = [8, 32], strides = [1, 1]} : vector<8x128xf32> to vector<8x32xf32>
    %c5_366 = arith.constant 5 : index
    %c0_367 = arith.constant 0 : index
    %c0_368 = arith.constant 0 : index
    %794 = vector.load %arg25[%c5_366, %c0_367, %c0_368] : memref<8x1x8xf32, #tpu.memory_space<vmem>>, vector<1x1x8xf32>
    %795 = vector.shape_cast %794 : vector<1x1x8xf32> to vector<1x8xf32>
    %796 = math.exp %795 : vector<1x8xf32>
    %cst_369 = arith.constant 0.000000e+00 : f32
    %797 = vector.broadcast %cst_369 : f32 to vector<1x8xf32>
    %798 = arith.subf %797, %796 : vector<1x8xf32>
    %799 = vector.broadcast %798 : vector<1x8xf32> to vector<8x8xf32>
    %800 = arith.mulf %799, %751 : vector<8x8xf32>
    %cst_370 = arith.constant dense<0.000000e+00> : vector<8x64xf32>
    %801 = tpu.matmul %800, %16, %cst_370 {dimension_numbers = #tpu.dot_dimension_numbers<[1], [0], [0], [1], [0, 0, 1, 1], [], []>} : vector<8x8xf32>, vector<8x64xf32>, vector<8x64xf32> -> vector<8x64xf32>
    %cst_371 = arith.constant dense<0.000000e+00> : vector<8x64xf32>
    %802 = tpu.matmul %14, %801, %cst_371 {dimension_numbers = #tpu.dot_dimension_numbers<[1], [0], [0], [1], [0, 0, 1, 1], [], []>} : vector<8x8xf32>, vector<8x64xf32>, vector<8x64xf32> -> vector<8x64xf32>
    %803 = arith.mulf %17, %801 : vector<8x64xf32>
    %cst_372 = arith.constant dense<0.000000e+00> : vector<64xf32>
    %804 = vector.multi_reduction <add>, %803, %cst_372 [0] : vector<8x64xf32> to vector<64xf32>
    %805 = vector.shape_cast %804 : vector<64xf32> to vector<1x64xf32>
    %cst_373 = arith.constant 5.000000e-01 : f32
    %806 = vector.broadcast %cst_373 : f32 to vector<8x64xf32>
    %807 = arith.cmpf ogt, %18, %806 : vector<8x64xf32>
    %808 = vector.broadcast %805 : vector<1x64xf32> to vector<8x64xf32>
    %809 = arith.subf %802, %808 : vector<8x64xf32>
    %cst_374 = arith.constant -1.000000e+30 : f32
    %810 = vector.broadcast %cst_374 : f32 to vector<8x64xf32>
    %811 = arith.select %807, %809, %810 : vector<8x64xi1>, vector<8x64xf32>
    %812 = math.exp %811 : vector<8x64xf32>
    %cst_375 = arith.constant dense<0.000000e+00> : vector<8x8xf32>
    %813 = tpu.matmul %793, %792, %cst_375 {dimension_numbers = #tpu.dot_dimension_numbers<[1], [1], [0], [0], [0, 0, 1, 0], [], []>} : vector<8x32xf32>, vector<8x32xf32>, vector<8x8xf32> -> vector<8x8xf32>
    %cst_376 = arith.constant dense<0.000000e+00> : vector<8x64xf32>
    %814 = tpu.matmul %813, %19, %cst_376 {dimension_numbers = #tpu.dot_dimension_numbers<[1], [0], [0], [1], [0, 0, 1, 1], [], []>} : vector<8x8xf32>, vector<8x64xf32>, vector<8x64xf32> -> vector<8x64xf32>
    %815 = arith.mulf %814, %812 : vector<8x64xf32>
    %cst_377 = arith.constant dense<0.000000e+00> : vector<8x64xf32>
    %816 = tpu.matmul %751, %22, %cst_377 {dimension_numbers = #tpu.dot_dimension_numbers<[1], [0], [0], [1], [0, 0, 1, 1], [], []>} : vector<8x8xf32>, vector<8x64xf32>, vector<8x64xf32> -> vector<8x64xf32>
    %c5_378 = arith.constant 5 : index
    %c0_379 = arith.constant 0 : index
    %c0_380 = arith.constant 0 : index
    %817 = vector.load %arg26[%c5_378, %c0_379, %c0_380] : memref<8x1x8xf32, #tpu.memory_space<vmem>>, vector<1x1x8xf32>
    %818 = vector.shape_cast %817 : vector<1x1x8xf32> to vector<1x8xf32>
    %cst_381 = arith.constant dense<0.000000e+00> : vector<1x64xf32>
    %819 = tpu.matmul %818, %22, %cst_381 {dimension_numbers = #tpu.dot_dimension_numbers<[1], [0], [0], [1], [0, 0, 1, 1], [], []>} : vector<1x8xf32>, vector<8x64xf32>, vector<1x64xf32> -> vector<1x64xf32>
    %820 = arith.mulf %791, %816 : vector<8x64xf32>
    %cst_382 = arith.constant dense<0.000000e+00> : vector<64x64xf32>
    %821 = tpu.matmul %20, %820, %cst_382 {dimension_numbers = #tpu.dot_dimension_numbers<[1], [0], [0], [1], [0, 0, 1, 1], [], []>} : vector<64x8xf32>, vector<8x64xf32>, vector<64x64xf32> -> vector<64x64xf32>
    %822 = arith.mulf %821, %21 : vector<64x64xf32>
    %cst_383 = arith.constant dense<0.000000e+00> : vector<8x64xf32>
    %823 = tpu.matmul %815, %822, %cst_383 {dimension_numbers = #tpu.dot_dimension_numbers<[1], [0], [0], [1], [0, 0, 1, 1], [], []>} : vector<8x64xf32>, vector<64x64xf32>, vector<8x64xf32> -> vector<8x64xf32>
    %824 = vector.broadcast %819 : vector<1x64xf32> to vector<8x64xf32>
    %825 = arith.mulf %791, %824 : vector<8x64xf32>
    %826 = arith.addf %823, %825 : vector<8x64xf32>
    %cst_384 = arith.constant 0.000000e+00 : f32
    %827 = vector.broadcast %cst_384 : f32 to vector<8x64xf32>
    %828 = arith.subf %827, %737 : vector<8x64xf32>
    %829 = math.exp %828 : vector<8x64xf32>
    %cst_385 = arith.constant 1.000000e+00 : f32
    %830 = vector.broadcast %cst_385 : f32 to vector<8x64xf32>
    %831 = arith.addf %830, %829 : vector<8x64xf32>
    %cst_386 = arith.constant 1.000000e+00 : f32
    %832 = vector.broadcast %cst_386 : f32 to vector<8x64xf32>
    %833 = arith.divf %832, %831 : vector<8x64xf32>
    %834 = arith.mulf %737, %833 : vector<8x64xf32>
    %835 = arith.mulf %826, %834 : vector<8x64xf32>
    %836 = arith.mulf %835, %835 : vector<8x64xf32>
    %cst_387 = arith.constant dense<0.000000e+00> : vector<8xf32>
    %837 = vector.multi_reduction <add>, %836, %cst_387 [1] : vector<8x64xf32> to vector<8xf32>
    %838 = vector.shape_cast %837 : vector<8xf32> to vector<8x1xf32>
    %cst_388 = arith.constant 6.400000e+01 : f32
    %839 = vector.broadcast %cst_388 : f32 to vector<8x1xf32>
    %840 = arith.divf %838, %839 : vector<8x1xf32>
    %cst_389 = arith.constant 9.99999974E-6 : f32
    %841 = vector.broadcast %cst_389 : f32 to vector<8x1xf32>
    %842 = arith.addf %840, %841 : vector<8x1xf32>
    %843 = math.rsqrt %842 : vector<8x1xf32>
    %844 = vector.broadcast %843 : vector<8x1xf32> to vector<8x64xf32>
    %845 = arith.mulf %835, %844 : vector<8x64xf32>
    %c5_390 = arith.constant 5 : index
    %c0_391 = arith.constant 0 : index
    %c0_392 = arith.constant 0 : index
    %846 = vector.load %arg27[%c5_390, %c0_391, %c0_392] : memref<8x1x64xf32, #tpu.memory_space<vmem>>, vector<1x1x64xf32>
    %847 = vector.shape_cast %846 : vector<1x1x64xf32> to vector<1x64xf32>
    %848 = vector.broadcast %847 : vector<1x64xf32> to vector<8x64xf32>
    %849 = arith.mulf %845, %848 : vector<8x64xf32>
    %c5_393 = arith.constant 5 : index
    %c0_394 = arith.constant 0 : index
    %c0_395 = arith.constant 0 : index
    %850 = vector.load %arg28[%c5_393, %c0_394, %c0_395] : memref<8x64x32xf32, #tpu.memory_space<vmem>>, vector<1x64x32xf32>
    %851 = vector.shape_cast %850 : vector<1x64x32xf32> to vector<64x32xf32>
    %cst_396 = arith.constant dense<0.000000e+00> : vector<8x32xf32>
    %852 = tpu.matmul %849, %851, %cst_396 {dimension_numbers = #tpu.dot_dimension_numbers<[1], [0], [0], [1], [0, 0, 1, 1], [], []>} : vector<8x64xf32>, vector<64x32xf32>, vector<8x32xf32> -> vector<8x32xf32>
    %853 = arith.addf %718, %852 : vector<8x32xf32>
    %854 = arith.mulf %853, %853 : vector<8x32xf32>
    %cst_397 = arith.constant dense<0.000000e+00> : vector<8xf32>
    %855 = vector.multi_reduction <add>, %854, %cst_397 [1] : vector<8x32xf32> to vector<8xf32>
    %856 = vector.shape_cast %855 : vector<8xf32> to vector<8x1xf32>
    %cst_398 = arith.constant 3.200000e+01 : f32
    %857 = vector.broadcast %cst_398 : f32 to vector<8x1xf32>
    %858 = arith.divf %856, %857 : vector<8x1xf32>
    %cst_399 = arith.constant 9.99999974E-6 : f32
    %859 = vector.broadcast %cst_399 : f32 to vector<8x1xf32>
    %860 = arith.addf %858, %859 : vector<8x1xf32>
    %861 = math.rsqrt %860 : vector<8x1xf32>
    %862 = vector.broadcast %861 : vector<8x1xf32> to vector<8x32xf32>
    %863 = arith.mulf %853, %862 : vector<8x32xf32>
    %c6 = arith.constant 6 : index
    %c0_400 = arith.constant 0 : index
    %c0_401 = arith.constant 0 : index
    %864 = vector.load %arg20[%c6, %c0_400, %c0_401] : memref<8x1x32xf32, #tpu.memory_space<vmem>>, vector<1x1x32xf32>
    %865 = vector.shape_cast %864 : vector<1x1x32xf32> to vector<1x32xf32>
    %866 = vector.broadcast %865 : vector<1x32xf32> to vector<8x32xf32>
    %867 = arith.mulf %863, %866 : vector<8x32xf32>
    %c6_402 = arith.constant 6 : index
    %c0_403 = arith.constant 0 : index
    %c0_404 = arith.constant 0 : index
    %868 = vector.load %arg21[%c6_402, %c0_403, %c0_404] : memref<8x32x256xf32, #tpu.memory_space<vmem>>, vector<1x32x256xf32>
    %869 = vector.shape_cast %868 : vector<1x32x256xf32> to vector<32x256xf32>
    %cst_405 = arith.constant dense<0.000000e+00> : vector<8x256xf32>
    %870 = tpu.matmul %867, %869, %cst_405 {dimension_numbers = #tpu.dot_dimension_numbers<[1], [0], [0], [1], [0, 0, 1, 1], [], []>} : vector<8x32xf32>, vector<32x256xf32>, vector<8x256xf32> -> vector<8x256xf32>
    %871 = vector.extract_strided_slice %870 {offsets = [0, 0], sizes = [8, 128], strides = [1, 1]} : vector<8x256xf32> to vector<8x128xf32>
    %872 = vector.extract_strided_slice %870 {offsets = [0, 128], sizes = [8, 64], strides = [1, 1]} : vector<8x256xf32> to vector<8x64xf32>
    %873 = vector.extract_strided_slice %870 {offsets = [0, 192], sizes = [8, 8], strides = [1, 1]} : vector<8x256xf32> to vector<8x8xf32>
    %c6_406 = arith.constant 6 : index
    %c0_407 = arith.constant 0 : index
    %c0_408 = arith.constant 0 : index
    %874 = vector.load %arg24[%c6_406, %c0_407, %c0_408] : memref<8x1x8xf32, #tpu.memory_space<vmem>>, vector<1x1x8xf32>
    %875 = vector.shape_cast %874 : vector<1x1x8xf32> to vector<1x8xf32>
    %876 = vector.broadcast %875 : vector<1x8xf32> to vector<8x8xf32>
    %877 = arith.addf %873, %876 : vector<8x8xf32>
    %cst_409 = arith.constant 2.000000e+01 : f32
    %878 = vector.broadcast %cst_409 : f32 to vector<8x8xf32>
    %879 = arith.cmpf ogt, %877, %878 : vector<8x8xf32>
    %cst_410 = arith.constant 2.000000e+01 : f32
    %880 = vector.broadcast %cst_410 : f32 to vector<8x8xf32>
    %881 = arith.minimumf %877, %880 : vector<8x8xf32>
    %882 = math.exp %881 : vector<8x8xf32>
    %cst_411 = arith.constant 1.000000e+00 : f32
    %883 = vector.broadcast %cst_411 : f32 to vector<8x8xf32>
    %884 = arith.addf %883, %882 : vector<8x8xf32>
    %885 = math.log %884 : vector<8x8xf32>
    %886 = arith.select %879, %877, %885 : vector<8x8xi1>, vector<8x8xf32>
    %c6_412 = arith.constant 6 : index
    %c0_413 = arith.constant 0 : index
    %c0_414 = arith.constant 0 : index
    %887 = vector.load %arg22[%c6_412, %c0_413, %c0_414] : memref<8x4x128xf32, #tpu.memory_space<vmem>>, vector<1x4x128xf32>
    %888 = vector.shape_cast %887 : vector<1x4x128xf32> to vector<4x128xf32>
    %cst_415 = arith.constant 0.000000e+00 : f32
    %889 = vector.broadcast %cst_415 : f32 to vector<8x128xf32>
    %c6_416 = arith.constant 6 : index
    %c0_417 = arith.constant 0 : index
    %c0_418 = arith.constant 0 : index
    %890 = vector.load %arg23[%c6_416, %c0_417, %c0_418] : memref<8x1x128xf32, #tpu.memory_space<vmem>>, vector<1x1x128xf32>
    %891 = vector.shape_cast %890 : vector<1x1x128xf32> to vector<1x128xf32>
    %892 = vector.broadcast %891 : vector<1x128xf32> to vector<8x128xf32>
    %893 = arith.addf %889, %892 : vector<8x128xf32>
    %894 = vector.extract_strided_slice %15 {offsets = [0, 0], sizes = [8, 8], strides = [1, 1]} : vector<32x8xf32> to vector<8x8xf32>
    %cst_419 = arith.constant dense<0.000000e+00> : vector<8x128xf32>
    %895 = tpu.matmul %894, %871, %cst_419 {dimension_numbers = #tpu.dot_dimension_numbers<[1], [0], [0], [1], [0, 0, 1, 1], [], []>} : vector<8x8xf32>, vector<8x128xf32>, vector<8x128xf32> -> vector<8x128xf32>
    %896 = vector.extract_strided_slice %888 {offsets = [0, 0], sizes = [1, 128], strides = [1, 1]} : vector<4x128xf32> to vector<1x128xf32>
    %897 = vector.broadcast %896 : vector<1x128xf32> to vector<8x128xf32>
    %898 = arith.mulf %895, %897 : vector<8x128xf32>
    %899 = arith.addf %893, %898 : vector<8x128xf32>
    %900 = vector.extract_strided_slice %15 {offsets = [8, 0], sizes = [8, 8], strides = [1, 1]} : vector<32x8xf32> to vector<8x8xf32>
    %cst_420 = arith.constant dense<0.000000e+00> : vector<8x128xf32>
    %901 = tpu.matmul %900, %871, %cst_420 {dimension_numbers = #tpu.dot_dimension_numbers<[1], [0], [0], [1], [0, 0, 1, 1], [], []>} : vector<8x8xf32>, vector<8x128xf32>, vector<8x128xf32> -> vector<8x128xf32>
    %902 = vector.extract_strided_slice %888 {offsets = [1, 0], sizes = [1, 128], strides = [1, 1]} : vector<4x128xf32> to vector<1x128xf32>
    %903 = vector.broadcast %902 : vector<1x128xf32> to vector<8x128xf32>
    %904 = arith.mulf %901, %903 : vector<8x128xf32>
    %905 = arith.addf %899, %904 : vector<8x128xf32>
    %906 = vector.extract_strided_slice %15 {offsets = [16, 0], sizes = [8, 8], strides = [1, 1]} : vector<32x8xf32> to vector<8x8xf32>
    %cst_421 = arith.constant dense<0.000000e+00> : vector<8x128xf32>
    %907 = tpu.matmul %906, %871, %cst_421 {dimension_numbers = #tpu.dot_dimension_numbers<[1], [0], [0], [1], [0, 0, 1, 1], [], []>} : vector<8x8xf32>, vector<8x128xf32>, vector<8x128xf32> -> vector<8x128xf32>
    %908 = vector.extract_strided_slice %888 {offsets = [2, 0], sizes = [1, 128], strides = [1, 1]} : vector<4x128xf32> to vector<1x128xf32>
    %909 = vector.broadcast %908 : vector<1x128xf32> to vector<8x128xf32>
    %910 = arith.mulf %907, %909 : vector<8x128xf32>
    %911 = arith.addf %905, %910 : vector<8x128xf32>
    %912 = vector.extract_strided_slice %15 {offsets = [24, 0], sizes = [8, 8], strides = [1, 1]} : vector<32x8xf32> to vector<8x8xf32>
    %cst_422 = arith.constant dense<0.000000e+00> : vector<8x128xf32>
    %913 = tpu.matmul %912, %871, %cst_422 {dimension_numbers = #tpu.dot_dimension_numbers<[1], [0], [0], [1], [0, 0, 1, 1], [], []>} : vector<8x8xf32>, vector<8x128xf32>, vector<8x128xf32> -> vector<8x128xf32>
    %914 = vector.extract_strided_slice %888 {offsets = [3, 0], sizes = [1, 128], strides = [1, 1]} : vector<4x128xf32> to vector<1x128xf32>
    %915 = vector.broadcast %914 : vector<1x128xf32> to vector<8x128xf32>
    %916 = arith.mulf %913, %915 : vector<8x128xf32>
    %917 = arith.addf %911, %916 : vector<8x128xf32>
    %cst_423 = arith.constant 0.000000e+00 : f32
    %918 = vector.broadcast %cst_423 : f32 to vector<8x128xf32>
    %919 = arith.subf %918, %917 : vector<8x128xf32>
    %920 = math.exp %919 : vector<8x128xf32>
    %cst_424 = arith.constant 1.000000e+00 : f32
    %921 = vector.broadcast %cst_424 : f32 to vector<8x128xf32>
    %922 = arith.addf %921, %920 : vector<8x128xf32>
    %cst_425 = arith.constant 1.000000e+00 : f32
    %923 = vector.broadcast %cst_425 : f32 to vector<8x128xf32>
    %924 = arith.divf %923, %922 : vector<8x128xf32>
    %925 = arith.mulf %917, %924 : vector<8x128xf32>
    %926 = vector.extract_strided_slice %925 {offsets = [0, 0], sizes = [8, 64], strides = [1, 1]} : vector<8x128xf32> to vector<8x64xf32>
    %927 = vector.extract_strided_slice %925 {offsets = [0, 64], sizes = [8, 32], strides = [1, 1]} : vector<8x128xf32> to vector<8x32xf32>
    %928 = vector.extract_strided_slice %925 {offsets = [0, 96], sizes = [8, 32], strides = [1, 1]} : vector<8x128xf32> to vector<8x32xf32>
    %c6_426 = arith.constant 6 : index
    %c0_427 = arith.constant 0 : index
    %c0_428 = arith.constant 0 : index
    %929 = vector.load %arg25[%c6_426, %c0_427, %c0_428] : memref<8x1x8xf32, #tpu.memory_space<vmem>>, vector<1x1x8xf32>
    %930 = vector.shape_cast %929 : vector<1x1x8xf32> to vector<1x8xf32>
    %931 = math.exp %930 : vector<1x8xf32>
    %cst_429 = arith.constant 0.000000e+00 : f32
    %932 = vector.broadcast %cst_429 : f32 to vector<1x8xf32>
    %933 = arith.subf %932, %931 : vector<1x8xf32>
    %934 = vector.broadcast %933 : vector<1x8xf32> to vector<8x8xf32>
    %935 = arith.mulf %934, %886 : vector<8x8xf32>
    %cst_430 = arith.constant dense<0.000000e+00> : vector<8x64xf32>
    %936 = tpu.matmul %935, %16, %cst_430 {dimension_numbers = #tpu.dot_dimension_numbers<[1], [0], [0], [1], [0, 0, 1, 1], [], []>} : vector<8x8xf32>, vector<8x64xf32>, vector<8x64xf32> -> vector<8x64xf32>
    %cst_431 = arith.constant dense<0.000000e+00> : vector<8x64xf32>
    %937 = tpu.matmul %14, %936, %cst_431 {dimension_numbers = #tpu.dot_dimension_numbers<[1], [0], [0], [1], [0, 0, 1, 1], [], []>} : vector<8x8xf32>, vector<8x64xf32>, vector<8x64xf32> -> vector<8x64xf32>
    %938 = arith.mulf %17, %936 : vector<8x64xf32>
    %cst_432 = arith.constant dense<0.000000e+00> : vector<64xf32>
    %939 = vector.multi_reduction <add>, %938, %cst_432 [0] : vector<8x64xf32> to vector<64xf32>
    %940 = vector.shape_cast %939 : vector<64xf32> to vector<1x64xf32>
    %cst_433 = arith.constant 5.000000e-01 : f32
    %941 = vector.broadcast %cst_433 : f32 to vector<8x64xf32>
    %942 = arith.cmpf ogt, %18, %941 : vector<8x64xf32>
    %943 = vector.broadcast %940 : vector<1x64xf32> to vector<8x64xf32>
    %944 = arith.subf %937, %943 : vector<8x64xf32>
    %cst_434 = arith.constant -1.000000e+30 : f32
    %945 = vector.broadcast %cst_434 : f32 to vector<8x64xf32>
    %946 = arith.select %942, %944, %945 : vector<8x64xi1>, vector<8x64xf32>
    %947 = math.exp %946 : vector<8x64xf32>
    %cst_435 = arith.constant dense<0.000000e+00> : vector<8x8xf32>
    %948 = tpu.matmul %928, %927, %cst_435 {dimension_numbers = #tpu.dot_dimension_numbers<[1], [1], [0], [0], [0, 0, 1, 0], [], []>} : vector<8x32xf32>, vector<8x32xf32>, vector<8x8xf32> -> vector<8x8xf32>
    %cst_436 = arith.constant dense<0.000000e+00> : vector<8x64xf32>
    %949 = tpu.matmul %948, %19, %cst_436 {dimension_numbers = #tpu.dot_dimension_numbers<[1], [0], [0], [1], [0, 0, 1, 1], [], []>} : vector<8x8xf32>, vector<8x64xf32>, vector<8x64xf32> -> vector<8x64xf32>
    %950 = arith.mulf %949, %947 : vector<8x64xf32>
    %cst_437 = arith.constant dense<0.000000e+00> : vector<8x64xf32>
    %951 = tpu.matmul %886, %22, %cst_437 {dimension_numbers = #tpu.dot_dimension_numbers<[1], [0], [0], [1], [0, 0, 1, 1], [], []>} : vector<8x8xf32>, vector<8x64xf32>, vector<8x64xf32> -> vector<8x64xf32>
    %c6_438 = arith.constant 6 : index
    %c0_439 = arith.constant 0 : index
    %c0_440 = arith.constant 0 : index
    %952 = vector.load %arg26[%c6_438, %c0_439, %c0_440] : memref<8x1x8xf32, #tpu.memory_space<vmem>>, vector<1x1x8xf32>
    %953 = vector.shape_cast %952 : vector<1x1x8xf32> to vector<1x8xf32>
    %cst_441 = arith.constant dense<0.000000e+00> : vector<1x64xf32>
    %954 = tpu.matmul %953, %22, %cst_441 {dimension_numbers = #tpu.dot_dimension_numbers<[1], [0], [0], [1], [0, 0, 1, 1], [], []>} : vector<1x8xf32>, vector<8x64xf32>, vector<1x64xf32> -> vector<1x64xf32>
    %955 = arith.mulf %926, %951 : vector<8x64xf32>
    %cst_442 = arith.constant dense<0.000000e+00> : vector<64x64xf32>
    %956 = tpu.matmul %20, %955, %cst_442 {dimension_numbers = #tpu.dot_dimension_numbers<[1], [0], [0], [1], [0, 0, 1, 1], [], []>} : vector<64x8xf32>, vector<8x64xf32>, vector<64x64xf32> -> vector<64x64xf32>
    %957 = arith.mulf %956, %21 : vector<64x64xf32>
    %cst_443 = arith.constant dense<0.000000e+00> : vector<8x64xf32>
    %958 = tpu.matmul %950, %957, %cst_443 {dimension_numbers = #tpu.dot_dimension_numbers<[1], [0], [0], [1], [0, 0, 1, 1], [], []>} : vector<8x64xf32>, vector<64x64xf32>, vector<8x64xf32> -> vector<8x64xf32>
    %959 = vector.broadcast %954 : vector<1x64xf32> to vector<8x64xf32>
    %960 = arith.mulf %926, %959 : vector<8x64xf32>
    %961 = arith.addf %958, %960 : vector<8x64xf32>
    %cst_444 = arith.constant 0.000000e+00 : f32
    %962 = vector.broadcast %cst_444 : f32 to vector<8x64xf32>
    %963 = arith.subf %962, %872 : vector<8x64xf32>
    %964 = math.exp %963 : vector<8x64xf32>
    %cst_445 = arith.constant 1.000000e+00 : f32
    %965 = vector.broadcast %cst_445 : f32 to vector<8x64xf32>
    %966 = arith.addf %965, %964 : vector<8x64xf32>
    %cst_446 = arith.constant 1.000000e+00 : f32
    %967 = vector.broadcast %cst_446 : f32 to vector<8x64xf32>
    %968 = arith.divf %967, %966 : vector<8x64xf32>
    %969 = arith.mulf %872, %968 : vector<8x64xf32>
    %970 = arith.mulf %961, %969 : vector<8x64xf32>
    %971 = arith.mulf %970, %970 : vector<8x64xf32>
    %cst_447 = arith.constant dense<0.000000e+00> : vector<8xf32>
    %972 = vector.multi_reduction <add>, %971, %cst_447 [1] : vector<8x64xf32> to vector<8xf32>
    %973 = vector.shape_cast %972 : vector<8xf32> to vector<8x1xf32>
    %cst_448 = arith.constant 6.400000e+01 : f32
    %974 = vector.broadcast %cst_448 : f32 to vector<8x1xf32>
    %975 = arith.divf %973, %974 : vector<8x1xf32>
    %cst_449 = arith.constant 9.99999974E-6 : f32
    %976 = vector.broadcast %cst_449 : f32 to vector<8x1xf32>
    %977 = arith.addf %975, %976 : vector<8x1xf32>
    %978 = math.rsqrt %977 : vector<8x1xf32>
    %979 = vector.broadcast %978 : vector<8x1xf32> to vector<8x64xf32>
    %980 = arith.mulf %970, %979 : vector<8x64xf32>
    %c6_450 = arith.constant 6 : index
    %c0_451 = arith.constant 0 : index
    %c0_452 = arith.constant 0 : index
    %981 = vector.load %arg27[%c6_450, %c0_451, %c0_452] : memref<8x1x64xf32, #tpu.memory_space<vmem>>, vector<1x1x64xf32>
    %982 = vector.shape_cast %981 : vector<1x1x64xf32> to vector<1x64xf32>
    %983 = vector.broadcast %982 : vector<1x64xf32> to vector<8x64xf32>
    %984 = arith.mulf %980, %983 : vector<8x64xf32>
    %c6_453 = arith.constant 6 : index
    %c0_454 = arith.constant 0 : index
    %c0_455 = arith.constant 0 : index
    %985 = vector.load %arg28[%c6_453, %c0_454, %c0_455] : memref<8x64x32xf32, #tpu.memory_space<vmem>>, vector<1x64x32xf32>
    %986 = vector.shape_cast %985 : vector<1x64x32xf32> to vector<64x32xf32>
    %cst_456 = arith.constant dense<0.000000e+00> : vector<8x32xf32>
    %987 = tpu.matmul %984, %986, %cst_456 {dimension_numbers = #tpu.dot_dimension_numbers<[1], [0], [0], [1], [0, 0, 1, 1], [], []>} : vector<8x64xf32>, vector<64x32xf32>, vector<8x32xf32> -> vector<8x32xf32>
    %988 = arith.addf %853, %987 : vector<8x32xf32>
    %989 = arith.mulf %988, %988 : vector<8x32xf32>
    %cst_457 = arith.constant dense<0.000000e+00> : vector<8xf32>
    %990 = vector.multi_reduction <add>, %989, %cst_457 [1] : vector<8x32xf32> to vector<8xf32>
    %991 = vector.shape_cast %990 : vector<8xf32> to vector<8x1xf32>
    %cst_458 = arith.constant 3.200000e+01 : f32
    %992 = vector.broadcast %cst_458 : f32 to vector<8x1xf32>
    %993 = arith.divf %991, %992 : vector<8x1xf32>
    %cst_459 = arith.constant 9.99999974E-6 : f32
    %994 = vector.broadcast %cst_459 : f32 to vector<8x1xf32>
    %995 = arith.addf %993, %994 : vector<8x1xf32>
    %996 = math.rsqrt %995 : vector<8x1xf32>
    %997 = vector.broadcast %996 : vector<8x1xf32> to vector<8x32xf32>
    %998 = arith.mulf %988, %997 : vector<8x32xf32>
    %c7 = arith.constant 7 : index
    %c0_460 = arith.constant 0 : index
    %c0_461 = arith.constant 0 : index
    %999 = vector.load %arg20[%c7, %c0_460, %c0_461] : memref<8x1x32xf32, #tpu.memory_space<vmem>>, vector<1x1x32xf32>
    %1000 = vector.shape_cast %999 : vector<1x1x32xf32> to vector<1x32xf32>
    %1001 = vector.broadcast %1000 : vector<1x32xf32> to vector<8x32xf32>
    %1002 = arith.mulf %998, %1001 : vector<8x32xf32>
    %c7_462 = arith.constant 7 : index
    %c0_463 = arith.constant 0 : index
    %c0_464 = arith.constant 0 : index
    %1003 = vector.load %arg21[%c7_462, %c0_463, %c0_464] : memref<8x32x256xf32, #tpu.memory_space<vmem>>, vector<1x32x256xf32>
    %1004 = vector.shape_cast %1003 : vector<1x32x256xf32> to vector<32x256xf32>
    %cst_465 = arith.constant dense<0.000000e+00> : vector<8x256xf32>
    %1005 = tpu.matmul %1002, %1004, %cst_465 {dimension_numbers = #tpu.dot_dimension_numbers<[1], [0], [0], [1], [0, 0, 1, 1], [], []>} : vector<8x32xf32>, vector<32x256xf32>, vector<8x256xf32> -> vector<8x256xf32>
    %1006 = vector.extract_strided_slice %1005 {offsets = [0, 0], sizes = [8, 128], strides = [1, 1]} : vector<8x256xf32> to vector<8x128xf32>
    %1007 = vector.extract_strided_slice %1005 {offsets = [0, 128], sizes = [8, 64], strides = [1, 1]} : vector<8x256xf32> to vector<8x64xf32>
    %1008 = vector.extract_strided_slice %1005 {offsets = [0, 192], sizes = [8, 8], strides = [1, 1]} : vector<8x256xf32> to vector<8x8xf32>
    %c7_466 = arith.constant 7 : index
    %c0_467 = arith.constant 0 : index
    %c0_468 = arith.constant 0 : index
    %1009 = vector.load %arg24[%c7_466, %c0_467, %c0_468] : memref<8x1x8xf32, #tpu.memory_space<vmem>>, vector<1x1x8xf32>
    %1010 = vector.shape_cast %1009 : vector<1x1x8xf32> to vector<1x8xf32>
    %1011 = vector.broadcast %1010 : vector<1x8xf32> to vector<8x8xf32>
    %1012 = arith.addf %1008, %1011 : vector<8x8xf32>
    %cst_469 = arith.constant 2.000000e+01 : f32
    %1013 = vector.broadcast %cst_469 : f32 to vector<8x8xf32>
    %1014 = arith.cmpf ogt, %1012, %1013 : vector<8x8xf32>
    %cst_470 = arith.constant 2.000000e+01 : f32
    %1015 = vector.broadcast %cst_470 : f32 to vector<8x8xf32>
    %1016 = arith.minimumf %1012, %1015 : vector<8x8xf32>
    %1017 = math.exp %1016 : vector<8x8xf32>
    %cst_471 = arith.constant 1.000000e+00 : f32
    %1018 = vector.broadcast %cst_471 : f32 to vector<8x8xf32>
    %1019 = arith.addf %1018, %1017 : vector<8x8xf32>
    %1020 = math.log %1019 : vector<8x8xf32>
    %1021 = arith.select %1014, %1012, %1020 : vector<8x8xi1>, vector<8x8xf32>
    %c7_472 = arith.constant 7 : index
    %c0_473 = arith.constant 0 : index
    %c0_474 = arith.constant 0 : index
    %1022 = vector.load %arg22[%c7_472, %c0_473, %c0_474] : memref<8x4x128xf32, #tpu.memory_space<vmem>>, vector<1x4x128xf32>
    %1023 = vector.shape_cast %1022 : vector<1x4x128xf32> to vector<4x128xf32>
    %cst_475 = arith.constant 0.000000e+00 : f32
    %1024 = vector.broadcast %cst_475 : f32 to vector<8x128xf32>
    %c7_476 = arith.constant 7 : index
    %c0_477 = arith.constant 0 : index
    %c0_478 = arith.constant 0 : index
    %1025 = vector.load %arg23[%c7_476, %c0_477, %c0_478] : memref<8x1x128xf32, #tpu.memory_space<vmem>>, vector<1x1x128xf32>
    %1026 = vector.shape_cast %1025 : vector<1x1x128xf32> to vector<1x128xf32>
    %1027 = vector.broadcast %1026 : vector<1x128xf32> to vector<8x128xf32>
    %1028 = arith.addf %1024, %1027 : vector<8x128xf32>
    %1029 = vector.extract_strided_slice %15 {offsets = [0, 0], sizes = [8, 8], strides = [1, 1]} : vector<32x8xf32> to vector<8x8xf32>
    %cst_479 = arith.constant dense<0.000000e+00> : vector<8x128xf32>
    %1030 = tpu.matmul %1029, %1006, %cst_479 {dimension_numbers = #tpu.dot_dimension_numbers<[1], [0], [0], [1], [0, 0, 1, 1], [], []>} : vector<8x8xf32>, vector<8x128xf32>, vector<8x128xf32> -> vector<8x128xf32>
    %1031 = vector.extract_strided_slice %1023 {offsets = [0, 0], sizes = [1, 128], strides = [1, 1]} : vector<4x128xf32> to vector<1x128xf32>
    %1032 = vector.broadcast %1031 : vector<1x128xf32> to vector<8x128xf32>
    %1033 = arith.mulf %1030, %1032 : vector<8x128xf32>
    %1034 = arith.addf %1028, %1033 : vector<8x128xf32>
    %1035 = vector.extract_strided_slice %15 {offsets = [8, 0], sizes = [8, 8], strides = [1, 1]} : vector<32x8xf32> to vector<8x8xf32>
    %cst_480 = arith.constant dense<0.000000e+00> : vector<8x128xf32>
    %1036 = tpu.matmul %1035, %1006, %cst_480 {dimension_numbers = #tpu.dot_dimension_numbers<[1], [0], [0], [1], [0, 0, 1, 1], [], []>} : vector<8x8xf32>, vector<8x128xf32>, vector<8x128xf32> -> vector<8x128xf32>
    %1037 = vector.extract_strided_slice %1023 {offsets = [1, 0], sizes = [1, 128], strides = [1, 1]} : vector<4x128xf32> to vector<1x128xf32>
    %1038 = vector.broadcast %1037 : vector<1x128xf32> to vector<8x128xf32>
    %1039 = arith.mulf %1036, %1038 : vector<8x128xf32>
    %1040 = arith.addf %1034, %1039 : vector<8x128xf32>
    %1041 = vector.extract_strided_slice %15 {offsets = [16, 0], sizes = [8, 8], strides = [1, 1]} : vector<32x8xf32> to vector<8x8xf32>
    %cst_481 = arith.constant dense<0.000000e+00> : vector<8x128xf32>
    %1042 = tpu.matmul %1041, %1006, %cst_481 {dimension_numbers = #tpu.dot_dimension_numbers<[1], [0], [0], [1], [0, 0, 1, 1], [], []>} : vector<8x8xf32>, vector<8x128xf32>, vector<8x128xf32> -> vector<8x128xf32>
    %1043 = vector.extract_strided_slice %1023 {offsets = [2, 0], sizes = [1, 128], strides = [1, 1]} : vector<4x128xf32> to vector<1x128xf32>
    %1044 = vector.broadcast %1043 : vector<1x128xf32> to vector<8x128xf32>
    %1045 = arith.mulf %1042, %1044 : vector<8x128xf32>
    %1046 = arith.addf %1040, %1045 : vector<8x128xf32>
    %1047 = vector.extract_strided_slice %15 {offsets = [24, 0], sizes = [8, 8], strides = [1, 1]} : vector<32x8xf32> to vector<8x8xf32>
    %cst_482 = arith.constant dense<0.000000e+00> : vector<8x128xf32>
    %1048 = tpu.matmul %1047, %1006, %cst_482 {dimension_numbers = #tpu.dot_dimension_numbers<[1], [0], [0], [1], [0, 0, 1, 1], [], []>} : vector<8x8xf32>, vector<8x128xf32>, vector<8x128xf32> -> vector<8x128xf32>
    %1049 = vector.extract_strided_slice %1023 {offsets = [3, 0], sizes = [1, 128], strides = [1, 1]} : vector<4x128xf32> to vector<1x128xf32>
    %1050 = vector.broadcast %1049 : vector<1x128xf32> to vector<8x128xf32>
    %1051 = arith.mulf %1048, %1050 : vector<8x128xf32>
    %1052 = arith.addf %1046, %1051 : vector<8x128xf32>
    %cst_483 = arith.constant 0.000000e+00 : f32
    %1053 = vector.broadcast %cst_483 : f32 to vector<8x128xf32>
    %1054 = arith.subf %1053, %1052 : vector<8x128xf32>
    %1055 = math.exp %1054 : vector<8x128xf32>
    %cst_484 = arith.constant 1.000000e+00 : f32
    %1056 = vector.broadcast %cst_484 : f32 to vector<8x128xf32>
    %1057 = arith.addf %1056, %1055 : vector<8x128xf32>
    %cst_485 = arith.constant 1.000000e+00 : f32
    %1058 = vector.broadcast %cst_485 : f32 to vector<8x128xf32>
    %1059 = arith.divf %1058, %1057 : vector<8x128xf32>
    %1060 = arith.mulf %1052, %1059 : vector<8x128xf32>
    %1061 = vector.extract_strided_slice %1060 {offsets = [0, 0], sizes = [8, 64], strides = [1, 1]} : vector<8x128xf32> to vector<8x64xf32>
    %1062 = vector.extract_strided_slice %1060 {offsets = [0, 64], sizes = [8, 32], strides = [1, 1]} : vector<8x128xf32> to vector<8x32xf32>
    %1063 = vector.extract_strided_slice %1060 {offsets = [0, 96], sizes = [8, 32], strides = [1, 1]} : vector<8x128xf32> to vector<8x32xf32>
    %c7_486 = arith.constant 7 : index
    %c0_487 = arith.constant 0 : index
    %c0_488 = arith.constant 0 : index
    %1064 = vector.load %arg25[%c7_486, %c0_487, %c0_488] : memref<8x1x8xf32, #tpu.memory_space<vmem>>, vector<1x1x8xf32>
    %1065 = vector.shape_cast %1064 : vector<1x1x8xf32> to vector<1x8xf32>
    %1066 = math.exp %1065 : vector<1x8xf32>
    %cst_489 = arith.constant 0.000000e+00 : f32
    %1067 = vector.broadcast %cst_489 : f32 to vector<1x8xf32>
    %1068 = arith.subf %1067, %1066 : vector<1x8xf32>
    %1069 = vector.broadcast %1068 : vector<1x8xf32> to vector<8x8xf32>
    %1070 = arith.mulf %1069, %1021 : vector<8x8xf32>
    %cst_490 = arith.constant dense<0.000000e+00> : vector<8x64xf32>
    %1071 = tpu.matmul %1070, %16, %cst_490 {dimension_numbers = #tpu.dot_dimension_numbers<[1], [0], [0], [1], [0, 0, 1, 1], [], []>} : vector<8x8xf32>, vector<8x64xf32>, vector<8x64xf32> -> vector<8x64xf32>
    %cst_491 = arith.constant dense<0.000000e+00> : vector<8x64xf32>
    %1072 = tpu.matmul %14, %1071, %cst_491 {dimension_numbers = #tpu.dot_dimension_numbers<[1], [0], [0], [1], [0, 0, 1, 1], [], []>} : vector<8x8xf32>, vector<8x64xf32>, vector<8x64xf32> -> vector<8x64xf32>
    %1073 = arith.mulf %17, %1071 : vector<8x64xf32>
    %cst_492 = arith.constant dense<0.000000e+00> : vector<64xf32>
    %1074 = vector.multi_reduction <add>, %1073, %cst_492 [0] : vector<8x64xf32> to vector<64xf32>
    %1075 = vector.shape_cast %1074 : vector<64xf32> to vector<1x64xf32>
    %cst_493 = arith.constant 5.000000e-01 : f32
    %1076 = vector.broadcast %cst_493 : f32 to vector<8x64xf32>
    %1077 = arith.cmpf ogt, %18, %1076 : vector<8x64xf32>
    %1078 = vector.broadcast %1075 : vector<1x64xf32> to vector<8x64xf32>
    %1079 = arith.subf %1072, %1078 : vector<8x64xf32>
    %cst_494 = arith.constant -1.000000e+30 : f32
    %1080 = vector.broadcast %cst_494 : f32 to vector<8x64xf32>
    %1081 = arith.select %1077, %1079, %1080 : vector<8x64xi1>, vector<8x64xf32>
    %1082 = math.exp %1081 : vector<8x64xf32>
    %cst_495 = arith.constant dense<0.000000e+00> : vector<8x8xf32>
    %1083 = tpu.matmul %1063, %1062, %cst_495 {dimension_numbers = #tpu.dot_dimension_numbers<[1], [1], [0], [0], [0, 0, 1, 0], [], []>} : vector<8x32xf32>, vector<8x32xf32>, vector<8x8xf32> -> vector<8x8xf32>
    %cst_496 = arith.constant dense<0.000000e+00> : vector<8x64xf32>
    %1084 = tpu.matmul %1083, %19, %cst_496 {dimension_numbers = #tpu.dot_dimension_numbers<[1], [0], [0], [1], [0, 0, 1, 1], [], []>} : vector<8x8xf32>, vector<8x64xf32>, vector<8x64xf32> -> vector<8x64xf32>
    %1085 = arith.mulf %1084, %1082 : vector<8x64xf32>
    %cst_497 = arith.constant dense<0.000000e+00> : vector<8x64xf32>
    %1086 = tpu.matmul %1021, %22, %cst_497 {dimension_numbers = #tpu.dot_dimension_numbers<[1], [0], [0], [1], [0, 0, 1, 1], [], []>} : vector<8x8xf32>, vector<8x64xf32>, vector<8x64xf32> -> vector<8x64xf32>
    %c7_498 = arith.constant 7 : index
    %c0_499 = arith.constant 0 : index
    %c0_500 = arith.constant 0 : index
    %1087 = vector.load %arg26[%c7_498, %c0_499, %c0_500] : memref<8x1x8xf32, #tpu.memory_space<vmem>>, vector<1x1x8xf32>
    %1088 = vector.shape_cast %1087 : vector<1x1x8xf32> to vector<1x8xf32>
    %cst_501 = arith.constant dense<0.000000e+00> : vector<1x64xf32>
    %1089 = tpu.matmul %1088, %22, %cst_501 {dimension_numbers = #tpu.dot_dimension_numbers<[1], [0], [0], [1], [0, 0, 1, 1], [], []>} : vector<1x8xf32>, vector<8x64xf32>, vector<1x64xf32> -> vector<1x64xf32>
    %1090 = arith.mulf %1061, %1086 : vector<8x64xf32>
    %cst_502 = arith.constant dense<0.000000e+00> : vector<64x64xf32>
    %1091 = tpu.matmul %20, %1090, %cst_502 {dimension_numbers = #tpu.dot_dimension_numbers<[1], [0], [0], [1], [0, 0, 1, 1], [], []>} : vector<64x8xf32>, vector<8x64xf32>, vector<64x64xf32> -> vector<64x64xf32>
    %1092 = arith.mulf %1091, %21 : vector<64x64xf32>
    %cst_503 = arith.constant dense<0.000000e+00> : vector<8x64xf32>
    %1093 = tpu.matmul %1085, %1092, %cst_503 {dimension_numbers = #tpu.dot_dimension_numbers<[1], [0], [0], [1], [0, 0, 1, 1], [], []>} : vector<8x64xf32>, vector<64x64xf32>, vector<8x64xf32> -> vector<8x64xf32>
    %1094 = vector.broadcast %1089 : vector<1x64xf32> to vector<8x64xf32>
    %1095 = arith.mulf %1061, %1094 : vector<8x64xf32>
    %1096 = arith.addf %1093, %1095 : vector<8x64xf32>
    %cst_504 = arith.constant 0.000000e+00 : f32
    %1097 = vector.broadcast %cst_504 : f32 to vector<8x64xf32>
    %1098 = arith.subf %1097, %1007 : vector<8x64xf32>
    %1099 = math.exp %1098 : vector<8x64xf32>
    %cst_505 = arith.constant 1.000000e+00 : f32
    %1100 = vector.broadcast %cst_505 : f32 to vector<8x64xf32>
    %1101 = arith.addf %1100, %1099 : vector<8x64xf32>
    %cst_506 = arith.constant 1.000000e+00 : f32
    %1102 = vector.broadcast %cst_506 : f32 to vector<8x64xf32>
    %1103 = arith.divf %1102, %1101 : vector<8x64xf32>
    %1104 = arith.mulf %1007, %1103 : vector<8x64xf32>
    %1105 = arith.mulf %1096, %1104 : vector<8x64xf32>
    %1106 = arith.mulf %1105, %1105 : vector<8x64xf32>
    %cst_507 = arith.constant dense<0.000000e+00> : vector<8xf32>
    %1107 = vector.multi_reduction <add>, %1106, %cst_507 [1] : vector<8x64xf32> to vector<8xf32>
    %1108 = vector.shape_cast %1107 : vector<8xf32> to vector<8x1xf32>
    %cst_508 = arith.constant 6.400000e+01 : f32
    %1109 = vector.broadcast %cst_508 : f32 to vector<8x1xf32>
    %1110 = arith.divf %1108, %1109 : vector<8x1xf32>
    %cst_509 = arith.constant 9.99999974E-6 : f32
    %1111 = vector.broadcast %cst_509 : f32 to vector<8x1xf32>
    %1112 = arith.addf %1110, %1111 : vector<8x1xf32>
    %1113 = math.rsqrt %1112 : vector<8x1xf32>
    %1114 = vector.broadcast %1113 : vector<8x1xf32> to vector<8x64xf32>
    %1115 = arith.mulf %1105, %1114 : vector<8x64xf32>
    %c7_510 = arith.constant 7 : index
    %c0_511 = arith.constant 0 : index
    %c0_512 = arith.constant 0 : index
    %1116 = vector.load %arg27[%c7_510, %c0_511, %c0_512] : memref<8x1x64xf32, #tpu.memory_space<vmem>>, vector<1x1x64xf32>
    %1117 = vector.shape_cast %1116 : vector<1x1x64xf32> to vector<1x64xf32>
    %1118 = vector.broadcast %1117 : vector<1x64xf32> to vector<8x64xf32>
    %1119 = arith.mulf %1115, %1118 : vector<8x64xf32>
    %c7_513 = arith.constant 7 : index
    %c0_514 = arith.constant 0 : index
    %c0_515 = arith.constant 0 : index
    %1120 = vector.load %arg28[%c7_513, %c0_514, %c0_515] : memref<8x64x32xf32, #tpu.memory_space<vmem>>, vector<1x64x32xf32>
    %1121 = vector.shape_cast %1120 : vector<1x64x32xf32> to vector<64x32xf32>
    %cst_516 = arith.constant dense<0.000000e+00> : vector<8x32xf32>
    %1122 = tpu.matmul %1119, %1121, %cst_516 {dimension_numbers = #tpu.dot_dimension_numbers<[1], [0], [0], [1], [0, 0, 1, 1], [], []>} : vector<8x64xf32>, vector<64x32xf32>, vector<8x32xf32> -> vector<8x32xf32>
    %1123 = arith.addf %988, %1122 : vector<8x32xf32>
    %1124 = vector.extract_strided_slice %8 {offsets = [0, 64], sizes = [1, 32], strides = [1, 1]} : vector<1x128xf32> to vector<1x32xf32>
    %1125 = vector.broadcast %1124 : vector<1x32xf32> to vector<8x32xf32>
    %1126 = arith.mulf %1123, %1125 : vector<8x32xf32>
    %1127 = vector.extract_strided_slice %13 {offsets = [0, 64], sizes = [1, 32], strides = [1, 1]} : vector<1x128xf32> to vector<1x32xf32>
    %1128 = vector.broadcast %1127 : vector<1x32xf32> to vector<8x32xf32>
    %1129 = arith.mulf %1126, %1128 : vector<8x32xf32>
    %1130 = vector.extract_strided_slice %8 {offsets = [0, 96], sizes = [1, 32], strides = [1, 1]} : vector<1x128xf32> to vector<1x32xf32>
    %1131 = vector.broadcast %1130 : vector<1x32xf32> to vector<8x32xf32>
    %1132 = arith.addf %1129, %1131 : vector<8x32xf32>
    %1133 = vector.extract_strided_slice %13 {offsets = [0, 96], sizes = [1, 32], strides = [1, 1]} : vector<1x128xf32> to vector<1x32xf32>
    %1134 = vector.broadcast %1133 : vector<1x32xf32> to vector<8x32xf32>
    %1135 = arith.addf %1132, %1134 : vector<8x32xf32>
    %c0_517 = arith.constant 0 : index
    %c0_518 = arith.constant 0 : index
    %1136 = vector.load %arg29[%c0_517, %c0_518] : memref<32x36xf32, #tpu.memory_space<vmem>>, vector<32x36xf32>
    %cst_519 = arith.constant dense<0.000000e+00> : vector<8x36xf32>
    %1137 = tpu.matmul %1135, %1136, %cst_519 {dimension_numbers = #tpu.dot_dimension_numbers<[1], [0], [0], [1], [0, 0, 1, 1], [], []>} : vector<8x32xf32>, vector<32x36xf32>, vector<8x36xf32> -> vector<8x36xf32>
    %c0_520 = arith.constant 0 : index
    %c0_521 = arith.constant 0 : index
    %1138 = vector.load %arg30[%c0_520, %c0_521] : memref<1x36xf32, #tpu.memory_space<vmem>>, vector<1x36xf32>
    %1139 = vector.broadcast %1138 : vector<1x36xf32> to vector<8x36xf32>
    %1140 = arith.addf %1137, %1139 : vector<8x36xf32>
    %c0_522 = arith.constant 0 : index
    %c0_523 = arith.constant 0 : index
    %c0_524 = arith.constant 0 : index
    %1141 = vector.load %arg31[%c0_522, %c0_523, %c0_524] : memref<1x8x36xf32, #tpu.memory_space<vmem>>, vector<1x8x36xf32>
    %1142 = vector.shape_cast %1141 : vector<1x8x36xf32> to vector<8x36xf32>
    %1143 = vector.shape_cast %1140 : vector<8x36xf32> to vector<1x8x36xf32>
    tpu.vector_store %arg31[%c0_522, %c0_523, %c0_524], %1143 {strides = array<i32>} : memref<1x8x36xf32, #tpu.memory_space<vmem>>, vector<1x8x36xf32>,
    return
  }
  func.func @transform_0(%arg0: i32) -> (i32, i32) {
    %c0_i32 = arith.constant 0 : i32
    %c0_i32_0 = arith.constant 0 : i32
    %c0_i32_1 = arith.constant 0 : i32
    return %c0_i32, %c0_i32_0 : i32, i32
  }
  func.func @transform_1(%arg0: i32) -> (i32, i32) {
    %c0_i32 = arith.constant 0 : i32
    %c0_i32_0 = arith.constant 0 : i32
    %c0_i32_1 = arith.constant 0 : i32
    return %c0_i32, %c0_i32_0 : i32, i32
  }
  func.func @transform_2(%arg0: i32) -> (i32, i32, i32) {
    %c0_i32 = arith.constant 0 : i32
    %c0_i32_0 = arith.constant 0 : i32
    %c0_i32_1 = arith.constant 0 : i32
    return %arg0, %c0_i32, %c0_i32_0 : i32, i32, i32
  }
  func.func @transform_3(%arg0: i32) -> (i32, i32) {
    %c0_i32 = arith.constant 0 : i32
    %c0_i32_0 = arith.constant 0 : i32
    %c0_i32_1 = arith.constant 0 : i32
    return %c0_i32, %c0_i32_0 : i32, i32
  }
  func.func @transform_4(%arg0: i32) -> (i32, i32) {
    %c0_i32 = arith.constant 0 : i32
    %c0_i32_0 = arith.constant 0 : i32
    %c0_i32_1 = arith.constant 0 : i32
    return %c0_i32, %c0_i32_0 : i32, i32
  }
  func.func @transform_5(%arg0: i32) -> (i32, i32) {
    %c0_i32 = arith.constant 0 : i32
    %c0_i32_0 = arith.constant 0 : i32
    %c0_i32_1 = arith.constant 0 : i32
    return %c0_i32, %c0_i32_0 : i32, i32
  }
  func.func @transform_6(%arg0: i32) -> (i32, i32) {
    %c0_i32 = arith.constant 0 : i32
    %c0_i32_0 = arith.constant 0 : i32
    %c0_i32_1 = arith.constant 0 : i32
    return %c0_i32, %c0_i32_0 : i32, i32
  }
  func.func @transform_7(%arg0: i32) -> (i32, i32) {
    %c0_i32 = arith.constant 0 : i32
    %c0_i32_0 = arith.constant 0 : i32
    %c0_i32_1 = arith.constant 0 : i32
    return %c0_i32, %c0_i32_0 : i32, i32
  }
  func.func @transform_8(%arg0: i32) -> (i32, i32) {
    %c0_i32 = arith.constant 0 : i32
    %c0_i32_0 = arith.constant 0 : i32
    %c0_i32_1 = arith.constant 0 : i32
    return %c0_i32, %c0_i32_0 : i32, i32
  }
  func.func @transform_9(%arg0: i32) -> (i32, i32) {
    %c0_i32 = arith.constant 0 : i32
    %c0_i32_0 = arith.constant 0 : i32
    %c0_i32_1 = arith.constant 0 : i32
    return %c0_i32, %c0_i32_0 : i32, i32
  }
  func.func @transform_10(%arg0: i32) -> (i32, i32) {
    %c0_i32 = arith.constant 0 : i32
    %c0_i32_0 = arith.constant 0 : i32
    %c0_i32_1 = arith.constant 0 : i32
    return %c0_i32, %c0_i32_0 : i32, i32
  }
  func.func @transform_11(%arg0: i32) -> (i32, i32) {
    %c0_i32 = arith.constant 0 : i32
    %c0_i32_0 = arith.constant 0 : i32
    %c0_i32_1 = arith.constant 0 : i32
    return %c0_i32, %c0_i32_0 : i32, i32
  }
  func.func @transform_12(%arg0: i32) -> (i32, i32) {
    %c0_i32 = arith.constant 0 : i32
    %c0_i32_0 = arith.constant 0 : i32
    %c0_i32_1 = arith.constant 0 : i32
    return %c0_i32, %c0_i32_0 : i32, i32
  }
  func.func @transform_13(%arg0: i32) -> (i32, i32) {
    %c0_i32 = arith.constant 0 : i32
    %c0_i32_0 = arith.constant 0 : i32
    %c0_i32_1 = arith.constant 0 : i32
    return %c0_i32, %c0_i32_0 : i32, i32
  }
  func.func @transform_14(%arg0: i32) -> (i32, i32) {
    %c0_i32 = arith.constant 0 : i32
    %c0_i32_0 = arith.constant 0 : i32
    %c0_i32_1 = arith.constant 0 : i32
    return %c0_i32, %c0_i32_0 : i32, i32
  }
  func.func @transform_15(%arg0: i32) -> (i32, i32) {
    %c0_i32 = arith.constant 0 : i32
    %c0_i32_0 = arith.constant 0 : i32
    %c0_i32_1 = arith.constant 0 : i32
    return %c0_i32, %c0_i32_0 : i32, i32
  }
  func.func @transform_16(%arg0: i32) -> (i32, i32) {
    %c0_i32 = arith.constant 0 : i32
    %c0_i32_0 = arith.constant 0 : i32
    %c0_i32_1 = arith.constant 0 : i32
    return %c0_i32, %c0_i32_0 : i32, i32
  }
  func.func @transform_17(%arg0: i32) -> (i32, i32) {
    %c0_i32 = arith.constant 0 : i32
    %c0_i32_0 = arith.constant 0 : i32
    %c0_i32_1 = arith.constant 0 : i32
    return %c0_i32, %c0_i32_0 : i32, i32
  }
  func.func @transform_18(%arg0: i32) -> (i32, i32) {
    %c0_i32 = arith.constant 0 : i32
    %c0_i32_0 = arith.constant 0 : i32
    %c0_i32_1 = arith.constant 0 : i32
    return %c0_i32, %c0_i32_0 : i32, i32
  }
  func.func @transform_19(%arg0: i32) -> (i32, i32, i32) {
    %c0_i32 = arith.constant 0 : i32
    %c0_i32_0 = arith.constant 0 : i32
    %c0_i32_1 = arith.constant 0 : i32
    %c0_i32_2 = arith.constant 0 : i32
    return %c0_i32, %c0_i32_0, %c0_i32_1 : i32, i32, i32
  }
  func.func @transform_20(%arg0: i32) -> (i32, i32, i32) {
    %c0_i32 = arith.constant 0 : i32
    %c0_i32_0 = arith.constant 0 : i32
    %c0_i32_1 = arith.constant 0 : i32
    %c0_i32_2 = arith.constant 0 : i32
    return %c0_i32, %c0_i32_0, %c0_i32_1 : i32, i32, i32
  }
  func.func @transform_21(%arg0: i32) -> (i32, i32, i32) {
    %c0_i32 = arith.constant 0 : i32
    %c0_i32_0 = arith.constant 0 : i32
    %c0_i32_1 = arith.constant 0 : i32
    %c0_i32_2 = arith.constant 0 : i32
    return %c0_i32, %c0_i32_0, %c0_i32_1 : i32, i32, i32
  }
  func.func @transform_22(%arg0: i32) -> (i32, i32, i32) {
    %c0_i32 = arith.constant 0 : i32
    %c0_i32_0 = arith.constant 0 : i32
    %c0_i32_1 = arith.constant 0 : i32
    %c0_i32_2 = arith.constant 0 : i32
    return %c0_i32, %c0_i32_0, %c0_i32_1 : i32, i32, i32
  }
  func.func @transform_23(%arg0: i32) -> (i32, i32, i32) {
    %c0_i32 = arith.constant 0 : i32
    %c0_i32_0 = arith.constant 0 : i32
    %c0_i32_1 = arith.constant 0 : i32
    %c0_i32_2 = arith.constant 0 : i32
    return %c0_i32, %c0_i32_0, %c0_i32_1 : i32, i32, i32
  }
  func.func @transform_24(%arg0: i32) -> (i32, i32, i32) {
    %c0_i32 = arith.constant 0 : i32
    %c0_i32_0 = arith.constant 0 : i32
    %c0_i32_1 = arith.constant 0 : i32
    %c0_i32_2 = arith.constant 0 : i32
    return %c0_i32, %c0_i32_0, %c0_i32_1 : i32, i32, i32
  }
  func.func @transform_25(%arg0: i32) -> (i32, i32, i32) {
    %c0_i32 = arith.constant 0 : i32
    %c0_i32_0 = arith.constant 0 : i32
    %c0_i32_1 = arith.constant 0 : i32
    %c0_i32_2 = arith.constant 0 : i32
    return %c0_i32, %c0_i32_0, %c0_i32_1 : i32, i32, i32
  }
  func.func @transform_26(%arg0: i32) -> (i32, i32, i32) {
    %c0_i32 = arith.constant 0 : i32
    %c0_i32_0 = arith.constant 0 : i32
    %c0_i32_1 = arith.constant 0 : i32
    %c0_i32_2 = arith.constant 0 : i32
    return %c0_i32, %c0_i32_0, %c0_i32_1 : i32, i32, i32
  }
  func.func @transform_27(%arg0: i32) -> (i32, i32, i32) {
    %c0_i32 = arith.constant 0 : i32
    %c0_i32_0 = arith.constant 0 : i32
    %c0_i32_1 = arith.constant 0 : i32
    %c0_i32_2 = arith.constant 0 : i32
    return %c0_i32, %c0_i32_0, %c0_i32_1 : i32, i32, i32
  }
  func.func @transform_28(%arg0: i32) -> (i32, i32) {
    %c0_i32 = arith.constant 0 : i32
    %c0_i32_0 = arith.constant 0 : i32
    %c0_i32_1 = arith.constant 0 : i32
    return %c0_i32, %c0_i32_0 : i32, i32
  }
  func.func @transform_29(%arg0: i32) -> (i32, i32) {
    %c0_i32 = arith.constant 0 : i32
    %c0_i32_0 = arith.constant 0 : i32
    %c0_i32_1 = arith.constant 0 : i32
    return %c0_i32, %c0_i32_0 : i32, i32
  }
  func.func @transform_30(%arg0: i32) -> (i32, i32, i32) {
    %c0_i32 = arith.constant 0 : i32
    %c0_i32_0 = arith.constant 0 : i32
    %c0_i32_1 = arith.constant 0 : i32
    return %arg0, %c0_i32, %c0_i32_0 : i32, i32, i32
  }
}

</mosaic_0001>

<bundles_post_ra>
// kernel: reward_guidance_forward.1
= control target key start
LH: loop header
LB: loop body
LE: loop exit
PB: predicated region body
PF: predicated region fallthrough
CT: control target
= control target key end

     0   :  { %s13001_s6 = smov 1   ;;  %s13002_s10 = smov 2   ;;  %s14778_s0 = inlined_call_operand.smem [shape: u32[31], index: -1, kind: input, shape index: {}] }
   0x1   :  { %s13046_s5 = sld [smem:[%s14778_s0]]   ;;  %s13003_s14 = smov 3  }
   0x2   :  { %s13051_s9 = sld [smem:[%s14778_s0 + %s13001_s6]]   ;;  %s13004_s18 = smov 4  }
   0x3   :  { %s13056_s13 = sld [smem:[%s14778_s0 + %s13002_s10]]   ;;  %s13005_s22 = smov 5  }
   0x4   :  { %s13061_s17 = sld [smem:[%s14778_s0 + %s13003_s14]]   ;;  %s13006_s26 = smov 6  }
   0x5   :  { %s13066_s21 = sld [smem:[%s14778_s0 + %s13004_s18]]   ;;  %s13007_s30 = smov 7  }
   0x6   :  { %s13071_s25 = sld [smem:[%s14778_s0 + %s13005_s22]]   ;;  %s13008_s4 = smov 8  }
   0x7   :  { %14798 = sst [smem:[#allocation8_spill]] %s13046_s5  ;;  %s13009_s10 = smov 9  }
   0x8   :  { %s13076_s29 = sld [smem:[%s14778_s0 + %s13006_s26]]   ;;  %s13010_s15 = smov 10  }
   0x9   :  { %s13081_s3 = sld [smem:[%s14778_s0 + %s13007_s30]]   ;;  %s13011_s20 = smov 11  }
   0xa   :  { %s13086_s8 = sld [smem:[%s14778_s0 + %s13008_s4]]   ;;  %s13012_s26 = smov 12  }
   0xb   :  { %s13091_s14 = sld [smem:[%s14778_s0 + %s13009_s10]]   ;;  %s13013_s1 = smov 13  }
   0xc   :  { %s13096_s19 = sld [smem:[%s14778_s0 + %s13010_s15]]   ;;  %s13014_s7 = smov 14  }
   0xd   :  { %s13101_s24 = sld [smem:[%s14778_s0 + %s13011_s20]]   ;;  %s13015_s15 = smov 15  }
   0xe   :  { %s13106_s30 = sld [smem:[%s14778_s0 + %s13012_s26]]   ;;  %s13016_s22 = smov 16  }
   0xf   :  { %14799 = sst [smem:[#allocation9_spill]] %s13081_s3  ;;  %s13017_s28 = smov 17  }
  0x10   :  { %14800 = sst [smem:[#allocation10_spill]] %s13086_s8 }
  0x11   :  { %s13111_s6 = sld [smem:[%s14778_s0 + %s13013_s1]]  }
  0x12   :  { %14801 = sst [smem:[#allocation11_spill]] %s13096_s19 }
  0x13   :  { %s13116_s12 = sld [smem:[%s14778_s0 + %s13014_s7]]   ;;  %s13018_s7 = smov 18  }
  0x14   :  { %14802 = sst [smem:[#allocation12_spill]] %s13106_s30 }
  0x15   :  { %s13121_s20 = sld [smem:[%s14778_s0 + %s13015_s15]]   ;;  %s13019_s15 = smov 19  }
  0x16   :  { %s13126_s27 = sld [smem:[%s14778_s0 + %s13016_s22]]   ;;  %s13020_s22 = smov 20  }
  0x17   :  { %14803 = sst [smem:[#allocation13_spill]] %s13111_s6 }
  0x18   :  { %s13131_s4 = sld [smem:[%s14778_s0 + %s13017_s28]]   ;;  %s13021_s28 = smov 21  }
  0x19   :  { %14804 = sst [smem:[#allocation14_spill]] %s13116_s12 }
  0x1a   :  { %s13136_s12 = sld [smem:[%s14778_s0 + %s13018_s7]]   ;;  %s13022_s7 = smov 22  }
  0x1b   :  { %14805 = sst [smem:[#allocation15_spill]] %s13121_s20 }
  0x1c   :  { %14806 = sst [smem:[#allocation16_spill]] %s13126_s27 }
  0x1d   :  { %s13141_s6 = sld [smem:[%s14778_s0 + %s13019_s15]]   ;;  %s13023_s15 = smov 23  }
  0x1e   :  { %14807 = sst [smem:[#allocation17_spill]] %s13131_s4 }
  0x1f   :  { %s13146_s27 = sld [smem:[%s14778_s0 + %s13020_s22]]   ;;  %s13024_s22 = smov 24  }
  0x20   :  { %14808 = sst [smem:[#allocation18_spill]] %s13136_s12 }
  0x21   :  { %s13151_s4 = sld [smem:[%s14778_s0 + %s13021_s28]]   ;;  %s13025_s28 = smov 25  }
  0x22   :  { %s13156_s20 = sld [smem:[%s14778_s0 + %s13022_s7]]   ;;  %s13026_s7 = smov 26  }
  0x23   :  { %s13161_s12 = sld [smem:[%s14778_s0 + %s13023_s15]]   ;;  %s13027_s15 = smov 27  }
  0x24   :  { %s13166_s19 = sld [smem:[%s14778_s0 + %s13024_s22]]   ;;  %s13028_s22 = smov 28  }
  0x25   :  { %s13181_s30 = sld [smem:[%s14778_s0 + %s13027_s15]]  }
  0x27   :  { %14809 = sst [smem:[#allocation19_spill]] %s13151_s4 }
  0x28   :  { %14810 = sst [smem:[#allocation20_spill]] %s13156_s20 }
  0x29   :  { %s13171_s4 = sld [smem:[%s14778_s0 + %s13025_s28]]   ;;  %s13029_s28 = smov 29  }
  0x2a   :  { %14811 = sst [smem:[#allocation21_spill]] %s13166_s19 }
  0x2b   :  { %s13176_s20 = sld [smem:[%s14778_s0 + %s13026_s7]]   ;;  %s13030_s7 = smov 30  }
  0x2c   :  { %s13186_s19 = sld [smem:[%s14778_s0 + %s13028_s22]]  }
  0x2f   :  { %14812 = sst [smem:[#allocation22_spill]] %s13171_s4 }
  0x30   :  { %s13191_s4 = sld [smem:[%s14778_s0 + %s13029_s28]]  }
  0x31   :  { %14813 = sst [smem:[#allocation23_spill]] %s13176_s20 }
  0x32   :  { %s13196_s20 = sld [smem:[%s14778_s0 + %s13030_s7]]  }
  0x33   :  { %66 = vsyncpa [#allocation3], 0 }
  0x34   :  { %67 = vsyncpa [#allocation5], 0  ;;  %s13198_s15 = smov 0  }
  0x35 LB: > { %s14814_s5 = sld [smem:[#allocation8_spill]]  ;;  %s13204_s16 = sadd.s32 4294967295, %s12999_s15   ;;  %s12999_s15 = sphi %s13198_s15, %s73_s15  }
  0x36   : > { %p11048_p0 = scmp.ge.s32.totalorder %s12999_s15, 1  ;;  %p739_p1 = scmp.lt.s32.totalorder %s12999_s15, 3 }
  0x37   : > { %p14791_p3 = scmp.eq.s32.totalorder %s13204_s16, 0  ;;  %s763_s22 = sshll.u32 %s13051_s9, 4  ;;  %s764_s22 = int_to_ptr.vmem [resolvable:$true] %s763_s22 }
  0x38   : > { %p13209_p2 = pnand %p11048_p0, %p739_p1 }
  0x3a   : > { %s14815_s18 = scalar_select %p13209_p2, 1, 0 }
  0x3b   : > { %s752_s0 = sshll.u32 %s14814_s5, 4  ;;  %p12669_p4 = pneg %p13209_p2  ;;  %s753_s0 = int_to_ptr.vmem [resolvable:$true] %s752_s0 }
  0x3c   : > { %s12955_s26 = scalar_lea.vmem %s753_s0, 32  ;;  %p12963_p10 = scmp.lt.s32.totalorder %s753_s0, %s753_s0 }
  0x3d   : > { %p13219_p5 = pnand %p14791_p3, %p12669_p4  ;;  %p12956_p6 = scmp.ne.s32.totalorder %s753_s0, %s12955_s26 }
  0x3e   : > { %p12964_p11 = scmp.lt.s32.totalorder %s12955_s26, %s12955_s26 }
  0x3f   : > { %p12957_p7 = pneg %p13219_p5 }
  0x40   : > { %p12965_p12 = por %p12964_p11, %p12963_p10 }
  0x41   : > { %p12958_p8 = pnand %p12957_p7, %p12956_p6 }
  0x43   : > { %p12959_p9 = pneg %p12958_p8 }
  0x45   : > { %p12966_p13 = pnand %p12965_p12, %p12959_p9 }
  0x47   : > { %12969 = shalt.err (!%p12966_p13)
}
  0x48   : > { %s13031_s28 = smov [#allocation2]   ;;  %s12970_s1 = scalar_lea.vmem %s764_s22, 32 }
  0x49   : > { %12672 = dma.vmem_to_smem (!%p13219_p5), %s753_s0, 32, %s13031_s28, [#allocation3]  }
  0x4a   : > { %p12971_p0 = scmp.ne.s32.totalorder %s764_s22, %s12970_s1  ;;  %p12978_p3 = scmp.lt.s32.totalorder %s764_s22, %s764_s22 }
  0x4b   : > { %p12979_p2 = scmp.lt.s32.totalorder %s12970_s1, %s12970_s1 }
  0x4c   : > { %p12973_p1 = pnand %p12971_p0, %p12957_p7 }
  0x4d   : > { %p12980_p6 = por %p12979_p2, %p12978_p3 }
  0x4e   : > { %p12974_p4 = pneg %p12973_p1 }
  0x50   : > { %p12981_p8 = pnand %p12980_p6, %p12974_p4 }
  0x52   : > { %12984 = shalt.err (!%p12981_p8)
}
  0x53   : > { %s13032_s2 = smov [#allocation4]   ;;  %p14817_p9 = scmp.ne.s32.totalorder %s14815_s18, 0 }
  0x54   : > { %12675 = dma.vmem_to_smem (!%p13219_p5), %s764_s22, 32, %s13032_s2, [#allocation5]  }
  0x55   : > { %864 = sbr.rel (%p14817_p9) target bundleno = 14068 (0x36f4), region = 140  ;;  %p14818_p10 = scmp.eq.s32.totalorder (!%p14817_p9), %s13204_s16, 0 }
  0x5a   : > { %12990 = dma.done.wait (%p14818_p10), [#allocation3], 32   ;;  %p14819_p11 = pmov %p14818_p10 }
  0x5b   : > { %p14820_p7 = pmov %p14818_p10 }
  0x5c   : > { %12992 = vsyncadd (%p14819_p11), [#allocation3], 4294967264 }
  0x5d   : > { %12994 = dma.done.wait (%p14820_p7), [#allocation5], 32   ;;  %p14821_p2 = pmov %p14820_p7 }
  0x5f   : > { %12996 = vsyncadd (%p14821_p2), [#allocation5], 4294967264 }
  0x60   : > { %874 = sfence }
  0x61   : > { %v1006_v0 = vld [vmem:[%s13066_s21 + $0x20] sm:$0xf]  ;;  %vm1011_vm0 = vcmask 1043456   ;;  %v13033_v1 = vmov 0.0   ;;  %v1005_v2 = vld [vmem:[%s13066_s21 + $0x18] sm:$0xff]  ;;  %p945_p3 = scmp.lt.s32.totalorder %s13204_s16, 1  ;;  %v1087_v3 = vlaneseq }
  0x62   : > { %11821 = vmatprep.subr.mxu0 %v13033_v1  ;;  %s11057_s7 = sshll.u32 %s13204_s16, 7  ;;  %1201 = vmatprep.mubr.f32.mxu1 %v13033_v1  ;;  %vm13034_vm1 = vmmov 0   ;;  %v1004_v4 = vld [vmem:[%s13066_s21 + $0x10] sm:$0xff]  ;;  %s14822_s3 = sld [smem:[#allocation9_spill]]  ;;  %v1003_v5 = vld [vmem:[%s13066_s21 + $0x8] sm:$0xff]  ;;  %v1002_v8 = vld [vmem:[%s13066_s21] sm:$0xff] }
  0x63   : > { %11822 = vmatpush3.msk.msra.mxu0 %vm1011_vm0, %v1006_v0  ;;  %11831 = vmatprep.mubr.msk.f32.mxu0 %vm13034_vm1, %v13033_v1  ;;  %s954_s10 = sld [smem:[#allocation2 + %s11057_s7]]  ;;  %s14841_s16 = smov (!%p945_p3, %s13204_s16), 1  ;;  %v13255_v6 = vshrl.u32 %v1087_v3, 7  ;;  %v956_v7 = vld [vmem:[%s13076_s29] sm:$0x1]  ;;  %vm1007_vm2 = vcmask 293888  }
  0x64   : > { %11823 = vmatprep.subr.mxu0 %v13033_v1  ;;  %s14823_s8 = sld [smem:[#allocation10_spill]]  ;;  %s14793_s0 = sshll.u32 %s14841_s16, 3  ;;  %v964_v16 = vld [vmem:[%s13091_s14] sm:$0x1]  ;;  %vm1109_vm3 = vcmask 261120   ;;  %v1133_v36 = vld [vmem:[%s13146_s27 + $0x38] sm:$0xff] }
  0x65   : > { %11824 = vmatpush3.msra.mxu0 %v1005_v2  ;;  %s955_s11 = sld [smem:[#allocation4 + %s11057_s7]]  ;;  %s948_s18 = scalar_lea.vmem %s13056_s13, %s14793_s0  ;;  %v13267_v14 = vsub.s32 0, %v13255_v6  ;;  %v993_v22 = vld [vmem:[%s13061_s17] sm:$0xff]  ;;  %v1132_v37 = vld [vmem:[%s13146_s27 + $0x30] sm:$0xff]  ;;  %v1131_v38 = vld [vmem:[%s13146_s27 + $0x28] sm:$0xff]  ;;  %1161 = vmatprep.subr.mxu1 %v1133_v36  ;;  %vm1235_vm4 = vcmask 64512  }
  0x66   : > { %11825 = vmatprep.subr.mxu0 %v13033_v1  ;;  %v992_v9 = vld [vmem:[%s948_s18] sm:$0xff]  ;;  %s13035_s22 = smov 96   ;;  %1162 = vmatpush1.msra.mxu1 %v1132_v37  ;;  %v1129_v40 = vld [vmem:[%s13146_s27 + $0x18] sm:$0xff]  ;;  %v1128_v41 = vld [vmem:[%s13146_s27 + $0x10] sm:$0xff]  ;;  %s14796_s23 = smov 64   ;;  %vm1721_vm6 = vcmask 523264  }
  0x67   : > { %11826 = vmatpush3.msra.mxu0 %v1004_v4  ;;  %v11058_v23 = vld [vmem:[%s13071_s25] ss:$0 sm:$0xff]  ;;  %1163 = vmatprep.subr.mxu1 %v1131_v38  ;;  %v1127_v42 = vld [vmem:[%s13146_s27 + $0x8] sm:$0xff]  ;;  %v13311_v55 = vld [vmem:[%s13101_s24 + $0x10] sm:$0xff]  ;;  %s14824_s26 = sld [smem:[#allocation12_spill]]  ;;  %s14837_s5 = smov 64  }
  0x68   : > { %11827 = vmatprep.subr.mxu0 %v13033_v1  ;;  %v959_v11 = vld [vmem:[%s14822_s3] sm:$0x1]  ;;  %v1001_v24 = vadd.f32 %v11058_v23, %v993_v22  ;;  %v13322_v58 = vld [vmem:[%s13101_s24 + $0x8] sm:$0xff]  ;;  %v13335_v61 = vld [vmem:[%s13101_s24 + $0x18] sm:$0xff]  ;;  %s14825_s28 = sld [smem:[#allocation21_spill]] }
  0x69   : > { %11828 = vmatpush3.msra.mxu0 %v1003_v5  ;;  %v957_v10 = vstv %s954_s10  ;;  %v1130_v39 = vld [vmem:[%s13146_s27 + $0x20] sm:$0xff]  ;;  %s14826_s1 = sld [smem:[#allocation19_spill]] }
  0x6a   : > { %v961_v12 = vld [vmem:[%s14823_s8] sm:$0x1]  ;;  %11829 = vmatprep.subr.mxu0 %v13033_v1  ;;  %v958_v13 = vmul.f32 %v957_v10, %v956_v7  ;;  %1164 = vmatpush1.msra.mxu1 %v1130_v39  ;;  %s14827_s2 = sld [smem:[#allocation20_spill]]  ;;  %s14838_s8 = smov 32  }
  0x6b   : > { %11830 = vmatpush3.msra.mxu0 %v1002_v8  ;;  %v962_v15 = vstv %s955_s11  ;;  %1165 = vmatprep.subr.mxu1 %v1129_v40  ;;  %v1126_v43 = vld [vmem:[%s13146_s27] sm:$0xff]  ;;  %s14828_s7 = sld [smem:[#allocation11_spill]]  ;;  %s14794_s11 = smov 32  }
  0x6c   : > { %11832 = vmatmul.mubr.msk.f32.vlgmr.msra.gmra.mxu0 %vm1007_vm2, %v992_v9  ;;  %v960_v17 = vadd.f32 %v959_v11, %v958_v13  ;;  %v963_v18 = vmul.f32 %v962_v15, %v961_v12  ;;  %11834 = vmatprep.subr.mxu0 %v13033_v1  ;;  %v11063_v44 = vld [vmem:[%s13161_s12] ss:$0 sm:$0xff]  ;;  %s14829_s10 = sld [smem:[#allocation18_spill]] }
  0x6d   : > { %11836 = vmatprep.mubr.msk.f32.mxu0 %vm13034_vm1, %v13033_v1  ;;  %1166 = vmatpush1.msra.mxu1 %v1128_v41  ;;  %v11061_v49 = vld [vmem:[%s13141_s6] ss:$0 sm:$0xff]  ;;  %s14830_s18 = sld [smem:[#allocation15_spill]] }
  0x6e   : > { %v13275_v19 = vrot.slane %v960_v17, %v13267_v14  ;;  %v965_v20 = vadd.f32 %v964_v16, %v963_v18  ;;  %1167 = vmatprep.subr.mxu1 %v1127_v42  ;;  %v13308_v52 = vld [vmem:[%s13101_s24] sm:$0xff]  ;;  %v13356_v16 = vsub.s32 1, %v13255_v6  ;;  %v13359_v17 = vsub.s32 2, %v13255_v6  ;;  %s14832_s0 = sld [smem:[#allocation13_spill]] }
  0x6f   : > { %1168 = vmatpush1.msra.mxu1 %v1126_v43  ;;  %v13343_v0 = vld [vmem:[%s14824_s26] sm:$0xff]  ;;  %s14835_s3 = sld [smem:[#allocation17_spill]] }
  0x70   : > { %1100 = vrot.lane.b32.xlu0 %v13275_v19, %s13035_s22  ;;  %v13279_v21 = vrot.slane %v965_v20, %v13267_v14  ;;  %11844 = vmatprep.subr.mxu1 %v13033_v1  ;;  %v1559_v5 = vld [vmem:[%s14825_s28] sm:$0x1] }
  0x71   : > { %v1560_v7 = vmul.f32 1.442695, %v1559_v5  ;;  %v1226_v13 = vld [vmem:[%s14826_s1] sm:$0xf] }
  0x72   : > { %v1312_v15 = vrot.slane %v1226_v13, %v13267_v14  ;;  %v1391_v22 = vrot.slane %v1226_v13, %v13356_v16  ;;  %v1470_v23 = vrot.slane %v1226_v13, %v13359_v17 }
  0x74   : > { %1104 = vrot.lane.b32.xlu0 %v13279_v21, %s13035_s22  ;;  %s14831_s22 = sld [smem:[#allocation16_spill]] }
  0xe2   : > { %v1101_v26 = vpop.permute.xlu0 %1100 }
  0xe6   : > { %v1105_v31 = vpop.permute.xlu0 %1104 }
 0x12c   : > { %v1081_v25 = vpop.f32.mrf.mxu0 }
 0x12d   : > { %v1085_v27 = vadd.f32 %v1081_v25, %v1001_v24  ;;  %v13364_v24 = vsub.s32 3, %v13255_v6  ;;  %v11064_v25 = vld [vmem:[%s14827_s2] ss:$0 sm:$0xff] }
 0x12e   : > { %v11833_v28 = vpop.f32.mrf.mxu0 }
 0x12f   : > { %v1092_v29 = vmul.f32 %v13275_v19, %v1085_v27 }
 0x131   : > { %v1099_v30 = vmul.f32 %v13279_v21, %v1092_v29 }
 0x133   : > { %v1103_v32 = vadd.f32 %v1101_v26, %v1099_v30 }
 0x135   : > { %v13286_v33 = vadd.f32 %v1105_v31, %v1103_v32 }
 0x137   : > { %v1108_v34 = vmul.f32 %v13286_v33, %v13286_v33 }
 0x139   : > { %v1110_v35 = vsel %vm1109_vm3, %v1108_v34, 0.0  ;;  %v1549_v34 = vrot.slane %v1226_v13, %v13364_v24 }
 0x13a   : > { %1111 = vadd.xlane.f32.xlu1 %v1110_v35 }
 0x14b   : > { %1214 = vrot.lane.b32.xlu1 %v11063_v44, %s14796_s23 }
 0x1c3   : > { %v1112_v45 = vpop.xlane.xlu1 %1111 }
 0x1c4   : > { %v1114_v46 = vmul.f32 0.03125, %v1112_v45 }
 0x1c6   : > { %v1115_v47 = vadd.f32 1e-05, %v1114_v46 }
 0x1c7   : > { %v1215_v54 = vpop.permute.xlu1 %1214 }
 0x1c8   : > { %12725 = vrsqrt.f32 %v1115_v47  ;;  %v13375_v47 = vld [vmem:[%s14828_s7] sm:$0xff] }
 0x1d5   : > { %v12726_v48 = vpop.eup %12725 }
 0x1d6   : > { %v1117_v50 = vmul.f32 %v12726_v48, %v13286_v33 }
 0x1d8   : > { %v1125_v51 = vmul.f32 %v11061_v49, %v1117_v50 }
 0x1da   : > { %11062 = vmatmul.mubr.msk.f32.vlgmr.msra.gmra.mxu1 %vm1109_vm3, %v1125_v51  ;;  %v13385_v51 = vld [vmem:[%s14829_s10] sm:$0xff] }
 0x1db   : > { %11846 = vmatprep.mubr.msk.f32.mxu1 %vm13034_vm1, %v13033_v1 }
 0x29a   : > { %v1203_v53 = vpop.f32.mrf.mxu1 }
 0x29b   : > { %11835 = vmatpush3.msra.mxu0 %v1203_v53  ;;  %11845 = vmatpush3.msra.mxu1 %v1203_v53 }
 0x29c   : > { %v13313_v56 = vpop.f32.mrf.mxu1  ;;  %11837 = vmatmul.mubr.msk.f32.vlgmr.msra.gmra.mxu0 %vm1235_vm4, %v13308_v52  ;;  %11839 = vmatprep.subr.mxu0 %v13033_v1 }
 0x29d   : > { %v1217_v57 = vadd.f32 %v1215_v54, %v13313_v56  ;;  %11840 = vmatpush3.msra.mxu0 %v1203_v53  ;;  %11841 = vmatprep.mubr.msk.f32.mxu0 %vm13034_vm1, %v13033_v1  ;;  %v13393_v54 = vld [vmem:[%s14830_s18] sm:$0xff] }
 0x29e   : > { %11849 = vmatprep.subr.mxu0 %v13033_v1  ;;  %11847 = vmatmul.mubr.msk.f32.vlgmr.msra.gmra.mxu1 %vm1235_vm4, %v13311_v55 }
 0x29f   : > { %v1219_v59 = vmin.f32 %v1217_v57, 20.0  ;;  %11854 = vmatprep.subr.mxu1 %v13033_v1  ;;  %11856 = vmatprep.mubr.msk.f32.mxu1 %vm13034_vm1, %v13033_v1  ;;  %vm1218_vm5 = vcmp.gt.f32.partialorder %v1217_v57, 20.0 }
 0x2a0   : > { %11842 = vmatmul.mubr.msk.f32.vlgmr.msra.gmra.mxu0 %vm1235_vm4, %v13322_v58  ;;  %11855 = vmatpush3.msra.mxu1 %v13343_v0 }
 0x2a1   : > { %v1220_v60 = vmul.f32 1.442695, %v1219_v59  ;;  %11850 = vmatpush3.msra.mxu0 %v1203_v53  ;;  %11851 = vmatprep.mubr.msk.f32.mxu0 %vm13034_vm1, %v13033_v1  ;;  %v13403_v59 = vld [vmem:[%s14832_s0] sm:$0xff] }
 0x2a2   : > { %11859 = vmatprep.subr.mxu0 %v13033_v1  ;;  %11864 = vmatprep.subr.mxu1 %v13033_v1 }
 0x2a3   : > { %12727 = vpow2.f32 %v1220_v60 }
 0x2a4   : > { %11852 = vmatmul.mubr.msk.f32.vlgmr.msra.gmra.mxu0 %vm1235_vm4, %v13335_v61 }
 0x2a5   : > { %11861 = vmatprep.mubr.msk.f32.mxu0 %vm13034_vm1, %v13033_v1 }
 0x2b0   : > { %v12728_v62 = vpop.eup %12727 }
 0x2b1   : > { %v1222_v63 = vadd.f32 1.0, %v12728_v62 }
 0x2b3   : > { %12729 = vlog2.f32 %v1222_v63 }
 0x2b4   : > { %12731 = vpow2.f32 %v1560_v7 }
 0x2c0   : > { %v12730_v2 = vpop.eup %12729 }
 0x2c1   : > { %v1224_v3 = vmul.f32 0.6931472, %v12730_v2  ;;  %v12732_v8 = vpop.eup %12731 }
 0x2c2   : > { %v1562_v9 = vsub.f32 0.0, %v12732_v8 }
 0x2c3   : > { %v1225_v4 = vsel %vm1218_vm5, %v1217_v57, %v1224_v3  ;;  %v13398_v57 = vld [vmem:[%s14831_s22] sm:$0xff] }
 0x2c4   : > { %1570 = vrot.lane.b32.xlu0 %v1225_v4, %s14796_s23  ;;  %v1567_v10 = vrot.slane %v1562_v9, %v13267_v14 }
 0x336   : > { %v1571_v11 = vpop.permute.xlu0 %1570 }
 0x337   : > { %v1573_v12 = vmul.f32 %v1571_v11, %v1567_v10 }
 0x339   : > { %11857 = vmatmul.mubr.msk.f32.vlgmr.msra.gmra.mxu1 %vm1235_vm4, %v1573_v12 }
 0x33a   : > { %11866 = vmatprep.mubr.msk.f32.mxu1 %vm13034_vm1, %v13033_v1 }
 0x35c   : > { %v1305_v18 = vpop.f32.mrf.mxu0 }
 0x35d   : > { %v1313_v20 = vmul.f32 %v1312_v15, %v1305_v18 }
 0x35e   : > { %v11838_v26 = vpop.f32.mrf.mxu0  ;;  %v1463_v27 = vpop.f32.mrf.mxu1 }
 0x35f   : > { %v1314_v30 = vadd.f32 %v11064_v25, %v1313_v20  ;;  %v1471_v32 = vmul.f32 %v1470_v23, %v1463_v27  ;;  %v13421_v23 = vld [vmem:[%s14831_s22 + $0x10] sm:$0xff]  ;;  %v13429_v25 = vld [vmem:[%s14831_s22 + $0x18] sm:$0xff]  ;;  %v13432_v26 = vld [vmem:[%s14831_s22 + $0x20] sm:$0xff] }
 0x360   : > { %v1384_v28 = vpop.f32.mrf.mxu0  ;;  %v11848_v29 = vpop.f32.mrf.mxu1  ;;  %v13439_v27 = vld [vmem:[%s14831_s22 + $0x28] sm:$0xff] }
 0x361   : > { %v1392_v31 = vmul.f32 %v1391_v22, %v1384_v28  ;;  %v13416_v22 = vld [vmem:[%s14831_s22 + $0x8] sm:$0xff]  ;;  %v13442_v28 = vld [vmem:[%s14831_s22 + $0x30] sm:$0xff]  ;;  %v13449_v29 = vld [vmem:[%s14831_s22 + $0x38] sm:$0xff] }
 0x362   : > { %v11843_v35 = vpop.f32.mrf.mxu0 }
 0x363   : > { %v1393_v36 = vadd.f32 %v1392_v31, %v1314_v30 }
 0x364   : > { %v1542_v37 = vpop.f32.mrf.mxu0 }
 0x365   : > { %v1472_v38 = vadd.f32 %v1471_v32, %v1393_v36  ;;  %v1550_v39 = vmul.f32 %v1549_v34, %v1542_v37 }
 0x366   : > { %v11853_v40 = vpop.f32.mrf.mxu0 }
 0x367   : > { %v1551_v41 = vadd.f32 %v1550_v39, %v1472_v38 }
 0x369   : > { %v1552_v6 = vsub.f32 0.0, %v1551_v41 }
 0x36b   : > { %v1553_v42 = vmul.f32 1.442695, %v1552_v6 }
 0x36d   : > { %12733 = vpow2.f32 %v1553_v42 }
 0x37a   : > { %v12734_v43 = vpop.eup %12733 }
 0x37b   : > { %v1555_v44 = vadd.f32 1.0, %v12734_v43  ;;  %v13462_v43 = vld [vmem:[%s14835_s3 + $0x38] sm:$0xff] }
 0x37d   : > { %12735 = vrcp.f32 %v1555_v44 }
 0x38a   : > { %v12736_v45 = vpop.eup %12735 }
 0x38b   : > { %v13368_v46 = vmul.f32 %v12736_v45, %v1551_v41  ;;  %v13465_v45 = vld [vmem:[%s14835_s3 + $0x30] sm:$0xff] }
 0x38d   : > { %1737 = vrot.lane.b32.xlu0 %v13368_v46, %s14796_s23  ;;  %s14834_s23 = sld [smem:[#allocation14_spill]] }
 0x391   : > { %1735 = vrot.lane.b32.xlu0 %v13368_v46, %s14794_s11  ;;  %s14833_s11 = sld [smem:[#allocation22_spill]] }
 0x393   : > { %v13456_v36 = vld [vmem:[%s14834_s23] sm:$0xff]  ;;  %s14836_s23 = sld [smem:[#allocation23_spill]] }
 0x394   : > { %vm1729_vm7 = vcmp.gt.f32.partialorder %v13456_v36, 0.5 }
 0x397   : > { %v1959_v13 = vld [vmem:[%s14833_s11] sm:$0x1] }
 0x3f9   : > { %v1643_v48 = vpop.f32.mrf.mxu1 }
 0x3fa   : > { %11860 = vmatpush3.msra.mxu0 %v1643_v48  ;;  %v1720_v60 = vmul.f32 %v1643_v48, %v13403_v59 }
 0x3fb   : > { %v11858_v49 = vpop.f32.mrf.mxu1  ;;  %11862 = vmatmul.mubr.msk.f32.vlgmr.msra.gmra.mxu0 %vm1235_vm4, %v13375_v47  ;;  %11869 = vmatprep.subr.mxu0 %v13033_v1 }
 0x3fc   : > { %11871 = vmatprep.mubr.msk.f32.mxu0 %vm13034_vm1, %v13033_v1  ;;  %11870 = vmatpush3.msra.mxu0 %v13393_v54  ;;  %v1722_v62 = vsel %vm1721_vm6, %v1720_v60, 0.0  ;;  %v13469_v49 = vld [vmem:[%s14835_s3 + $0x28] sm:$0xff]  ;;  %v13473_v60 = vld [vmem:[%s14835_s3 + $0x20] sm:$0xff] }
 0x3fd   : > { %11879 = vmatprep.subr.mxu0 %v13033_v1  ;;  %v1723_v63 = vrot.slane %v1722_v62, 4 }
 0x3ff   : > { %v1738_v50 = vpop.permute.xlu0 %1737  ;;  %v1724_v2 = vadd.f32 %v1723_v63, %v1722_v62  ;;  %v13478_v63 = vld [vmem:[%s14835_s3 + $0x18] sm:$0xff] }
 0x400   : > { %11865 = vmatpush3.xpose.msk.msra.mxu1 %vm1109_vm3, %v1738_v50 }
 0x401   : > { %11874 = vmatprep.subr.mxu1 %v13033_v1  ;;  %v1725_v3 = vrot.slane %v1724_v2, 2 }
 0x403   : > { %v1736_v53 = vpop.permute.xlu0 %1735  ;;  %v1726_v4 = vadd.f32 %v1725_v3, %v1724_v2  ;;  %v13483_v3 = vld [vmem:[%s14835_s3 + $0x10] sm:$0xff] }
 0x404   : > { %11867 = vmatmul.mubr.msk.f32.vlgmr.msra.gmra.mxu1 %vm1109_vm3, %v1736_v53 }
 0x405   : > { %11875 = vmatpush3.msra.mxu1 %v13385_v51  ;;  %11876 = vmatprep.mubr.msk.f32.mxu1 %vm13034_vm1, %v13033_v1  ;;  %v1727_v5 = vrot.slane %v1726_v4, 1 }
 0x407   : > { %v1728_v7 = vadd.f32 %v1727_v5, %v1726_v4  ;;  %v13488_v5 = vld [vmem:[%s14835_s3 + $0x8] sm:$0xff] }
 0x408   : > { %11877 = vmatmul.mubr.msk.f32.vlgmr.msra.gmra.mxu1 %vm1235_vm4, %v1571_v11 }
 0x409   : > { %11886 = vmatprep.mubr.msk.f32.mxu1 %vm1235_vm4, %v13398_v57 }
 0x4bb   : > { %v1716_v8 = vpop.f32.mrf.mxu0 }
 0x4bc   : > { %v1730_v9 = vsub.f32 %v1716_v8, %v1728_v7  ;;  %v13493_v8 = vld [vmem:[%s14835_s3] sm:$0xff] }
 0x4bd   : > { %v11863_v10 = vpop.f32.mrf.mxu0 }
 0x4be   : > { %v1731_v40 = vsel %vm1729_vm7, %v1730_v9, -1e+30 }
 0x4bf   : > { %v1732_v6 = vmul.f32 1.442695, %v1731_v40 }
 0x4c1   : > { %12737 = vpow2.f32 %v1732_v6 }
 0x4c4   : > { %v1809_v11 = vpop.f32.mrf.mxu1 }
 0x4c5   : > { %11872 = vmatmul.mubr.msk.f32.vlgmr.msra.gmra.mxu0 %vm1235_vm4, %v1809_v11 }
 0x4c6   : > { %v11868_v12 = vpop.f32.mrf.mxu1  ;;  %11880 = vmatpush3.msra.mxu0 %v13385_v51  ;;  %11881 = vmatprep.mubr.msk.f32.mxu0 %vm13034_vm1, %v13033_v1 }
 0x4c7   : > { %11898 = vmatprep.subr.mxu0 %v13033_v1 }
 0x4c8   : > { %v1955_v15 = vpop.f32.mrf.mxu1 }
 0x4c9   : > { %v2033_v18 = vmul.f32 %v1955_v15, %v13368_v46  ;;  %11882 = vmatmul.mubr.msk.f32.vlgmr.msra.gmra.mxu0 %vm1235_vm4, %v1959_v13  ;;  %v2249_v13 = vsub.f32 0.0, %v13313_v56 }
 0x4ca   : > { %v11878_v20 = vpop.f32.mrf.mxu1  ;;  %11914 = vmatprep.mubr.msk.f32.mxu0 %vm13034_vm1, %v13033_v1 }
 0x4cb   : > { %11884 = vmatprep.subr.mxu1 %v2033_v18  ;;  %v2250_v15 = vmul.f32 1.442695, %v2249_v13 }
 0x4cc   : > { %11885 = vmatpush3.msra.mxu1 %v2033_v18 }
 0x4cd   : > { %11887 = vmatmul.mubr.msk.f32.vlgmr.msra.gmra.mxu1 %vm1235_vm4, %v13416_v22  ;;  %11917 = vmatprep.subr.mxu1 %v13033_v1  ;;  %12739 = vpow2.f32 %v2250_v15 }
 0x4ce   : > { %11889 = vmatprep.mubr.msk.f32.mxu1 %vm1235_vm4, %v13421_v23  ;;  %v12738_v10 = vpop.eup %12737 }
 0x4d1   : > { %11890 = vmatmul.mubr.msk.f32.gmra.mxu1 %vm1235_vm4, %v13429_v25 }
 0x4d2   : > { %11892 = vmatprep.mubr.msk.f32.mxu1 %vm1235_vm4, %v13432_v26 }
 0x4d5   : > { %11893 = vmatmul.mubr.msk.f32.gmra.mxu1 %vm1235_vm4, %v13439_v27 }
 0x4d6   : > { %11895 = vmatprep.mubr.msk.f32.mxu1 %vm1235_vm4, %v13442_v28 }
 0x4d9   : > { %11896 = vmatmul.mubr.msk.f32.gmra.mxu1 %vm1235_vm4, %v13449_v29 }
 0x4da   : > { %11933 = vmatprep.mubr.msk.f32.mxu1 %vm13034_vm1, %v13033_v1  ;;  %v12740_v18 = vpop.eup %12739 }
 0x4db   : > { %v2252_v20 = vadd.f32 1.0, %v12740_v18 }
 0x4dd   : > { %12741 = vrcp.f32 %v2252_v20 }
 0x585   : > { %v1882_v30 = vpop.f32.mrf.mxu0 }
 0x586   : > { %v1886_v12 = vmul.f32 %v12738_v10, %v1882_v30 }
 0x587   : > { %v11873_v31 = vpop.f32.mrf.mxu0 }
 0x589   : > { %v2029_v32 = vpop.f32.mrf.mxu0 }
 0x58a   : > { %v2174_v31 = vrot.slane %v2029_v32, %v13267_v14  ;;  %v2280_v32 = vld [vmem:[%s13181_s30 + $0x30] sm:$0xff] }
 0x58b   : > { %v11883_v34 = vpop.f32.mrf.mxu0 }
 0x58c   : > { %v12742_v34 = vpop.eup %12741  ;;  %v2175_v30 = vmul.f32 %v2174_v31, %v13368_v46  ;;  %v2279_v46 = vld [vmem:[%s13181_s30 + $0x28] sm:$0xff]  ;;  %v11096_v31 = vld [vmem:[%s13146_s27 + $0x78] sm:$0xff] }
 0x58d   : > { %v11888_v35 = vpop.f32.mrf.mxu1 }
 0x58e   : > { %v2164_v9 = vmul.f32 %v11888_v35, %v13488_v5 }
 0x58f   : > { %v2124_v37 = vpop.f32.mrf.mxu1 }
 0x590   : > { %v2163_v11 = vmul.f32 %v2124_v37, %v13493_v8 }
 0x591   : > { %v11891_v38 = vpop.f32.mrf.mxu1 }
 0x592   : > { %v2166_v4 = vmul.f32 %v11891_v38, %v13478_v63  ;;  %v2255_v38 = vmul.f32 %v12742_v34, %v13313_v56  ;;  %v2278_v56 = vld [vmem:[%s13181_s30 + $0x20] sm:$0xff]  ;;  %v11095_v34 = vld [vmem:[%s13146_s27 + $0x70] sm:$0xff] }
 0x593   : > { %v2134_v39 = vpop.f32.mrf.mxu1 }
 0x594   : > { %v2165_v7 = vmul.f32 %v2134_v39, %v13483_v3 }
 0x595   : > { %v11894_v41 = vpop.f32.mrf.mxu1 }
 0x596   : > { %v2168_v62 = vmul.f32 %v11894_v41, %v13469_v49 }
 0x597   : > { %v2144_v42 = vpop.f32.mrf.mxu1 }
 0x598   : > { %v2167_v2 = vmul.f32 %v2144_v42, %v13473_v60  ;;  %v2281_v42 = vld [vmem:[%s13181_s30 + $0x38] sm:$0xff] }
 0x599   : > { %v11897_v44 = vpop.f32.mrf.mxu1  ;;  %11918 = vmatpush3.msra.mxu1 %v2281_v42 }
 0x59a   : > { %v2170_v48 = vmul.f32 %v11897_v44, %v13462_v43  ;;  %11919 = vmatprep.subr.mxu1 %v13033_v1  ;;  %v2277_v44 = vld [vmem:[%s13181_s30 + $0x18] sm:$0xff] }
 0x59b   : > { %v2154_v50 = vpop.f32.mrf.mxu1  ;;  %11920 = vmatpush3.msra.mxu1 %v2280_v32 }
 0x59c   : > { %v2169_v53 = vmul.f32 %v2154_v50, %v13465_v45  ;;  %11899 = vmatpush3.msra.mxu0 %v2170_v48  ;;  %11921 = vmatprep.subr.mxu1 %v13033_v1  ;;  %v2276_v48 = vld [vmem:[%s13181_s30 + $0x10] sm:$0xff]  ;;  %v2275_v50 = vld [vmem:[%s13181_s30 + $0x8] sm:$0xff] }
 0x59d   : > { %11900 = vmatprep.subr.mxu0 %v13033_v1  ;;  %11922 = vmatpush3.msra.mxu1 %v2279_v46  ;;  %v11088_v46 = vld [vmem:[%s13141_s6 + $0x1] ss:$0 sm:$0xff] }
 0x59e   : > { %11901 = vmatpush3.msra.mxu0 %v2169_v53  ;;  %11923 = vmatprep.subr.mxu1 %v13033_v1  ;;  %v2274_v53 = vld [vmem:[%s13181_s30] sm:$0xff] }
 0x59f   : > { %11902 = vmatprep.subr.mxu0 %v13033_v1  ;;  %11924 = vmatpush3.msra.mxu1 %v2278_v56 }
 0x5a0   : > { %11903 = vmatpush3.msra.mxu0 %v2168_v62  ;;  %11925 = vmatprep.subr.mxu1 %v13033_v1 }
 0x5a1   : > { %11904 = vmatprep.subr.mxu0 %v13033_v1  ;;  %11926 = vmatpush3.msra.mxu1 %v2277_v44 }
 0x5a2   : > { %11905 = vmatpush3.msra.mxu0 %v2167_v2  ;;  %11927 = vmatprep.subr.mxu1 %v13033_v1 }
 0x5a3   : > { %11906 = vmatprep.subr.mxu0 %v13033_v1  ;;  %11928 = vmatpush3.msra.mxu1 %v2276_v48 }
 0x5a4   : > { %11907 = vmatpush3.msra.mxu0 %v2166_v4  ;;  %11929 = vmatprep.subr.mxu1 %v13033_v1 }
 0x5a5   : > { %11908 = vmatprep.subr.mxu0 %v13033_v1  ;;  %11930 = vmatpush3.msra.mxu1 %v2275_v50 }
 0x5a6   : > { %11909 = vmatpush3.msra.mxu0 %v2165_v7  ;;  %11931 = vmatprep.subr.mxu1 %v13033_v1 }
 0x5a7   : > { %11910 = vmatprep.subr.mxu0 %v13033_v1  ;;  %11932 = vmatpush3.msra.mxu1 %v2274_v53 }
 0x5a8   : > { %11911 = vmatpush3.msra.mxu0 %v2164_v9  ;;  %11936 = vmatprep.subr.mxu1 %v13033_v1  ;;  %v11085_v9 = vld [vmem:[%s14836_s23] ss:$0 sm:$0xff] }
 0x5a9   : > { %11912 = vmatprep.subr.mxu0 %v13033_v1 }
 0x5aa   : > { %11913 = vmatpush3.msra.mxu0 %v2163_v11 }
 0x5ab   : > { %11915 = vmatmul.mubr.msk.f32.vlgmr.msra.gmra.mxu0 %vm1721_vm6, %v1886_v12  ;;  %2409 = vmatprep.subr.mxu0 %v11096_v31 }
 0x5ac   : > { %2449 = vmatprep.mubr.f32.mxu0 %v13033_v1  ;;  %2410 = vmatpush1.msra.mxu0 %v11095_v34 }
 0x66b   : > { %v2245_v35 = vpop.f32.mrf.mxu0 }
 0x66c   : > { %v2246_v37 = vadd.f32 %v2245_v35, %v2175_v30  ;;  %v11094_v30 = vld [vmem:[%s13146_s27 + $0x68] sm:$0xff]  ;;  %v11093_v35 = vld [vmem:[%s13146_s27 + $0x60] sm:$0xff] }
 0x66d   : > { %v11916_v39 = vpop.f32.mrf.mxu0  ;;  %2411 = vmatprep.subr.mxu0 %v11094_v30 }
 0x66e   : > { %v2256_v40 = vmul.f32 %v2255_v38, %v2246_v37  ;;  %v11092_v37 = vld [vmem:[%s13146_s27 + $0x58] sm:$0xff]  ;;  %v11091_v38 = vld [vmem:[%s13146_s27 + $0x50] sm:$0xff]  ;;  %2412 = vmatpush1.msra.mxu0 %v11093_v35  ;;  %v11089_v39 = vld [vmem:[%s13146_s27 + $0x40] sm:$0xff] }
 0x66f   : > { %2413 = vmatprep.subr.mxu0 %v11092_v37 }
 0x670   : > { %v2257_v41 = vmul.f32 %v2256_v40, %v2256_v40  ;;  %2414 = vmatpush1.msra.mxu0 %v11091_v38  ;;  %v11102_v38 = vld [vmem:[%s14827_s2 + $0x1] ss:$0 sm:$0xff] }
 0x672   : > { %v2258_v6 = vsel %vm1721_vm6, %v2257_v41, 0.0 }
 0x673   : > { %2259 = vadd.xlane.f32.xlu0 %v2258_v6 }
 0x6fc   : > { %v2260_v62 = vpop.xlane.xlu0 %2259 }
 0x6fd   : > { %v2262_v2 = vmul.f32 0.015625, %v2260_v62 }
 0x6ff   : > { %v2263_v4 = vadd.f32 1e-05, %v2262_v2 }
 0x701   : > { %12743 = vrsqrt.f32 %v2263_v4 }
 0x70e   : > { %v12744_v7 = vpop.eup %12743 }
 0x70f   : > { %v2265_v10 = vmul.f32 %v12744_v7, %v2256_v40  ;;  %v11099_v40 = vld [vmem:[%s13161_s12 + $0x1] ss:$0 sm:$0xff] }
 0x710   : > { %2463 = vrot.lane.b32.xlu0 %v11099_v40, %s14837_s5 }
 0x711   : > { %v2273_v11 = vmul.f32 %v11085_v9, %v2265_v10  ;;  %v11107_v9 = vld [vmem:[%s14825_s28 + $0x1] sm:$0x1] }
 0x712   : > { %v2799_v10 = vmul.f32 1.442695, %v11107_v9 }
 0x713   : > { %11934 = vmatmul.mubr.msk.f32.vlgmr.msra.gmra.mxu1 %vm1721_vm6, %v2273_v11 }
 0x714   : > { %11938 = vmatprep.mubr.msk.f32.mxu1 %vm13034_vm1, %v13033_v1 }
 0x782   : > { %v2464_v50 = vpop.permute.xlu0 %2463 }
 0x7d3   : > { %v2351_v12 = vpop.f32.mrf.mxu1 }
 0x7d4   : > { %v13528_v13 = vadd.f32 %v2351_v12, %v13286_v33  ;;  %v11090_v33 = vld [vmem:[%s13146_s27 + $0x48] sm:$0xff] }
 0x7d5   : > { %v11935_v15 = vpop.f32.mrf.mxu1  ;;  %2415 = vmatprep.subr.mxu0 %v11090_v33 }
 0x7d6   : > { %v2356_v18 = vmul.f32 %v13528_v13, %v13528_v13  ;;  %2416 = vmatpush1.msra.mxu0 %v11089_v39 }
 0x7d7   : > { %11946 = vmatprep.subr.mxu0 %v13033_v1 }
 0x7d8   : > { %v2357_v20 = vsel %vm1109_vm3, %v2356_v18, 0.0 }
 0x7d9   : > { %2358 = vadd.xlane.f32.xlu1 %v2357_v20  ;;  %v11100_v20 = vld [vmem:[%s14826_s1 + $0x4] sm:$0xf] }
 0x7da   : > { %v2559_v31 = vrot.slane %v11100_v20, %v13267_v14  ;;  %v2635_v35 = vrot.slane %v11100_v20, %v13356_v16  ;;  %v2711_v37 = vrot.slane %v11100_v20, %v13359_v17 }
 0x862   : > { %v2359_v41 = vpop.xlane.xlu1 %2358 }
 0x863   : > { %v2360_v6 = vmul.f32 0.03125, %v2359_v41 }
 0x865   : > { %v2361_v42 = vadd.f32 1e-05, %v2360_v6 }
 0x867   : > { %12745 = vrsqrt.f32 %v2361_v42 }
 0x874   : > { %v12746_v32 = vpop.eup %12745 }
 0x875   : > { %v2363_v56 = vmul.f32 %v12746_v32, %v13528_v13 }
 0x877   : > { %v2372_v44 = vmul.f32 %v11088_v46, %v2363_v56  ;;  %v2787_v46 = vrot.slane %v11100_v20, %v13364_v24 }
 0x879   : > { %11097 = vmatmul.mubr.msk.f32.vlgmr.msra.gmra.mxu0 %vm1109_vm3, %v2372_v44 }
 0x87a   : > { %11948 = vmatprep.mubr.msk.f32.mxu0 %vm13034_vm1, %v13033_v1 }
 0x939   : > { %v2451_v48 = vpop.f32.mrf.mxu0 }
 0x93a   : > { %11937 = vmatpush3.msra.mxu1 %v2451_v48  ;;  %11947 = vmatpush3.msra.mxu0 %v2451_v48 }
 0x93b   : > { %v13549_v53 = vpop.f32.mrf.mxu0  ;;  %11939 = vmatmul.mubr.msk.f32.vlgmr.msra.gmra.mxu1 %vm1235_vm4, %v13308_v52  ;;  %11941 = vmatprep.subr.mxu1 %v13033_v1 }
 0x93c   : > { %v2466_v62 = vadd.f32 %v2464_v50, %v13549_v53  ;;  %11942 = vmatpush3.msra.mxu1 %v2451_v48  ;;  %11943 = vmatprep.mubr.msk.f32.mxu1 %vm13034_vm1, %v13033_v1 }
 0x93d   : > { %11951 = vmatprep.subr.mxu1 %v13033_v1  ;;  %11949 = vmatmul.mubr.msk.f32.vlgmr.msra.gmra.mxu0 %vm1235_vm4, %v13311_v55 }
 0x93e   : > { %v2468_v2 = vmin.f32 %v2466_v62, 20.0  ;;  %11956 = vmatprep.subr.mxu0 %v13033_v1  ;;  %11958 = vmatprep.mubr.msk.f32.mxu0 %vm13034_vm1, %v13033_v1  ;;  %vm2467_vm8 = vcmp.gt.f32.partialorder %v2466_v62, 20.0 }
 0x93f   : > { %11944 = vmatmul.mubr.msk.f32.vlgmr.msra.gmra.mxu1 %vm1235_vm4, %v13322_v58  ;;  %11957 = vmatpush3.msra.mxu0 %v13343_v0 }
 0x940   : > { %v2469_v52 = vmul.f32 1.442695, %v2468_v2  ;;  %11952 = vmatpush3.msra.mxu1 %v2451_v48  ;;  %11953 = vmatprep.mubr.msk.f32.mxu1 %vm13034_vm1, %v13033_v1 }
 0x941   : > { %11961 = vmatprep.subr.mxu1 %v13033_v1  ;;  %11966 = vmatprep.subr.mxu0 %v13033_v1 }
 0x942   : > { %12747 = vpow2.f32 %v2469_v52 }
 0x943   : > { %11954 = vmatmul.mubr.msk.f32.vlgmr.msra.gmra.mxu1 %vm1235_vm4, %v13335_v61 }
 0x944   : > { %11963 = vmatprep.mubr.msk.f32.mxu1 %vm13034_vm1, %v13033_v1 }
 0x94f   : > { %v12748_v55 = vpop.eup %12747 }
 0x950   : > { %v2471_v58 = vadd.f32 1.0, %v12748_v55 }
 0x952   : > { %12749 = vlog2.f32 %v2471_v58 }
 0x953   : > { %12751 = vpow2.f32 %v2799_v10 }
 0x95f   : > { %v12750_v0 = vpop.eup %12749 }
 0x960   : > { %v2473_v4 = vmul.f32 0.6931472, %v12750_v0  ;;  %v12752_v11 = vpop.eup %12751 }
 0x961   : > { %v2801_v12 = vsub.f32 0.0, %v12752_v11 }
 0x962   : > { %v2474_v7 = vsel %vm2467_vm8, %v2466_v62, %v2473_v4 }
 0x963   : > { %2809 = vrot.lane.b32.xlu1 %v2474_v7, %s14837_s5  ;;  %v2806_v61 = vrot.slane %v2801_v12, %v13267_v14 }
 0x9d5   : > { %v2810_v15 = vpop.permute.xlu1 %2809 }
 0x9d6   : > { %v2812_v18 = vmul.f32 %v2810_v15, %v2806_v61 }
 0x9d8   : > { %11959 = vmatmul.mubr.msk.f32.vlgmr.msra.gmra.mxu0 %vm1235_vm4, %v2812_v18 }
 0x9d9   : > { %11968 = vmatprep.mubr.msk.f32.mxu0 %vm13034_vm1, %v13033_v1 }
 0x9fb   : > { %v2552_v34 = vpop.f32.mrf.mxu1 }
 0x9fc   : > { %v2560_v30 = vmul.f32 %v2559_v31, %v2552_v34 }
 0x9fd   : > { %v11940_v33 = vpop.f32.mrf.mxu1  ;;  %v2704_v39 = vpop.f32.mrf.mxu0 }
 0x9fe   : > { %v2561_v6 = vadd.f32 %v11102_v38, %v2560_v30  ;;  %v2712_v32 = vmul.f32 %v2711_v37, %v2704_v39 }
 0x9ff   : > { %v2628_v40 = vpop.f32.mrf.mxu1  ;;  %v11950_v41 = vpop.f32.mrf.mxu0 }
 0xa00   : > { %v2636_v42 = vmul.f32 %v2635_v35, %v2628_v40 }
 0xa01   : > { %v11945_v56 = vpop.f32.mrf.mxu1 }
 0xa02   : > { %v2637_v44 = vadd.f32 %v2636_v42, %v2561_v6 }
 0xa03   : > { %v2780_v48 = vpop.f32.mrf.mxu1 }
 0xa04   : > { %v2713_v50 = vadd.f32 %v2712_v32, %v2637_v44  ;;  %v2788_v62 = vmul.f32 %v2787_v46, %v2780_v48 }
 0xa05   : > { %v11955_v2 = vpop.f32.mrf.mxu1 }
 0xa06   : > { %v2789_v52 = vadd.f32 %v2788_v62, %v2713_v50 }
 0xa08   : > { %v2790_v55 = vsub.f32 0.0, %v2789_v52 }
 0xa0a   : > { %v2791_v58 = vmul.f32 1.442695, %v2790_v55 }
 0xa0c   : > { %12753 = vpow2.f32 %v2791_v58 }
 0xa19   : > { %v12754_v0 = vpop.eup %12753 }
 0xa1a   : > { %v2793_v4 = vadd.f32 1.0, %v12754_v0 }
 0xa1c   : > { %12755 = vrcp.f32 %v2793_v4 }
 0xa29   : > { %v12756_v7 = vpop.eup %12755 }
 0xa2a   : > { %v13586_v9 = vmul.f32 %v12756_v7, %v2789_v52 }
 0xa2c   : > { %2971 = vrot.lane.b32.xlu0 %v13586_v9, %s14837_s5  ;;  %2969 = vrot.lane.b32.xlu1 %v13586_v9, %s14838_s8 }
 0xa98   : > { %v2882_v10 = vpop.f32.mrf.mxu0 }
 0xa99   : > { %11962 = vmatpush3.msra.mxu1 %v2882_v10 }
 0xa9a   : > { %v11960_v11 = vpop.f32.mrf.mxu0  ;;  %11964 = vmatmul.mubr.msk.f32.vlgmr.msra.gmra.mxu1 %vm1235_vm4, %v13375_v47  ;;  %11971 = vmatprep.subr.mxu1 %v13033_v1  ;;  %v2956_v47 = vmul.f32 %v2882_v10, %v13403_v59 }
 0xa9b   : > { %11972 = vmatpush3.msra.mxu1 %v13393_v54  ;;  %11973 = vmatprep.mubr.msk.f32.mxu1 %vm13034_vm1, %v13033_v1 }
 0xa9c   : > { %11981 = vmatprep.subr.mxu1 %v13033_v1  ;;  %v2957_v54 = vsel %vm1721_vm6, %v2956_v47, 0.0 }
 0xa9d   : > { %v2958_v18 = vrot.slane %v2957_v54, 4 }
 0xa9e   : > { %v2972_v12 = vpop.permute.xlu0 %2971  ;;  %v2970_v61 = vpop.permute.xlu1 %2969 }
 0xa9f   : > { %11967 = vmatpush3.xpose.msk.msra.mxu0 %vm1109_vm3, %v2972_v12  ;;  %v2959_v20 = vadd.f32 %v2958_v18, %v2957_v54  ;;  %v11134_v18 = vld [vmem:[%s13181_s30 + $0x78] sm:$0xff] }
 0xaa0   : > { %11976 = vmatprep.subr.mxu0 %v13033_v1 }
 0xaa1   : > { %v2960_v31 = vrot.slane %v2959_v20, 2 }
 0xaa2   : > { %11969 = vmatmul.mubr.msk.f32.vlgmr.msra.gmra.mxu0 %vm1109_vm3, %v2970_v61 }
 0xaa3   : > { %11977 = vmatpush3.msra.mxu0 %v13385_v51  ;;  %11978 = vmatprep.mubr.msk.f32.mxu0 %vm13034_vm1, %v13033_v1  ;;  %v2961_v34 = vadd.f32 %v2960_v31, %v2959_v20  ;;  %v11133_v20 = vld [vmem:[%s13181_s30 + $0x70] sm:$0xff]  ;;  %v11130_v31 = vld [vmem:[%s13181_s30 + $0x58] sm:$0xff] }
 0xaa5   : > { %v2962_v30 = vrot.slane %v2961_v34, 1 }
 0xaa6   : > { %11979 = vmatmul.mubr.msk.f32.vlgmr.msra.gmra.mxu0 %vm1235_vm4, %v2810_v15 }
 0xaa7   : > { %11988 = vmatprep.mubr.msk.f32.mxu0 %vm1235_vm4, %v13398_v57  ;;  %v2963_v35 = vadd.f32 %v2962_v30, %v2961_v34  ;;  %v11114_v57 = vld [vmem:[%s14833_s11 + $0x1] sm:$0x1]  ;;  %v11129_v34 = vld [vmem:[%s13181_s30 + $0x50] sm:$0xff]  ;;  %v11128_v30 = vld [vmem:[%s13181_s30 + $0x48] sm:$0xff] }
 0xb5a   : > { %v2952_v37 = vpop.f32.mrf.mxu1 }
 0xb5b   : > { %v2964_v38 = vsub.f32 %v2952_v37, %v2963_v35  ;;  %v11127_v35 = vld [vmem:[%s13181_s30 + $0x40] sm:$0xff] }
 0xb5c   : > { %v11965_v33 = vpop.f32.mrf.mxu1 }
 0xb62   : > { %v3043_v39 = vpop.f32.mrf.mxu0 }
 0xb63   : > { %11974 = vmatmul.mubr.msk.f32.vlgmr.msra.gmra.mxu1 %vm1235_vm4, %v3043_v39 }
 0xb64   : > { %v11970_v15 = vpop.f32.mrf.mxu0  ;;  %11982 = vmatpush3.msra.mxu1 %v13385_v51  ;;  %11983 = vmatprep.mubr.msk.f32.mxu1 %vm13034_vm1, %v13033_v1 }
 0xb65   : > { %12000 = vmatprep.subr.mxu1 %v13033_v1  ;;  %v11126_v15 = vld [vmem:[%s14836_s23 + $0x1] ss:$0 sm:$0xff] }
 0xb66   : > { %v3189_v59 = vpop.f32.mrf.mxu0 }
 0xb67   : > { %v3268_v40 = vmul.f32 %v3189_v59, %v13586_v9  ;;  %11984 = vmatmul.mubr.msk.f32.vlgmr.msra.gmra.mxu1 %vm1235_vm4, %v11114_v57 }
 0xb68   : > { %v11980_v41 = vpop.f32.mrf.mxu0  ;;  %12016 = vmatprep.mubr.msk.f32.mxu1 %vm13034_vm1, %v13033_v1 }
 0xb69   : > { %11986 = vmatprep.subr.mxu0 %v3268_v40 }
 0xb6a   : > { %11987 = vmatpush3.msra.mxu0 %v3268_v40 }
 0xb6b   : > { %11989 = vmatmul.mubr.msk.f32.vlgmr.msra.gmra.mxu0 %vm1235_vm4, %v13416_v22  ;;  %12019 = vmatprep.subr.mxu0 %v13033_v1 }
 0xb6c   : > { %11991 = vmatprep.mubr.msk.f32.mxu0 %vm1235_vm4, %v13421_v23  ;;  %12020 = vmatpush3.msra.mxu0 %v11134_v18 }
 0xb6d   : > { %12021 = vmatprep.subr.mxu0 %v13033_v1 }
 0xb6e   : > { %12022 = vmatpush3.msra.mxu0 %v11133_v20 }
 0xb6f   : > { %11992 = vmatmul.mubr.msk.f32.gmra.mxu0 %vm1235_vm4, %v13429_v25  ;;  %12023 = vmatprep.subr.mxu0 %v13033_v1 }
 0xb70   : > { %11994 = vmatprep.mubr.msk.f32.mxu0 %vm1235_vm4, %v13432_v26 }
 0xb73   : > { %11995 = vmatmul.mubr.msk.f32.gmra.mxu0 %vm1235_vm4, %v13439_v27  ;;  %v2965_v27 = vsel %vm1729_vm7, %v2964_v38, -1e+30 }
 0xb74   : > { %11997 = vmatprep.mubr.msk.f32.mxu0 %vm1235_vm4, %v13442_v28  ;;  %v2966_v56 = vmul.f32 1.442695, %v2965_v27  ;;  %v11140_v27 = vld [vmem:[%s13146_s27 + $0x90] sm:$0xff] }
 0xb76   : > { %12757 = vpow2.f32 %v2966_v56  ;;  %v11148_v56 = vld [vmem:[%s13161_s12 + $0x2] ss:$0 sm:$0xff] }
 0xb77   : > { %11998 = vmatmul.mubr.msk.f32.gmra.mxu0 %vm1235_vm4, %v13449_v29 }
 0xb78   : > { %12035 = vmatprep.mubr.msk.f32.mxu0 %vm13034_vm1, %v13033_v1 }
 0xc23   : > { %v3116_v51 = vpop.f32.mrf.mxu1 }
 0xc25   : > { %v11975_v22 = vpop.f32.mrf.mxu1 }
 0xc27   : > { %v3264_v23 = vpop.f32.mrf.mxu1 }
 0xc29   : > { %v11985_v6 = vpop.f32.mrf.mxu1 }
 0xc2a   : > { %v11145_v6 = vld [vmem:[%s13146_s27 + $0xb8] sm:$0xff] }
 0xc2b   : > { %v11990_v25 = vpop.f32.mrf.mxu0 }
 0xc2d   : > { %v3335_v42 = vpop.f32.mrf.mxu0 }
 0xc2f   : > { %v11993_v32 = vpop.f32.mrf.mxu0 }
 0xc30   : > { %v3377_v52 = vmul.f32 %v11993_v32, %v13478_v63  ;;  %v3460_v63 = vsub.f32 0.0, %v13549_v53  ;;  %v11142_v32 = vld [vmem:[%s13146_s27 + $0xa0] sm:$0xff] }
 0xc31   : > { %v3345_v26 = vpop.f32.mrf.mxu0 }
 0xc33   : > { %v11996_v46 = vpop.f32.mrf.mxu0 }
 0xc34   : > { %v3379_v62 = vmul.f32 %v11996_v46, %v13469_v49  ;;  %v12758_v49 = vpop.eup %12757  ;;  %v11138_v46 = vld [vmem:[%s13146_s27 + $0x80] sm:$0xff] }
 0xc35   : > { %v3355_v28 = vpop.f32.mrf.mxu0  ;;  %v3120_v55 = vmul.f32 %v12758_v49, %v3116_v51  ;;  %v13706_v49 = vld [vmem:[%s13101_s24] sm:$0xff] }
 0xc36   : > { %v3378_v2 = vmul.f32 %v3355_v28, %v13473_v60  ;;  %v3374_v60 = vmul.f32 %v3335_v42, %v13493_v8  ;;  %v3385_v8 = vrot.slane %v3264_v23, %v13267_v14  ;;  %v11143_v42 = vld [vmem:[%s13146_s27 + $0xa8] sm:$0xff] }
 0xc37   : > { %v11999_v44 = vpop.f32.mrf.mxu0 }
 0xc38   : > { %v3381_v29 = vmul.f32 %v11999_v44, %v13462_v43  ;;  %v3376_v43 = vmul.f32 %v3345_v26, %v13483_v3  ;;  %v3461_v3 = vmul.f32 1.442695, %v3460_v63  ;;  %v3386_v4 = vmul.f32 %v3385_v8, %v13586_v9  ;;  %v11132_v9 = vld [vmem:[%s13181_s30 + $0x68] sm:$0xff]  ;;  %v11141_v26 = vld [vmem:[%s13146_s27 + $0x98] sm:$0xff] }
 0xc39   : > { %v3365_v48 = vpop.f32.mrf.mxu0  ;;  %12024 = vmatpush3.msra.mxu0 %v11132_v9  ;;  %v13737_v8 = vld [vmem:[%s13101_s24 + $0x18] sm:$0xff] }
 0xc3a   : > { %v3380_v50 = vmul.f32 %v3365_v48, %v13465_v45  ;;  %12001 = vmatpush3.msra.mxu1 %v3381_v29  ;;  %v3375_v45 = vmul.f32 %v11990_v25, %v13488_v5  ;;  %12759 = vpow2.f32 %v3461_v3  ;;  %12025 = vmatprep.subr.mxu0 %v13033_v1  ;;  %v11144_v25 = vld [vmem:[%s13146_s27 + $0xb0] sm:$0xff]  ;;  %v13724_v3 = vld [vmem:[%s13101_s24 + $0x8] sm:$0xff] }
 0xc3b   : > { %12002 = vmatprep.subr.mxu1 %v13033_v1 }
 0xc3c   : > { %12003 = vmatpush3.msra.mxu1 %v3380_v50  ;;  %v11137_v50 = vld [vmem:[%s13141_s6 + $0x2] ss:$0 sm:$0xff] }
 0xc3d   : > { %12004 = vmatprep.subr.mxu1 %v13033_v1 }
 0xc3e   : > { %12005 = vmatpush3.msra.mxu1 %v3379_v62 }
 0xc3f   : > { %12006 = vmatprep.subr.mxu1 %v13033_v1 }
 0xc40   : > { %12007 = vmatpush3.msra.mxu1 %v3378_v2 }
 0xc41   : > { %12008 = vmatprep.subr.mxu1 %v13033_v1 }
 0xc42   : > { %12009 = vmatpush3.msra.mxu1 %v3377_v52 }
 0xc43   : > { %12010 = vmatprep.subr.mxu1 %v13033_v1 }
 0xc44   : > { %12011 = vmatpush3.msra.mxu1 %v3376_v43 }
 0xc45   : > { %12012 = vmatprep.subr.mxu1 %v13033_v1 }
 0xc46   : > { %12013 = vmatpush3.msra.mxu1 %v3375_v45 }
 0xc47   : > { %12014 = vmatprep.subr.mxu1 %v13033_v1  ;;  %v12760_v5 = vpop.eup %12759 }
 0xc48   : > { %12015 = vmatpush3.msra.mxu1 %v3374_v60  ;;  %v3463_v58 = vadd.f32 1.0, %v12760_v5  ;;  %v13729_v5 = vld [vmem:[%s14824_s26] sm:$0xff] }
 0xc49   : > { %12017 = vmatmul.mubr.msk.f32.vlgmr.msra.gmra.mxu1 %vm1721_vm6, %v3120_v55  ;;  %3621 = vmatprep.subr.mxu1 %v11145_v6  ;;  %v13716_v55 = vld [vmem:[%s13101_s24 + $0x10] sm:$0xff] }
 0xc4a   : > { %3661 = vmatprep.mubr.f32.mxu1 %v13033_v1  ;;  %12761 = vrcp.f32 %v3463_v58  ;;  %3622 = vmatpush1.msra.mxu1 %v11144_v25 }
 0xc4b   : > { %3623 = vmatprep.subr.mxu1 %v11143_v42 }
 0xc4c   : > { %3624 = vmatpush1.msra.mxu1 %v11142_v32 }
 0xc4d   : > { %3625 = vmatprep.subr.mxu1 %v11141_v26 }
 0xc4e   : > { %3626 = vmatpush1.msra.mxu1 %v11140_v27 }
 0xc57   : > { %v12762_v0 = vpop.eup %12761 }
 0xc58   : > { %v3466_v11 = vmul.f32 %v12762_v0, %v13549_v53  ;;  %v11131_v53 = vld [vmem:[%s13181_s30 + $0x60] sm:$0xff] }
 0xc59   : > { %12026 = vmatpush3.msra.mxu0 %v11131_v53  ;;  %v11149_v53 = vld [vmem:[%s14826_s1 + $0x8] sm:$0xf] }
 0xc5a   : > { %12027 = vmatprep.subr.mxu0 %v13033_v1 }
 0xc5b   : > { %12028 = vmatpush3.msra.mxu0 %v11130_v31  ;;  %v3771_v31 = vrot.slane %v11149_v53, %v13267_v14 }
 0xc5c   : > { %12029 = vmatprep.subr.mxu0 %v13033_v1 }
 0xc5d   : > { %12030 = vmatpush3.msra.mxu0 %v11129_v34 }
 0xc5e   : > { %12031 = vmatprep.subr.mxu0 %v13033_v1 }
 0xc5f   : > { %12032 = vmatpush3.msra.mxu0 %v11128_v30 }
 0xc60   : > { %12033 = vmatprep.subr.mxu0 %v13033_v1 }
 0xc61   : > { %12034 = vmatpush3.msra.mxu0 %v11127_v35  ;;  %v3847_v35 = vrot.slane %v11149_v53, %v13356_v16 }
 0xc62   : > { %12038 = vmatprep.subr.mxu0 %v13033_v1 }
 0xd09   : > { %v3456_v7 = vpop.f32.mrf.mxu1 }
 0xd0a   : > { %v3457_v10 = vadd.f32 %v3456_v7, %v3386_v4 }
 0xd0b   : > { %v12018_v12 = vpop.f32.mrf.mxu1 }
 0xd0c   : > { %v3467_v61 = vmul.f32 %v3466_v11, %v3457_v10  ;;  %v11156_v12 = vld [vmem:[%s14825_s28 + $0x2] sm:$0x1] }
 0xd0e   : > { %v3468_v47 = vmul.f32 %v3467_v61, %v3467_v61 }
 0xd10   : > { %v3469_v54 = vsel %vm1721_vm6, %v3468_v47, 0.0 }
 0xd11   : > { %3470 = vadd.xlane.f32.xlu0 %v3469_v54 }
 0xd27   : > { %3675 = vrot.lane.b32.xlu0 %v11148_v56, %s14837_s5 }
 0xd9a   : > { %v3471_v37 = vpop.xlane.xlu0 %3470 }
 0xd9b   : > { %v3472_v38 = vmul.f32 0.015625, %v3471_v37  ;;  %v3923_v37 = vrot.slane %v11149_v53, %v13359_v17 }
 0xd9d   : > { %v3473_v33 = vadd.f32 1e-05, %v3472_v38  ;;  %v11151_v38 = vld [vmem:[%s14827_s2 + $0x2] ss:$0 sm:$0xff] }
 0xd9e   : > { %v3676_v43 = vpop.permute.xlu0 %3675 }
 0xd9f   : > { %12763 = vrsqrt.f32 %v3473_v33 }
 0xdac   : > { %v12764_v39 = vpop.eup %12763 }
 0xdad   : > { %v3475_v57 = vmul.f32 %v12764_v39, %v3467_v61  ;;  %v4011_v61 = vmul.f32 1.442695, %v11156_v12 }
 0xdaf   : > { %v3484_v59 = vmul.f32 %v11126_v15, %v3475_v57 }
 0xdb1   : > { %12036 = vmatmul.mubr.msk.f32.vlgmr.msra.gmra.mxu0 %vm1721_vm6, %v3484_v59 }
 0xdb2   : > { %12040 = vmatprep.mubr.msk.f32.mxu0 %vm13034_vm1, %v13033_v1 }
 0xe71   : > { %v3563_v40 = vpop.f32.mrf.mxu0 }
 0xe72   : > { %v13682_v41 = vadd.f32 %v3563_v40, %v13528_v13  ;;  %v11139_v13 = vld [vmem:[%s13146_s27 + $0x88] sm:$0xff] }
 0xe73   : > { %v12037_v51 = vpop.f32.mrf.mxu0  ;;  %3627 = vmatprep.subr.mxu1 %v11139_v13 }
 0xe74   : > { %v3568_v22 = vmul.f32 %v13682_v41, %v13682_v41  ;;  %3628 = vmatpush1.msra.mxu1 %v11138_v46 }
 0xe75   : > { %12048 = vmatprep.subr.mxu1 %v13033_v1 }
 0xe76   : > { %v3569_v23 = vsel %vm1109_vm3, %v3568_v22, 0.0  ;;  %v3999_v22 = vrot.slane %v11149_v53, %v13364_v24 }
 0xe77   : > { %3570 = vadd.xlane.f32.xlu1 %v3569_v23 }
 0xf00   : > { %v3571_v28 = vpop.xlane.xlu1 %3570 }
 0xf01   : > { %v3572_v44 = vmul.f32 0.03125, %v3571_v28 }
 0xf03   : > { %v3573_v29 = vadd.f32 1e-05, %v3572_v44 }
 0xf05   : > { %12765 = vrsqrt.f32 %v3573_v29 }
 0xf12   : > { %v12766_v48 = vpop.eup %12765 }
 0xf13   : > { %v3575_v62 = vmul.f32 %v12766_v48, %v13682_v41 }
 0xf15   : > { %v3584_v2 = vmul.f32 %v11137_v50, %v3575_v62  ;;  %v13762_v62 = vld [vmem:[%s14828_s7] sm:$0xff] }
 0xf17   : > { %11146 = vmatmul.mubr.msk.f32.vlgmr.msra.gmra.mxu1 %vm1109_vm3, %v3584_v2  ;;  %v13768_v2 = vld [vmem:[%s14830_s18] sm:$0xff] }
 0xf18   : > { %12050 = vmatprep.mubr.msk.f32.mxu1 %vm13034_vm1, %v13033_v1 }
 0xfd7   : > { %v3663_v52 = vpop.f32.mrf.mxu1 }
 0xfd8   : > { %12039 = vmatpush3.msra.mxu0 %v3663_v52  ;;  %12049 = vmatpush3.msra.mxu1 %v3663_v52 }
 0xfd9   : > { %v13703_v45 = vpop.f32.mrf.mxu1  ;;  %12041 = vmatmul.mubr.msk.f32.vlgmr.msra.gmra.mxu0 %vm1235_vm4, %v13706_v49  ;;  %12043 = vmatprep.subr.mxu0 %v13033_v1 }
 0xfda   : > { %v3678_v60 = vadd.f32 %v3676_v43, %v13703_v45  ;;  %12044 = vmatpush3.msra.mxu0 %v3663_v52  ;;  %12045 = vmatprep.mubr.msk.f32.mxu0 %vm13034_vm1, %v13033_v1 }
 0xfdb   : > { %12053 = vmatprep.subr.mxu0 %v13033_v1  ;;  %12051 = vmatmul.mubr.msk.f32.vlgmr.msra.gmra.mxu1 %vm1235_vm4, %v13716_v55 }
 0xfdc   : > { %v3680_v63 = vmin.f32 %v3678_v60, 20.0  ;;  %12058 = vmatprep.subr.mxu1 %v13033_v1  ;;  %12060 = vmatprep.mubr.msk.f32.mxu1 %vm13034_vm1, %v13033_v1  ;;  %vm3679_vm9 = vcmp.gt.f32.partialorder %v3678_v60, 20.0 }
 0xfdd   : > { %12046 = vmatmul.mubr.msk.f32.vlgmr.msra.gmra.mxu0 %vm1235_vm4, %v13724_v3  ;;  %12059 = vmatpush3.msra.mxu1 %v13729_v5 }
 0xfde   : > { %v3681_v58 = vmul.f32 1.442695, %v3680_v63  ;;  %12054 = vmatpush3.msra.mxu0 %v3663_v52  ;;  %12055 = vmatprep.mubr.msk.f32.mxu0 %vm13034_vm1, %v13033_v1  ;;  %v13785_v63 = vld [vmem:[%s14831_s22] sm:$0xff] }
 0xfdf   : > { %12063 = vmatprep.subr.mxu0 %v13033_v1  ;;  %12068 = vmatprep.subr.mxu1 %v13033_v1 }
 0xfe0   : > { %12767 = vpow2.f32 %v3681_v58  ;;  %v13790_v58 = vld [vmem:[%s14832_s0] sm:$0xff] }
 0xfe1   : > { %12056 = vmatmul.mubr.msk.f32.vlgmr.msra.gmra.mxu0 %vm1235_vm4, %v13737_v8 }
 0xfe2   : > { %12065 = vmatprep.mubr.msk.f32.mxu0 %vm13034_vm1, %v13033_v1 }
 0xfed   : > { %v12768_v0 = vpop.eup %12767 }
 0xfee   : > { %v3683_v4 = vadd.f32 1.0, %v12768_v0 }
 0xff0   : > { %12769 = vlog2.f32 %v3683_v4 }
 0xff1   : > { %12771 = vpow2.f32 %v4011_v61 }
 0xffd   : > { %v12770_v7 = vpop.eup %12769 }
 0xffe   : > { %v3685_v10 = vmul.f32 0.6931472, %v12770_v7  ;;  %v12772_v47 = vpop.eup %12771 }
 0xfff   : > { %v4013_v54 = vsub.f32 0.0, %v12772_v47 }
0x1000   : > { %v3686_v11 = vsel %vm3679_vm9, %v3678_v60, %v3685_v10  ;;  %v13778_v60 = vld [vmem:[%s14829_s10] sm:$0xff] }
0x1001   : > { %4021 = vrot.lane.b32.xlu1 %v3686_v11, %s14837_s5  ;;  %v4018_v18 = vrot.slane %v4013_v54, %v13267_v14 }
0x1073   : > { %v4022_v20 = vpop.permute.xlu1 %4021 }
0x1074   : > { %v4024_v9 = vmul.f32 %v4022_v20, %v4018_v18 }
0x1076   : > { %12061 = vmatmul.mubr.msk.f32.vlgmr.msra.gmra.mxu1 %vm1235_vm4, %v4024_v9 }
0x1077   : > { %12070 = vmatprep.mubr.msk.f32.mxu1 %vm13034_vm1, %v13033_v1 }
0x1099   : > { %v3764_v34 = vpop.f32.mrf.mxu0 }
0x109a   : > { %v3772_v30 = vmul.f32 %v3771_v31, %v3764_v34  ;;  %v11163_v31 = vld [vmem:[%s14833_s11 + $0x2] sm:$0x1] }
0x109b   : > { %v12042_v33 = vpop.f32.mrf.mxu0  ;;  %v3916_v39 = vpop.f32.mrf.mxu1 }
0x109c   : > { %v3773_v59 = vadd.f32 %v11151_v38, %v3772_v30  ;;  %v3924_v51 = vmul.f32 %v3923_v37, %v3916_v39  ;;  %v13805_v37 = vld [vmem:[%s14831_s22 + $0x8] sm:$0xff]  ;;  %v13811_v38 = vld [vmem:[%s14831_s22 + $0x10] sm:$0xff]  ;;  %v13816_v33 = vld [vmem:[%s14831_s22 + $0x18] sm:$0xff] }
0x109d   : > { %v3840_v15 = vpop.f32.mrf.mxu0  ;;  %v12052_v57 = vpop.f32.mrf.mxu1  ;;  %v13821_v39 = vld [vmem:[%s14831_s22 + $0x20] sm:$0xff] }
0x109e   : > { %v3848_v40 = vmul.f32 %v3847_v35, %v3840_v15  ;;  %v13826_v15 = vld [vmem:[%s14831_s22 + $0x28] sm:$0xff]  ;;  %v13831_v57 = vld [vmem:[%s14831_s22 + $0x30] sm:$0xff] }
0x109f   : > { %v12047_v23 = vpop.f32.mrf.mxu0 }
0x10a0   : > { %v3849_v6 = vadd.f32 %v3848_v40, %v3773_v59  ;;  %v13836_v59 = vld [vmem:[%s14831_s22 + $0x38] sm:$0xff] }
0x10a1   : > { %v3992_v25 = vpop.f32.mrf.mxu0 }
0x10a2   : > { %v3925_v42 = vadd.f32 %v3924_v51, %v3849_v6  ;;  %v4000_v32 = vmul.f32 %v3999_v22, %v3992_v25 }
0x10a3   : > { %v12057_v26 = vpop.f32.mrf.mxu0 }
0x10a4   : > { %v4001_v27 = vadd.f32 %v4000_v32, %v3925_v42 }
0x10a6   : > { %v4002_v13 = vsub.f32 0.0, %v4001_v27 }
0x10a8   : > { %v4003_v46 = vmul.f32 1.442695, %v4002_v13 }
0x10aa   : > { %12773 = vpow2.f32 %v4003_v46 }
0x10b7   : > { %v12774_v56 = vpop.eup %12773 }
0x10b8   : > { %v4005_v28 = vadd.f32 1.0, %v12774_v56 }
0x10ba   : > { %12775 = vrcp.f32 %v4005_v28  ;;  %v13845_v28 = vld [vmem:[%s14835_s3 + $0x38] sm:$0xff] }
0x10c7   : > { %v12776_v44 = vpop.eup %12775 }
0x10c8   : > { %v13755_v29 = vmul.f32 %v12776_v44, %v4001_v27 }
0x10ca   : > { %4183 = vrot.lane.b32.xlu0 %v13755_v29, %s14837_s5  ;;  %4181 = vrot.lane.b32.xlu1 %v13755_v29, %s14838_s8 }
0x1136   : > { %v4094_v48 = vpop.f32.mrf.mxu1 }
0x1137   : > { %12064 = vmatpush3.msra.mxu0 %v4094_v48  ;;  %v4168_v0 = vmul.f32 %v13790_v58, %v4094_v48 }
0x1138   : > { %v12062_v50 = vpop.f32.mrf.mxu1  ;;  %12066 = vmatmul.mubr.msk.f32.vlgmr.msra.gmra.mxu0 %vm1235_vm4, %v13762_v62  ;;  %12073 = vmatprep.subr.mxu0 %v13033_v1 }
0x1139   : > { %12074 = vmatpush3.msra.mxu0 %v13768_v2  ;;  %12075 = vmatprep.mubr.msk.f32.mxu0 %vm13034_vm1, %v13033_v1  ;;  %v4169_v4 = vsel %vm1721_vm6, %v4168_v0, 0.0  ;;  %v13849_v50 = vld [vmem:[%s14835_s3 + $0x30] sm:$0xff] }
0x113a   : > { %12083 = vmatprep.subr.mxu0 %v13033_v1  ;;  %v4170_v7 = vrot.slane %v4169_v4, 4 }
0x113c   : > { %v4184_v52 = vpop.permute.xlu0 %4183  ;;  %v4182_v43 = vpop.permute.xlu1 %4181  ;;  %v4171_v10 = vadd.f32 %v4170_v7, %v4169_v4  ;;  %v13859_v4 = vld [vmem:[%s14835_s3 + $0x20] sm:$0xff] }
0x113d   : > { %12069 = vmatpush3.xpose.msk.msra.mxu1 %vm1109_vm3, %v4184_v52 }
0x113e   : > { %12078 = vmatprep.subr.mxu1 %v13033_v1  ;;  %v4172_v11 = vrot.slane %v4171_v10, 2 }
0x1140   : > { %12071 = vmatmul.mubr.msk.f32.vlgmr.msra.gmra.mxu1 %vm1109_vm3, %v4182_v43  ;;  %v4173_v12 = vadd.f32 %v4172_v11, %v4171_v10  ;;  %v13854_v43 = vld [vmem:[%s14835_s3 + $0x28] sm:$0xff]  ;;  %v13864_v10 = vld [vmem:[%s14835_s3 + $0x18] sm:$0xff] }
0x1141   : > { %12079 = vmatpush3.msra.mxu1 %v13778_v60  ;;  %12080 = vmatprep.mubr.msk.f32.mxu1 %vm13034_vm1, %v13033_v1 }
0x1142   : > { %v4174_v61 = vrot.slane %v4173_v12, 1 }
0x1144   : > { %12081 = vmatmul.mubr.msk.f32.vlgmr.msra.gmra.mxu1 %vm1235_vm4, %v4022_v20  ;;  %v4175_v47 = vadd.f32 %v4174_v61, %v4173_v12  ;;  %v13869_v12 = vld [vmem:[%s14835_s3 + $0x10] sm:$0xff] }
0x1145   : > { %12090 = vmatprep.mubr.msk.f32.mxu1 %vm1235_vm4, %v13785_v63 }
0x11f8   : > { %v4164_v54 = vpop.f32.mrf.mxu0 }
0x11f9   : > { %v4176_v18 = vsub.f32 %v4164_v54, %v4175_v47  ;;  %v13874_v47 = vld [vmem:[%s14835_s3 + $0x8] sm:$0xff] }
0x11fa   : > { %v12067_v20 = vpop.f32.mrf.mxu0 }
0x11fb   : > { %v4177_v26 = vsel %vm1729_vm7, %v4176_v18, -1e+30  ;;  %v13879_v20 = vld [vmem:[%s14835_s3] sm:$0xff] }
0x11fc   : > { %v4178_v13 = vmul.f32 1.442695, %v4177_v26 }
0x11fe   : > { %12777 = vpow2.f32 %v4178_v13 }
0x1200   : > { %v4255_v9 = vpop.f32.mrf.mxu1 }
0x1201   : > { %12076 = vmatmul.mubr.msk.f32.vlgmr.msra.gmra.mxu0 %vm1235_vm4, %v4255_v9 }
0x1202   : > { %v12072_v53 = vpop.f32.mrf.mxu1  ;;  %12084 = vmatpush3.msra.mxu0 %v13778_v60  ;;  %12085 = vmatprep.mubr.msk.f32.mxu0 %vm13034_vm1, %v13033_v1 }
0x1203   : > { %12102 = vmatprep.subr.mxu0 %v13033_v1 }
0x1204   : > { %v4401_v34 = vpop.f32.mrf.mxu1 }
0x1205   : > { %v4480_v30 = vmul.f32 %v4401_v34, %v13755_v29  ;;  %12086 = vmatmul.mubr.msk.f32.vlgmr.msra.gmra.mxu0 %vm1235_vm4, %v11163_v31  ;;  %v4672_v31 = vsub.f32 0.0, %v13703_v45 }
0x1206   : > { %v12082_v35 = vpop.f32.mrf.mxu1  ;;  %12118 = vmatprep.mubr.msk.f32.mxu0 %vm13034_vm1, %v13033_v1 }
0x1207   : > { %12088 = vmatprep.subr.mxu1 %v4480_v30  ;;  %v4673_v34 = vmul.f32 1.442695, %v4672_v31 }
0x1208   : > { %12089 = vmatpush3.msra.mxu1 %v4480_v30 }
0x1209   : > { %12091 = vmatmul.mubr.msk.f32.vlgmr.msra.gmra.mxu1 %vm1235_vm4, %v13805_v37  ;;  %12121 = vmatprep.subr.mxu1 %v13033_v1  ;;  %12779 = vpow2.f32 %v4673_v34 }
0x120a   : > { %12093 = vmatprep.mubr.msk.f32.mxu1 %vm1235_vm4, %v13811_v38 }
0x120b   : > { %v12778_v18 = vpop.eup %12777 }
0x120d   : > { %12094 = vmatmul.mubr.msk.f32.gmra.mxu1 %vm1235_vm4, %v13816_v33 }
0x120e   : > { %12096 = vmatprep.mubr.msk.f32.mxu1 %vm1235_vm4, %v13821_v39 }
0x1211   : > { %12097 = vmatmul.mubr.msk.f32.gmra.mxu1 %vm1235_vm4, %v13826_v15 }
0x1212   : > { %12099 = vmatprep.mubr.msk.f32.mxu1 %vm1235_vm4, %v13831_v57 }
0x1215   : > { %12100 = vmatmul.mubr.msk.f32.gmra.mxu1 %vm1235_vm4, %v13836_v59 }
0x1216   : > { %12137 = vmatprep.mubr.msk.f32.mxu1 %vm13034_vm1, %v13033_v1  ;;  %v12780_v30 = vpop.eup %12779 }
0x1217   : > { %v4675_v35 = vadd.f32 1.0, %v12780_v30 }
0x1219   : > { %12781 = vrcp.f32 %v4675_v35 }
0x12c1   : > { %v4328_v40 = vpop.f32.mrf.mxu0 }
0x12c2   : > { %v4332_v53 = vmul.f32 %v12778_v18, %v4328_v40 }
0x12c3   : > { %v12077_v51 = vpop.f32.mrf.mxu0 }
0x12c5   : > { %v4476_v22 = vpop.f32.mrf.mxu0 }
0x12c6   : > { %v4597_v51 = vrot.slane %v4476_v22, %v13267_v14  ;;  %v11182_v22 = vld [vmem:[%s13181_s30 + $0xb0] sm:$0xff] }
0x12c7   : > { %v12087_v23 = vpop.f32.mrf.mxu0 }
0x12c8   : > { %v12782_v23 = vpop.eup %12781  ;;  %v4598_v40 = vmul.f32 %v4597_v51, %v13755_v29  ;;  %v11180_v29 = vld [vmem:[%s13181_s30 + $0xa0] sm:$0xff]  ;;  %v11194_v51 = vld [vmem:[%s13146_s27 + $0xf8] sm:$0xff] }
0x12c9   : > { %v12092_v6 = vpop.f32.mrf.mxu1 }
0x12ca   : > { %v4587_v54 = vmul.f32 %v13874_v47, %v12092_v6 }
0x12cb   : > { %v4547_v25 = vpop.f32.mrf.mxu1 }
0x12cc   : > { %v4586_v9 = vmul.f32 %v13879_v20, %v4547_v25  ;;  %v4678_v25 = vmul.f32 %v12782_v23, %v13703_v45  ;;  %v11181_v45 = vld [vmem:[%s13181_s30 + $0xa8] sm:$0xff]  ;;  %v11193_v23 = vld [vmem:[%s13146_s27 + $0xf0] sm:$0xff] }
0x12cd   : > { %v12095_v42 = vpop.f32.mrf.mxu1 }
0x12ce   : > { %v4589_v11 = vmul.f32 %v13864_v10, %v12095_v42 }
0x12cf   : > { %v4557_v32 = vpop.f32.mrf.mxu1 }
0x12d0   : > { %v4588_v61 = vmul.f32 %v13869_v12, %v4557_v32 }
0x12d1   : > { %v12098_v27 = vpop.f32.mrf.mxu1 }
0x12d2   : > { %v4591_v0 = vmul.f32 %v13854_v43, %v12098_v27 }
0x12d3   : > { %v4567_v46 = vpop.f32.mrf.mxu1 }
0x12d4   : > { %v4590_v7 = vmul.f32 %v13859_v4, %v4567_v46  ;;  %v11183_v46 = vld [vmem:[%s13181_s30 + $0xb8] sm:$0xff] }
0x12d5   : > { %v12101_v56 = vpop.f32.mrf.mxu1  ;;  %12122 = vmatpush3.msra.mxu1 %v11183_v46 }
0x12d6   : > { %v4593_v44 = vmul.f32 %v13845_v28, %v12101_v56  ;;  %12123 = vmatprep.subr.mxu1 %v13033_v1  ;;  %v11179_v56 = vld [vmem:[%s13181_s30 + $0x98] sm:$0xff] }
0x12d7   : > { %v4577_v48 = vpop.f32.mrf.mxu1  ;;  %12124 = vmatpush3.msra.mxu1 %v11182_v22 }
0x12d8   : > { %v4592_v52 = vmul.f32 %v13849_v50, %v4577_v48  ;;  %12103 = vmatpush3.msra.mxu0 %v4593_v44  ;;  %12125 = vmatprep.subr.mxu1 %v13033_v1  ;;  %v11178_v44 = vld [vmem:[%s13181_s30 + $0x90] sm:$0xff]  ;;  %v11177_v48 = vld [vmem:[%s13181_s30 + $0x88] sm:$0xff] }
0x12d9   : > { %12104 = vmatprep.subr.mxu0 %v13033_v1  ;;  %12126 = vmatpush3.msra.mxu1 %v11181_v45  ;;  %v11186_v45 = vld [vmem:[%s13141_s6 + $0x3] ss:$0 sm:$0xff] }
0x12da   : > { %12105 = vmatpush3.msra.mxu0 %v4592_v52  ;;  %12127 = vmatprep.subr.mxu1 %v13033_v1  ;;  %v11176_v52 = vld [vmem:[%s13181_s30 + $0x80] sm:$0xff] }
0x12db   : > { %12106 = vmatprep.subr.mxu0 %v13033_v1  ;;  %12128 = vmatpush3.msra.mxu1 %v11180_v29 }
0x12dc   : > { %12107 = vmatpush3.msra.mxu0 %v4591_v0  ;;  %12129 = vmatprep.subr.mxu1 %v13033_v1 }
0x12dd   : > { %12108 = vmatprep.subr.mxu0 %v13033_v1  ;;  %12130 = vmatpush3.msra.mxu1 %v11179_v56 }
0x12de   : > { %12109 = vmatpush3.msra.mxu0 %v4590_v7  ;;  %12131 = vmatprep.subr.mxu1 %v13033_v1 }
0x12df   : > { %12110 = vmatprep.subr.mxu0 %v13033_v1  ;;  %12132 = vmatpush3.msra.mxu1 %v11178_v44 }
0x12e0   : > { %12111 = vmatpush3.msra.mxu0 %v4589_v11  ;;  %12133 = vmatprep.subr.mxu1 %v13033_v1 }
0x12e1   : > { %12112 = vmatprep.subr.mxu0 %v13033_v1  ;;  %12134 = vmatpush3.msra.mxu1 %v11177_v48 }
0x12e2   : > { %12113 = vmatpush3.msra.mxu0 %v4588_v61  ;;  %12135 = vmatprep.subr.mxu1 %v13033_v1 }
0x12e3   : > { %12114 = vmatprep.subr.mxu0 %v13033_v1  ;;  %12136 = vmatpush3.msra.mxu1 %v11176_v52 }
0x12e4   : > { %12115 = vmatpush3.msra.mxu0 %v4587_v54  ;;  %12140 = vmatprep.subr.mxu1 %v13033_v1  ;;  %v11175_v54 = vld [vmem:[%s14836_s23 + $0x2] ss:$0 sm:$0xff] }
0x12e5   : > { %12116 = vmatprep.subr.mxu0 %v13033_v1 }
0x12e6   : > { %12117 = vmatpush3.msra.mxu0 %v4586_v9 }
0x12e7   : > { %12119 = vmatmul.mubr.msk.f32.vlgmr.msra.gmra.mxu0 %vm1721_vm6, %v4332_v53  ;;  %4833 = vmatprep.subr.mxu0 %v11194_v51 }
0x12e8   : > { %4873 = vmatprep.mubr.f32.mxu0 %v13033_v1  ;;  %4834 = vmatpush1.msra.mxu0 %v11193_v23 }
0x13a7   : > { %v4668_v6 = vpop.f32.mrf.mxu0 }
0x13a8   : > { %v4669_v42 = vadd.f32 %v4668_v6, %v4598_v40  ;;  %v11192_v40 = vld [vmem:[%s13146_s27 + $0xe8] sm:$0xff]  ;;  %v11191_v6 = vld [vmem:[%s13146_s27 + $0xe0] sm:$0xff] }
0x13a9   : > { %v12120_v32 = vpop.f32.mrf.mxu0  ;;  %4835 = vmatprep.subr.mxu0 %v11192_v40 }
0x13aa   : > { %v4679_v26 = vmul.f32 %v4678_v25, %v4669_v42  ;;  %v11190_v25 = vld [vmem:[%s13146_s27 + $0xd8] sm:$0xff]  ;;  %v11189_v42 = vld [vmem:[%s13146_s27 + $0xd0] sm:$0xff]  ;;  %4836 = vmatpush1.msra.mxu0 %v11191_v6  ;;  %v11187_v32 = vld [vmem:[%s13146_s27 + $0xc0] sm:$0xff] }
0x13ab   : > { %4837 = vmatprep.subr.mxu0 %v11190_v25  ;;  %v11198_v25 = vld [vmem:[%s14826_s1 + $0xc] sm:$0xf] }
0x13ac   : > { %v4680_v27 = vmul.f32 %v4679_v26, %v4679_v26  ;;  %4838 = vmatpush1.msra.mxu0 %v11189_v42  ;;  %v4983_v42 = vrot.slane %v11198_v25, %v13267_v14 }
0x13ae   : > { %v4681_v13 = vsel %vm1721_vm6, %v4680_v27, 0.0 }
0x13af   : > { %4682 = vadd.xlane.f32.xlu0 %v4681_v13 }
0x1438   : > { %v4683_v0 = vpop.xlane.xlu0 %4682 }
0x1439   : > { %v4684_v7 = vmul.f32 0.015625, %v4683_v0 }
0x143b   : > { %v4685_v11 = vadd.f32 1e-05, %v4684_v7 }
0x143d   : > { %12783 = vrsqrt.f32 %v4685_v11 }
0x144a   : > { %v12784_v61 = vpop.eup %12783 }
0x144b   : > { %v4687_v18 = vmul.f32 %v12784_v61, %v4679_v26  ;;  %v11197_v26 = vld [vmem:[%s13161_s12 + $0x3] ss:$0 sm:$0xff] }
0x144c   : > { %4887 = vrot.lane.b32.xlu0 %v11197_v26, %s14837_s5  ;;  %v5059_v26 = vrot.slane %v11198_v25, %v13356_v16 }
0x144d   : > { %v4696_v9 = vmul.f32 %v11175_v54, %v4687_v18 }
0x144f   : > { %12138 = vmatmul.mubr.msk.f32.vlgmr.msra.gmra.mxu1 %vm1721_vm6, %v4696_v9 }
0x1450   : > { %12142 = vmatprep.mubr.msk.f32.mxu1 %vm13034_vm1, %v13033_v1 }
0x14be   : > { %v4888_v48 = vpop.permute.xlu0 %4887 }
0x150f   : > { %v4775_v53 = vpop.f32.mrf.mxu1 }
0x1510   : > { %v13911_v31 = vadd.f32 %v4775_v53, %v13682_v41  ;;  %v11188_v41 = vld [vmem:[%s13146_s27 + $0xc8] sm:$0xff] }
0x1511   : > { %v12139_v34 = vpop.f32.mrf.mxu1  ;;  %4839 = vmatprep.subr.mxu0 %v11188_v41 }
0x1512   : > { %v4780_v30 = vmul.f32 %v13911_v31, %v13911_v31  ;;  %4840 = vmatpush1.msra.mxu0 %v11187_v32  ;;  %v11205_v34 = vld [vmem:[%s14825_s28 + $0x3] sm:$0x1] }
0x1513   : > { %12150 = vmatprep.subr.mxu0 %v13033_v1 }
0x1514   : > { %v4781_v35 = vsel %vm1109_vm3, %v4780_v30, 0.0  ;;  %v5223_v30 = vmul.f32 1.442695, %v11205_v34 }
0x1515   : > { %4782 = vadd.xlane.f32.xlu1 %v4781_v35 }
0x159e   : > { %v4783_v27 = vpop.xlane.xlu1 %4782 }
0x159f   : > { %v4784_v13 = vmul.f32 0.03125, %v4783_v27  ;;  %v5135_v27 = vrot.slane %v11198_v25, %v13359_v17 }
0x15a1   : > { %v4785_v46 = vadd.f32 1e-05, %v4784_v13  ;;  %v11200_v13 = vld [vmem:[%s14827_s2 + $0x3] ss:$0 sm:$0xff] }
0x15a3   : > { %12785 = vrsqrt.f32 %v4785_v46 }
0x15b0   : > { %v12786_v22 = vpop.eup %12785 }
0x15b1   : > { %v4787_v29 = vmul.f32 %v12786_v22, %v13911_v31 }
0x15b3   : > { %v4796_v56 = vmul.f32 %v11186_v45, %v4787_v29 }
0x15b5   : > { %11195 = vmatmul.mubr.msk.f32.vlgmr.msra.gmra.mxu0 %vm1109_vm3, %v4796_v56 }
0x15b6   : > { %12152 = vmatprep.mubr.msk.f32.mxu0 %vm13034_vm1, %v13033_v1 }
0x1675   : > { %v4875_v44 = vpop.f32.mrf.mxu0 }
0x1676   : > { %12141 = vmatpush3.msra.mxu1 %v4875_v44  ;;  %12151 = vmatpush3.msra.mxu0 %v4875_v44 }
0x1677   : > { %v13932_v52 = vpop.f32.mrf.mxu0  ;;  %12143 = vmatmul.mubr.msk.f32.vlgmr.msra.gmra.mxu1 %vm1235_vm4, %v13706_v49  ;;  %12145 = vmatprep.subr.mxu1 %v13033_v1 }
0x1678   : > { %v4890_v0 = vadd.f32 %v4888_v48, %v13932_v52  ;;  %12146 = vmatpush3.msra.mxu1 %v4875_v44  ;;  %12147 = vmatprep.mubr.msk.f32.mxu1 %vm13034_vm1, %v13033_v1 }
0x1679   : > { %12155 = vmatprep.subr.mxu1 %v13033_v1  ;;  %12153 = vmatmul.mubr.msk.f32.vlgmr.msra.gmra.mxu0 %vm1235_vm4, %v13716_v55 }
0x167a   : > { %v4892_v7 = vmin.f32 %v4890_v0, 20.0  ;;  %12160 = vmatprep.subr.mxu0 %v13033_v1  ;;  %12162 = vmatprep.mubr.msk.f32.mxu0 %vm13034_vm1, %v13033_v1  ;;  %vm4891_vm10 = vcmp.gt.f32.partialorder %v4890_v0, 20.0 }
0x167b   : > { %12148 = vmatmul.mubr.msk.f32.vlgmr.msra.gmra.mxu1 %vm1235_vm4, %v13724_v3  ;;  %12161 = vmatpush3.msra.mxu0 %v13729_v5 }
0x167c   : > { %v4893_v11 = vmul.f32 1.442695, %v4892_v7  ;;  %12156 = vmatpush3.msra.mxu1 %v4875_v44  ;;  %12157 = vmatprep.mubr.msk.f32.mxu1 %vm13034_vm1, %v13033_v1 }
0x167d   : > { %12165 = vmatprep.subr.mxu1 %v13033_v1  ;;  %12170 = vmatprep.subr.mxu0 %v13033_v1 }
0x167e   : > { %12787 = vpow2.f32 %v4893_v11 }
0x167f   : > { %12158 = vmatmul.mubr.msk.f32.vlgmr.msra.gmra.mxu1 %vm1235_vm4, %v13737_v8 }
0x1680   : > { %12167 = vmatprep.mubr.msk.f32.mxu1 %vm13034_vm1, %v13033_v1 }
0x168b   : > { %v12788_v61 = vpop.eup %12787 }
0x168c   : > { %v4895_v54 = vadd.f32 1.0, %v12788_v61 }
0x168e   : > { %12789 = vlog2.f32 %v4895_v54 }
0x168f   : > { %12791 = vpow2.f32 %v5223_v30 }
0x169b   : > { %v12790_v18 = vpop.eup %12789 }
0x169c   : > { %v4897_v9 = vmul.f32 0.6931472, %v12790_v18  ;;  %v12792_v35 = vpop.eup %12791 }
0x169d   : > { %v5225_v51 = vsub.f32 0.0, %v12792_v35 }
0x169e   : > { %v4898_v53 = vsel %vm4891_vm10, %v4890_v0, %v4897_v9  ;;  %v5211_v0 = vrot.slane %v11198_v25, %v13364_v24 }
0x169f   : > { %5233 = vrot.lane.b32.xlu1 %v4898_v53, %s14837_s5  ;;  %v5230_v23 = vrot.slane %v5225_v51, %v13267_v14 }
0x1711   : > { %v5234_v40 = vpop.permute.xlu1 %5233 }
0x1712   : > { %v5236_v6 = vmul.f32 %v5234_v40, %v5230_v23 }
0x1714   : > { %12163 = vmatmul.mubr.msk.f32.vlgmr.msra.gmra.mxu0 %vm1235_vm4, %v5236_v6 }
0x1715   : > { %12172 = vmatprep.mubr.msk.f32.mxu0 %vm13034_vm1, %v13033_v1 }
0x1737   : > { %v4976_v41 = vpop.f32.mrf.mxu1 }
0x1738   : > { %v4984_v32 = vmul.f32 %v4983_v42, %v4976_v41 }
0x1739   : > { %v12144_v46 = vpop.f32.mrf.mxu1  ;;  %v5128_v22 = vpop.f32.mrf.mxu0 }
0x173a   : > { %v4985_v56 = vadd.f32 %v11200_v13, %v4984_v32  ;;  %v5136_v48 = vmul.f32 %v5135_v27, %v5128_v22 }
0x173b   : > { %v5052_v45 = vpop.f32.mrf.mxu1  ;;  %v12154_v29 = vpop.f32.mrf.mxu0 }
0x173c   : > { %v5060_v44 = vmul.f32 %v5059_v26, %v5052_v45 }
0x173d   : > { %v12149_v7 = vpop.f32.mrf.mxu1 }
0x173e   : > { %v5061_v11 = vadd.f32 %v5060_v44, %v4985_v56 }
0x173f   : > { %v5204_v61 = vpop.f32.mrf.mxu1 }
0x1740   : > { %v5137_v54 = vadd.f32 %v5136_v48, %v5061_v11  ;;  %v5212_v18 = vmul.f32 %v5211_v0, %v5204_v61  ;;  %v11212_v11 = vld [vmem:[%s14833_s11 + $0x3] sm:$0x1] }
0x1741   : > { %v12159_v9 = vpop.f32.mrf.mxu1 }
0x1742   : > { %v5213_v53 = vadd.f32 %v5212_v18, %v5137_v54 }
0x1744   : > { %v5214_v34 = vsub.f32 0.0, %v5213_v53 }
0x1746   : > { %v5215_v30 = vmul.f32 1.442695, %v5214_v34 }
0x1748   : > { %12793 = vpow2.f32 %v5215_v30 }
0x1755   : > { %v12794_v35 = vpop.eup %12793 }
0x1756   : > { %v5217_v51 = vadd.f32 1.0, %v12794_v35 }
0x1758   : > { %12795 = vrcp.f32 %v5217_v51 }
0x1765   : > { %v12796_v23 = vpop.eup %12795 }
0x1766   : > { %v13969_v6 = vmul.f32 %v12796_v23, %v5213_v53 }
0x1768   : > { %5395 = vrot.lane.b32.xlu0 %v13969_v6, %s14837_s5  ;;  %5393 = vrot.lane.b32.xlu1 %v13969_v6, %s14838_s8 }
0x17d4   : > { %v5306_v25 = vpop.f32.mrf.mxu0 }
0x17d5   : > { %12166 = vmatpush3.msra.mxu1 %v5306_v25  ;;  %v5380_v26 = vmul.f32 %v13790_v58, %v5306_v25 }
0x17d6   : > { %v12164_v42 = vpop.f32.mrf.mxu0  ;;  %12168 = vmatmul.mubr.msk.f32.vlgmr.msra.gmra.mxu1 %vm1235_vm4, %v13762_v62  ;;  %12175 = vmatprep.subr.mxu1 %v13033_v1 }
0x17d7   : > { %12176 = vmatpush3.msra.mxu1 %v13768_v2  ;;  %12177 = vmatprep.mubr.msk.f32.mxu1 %vm13034_vm1, %v13033_v1  ;;  %v5381_v27 = vsel %vm1721_vm6, %v5380_v26, 0.0 }
0x17d8   : > { %12185 = vmatprep.subr.mxu1 %v13033_v1  ;;  %v5382_v13 = vrot.slane %v5381_v27, 4 }
0x17da   : > { %v5396_v41 = vpop.permute.xlu0 %5395  ;;  %v5394_v32 = vpop.permute.xlu1 %5393  ;;  %v5383_v46 = vadd.f32 %v5382_v13, %v5381_v27 }
0x17db   : > { %12171 = vmatpush3.xpose.msk.msra.mxu0 %vm1109_vm3, %v5396_v41 }
0x17dc   : > { %12180 = vmatprep.subr.mxu0 %v13033_v1  ;;  %v5384_v22 = vrot.slane %v5383_v46, 2 }
0x17de   : > { %12173 = vmatmul.mubr.msk.f32.vlgmr.msra.gmra.mxu0 %vm1109_vm3, %v5394_v32  ;;  %v5385_v45 = vadd.f32 %v5384_v22, %v5383_v46 }
0x17df   : > { %12181 = vmatpush3.msra.mxu0 %v13778_v60  ;;  %12182 = vmatprep.mubr.msk.f32.mxu0 %vm13034_vm1, %v13033_v1 }
0x17e0   : > { %v5386_v29 = vrot.slane %v5385_v45, 1 }
0x17e2   : > { %12183 = vmatmul.mubr.msk.f32.vlgmr.msra.gmra.mxu0 %vm1235_vm4, %v5234_v40  ;;  %v5387_v56 = vadd.f32 %v5386_v29, %v5385_v45 }
0x17e3   : > { %12192 = vmatprep.mubr.msk.f32.mxu0 %vm1235_vm4, %v13785_v63 }
0x1896   : > { %v5376_v44 = vpop.f32.mrf.mxu1 }
0x1897   : > { %v5388_v48 = vsub.f32 %v5376_v44, %v5387_v56 }
0x1898   : > { %v12169_v0 = vpop.f32.mrf.mxu1 }
0x1899   : > { %v5389_v42 = vsel %vm1729_vm7, %v5388_v48, -1e+30 }
0x189a   : > { %v5390_v32 = vmul.f32 1.442695, %v5389_v42 }
0x189c   : > { %12797 = vpow2.f32 %v5390_v32 }
0x189e   : > { %v5467_v7 = vpop.f32.mrf.mxu0 }
0x189f   : > { %12178 = vmatmul.mubr.msk.f32.vlgmr.msra.gmra.mxu1 %vm1235_vm4, %v5467_v7 }
0x18a0   : > { %v12174_v40 = vpop.f32.mrf.mxu0  ;;  %12186 = vmatpush3.msra.mxu1 %v13778_v60  ;;  %12187 = vmatprep.mubr.msk.f32.mxu1 %vm13034_vm1, %v13033_v1 }
0x18a1   : > { %12204 = vmatprep.subr.mxu1 %v13033_v1 }
0x18a2   : > { %v5613_v61 = vpop.f32.mrf.mxu0 }
0x18a3   : > { %v5692_v54 = vmul.f32 %v5613_v61, %v13969_v6  ;;  %12188 = vmatmul.mubr.msk.f32.vlgmr.msra.gmra.mxu1 %vm1235_vm4, %v11212_v11  ;;  %v5884_v11 = vsub.f32 0.0, %v13932_v52 }
0x18a4   : > { %v12184_v18 = vpop.f32.mrf.mxu0  ;;  %12220 = vmatprep.mubr.msk.f32.mxu1 %vm13034_vm1, %v13033_v1 }
0x18a5   : > { %12190 = vmatprep.subr.mxu0 %v5692_v54  ;;  %v5885_v61 = vmul.f32 1.442695, %v5884_v11 }
0x18a6   : > { %12191 = vmatpush3.msra.mxu0 %v5692_v54 }
0x18a7   : > { %12193 = vmatmul.mubr.msk.f32.vlgmr.msra.gmra.mxu0 %vm1235_vm4, %v13805_v37  ;;  %12223 = vmatprep.subr.mxu0 %v13033_v1  ;;  %12799 = vpow2.f32 %v5885_v61 }
0x18a8   : > { %12195 = vmatprep.mubr.msk.f32.mxu0 %vm1235_vm4, %v13811_v38 }
0x18a9   : > { %v12798_v0 = vpop.eup %12797 }
0x18ab   : > { %12196 = vmatmul.mubr.msk.f32.gmra.mxu0 %vm1235_vm4, %v13816_v33 }
0x18ac   : > { %12198 = vmatprep.mubr.msk.f32.mxu0 %vm1235_vm4, %v13821_v39 }
0x18af   : > { %12199 = vmatmul.mubr.msk.f32.gmra.mxu0 %vm1235_vm4, %v13826_v15 }
0x18b0   : > { %12201 = vmatprep.mubr.msk.f32.mxu0 %vm1235_vm4, %v13831_v57 }
0x18b3   : > { %12202 = vmatmul.mubr.msk.f32.gmra.mxu0 %vm1235_vm4, %v13836_v59 }
0x18b4   : > { %12239 = vmatprep.mubr.msk.f32.mxu0 %vm13034_vm1, %v13033_v1  ;;  %v12800_v54 = vpop.eup %12799 }
0x18b5   : > { %v5887_v18 = vadd.f32 1.0, %v12800_v54 }
0x18b7   : > { %12801 = vrcp.f32 %v5887_v18 }
0x195f   : > { %v5540_v9 = vpop.f32.mrf.mxu1 }
0x1960   : > { %v5544_v40 = vmul.f32 %v12798_v0, %v5540_v9 }
0x1961   : > { %v12179_v53 = vpop.f32.mrf.mxu1 }
0x1963   : > { %v5688_v34 = vpop.f32.mrf.mxu1 }
0x1964   : > { %v5809_v53 = vrot.slane %v5688_v34, %v13267_v14  ;;  %v11231_v34 = vld [vmem:[%s13181_s30 + $0xf0] sm:$0xff] }
0x1965   : > { %v12189_v30 = vpop.f32.mrf.mxu1 }
0x1966   : > { %v12802_v30 = vpop.eup %12801  ;;  %v5810_v9 = vmul.f32 %v5809_v53, %v13969_v6  ;;  %v11229_v6 = vld [vmem:[%s13181_s30 + $0xe0] sm:$0xff]  ;;  %v11243_v53 = vld [vmem:[%s13146_s27 + $0x138] sm:$0xff] }
0x1967   : > { %v12194_v35 = vpop.f32.mrf.mxu0 }
0x1968   : > { %v5799_v48 = vmul.f32 %v13874_v47, %v12194_v35 }
0x1969   : > { %v5759_v51 = vpop.f32.mrf.mxu0 }
0x196a   : > { %v5798_v7 = vmul.f32 %v13879_v20, %v5759_v51  ;;  %v5890_v51 = vmul.f32 %v12802_v30, %v13932_v52  ;;  %v11230_v52 = vld [vmem:[%s13181_s30 + $0xe8] sm:$0xff]  ;;  %v11242_v30 = vld [vmem:[%s13146_s27 + $0x130] sm:$0xff] }
0x196b   : > { %v12197_v23 = vpop.f32.mrf.mxu0 }
0x196c   : > { %v5801_v56 = vmul.f32 %v13864_v10, %v12197_v23 }
0x196d   : > { %v5769_v25 = vpop.f32.mrf.mxu0 }
0x196e   : > { %v5800_v44 = vmul.f32 %v13869_v12, %v5769_v25 }
0x196f   : > { %v12200_v41 = vpop.f32.mrf.mxu0 }
0x1970   : > { %v5803_v45 = vmul.f32 %v13854_v43, %v12200_v41 }
0x1971   : > { %v5779_v26 = vpop.f32.mrf.mxu0 }
0x1972   : > { %v5802_v29 = vmul.f32 %v13859_v4, %v5779_v26  ;;  %v11232_v26 = vld [vmem:[%s13181_s30 + $0xf8] sm:$0xff] }
0x1973   : > { %v12203_v27 = vpop.f32.mrf.mxu0  ;;  %12224 = vmatpush3.msra.mxu0 %v11232_v26 }
0x1974   : > { %v5805_v13 = vmul.f32 %v13845_v28, %v12203_v27  ;;  %12225 = vmatprep.subr.mxu0 %v13033_v1  ;;  %v11228_v27 = vld [vmem:[%s13181_s30 + $0xd8] sm:$0xff] }
0x1975   : > { %v5789_v46 = vpop.f32.mrf.mxu0  ;;  %12226 = vmatpush3.msra.mxu0 %v11231_v34 }
0x1976   : > { %v5804_v22 = vmul.f32 %v13849_v50, %v5789_v46  ;;  %12205 = vmatpush3.msra.mxu1 %v5805_v13  ;;  %12227 = vmatprep.subr.mxu0 %v13033_v1  ;;  %v11227_v13 = vld [vmem:[%s13181_s30 + $0xd0] sm:$0xff]  ;;  %v11226_v46 = vld [vmem:[%s13181_s30 + $0xc8] sm:$0xff] }
0x1977   : > { %12206 = vmatprep.subr.mxu1 %v13033_v1  ;;  %12228 = vmatpush3.msra.mxu0 %v11230_v52  ;;  %v11235_v52 = vld [vmem:[%s13141_s6 + $0x4] ss:$0 sm:$0xff] }
0x1978   : > { %12207 = vmatpush3.msra.mxu1 %v5804_v22  ;;  %12229 = vmatprep.subr.mxu0 %v13033_v1  ;;  %v11225_v22 = vld [vmem:[%s13181_s30 + $0xc0] sm:$0xff] }
0x1979   : > { %12208 = vmatprep.subr.mxu1 %v13033_v1  ;;  %12230 = vmatpush3.msra.mxu0 %v11229_v6 }
0x197a   : > { %12209 = vmatpush3.msra.mxu1 %v5803_v45  ;;  %12231 = vmatprep.subr.mxu0 %v13033_v1 }
0x197b   : > { %12210 = vmatprep.subr.mxu1 %v13033_v1  ;;  %12232 = vmatpush3.msra.mxu0 %v11228_v27 }
0x197c   : > { %12211 = vmatpush3.msra.mxu1 %v5802_v29  ;;  %12233 = vmatprep.subr.mxu0 %v13033_v1 }
0x197d   : > { %12212 = vmatprep.subr.mxu1 %v13033_v1  ;;  %12234 = vmatpush3.msra.mxu0 %v11227_v13 }
0x197e   : > { %12213 = vmatpush3.msra.mxu1 %v5801_v56  ;;  %12235 = vmatprep.subr.mxu0 %v13033_v1 }
0x197f   : > { %12214 = vmatprep.subr.mxu1 %v13033_v1  ;;  %12236 = vmatpush3.msra.mxu0 %v11226_v46 }
0x1980   : > { %12215 = vmatpush3.msra.mxu1 %v5800_v44  ;;  %12237 = vmatprep.subr.mxu0 %v13033_v1 }
0x1981   : > { %12216 = vmatprep.subr.mxu1 %v13033_v1  ;;  %12238 = vmatpush3.msra.mxu0 %v11225_v22 }
0x1982   : > { %12217 = vmatpush3.msra.mxu1 %v5799_v48  ;;  %12242 = vmatprep.subr.mxu0 %v13033_v1  ;;  %v11224_v48 = vld [vmem:[%s14836_s23 + $0x3] ss:$0 sm:$0xff] }
0x1983   : > { %12218 = vmatprep.subr.mxu1 %v13033_v1 }
0x1984   : > { %12219 = vmatpush3.msra.mxu1 %v5798_v7 }
0x1985   : > { %12221 = vmatmul.mubr.msk.f32.vlgmr.msra.gmra.mxu1 %vm1721_vm6, %v5544_v40  ;;  %6045 = vmatprep.subr.mxu1 %v11243_v53 }
0x1986   : > { %6085 = vmatprep.mubr.f32.mxu1 %v13033_v1  ;;  %6046 = vmatpush1.msra.mxu1 %v11242_v30 }
0x1a45   : > { %v5880_v35 = vpop.f32.mrf.mxu1 }
0x1a46   : > { %v5881_v23 = vadd.f32 %v5880_v35, %v5810_v9  ;;  %v11241_v9 = vld [vmem:[%s13146_s27 + $0x128] sm:$0xff]  ;;  %v11240_v35 = vld [vmem:[%s13146_s27 + $0x120] sm:$0xff] }
0x1a47   : > { %v12222_v25 = vpop.f32.mrf.mxu1  ;;  %6047 = vmatprep.subr.mxu1 %v11241_v9 }
0x1a48   : > { %v5891_v42 = vmul.f32 %v5890_v51, %v5881_v23  ;;  %v11239_v51 = vld [vmem:[%s13146_s27 + $0x118] sm:$0xff]  ;;  %v11238_v23 = vld [vmem:[%s13146_s27 + $0x110] sm:$0xff]  ;;  %6048 = vmatpush1.msra.mxu1 %v11240_v35  ;;  %v11236_v25 = vld [vmem:[%s13146_s27 + $0x100] sm:$0xff] }
0x1a49   : > { %6049 = vmatprep.subr.mxu1 %v11239_v51 }
0x1a4a   : > { %v5892_v41 = vmul.f32 %v5891_v42, %v5891_v42  ;;  %6050 = vmatpush1.msra.mxu1 %v11238_v23  ;;  %v11249_v23 = vld [vmem:[%s14827_s2 + $0x4] ss:$0 sm:$0xff] }
0x1a4c   : > { %v5893_v32 = vsel %vm1721_vm6, %v5892_v41, 0.0 }
0x1a4d   : > { %5894 = vadd.xlane.f32.xlu0 %v5893_v32 }
0x1ad6   : > { %v5895_v45 = vpop.xlane.xlu0 %5894 }
0x1ad7   : > { %v5896_v29 = vmul.f32 0.015625, %v5895_v45 }
0x1ad9   : > { %v5897_v56 = vadd.f32 1e-05, %v5896_v29 }
0x1adb   : > { %12803 = vrsqrt.f32 %v5897_v56 }
0x1ae8   : > { %v12804_v44 = vpop.eup %12803 }
0x1ae9   : > { %v5899_v0 = vmul.f32 %v12804_v44, %v5891_v42  ;;  %v11246_v42 = vld [vmem:[%s13161_s12 + $0x4] ss:$0 sm:$0xff] }
0x1aea   : > { %6099 = vrot.lane.b32.xlu0 %v11246_v42, %s14837_s5 }
0x1aeb   : > { %v5908_v7 = vmul.f32 %v11224_v48, %v5899_v0  ;;  %v11254_v48 = vld [vmem:[%s14825_s28 + $0x4] sm:$0x1] }
0x1aec   : > { %v6435_v0 = vmul.f32 1.442695, %v11254_v48 }
0x1aed   : > { %12240 = vmatmul.mubr.msk.f32.vlgmr.msra.gmra.mxu0 %vm1721_vm6, %v5908_v7 }
0x1aee   : > { %12244 = vmatprep.mubr.msk.f32.mxu0 %vm13034_vm1, %v13033_v1 }
0x1b5c   : > { %v6100_v46 = vpop.permute.xlu0 %6099 }
0x1bad   : > { %v5987_v40 = vpop.f32.mrf.mxu0 }
0x1bae   : > { %v14065_v11 = vadd.f32 %v5987_v40, %v13911_v31  ;;  %v11237_v31 = vld [vmem:[%s13146_s27 + $0x108] sm:$0xff] }
0x1baf   : > { %v12241_v61 = vpop.f32.mrf.mxu0  ;;  %6051 = vmatprep.subr.mxu1 %v11237_v31 }
0x1bb0   : > { %v5992_v54 = vmul.f32 %v14065_v11, %v14065_v11  ;;  %6052 = vmatpush1.msra.mxu1 %v11236_v25 }
0x1bb1   : > { %12252 = vmatprep.subr.mxu1 %v13033_v1 }
0x1bb2   : > { %v5993_v18 = vsel %vm1109_vm3, %v5992_v54, 0.0 }
0x1bb3   : > { %5994 = vadd.xlane.f32.xlu1 %v5993_v18  ;;  %v11247_v18 = vld [vmem:[%s14826_s1 + $0x10] sm:$0xf] }
0x1bb4   : > { %v6195_v53 = vrot.slane %v11247_v18, %v13267_v14  ;;  %v6271_v35 = vrot.slane %v11247_v18, %v13356_v16  ;;  %v6347_v51 = vrot.slane %v11247_v18, %v13359_v17 }
0x1c3c   : > { %v5995_v41 = vpop.xlane.xlu1 %5994 }
0x1c3d   : > { %v5996_v32 = vmul.f32 0.03125, %v5995_v41 }
0x1c3f   : > { %v5997_v26 = vadd.f32 1e-05, %v5996_v32 }
0x1c41   : > { %12805 = vrsqrt.f32 %v5997_v26 }
0x1c4e   : > { %v12806_v34 = vpop.eup %12805 }
0x1c4f   : > { %v5999_v6 = vmul.f32 %v12806_v34, %v14065_v11 }
0x1c51   : > { %v6008_v27 = vmul.f32 %v11235_v52, %v5999_v6  ;;  %v6423_v52 = vrot.slane %v11247_v18, %v13364_v24 }
0x1c53   : > { %11244 = vmatmul.mubr.msk.f32.vlgmr.msra.gmra.mxu1 %vm1109_vm3, %v6008_v27 }
0x1c54   : > { %12254 = vmatprep.mubr.msk.f32.mxu1 %vm13034_vm1, %v13033_v1 }
0x1d13   : > { %v6087_v13 = vpop.f32.mrf.mxu1 }
0x1d14   : > { %12243 = vmatpush3.msra.mxu0 %v6087_v13  ;;  %12253 = vmatpush3.msra.mxu1 %v6087_v13 }
0x1d15   : > { %v14086_v22 = vpop.f32.mrf.mxu1  ;;  %12245 = vmatmul.mubr.msk.f32.vlgmr.msra.gmra.mxu0 %vm1235_vm4, %v13706_v49  ;;  %12247 = vmatprep.subr.mxu0 %v13033_v1 }
0x1d16   : > { %v6102_v45 = vadd.f32 %v6100_v46, %v14086_v22  ;;  %12248 = vmatpush3.msra.mxu0 %v6087_v13  ;;  %12249 = vmatprep.mubr.msk.f32.mxu0 %vm13034_vm1, %v13033_v1 }
0x1d17   : > { %12257 = vmatprep.subr.mxu0 %v13033_v1  ;;  %12255 = vmatmul.mubr.msk.f32.vlgmr.msra.gmra.mxu1 %vm1235_vm4, %v13716_v55 }
0x1d18   : > { %v6104_v29 = vmin.f32 %v6102_v45, 20.0  ;;  %12262 = vmatprep.subr.mxu1 %v13033_v1  ;;  %12264 = vmatprep.mubr.msk.f32.mxu1 %vm13034_vm1, %v13033_v1  ;;  %vm6103_vm11 = vcmp.gt.f32.partialorder %v6102_v45, 20.0 }
0x1d19   : > { %12250 = vmatmul.mubr.msk.f32.vlgmr.msra.gmra.mxu0 %vm1235_vm4, %v13724_v3  ;;  %12263 = vmatpush3.msra.mxu1 %v13729_v5 }
0x1d1a   : > { %v6105_v49 = vmul.f32 1.442695, %v6104_v29  ;;  %12258 = vmatpush3.msra.mxu0 %v6087_v13  ;;  %12259 = vmatprep.mubr.msk.f32.mxu0 %vm13034_vm1, %v13033_v1 }
0x1d1b   : > { %12267 = vmatprep.subr.mxu0 %v13033_v1  ;;  %12272 = vmatprep.subr.mxu1 %v13033_v1 }
0x1d1c   : > { %12807 = vpow2.f32 %v6105_v49 }
0x1d1d   : > { %12260 = vmatmul.mubr.msk.f32.vlgmr.msra.gmra.mxu0 %vm1235_vm4, %v13737_v8 }
0x1d1e   : > { %12269 = vmatprep.mubr.msk.f32.mxu0 %vm13034_vm1, %v13033_v1 }
0x1d29   : > { %v12808_v55 = vpop.eup %12807 }
0x1d2a   : > { %v6107_v3 = vadd.f32 1.0, %v12808_v55 }
0x1d2c   : > { %12809 = vlog2.f32 %v6107_v3 }
0x1d2d   : > { %12811 = vpow2.f32 %v6435_v0 }
0x1d39   : > { %v12810_v5 = vpop.eup %12809 }
0x1d3a   : > { %v6109_v56 = vmul.f32 0.6931472, %v12810_v5  ;;  %v12812_v7 = vpop.eup %12811 }
0x1d3b   : > { %v6437_v40 = vsub.f32 0.0, %v12812_v7 }
0x1d3c   : > { %v6110_v44 = vsel %vm6103_vm11, %v6102_v45, %v6109_v56 }
0x1d3d   : > { %6445 = vrot.lane.b32.xlu1 %v6110_v44, %s14837_s5  ;;  %v6442_v8 = vrot.slane %v6437_v40, %v13267_v14 }
0x1daf   : > { %v6446_v61 = vpop.permute.xlu1 %6445 }
0x1db0   : > { %v6448_v54 = vmul.f32 %v6446_v61, %v6442_v8 }
0x1db2   : > { %12265 = vmatmul.mubr.msk.f32.vlgmr.msra.gmra.mxu1 %vm1235_vm4, %v6448_v54 }
0x1db3   : > { %12274 = vmatprep.mubr.msk.f32.mxu1 %vm13034_vm1, %v13033_v1 }
0x1dd5   : > { %v6188_v30 = vpop.f32.mrf.mxu0 }
0x1dd6   : > { %v6196_v9 = vmul.f32 %v6195_v53, %v6188_v30 }
0x1dd7   : > { %v12246_v31 = vpop.f32.mrf.mxu0  ;;  %v6340_v25 = vpop.f32.mrf.mxu1 }
0x1dd8   : > { %v6197_v32 = vadd.f32 %v11249_v23, %v6196_v9  ;;  %v6348_v34 = vmul.f32 %v6347_v51, %v6340_v25  ;;  %v14149_v25 = vld [vmem:[%s14829_s10] sm:$0xff] }
0x1dd9   : > { %v6264_v42 = vpop.f32.mrf.mxu0  ;;  %v12256_v41 = vpop.f32.mrf.mxu1 }
0x1dda   : > { %v6272_v26 = vmul.f32 %v6271_v35, %v6264_v42 }
0x1ddb   : > { %v12251_v6 = vpop.f32.mrf.mxu0 }
0x1ddc   : > { %v6273_v27 = vadd.f32 %v6272_v26, %v6197_v32 }
0x1ddd   : > { %v6416_v13 = vpop.f32.mrf.mxu0 }
0x1dde   : > { %v6349_v46 = vadd.f32 %v6348_v34, %v6273_v27  ;;  %v6424_v45 = vmul.f32 %v6423_v52, %v6416_v13 }
0x1ddf   : > { %v12261_v29 = vpop.f32.mrf.mxu0 }
0x1de0   : > { %v6425_v49 = vadd.f32 %v6424_v45, %v6349_v46 }
0x1de2   : > { %v6426_v55 = vsub.f32 0.0, %v6425_v49 }
0x1de4   : > { %v6427_v3 = vmul.f32 1.442695, %v6426_v55 }
0x1de6   : > { %12813 = vpow2.f32 %v6427_v3 }
0x1df3   : > { %v12814_v5 = vpop.eup %12813 }
0x1df4   : > { %v6429_v56 = vadd.f32 1.0, %v12814_v5 }
0x1df6   : > { %12815 = vrcp.f32 %v6429_v56 }
0x1e03   : > { %v12816_v44 = vpop.eup %12815 }
0x1e04   : > { %v14123_v48 = vmul.f32 %v12816_v44, %v6425_v49 }
0x1e06   : > { %6607 = vrot.lane.b32.xlu0 %v14123_v48, %s14837_s5  ;;  %6605 = vrot.lane.b32.xlu1 %v14123_v48, %s14838_s8 }
0x1e72   : > { %v6518_v0 = vpop.f32.mrf.mxu1 }
0x1e73   : > { %12268 = vmatpush3.msra.mxu0 %v6518_v0 }
0x1e74   : > { %v12266_v7 = vpop.f32.mrf.mxu1  ;;  %12270 = vmatmul.mubr.msk.f32.vlgmr.msra.gmra.mxu0 %vm1235_vm4, %v13762_v62  ;;  %12277 = vmatprep.subr.mxu0 %v13033_v1  ;;  %v6592_v62 = vmul.f32 %v13790_v58, %v6518_v0 }
0x1e75   : > { %12278 = vmatpush3.msra.mxu0 %v13768_v2  ;;  %12279 = vmatprep.mubr.msk.f32.mxu0 %vm13034_vm1, %v13033_v1 }
0x1e76   : > { %12287 = vmatprep.subr.mxu0 %v13033_v1  ;;  %v6593_v2 = vsel %vm1721_vm6, %v6592_v62, 0.0 }
0x1e77   : > { %v6594_v54 = vrot.slane %v6593_v2, 4 }
0x1e78   : > { %v6608_v40 = vpop.permute.xlu0 %6607  ;;  %v6606_v8 = vpop.permute.xlu1 %6605 }
0x1e79   : > { %12273 = vmatpush3.xpose.msk.msra.mxu1 %vm1109_vm3, %v6608_v40  ;;  %v6595_v18 = vadd.f32 %v6594_v54, %v6593_v2 }
0x1e7a   : > { %12282 = vmatprep.subr.mxu1 %v13033_v1 }
0x1e7b   : > { %v6596_v53 = vrot.slane %v6595_v18, 2 }
0x1e7c   : > { %12275 = vmatmul.mubr.msk.f32.vlgmr.msra.gmra.mxu1 %vm1109_vm3, %v6606_v8 }
0x1e7d   : > { %12283 = vmatpush3.msra.mxu1 %v13778_v60  ;;  %12284 = vmatprep.mubr.msk.f32.mxu1 %vm13034_vm1, %v13033_v1  ;;  %v6597_v30 = vadd.f32 %v6596_v53, %v6595_v18  ;;  %v11281_v18 = vld [vmem:[%s13181_s30 + $0x138] sm:$0xff]  ;;  %v11280_v53 = vld [vmem:[%s13181_s30 + $0x130] sm:$0xff] }
0x1e7f   : > { %v6598_v9 = vrot.slane %v6597_v30, 1 }
0x1e80   : > { %12285 = vmatmul.mubr.msk.f32.vlgmr.msra.gmra.mxu1 %vm1235_vm4, %v6446_v61 }
0x1e81   : > { %12294 = vmatprep.mubr.msk.f32.mxu1 %vm1235_vm4, %v13785_v63  ;;  %v6599_v60 = vadd.f32 %v6598_v9, %v6597_v30  ;;  %v11261_v63 = vld [vmem:[%s14833_s11 + $0x4] sm:$0x1]  ;;  %v11277_v30 = vld [vmem:[%s13181_s30 + $0x118] sm:$0xff]  ;;  %v11276_v9 = vld [vmem:[%s13181_s30 + $0x110] sm:$0xff] }
0x1f34   : > { %v6588_v35 = vpop.f32.mrf.mxu0 }
0x1f35   : > { %v6600_v51 = vsub.f32 %v6588_v35, %v6599_v60  ;;  %v11275_v60 = vld [vmem:[%s13181_s30 + $0x108] sm:$0xff]  ;;  %v11274_v35 = vld [vmem:[%s13181_s30 + $0x100] sm:$0xff] }
0x1f36   : > { %v12271_v23 = vpop.f32.mrf.mxu0 }
0x1f3c   : > { %v6679_v31 = vpop.f32.mrf.mxu1 }
0x1f3d   : > { %12280 = vmatmul.mubr.msk.f32.vlgmr.msra.gmra.mxu0 %vm1235_vm4, %v6679_v31 }
0x1f3e   : > { %v12276_v61 = vpop.f32.mrf.mxu1  ;;  %12288 = vmatpush3.msra.mxu0 %v14149_v25  ;;  %12289 = vmatprep.mubr.msk.f32.mxu0 %vm13034_vm1, %v13033_v1 }
0x1f3f   : > { %12306 = vmatprep.subr.mxu0 %v13033_v1 }
0x1f40   : > { %v6825_v58 = vpop.f32.mrf.mxu1 }
0x1f41   : > { %v6904_v42 = vmul.f32 %v6825_v58, %v14123_v48  ;;  %12290 = vmatmul.mubr.msk.f32.vlgmr.msra.gmra.mxu0 %vm1235_vm4, %v11261_v63  ;;  %v11273_v63 = vld [vmem:[%s14836_s23 + $0x4] ss:$0 sm:$0xff] }
0x1f42   : > { %v12286_v41 = vpop.f32.mrf.mxu1  ;;  %12322 = vmatprep.mubr.msk.f32.mxu0 %vm13034_vm1, %v13033_v1 }
0x1f43   : > { %12292 = vmatprep.subr.mxu1 %v6904_v42 }
0x1f44   : > { %12293 = vmatpush3.msra.mxu1 %v6904_v42 }
0x1f45   : > { %12295 = vmatmul.mubr.msk.f32.vlgmr.msra.gmra.mxu1 %vm1235_vm4, %v13805_v37  ;;  %12325 = vmatprep.subr.mxu1 %v13033_v1 }
0x1f46   : > { %12297 = vmatprep.mubr.msk.f32.mxu1 %vm1235_vm4, %v13811_v38  ;;  %12326 = vmatpush3.msra.mxu1 %v11281_v18 }
0x1f47   : > { %12327 = vmatprep.subr.mxu1 %v13033_v1 }
0x1f48   : > { %12328 = vmatpush3.msra.mxu1 %v11280_v53 }
0x1f49   : > { %12298 = vmatmul.mubr.msk.f32.gmra.mxu1 %vm1235_vm4, %v13816_v33  ;;  %12329 = vmatprep.subr.mxu1 %v13033_v1 }
0x1f4a   : > { %12300 = vmatprep.mubr.msk.f32.mxu1 %vm1235_vm4, %v13821_v39 }
0x1f4d   : > { %12301 = vmatmul.mubr.msk.f32.gmra.mxu1 %vm1235_vm4, %v13826_v15  ;;  %v6601_v15 = vsel %vm1729_vm7, %v6600_v51, -1e+30 }
0x1f4e   : > { %12303 = vmatprep.mubr.msk.f32.mxu1 %vm1235_vm4, %v13831_v57  ;;  %v6602_v27 = vmul.f32 1.442695, %v6601_v15  ;;  %v11288_v15 = vld [vmem:[%s13146_s27 + $0x158] sm:$0xff] }
0x1f50   : > { %12817 = vpow2.f32 %v6602_v27  ;;  %v11285_v27 = vld [vmem:[%s13146_s27 + $0x140] sm:$0xff] }
0x1f51   : > { %12304 = vmatmul.mubr.msk.f32.gmra.mxu1 %vm1235_vm4, %v13836_v59 }
0x1f52   : > { %12341 = vmatprep.mubr.msk.f32.mxu1 %vm13034_vm1, %v13033_v1 }
0x1ffd   : > { %v6752_v37 = vpop.f32.mrf.mxu0 }
0x1fff   : > { %v12281_v38 = vpop.f32.mrf.mxu0 }
0x2001   : > { %v6900_v32 = vpop.f32.mrf.mxu0 }
0x2003   : > { %v12291_v26 = vpop.f32.mrf.mxu0 }
0x2005   : > { %v12296_v33 = vpop.f32.mrf.mxu1 }
0x2007   : > { %v6971_v34 = vpop.f32.mrf.mxu1 }
0x2009   : > { %v12299_v52 = vpop.f32.mrf.mxu1 }
0x200a   : > { %v7013_v55 = vmul.f32 %v13864_v10, %v12299_v52  ;;  %v7096_v10 = vsub.f32 0.0, %v14086_v22  ;;  %v11290_v52 = vld [vmem:[%s13146_s27 + $0x168] sm:$0xff] }
0x200b   : > { %v6981_v39 = vpop.f32.mrf.mxu1 }
0x200d   : > { %v12302_v6 = vpop.f32.mrf.mxu1 }
0x200e   : > { %v7015_v29 = vmul.f32 %v13854_v43, %v12302_v6  ;;  %v12818_v43 = vpop.eup %12817  ;;  %v11287_v6 = vld [vmem:[%s13146_s27 + $0x150] sm:$0xff] }
0x200f   : > { %v6991_v57 = vpop.f32.mrf.mxu1  ;;  %v6756_v3 = vmul.f32 %v12818_v43, %v6752_v37 }
0x2010   : > { %v7014_v49 = vmul.f32 %v13859_v4, %v6991_v57  ;;  %v7010_v4 = vmul.f32 %v13879_v20, %v6971_v34  ;;  %v7021_v20 = vrot.slane %v6900_v32, %v13267_v14  ;;  %v11291_v34 = vld [vmem:[%s13146_s27 + $0x170] sm:$0xff]  ;;  %v11295_v57 = vld [vmem:[%s13161_s12 + $0x5] ss:$0 sm:$0xff] }
0x2011   : > { %v12305_v13 = vpop.f32.mrf.mxu1 }
0x2012   : > { %v7017_v59 = vmul.f32 %v13845_v28, %v12305_v13  ;;  %v7012_v28 = vmul.f32 %v13869_v12, %v6981_v39  ;;  %v7097_v12 = vmul.f32 1.442695, %v7096_v10  ;;  %v7022_v44 = vmul.f32 %v7021_v20, %v14123_v48  ;;  %v11278_v48 = vld [vmem:[%s13181_s30 + $0x120] sm:$0xff]  ;;  %v14256_v10 = vld [vmem:[%s13101_s24 + $0x10] sm:$0xff] }
0x2013   : > { %v7001_v46 = vpop.f32.mrf.mxu1  ;;  %v11289_v39 = vld [vmem:[%s13146_s27 + $0x160] sm:$0xff] }
0x2014   : > { %v7016_v45 = vmul.f32 %v13849_v50, %v7001_v46  ;;  %12307 = vmatpush3.msra.mxu0 %v7017_v59  ;;  %v7011_v50 = vmul.f32 %v13874_v47, %v12296_v33  ;;  %12819 = vpow2.f32 %v7097_v12  ;;  %v11292_v33 = vld [vmem:[%s13146_s27 + $0x178] sm:$0xff] }
0x2015   : > { %12308 = vmatprep.subr.mxu0 %v13033_v1 }
0x2016   : > { %12309 = vmatpush3.msra.mxu0 %v7016_v45 }
0x2017   : > { %12310 = vmatprep.subr.mxu0 %v13033_v1 }
0x2018   : > { %12311 = vmatpush3.msra.mxu0 %v7015_v29  ;;  %v11284_v29 = vld [vmem:[%s13141_s6 + $0x5] ss:$0 sm:$0xff] }
0x2019   : > { %12312 = vmatprep.subr.mxu0 %v13033_v1 }
0x201a   : > { %12313 = vmatpush3.msra.mxu0 %v7014_v49 }
0x201b   : > { %12314 = vmatprep.subr.mxu0 %v13033_v1 }
0x201c   : > { %12315 = vmatpush3.msra.mxu0 %v7013_v55 }
0x201d   : > { %12316 = vmatprep.subr.mxu0 %v13033_v1 }
0x201e   : > { %12317 = vmatpush3.msra.mxu0 %v7012_v28 }
0x201f   : > { %12318 = vmatprep.subr.mxu0 %v13033_v1 }
0x2020   : > { %12319 = vmatpush3.msra.mxu0 %v7011_v50 }
0x2021   : > { %12320 = vmatprep.subr.mxu0 %v13033_v1  ;;  %v12820_v47 = vpop.eup %12819 }
0x2022   : > { %12321 = vmatpush3.msra.mxu0 %v7010_v4  ;;  %v7099_v5 = vadd.f32 1.0, %v12820_v47  ;;  %v14246_v4 = vld [vmem:[%s13101_s24] sm:$0xff]  ;;  %v14264_v47 = vld [vmem:[%s13101_s24 + $0x8] sm:$0xff] }
0x2023   : > { %12323 = vmatmul.mubr.msk.f32.vlgmr.msra.gmra.mxu0 %vm1721_vm6, %v6756_v3  ;;  %7257 = vmatprep.subr.mxu0 %v11292_v33 }
0x2024   : > { %7297 = vmatprep.mubr.f32.mxu0 %v13033_v1  ;;  %12821 = vrcp.f32 %v7099_v5  ;;  %7258 = vmatpush1.msra.mxu0 %v11291_v34  ;;  %v14269_v5 = vld [vmem:[%s14824_s26] sm:$0xff] }
0x2025   : > { %7259 = vmatprep.subr.mxu0 %v11290_v52 }
0x2026   : > { %7260 = vmatpush1.msra.mxu0 %v11289_v39 }
0x2027   : > { %7261 = vmatprep.subr.mxu0 %v11288_v15 }
0x2028   : > { %7262 = vmatpush1.msra.mxu0 %v11287_v6 }
0x2031   : > { %v12822_v56 = vpop.eup %12821 }
0x2032   : > { %v7102_v7 = vmul.f32 %v12822_v56, %v14086_v22  ;;  %v11279_v22 = vld [vmem:[%s13181_s30 + $0x128] sm:$0xff]  ;;  %v14277_v56 = vld [vmem:[%s13101_s24 + $0x18] sm:$0xff] }
0x2033   : > { %12330 = vmatpush3.msra.mxu1 %v11279_v22 }
0x2034   : > { %12331 = vmatprep.subr.mxu1 %v13033_v1 }
0x2035   : > { %12332 = vmatpush3.msra.mxu1 %v11278_v48 }
0x2036   : > { %12333 = vmatprep.subr.mxu1 %v13033_v1 }
0x2037   : > { %12334 = vmatpush3.msra.mxu1 %v11277_v30  ;;  %v11296_v30 = vld [vmem:[%s14826_s1 + $0x14] sm:$0xf] }
0x2038   : > { %12335 = vmatprep.subr.mxu1 %v13033_v1 }
0x2039   : > { %12336 = vmatpush3.msra.mxu1 %v11276_v9  ;;  %v7407_v9 = vrot.slane %v11296_v30, %v13267_v14 }
0x203a   : > { %12337 = vmatprep.subr.mxu1 %v13033_v1 }
0x203b   : > { %12338 = vmatpush3.msra.mxu1 %v11275_v60 }
0x203c   : > { %12339 = vmatprep.subr.mxu1 %v13033_v1 }
0x203d   : > { %12340 = vmatpush3.msra.mxu1 %v11274_v35 }
0x203e   : > { %12344 = vmatprep.subr.mxu1 %v13033_v1 }
0x20e3   : > { %v7092_v0 = vpop.f32.mrf.mxu0 }
0x20e4   : > { %v7093_v40 = vadd.f32 %v7092_v0, %v7022_v44 }
0x20e5   : > { %v12324_v8 = vpop.f32.mrf.mxu0 }
0x20e6   : > { %v7103_v62 = vmul.f32 %v7102_v7, %v7093_v40 }
0x20e8   : > { %v7104_v2 = vmul.f32 %v7103_v62, %v7103_v62 }
0x20ea   : > { %v7105_v54 = vsel %vm1721_vm6, %v7104_v2, 0.0 }
0x20eb   : > { %7106 = vadd.xlane.f32.xlu0 %v7105_v54 }
0x2101   : > { %7311 = vrot.lane.b32.xlu0 %v11295_v57, %s14837_s5 }
0x2174   : > { %v7107_v51 = vpop.xlane.xlu0 %7106 }
0x2175   : > { %v7108_v23 = vmul.f32 0.015625, %v7107_v51  ;;  %v7483_v51 = vrot.slane %v11296_v30, %v13356_v16 }
0x2177   : > { %v7109_v31 = vadd.f32 1e-05, %v7108_v23  ;;  %v7559_v23 = vrot.slane %v11296_v30, %v13359_v17 }
0x2178   : > { %v7312_v50 = vpop.permute.xlu0 %7311 }
0x2179   : > { %12823 = vrsqrt.f32 %v7109_v31  ;;  %v11298_v31 = vld [vmem:[%s14827_s2 + $0x5] ss:$0 sm:$0xff] }
0x2186   : > { %v12824_v61 = vpop.eup %12823 }
0x2187   : > { %v7111_v58 = vmul.f32 %v12824_v61, %v7103_v62  ;;  %v11303_v62 = vld [vmem:[%s14825_s28 + $0x5] sm:$0x1] }
0x2188   : > { %v7647_v2 = vmul.f32 1.442695, %v11303_v62 }
0x2189   : > { %v7120_v42 = vmul.f32 %v11273_v63, %v7111_v58 }
0x218b   : > { %12342 = vmatmul.mubr.msk.f32.vlgmr.msra.gmra.mxu1 %vm1721_vm6, %v7120_v42 }
0x218c   : > { %12346 = vmatprep.mubr.msk.f32.mxu1 %vm13034_vm1, %v13033_v1 }
0x224b   : > { %v7199_v41 = vpop.f32.mrf.mxu1 }
0x224c   : > { %v14222_v37 = vadd.f32 %v7199_v41, %v14065_v11  ;;  %v11286_v11 = vld [vmem:[%s13146_s27 + $0x148] sm:$0xff] }
0x224d   : > { %v12343_v38 = vpop.f32.mrf.mxu1  ;;  %7263 = vmatprep.subr.mxu0 %v11286_v11 }
0x224e   : > { %v7204_v32 = vmul.f32 %v14222_v37, %v14222_v37  ;;  %7264 = vmatpush1.msra.mxu0 %v11285_v27 }
0x224f   : > { %12354 = vmatprep.subr.mxu0 %v13033_v1 }
0x2250   : > { %v7205_v26 = vsel %vm1109_vm3, %v7204_v32, 0.0 }
0x2251   : > { %7206 = vadd.xlane.f32.xlu1 %v7205_v26  ;;  %v7635_v26 = vrot.slane %v11296_v30, %v13364_v24 }
0x22da   : > { %v7207_v13 = vpop.xlane.xlu1 %7206 }
0x22db   : > { %v7208_v59 = vmul.f32 0.03125, %v7207_v13 }
0x22dd   : > { %v7209_v46 = vadd.f32 1e-05, %v7208_v59 }
0x22df   : > { %12825 = vrsqrt.f32 %v7209_v46 }
0x22ec   : > { %v12826_v45 = vpop.eup %12825 }
0x22ed   : > { %v7211_v49 = vmul.f32 %v12826_v45, %v14222_v37 }
0x22ef   : > { %v7220_v55 = vmul.f32 %v11284_v29, %v7211_v49 }
0x22f1   : > { %11293 = vmatmul.mubr.msk.f32.vlgmr.msra.gmra.mxu0 %vm1109_vm3, %v7220_v55  ;;  %v14302_v55 = vld [vmem:[%s14828_s7] sm:$0xff] }
0x22f2   : > { %12356 = vmatprep.mubr.msk.f32.mxu0 %vm13034_vm1, %v13033_v1 }
0x23b1   : > { %v7299_v28 = vpop.f32.mrf.mxu0 }
0x23b2   : > { %12345 = vmatpush3.msra.mxu1 %v7299_v28  ;;  %12355 = vmatpush3.msra.mxu0 %v7299_v28 }
0x23b3   : > { %v14243_v43 = vpop.f32.mrf.mxu0  ;;  %12347 = vmatmul.mubr.msk.f32.vlgmr.msra.gmra.mxu1 %vm1235_vm4, %v14246_v4  ;;  %12349 = vmatprep.subr.mxu1 %v13033_v1 }
0x23b4   : > { %v7314_v3 = vadd.f32 %v7312_v50, %v14243_v43  ;;  %12350 = vmatpush3.msra.mxu1 %v7299_v28  ;;  %12351 = vmatprep.mubr.msk.f32.mxu1 %vm13034_vm1, %v13033_v1 }
0x23b5   : > { %12359 = vmatprep.subr.mxu1 %v13033_v1  ;;  %12357 = vmatmul.mubr.msk.f32.vlgmr.msra.gmra.mxu0 %vm1235_vm4, %v14256_v10 }
0x23b6   : > { %v7316_v12 = vmin.f32 %v7314_v3, 20.0  ;;  %12364 = vmatprep.subr.mxu0 %v13033_v1  ;;  %12366 = vmatprep.mubr.msk.f32.mxu0 %vm13034_vm1, %v13033_v1  ;;  %vm7315_vm12 = vcmp.gt.f32.partialorder %v7314_v3, 20.0 }
0x23b7   : > { %12352 = vmatmul.mubr.msk.f32.vlgmr.msra.gmra.mxu1 %vm1235_vm4, %v14264_v47  ;;  %12365 = vmatpush3.msra.mxu0 %v14269_v5 }
0x23b8   : > { %v7317_v20 = vmul.f32 1.442695, %v7316_v12  ;;  %12360 = vmatpush3.msra.mxu1 %v7299_v28  ;;  %12361 = vmatprep.mubr.msk.f32.mxu1 %vm13034_vm1, %v13033_v1  ;;  %v14308_v28 = vld [vmem:[%s14830_s18] sm:$0xff] }
0x23b9   : > { %12369 = vmatprep.subr.mxu1 %v13033_v1  ;;  %12374 = vmatprep.subr.mxu0 %v13033_v1  ;;  %v14322_v12 = vld [vmem:[%s14831_s22] sm:$0xff] }
0x23ba   : > { %12827 = vpow2.f32 %v7317_v20  ;;  %v14327_v20 = vld [vmem:[%s14832_s0] sm:$0xff] }
0x23bb   : > { %12362 = vmatmul.mubr.msk.f32.vlgmr.msra.gmra.mxu1 %vm1235_vm4, %v14277_v56 }
0x23bc   : > { %12371 = vmatprep.mubr.msk.f32.mxu1 %vm13034_vm1, %v13033_v1 }
0x23c7   : > { %v12828_v44 = vpop.eup %12827 }
0x23c8   : > { %v7319_v0 = vadd.f32 1.0, %v12828_v44 }
0x23ca   : > { %12829 = vlog2.f32 %v7319_v0 }
0x23cb   : > { %12831 = vpow2.f32 %v7647_v2 }
0x23d7   : > { %v12830_v7 = vpop.eup %12829 }
0x23d8   : > { %v7321_v40 = vmul.f32 0.6931472, %v12830_v7  ;;  %v12832_v54 = vpop.eup %12831 }
0x23d9   : > { %v7649_v18 = vsub.f32 0.0, %v12832_v54 }
0x23da   : > { %v7322_v8 = vsel %vm7315_vm12, %v7314_v3, %v7321_v40 }
0x23db   : > { %7657 = vrot.lane.b32.xlu1 %v7322_v8, %s14837_s5  ;;  %v7654_v53 = vrot.slane %v7649_v18, %v13267_v14 }
0x244d   : > { %v7658_v22 = vpop.permute.xlu1 %7657 }
0x244e   : > { %v7660_v48 = vmul.f32 %v7658_v22, %v7654_v53 }
0x2450   : > { %12367 = vmatmul.mubr.msk.f32.vlgmr.msra.gmra.mxu0 %vm1235_vm4, %v7660_v48 }
0x2451   : > { %12376 = vmatprep.mubr.msk.f32.mxu0 %vm13034_vm1, %v13033_v1 }
0x2473   : > { %v7400_v60 = vpop.f32.mrf.mxu1 }
0x2474   : > { %v7408_v35 = vmul.f32 %v7407_v9, %v7400_v60  ;;  %v11310_v9 = vld [vmem:[%s14833_s11 + $0x5] sm:$0x1] }
0x2475   : > { %v12348_v61 = vpop.f32.mrf.mxu1  ;;  %v7552_v63 = vpop.f32.mrf.mxu0 }
0x2476   : > { %v7409_v41 = vadd.f32 %v11298_v31, %v7408_v35  ;;  %v7560_v32 = vmul.f32 %v7559_v23, %v7552_v63  ;;  %v14342_v23 = vld [vmem:[%s14831_s22 + $0x8] sm:$0xff]  ;;  %v14348_v31 = vld [vmem:[%s14831_s22 + $0x10] sm:$0xff]  ;;  %v14353_v61 = vld [vmem:[%s14831_s22 + $0x18] sm:$0xff] }
0x2477   : > { %v7476_v58 = vpop.f32.mrf.mxu1  ;;  %v12358_v42 = vpop.f32.mrf.mxu0  ;;  %v14358_v63 = vld [vmem:[%s14831_s22 + $0x20] sm:$0xff] }
0x2478   : > { %v7484_v38 = vmul.f32 %v7483_v51, %v7476_v58  ;;  %v14363_v58 = vld [vmem:[%s14831_s22 + $0x28] sm:$0xff]  ;;  %v14368_v42 = vld [vmem:[%s14831_s22 + $0x30] sm:$0xff] }
0x2479   : > { %v12353_v33 = vpop.f32.mrf.mxu1 }
0x247a   : > { %v7485_v34 = vadd.f32 %v7484_v38, %v7409_v41  ;;  %v14373_v41 = vld [vmem:[%s14831_s22 + $0x38] sm:$0xff] }
0x247b   : > { %v7628_v52 = vpop.f32.mrf.mxu1 }
0x247c   : > { %v7561_v39 = vadd.f32 %v7560_v32, %v7485_v34  ;;  %v7636_v15 = vmul.f32 %v7635_v26, %v7628_v52 }
0x247d   : > { %v12363_v6 = vpop.f32.mrf.mxu1 }
0x247e   : > { %v7637_v11 = vadd.f32 %v7636_v15, %v7561_v39 }
0x2480   : > { %v7638_v27 = vsub.f32 0.0, %v7637_v11 }
0x2482   : > { %v7639_v57 = vmul.f32 1.442695, %v7638_v27 }
0x2484   : > { %12833 = vpow2.f32 %v7639_v57 }
0x2491   : > { %v12834_v13 = vpop.eup %12833 }
0x2492   : > { %v7641_v59 = vadd.f32 1.0, %v12834_v13 }
0x2494   : > { %12835 = vrcp.f32 %v7641_v59  ;;  %v14382_v59 = vld [vmem:[%s14835_s3 + $0x38] sm:$0xff] }
0x24a1   : > { %v12836_v46 = vpop.eup %12835 }
0x24a2   : > { %v14295_v45 = vmul.f32 %v12836_v46, %v7637_v11 }
0x24a4   : > { %7819 = vrot.lane.b32.xlu0 %v14295_v45, %s14837_s5  ;;  %7817 = vrot.lane.b32.xlu1 %v14295_v45, %s14838_s8 }
0x2510   : > { %v7730_v29 = vpop.f32.mrf.mxu0 }
0x2511   : > { %12370 = vmatpush3.msra.mxu1 %v7730_v29  ;;  %v7804_v44 = vmul.f32 %v14327_v20, %v7730_v29 }
0x2512   : > { %v12368_v49 = vpop.f32.mrf.mxu0  ;;  %12372 = vmatmul.mubr.msk.f32.vlgmr.msra.gmra.mxu1 %vm1235_vm4, %v14302_v55  ;;  %12379 = vmatprep.subr.mxu1 %v13033_v1 }
0x2513   : > { %12380 = vmatpush3.msra.mxu1 %v14308_v28  ;;  %12381 = vmatprep.mubr.msk.f32.mxu1 %vm13034_vm1, %v13033_v1  ;;  %v7805_v0 = vsel %vm1721_vm6, %v7804_v44, 0.0  ;;  %v14386_v49 = vld [vmem:[%s14835_s3 + $0x30] sm:$0xff] }
0x2514   : > { %12389 = vmatprep.subr.mxu1 %v13033_v1  ;;  %v7806_v7 = vrot.slane %v7805_v0, 4 }
0x2516   : > { %v7820_v50 = vpop.permute.xlu0 %7819  ;;  %v7818_v3 = vpop.permute.xlu1 %7817  ;;  %v7807_v40 = vadd.f32 %v7806_v7, %v7805_v0  ;;  %v14396_v0 = vld [vmem:[%s14835_s3 + $0x20] sm:$0xff] }
0x2517   : > { %12375 = vmatpush3.xpose.msk.msra.mxu0 %vm1109_vm3, %v7820_v50 }
0x2518   : > { %12384 = vmatprep.subr.mxu0 %v13033_v1  ;;  %v7808_v8 = vrot.slane %v7807_v40, 2 }
0x251a   : > { %12377 = vmatmul.mubr.msk.f32.vlgmr.msra.gmra.mxu0 %vm1109_vm3, %v7818_v3  ;;  %v7809_v62 = vadd.f32 %v7808_v8, %v7807_v40  ;;  %v14391_v3 = vld [vmem:[%s14835_s3 + $0x28] sm:$0xff]  ;;  %v14401_v40 = vld [vmem:[%s14835_s3 + $0x18] sm:$0xff] }
0x251b   : > { %12385 = vmatpush3.msra.mxu0 %v14149_v25  ;;  %12386 = vmatprep.mubr.msk.f32.mxu0 %vm13034_vm1, %v13033_v1 }
0x251c   : > { %v7810_v2 = vrot.slane %v7809_v62, 1 }
0x251e   : > { %12387 = vmatmul.mubr.msk.f32.vlgmr.msra.gmra.mxu0 %vm1235_vm4, %v7658_v22  ;;  %v7811_v54 = vadd.f32 %v7810_v2, %v7809_v62  ;;  %v14406_v62 = vld [vmem:[%s14835_s3 + $0x10] sm:$0xff] }
0x251f   : > { %12396 = vmatprep.mubr.msk.f32.mxu0 %vm1235_vm4, %v14322_v12 }
0x25d2   : > { %v7800_v18 = vpop.f32.mrf.mxu1 }
0x25d3   : > { %v7812_v53 = vsub.f32 %v7800_v18, %v7811_v54  ;;  %v14411_v54 = vld [vmem:[%s14835_s3 + $0x8] sm:$0xff] }
0x25d4   : > { %v12373_v22 = vpop.f32.mrf.mxu1 }
0x25d5   : > { %v7813_v6 = vsel %vm1729_vm7, %v7812_v53, -1e+30  ;;  %v14416_v22 = vld [vmem:[%s14835_s3] sm:$0xff] }
0x25d6   : > { %v7814_v27 = vmul.f32 1.442695, %v7813_v6 }
0x25d8   : > { %12837 = vpow2.f32 %v7814_v27 }
0x25da   : > { %v7891_v48 = vpop.f32.mrf.mxu0 }
0x25db   : > { %12382 = vmatmul.mubr.msk.f32.vlgmr.msra.gmra.mxu1 %vm1235_vm4, %v7891_v48 }
0x25dc   : > { %v12378_v30 = vpop.f32.mrf.mxu0  ;;  %12390 = vmatpush3.msra.mxu1 %v14149_v25  ;;  %12391 = vmatprep.mubr.msk.f32.mxu1 %vm13034_vm1, %v13033_v1 }
0x25dd   : > { %12408 = vmatprep.subr.mxu1 %v13033_v1 }
0x25de   : > { %v8037_v60 = vpop.f32.mrf.mxu0 }
0x25df   : > { %v8116_v35 = vmul.f32 %v8037_v60, %v14295_v45  ;;  %12392 = vmatmul.mubr.msk.f32.vlgmr.msra.gmra.mxu1 %vm1235_vm4, %v11310_v9  ;;  %v8308_v9 = vsub.f32 0.0, %v14243_v43 }
0x25e0   : > { %v12388_v51 = vpop.f32.mrf.mxu0  ;;  %12424 = vmatprep.mubr.msk.f32.mxu1 %vm13034_vm1, %v13033_v1 }
0x25e1   : > { %12394 = vmatprep.subr.mxu0 %v8116_v35  ;;  %v8309_v60 = vmul.f32 1.442695, %v8308_v9 }
0x25e2   : > { %12395 = vmatpush3.msra.mxu0 %v8116_v35 }
0x25e3   : > { %12397 = vmatmul.mubr.msk.f32.vlgmr.msra.gmra.mxu0 %vm1235_vm4, %v14342_v23  ;;  %12427 = vmatprep.subr.mxu0 %v13033_v1  ;;  %12839 = vpow2.f32 %v8309_v60 }
0x25e4   : > { %12399 = vmatprep.mubr.msk.f32.mxu0 %vm1235_vm4, %v14348_v31 }
0x25e5   : > { %v12838_v53 = vpop.eup %12837 }
0x25e7   : > { %12400 = vmatmul.mubr.msk.f32.gmra.mxu0 %vm1235_vm4, %v14353_v61 }
0x25e8   : > { %12402 = vmatprep.mubr.msk.f32.mxu0 %vm1235_vm4, %v14358_v63 }
0x25eb   : > { %12403 = vmatmul.mubr.msk.f32.gmra.mxu0 %vm1235_vm4, %v14363_v58 }
0x25ec   : > { %12405 = vmatprep.mubr.msk.f32.mxu0 %vm1235_vm4, %v14368_v42 }
0x25ef   : > { %12406 = vmatmul.mubr.msk.f32.gmra.mxu0 %vm1235_vm4, %v14373_v41 }
0x25f0   : > { %12443 = vmatprep.mubr.msk.f32.mxu0 %vm13034_vm1, %v13033_v1  ;;  %v12840_v35 = vpop.eup %12839 }
0x25f1   : > { %v8311_v51 = vadd.f32 1.0, %v12840_v35 }
0x25f3   : > { %12841 = vrcp.f32 %v8311_v51 }
0x269b   : > { %v7964_v38 = vpop.f32.mrf.mxu1 }
0x269c   : > { %v7968_v30 = vmul.f32 %v12838_v53, %v7964_v38 }
0x269d   : > { %v12383_v32 = vpop.f32.mrf.mxu1 }
0x269f   : > { %v8112_v26 = vpop.f32.mrf.mxu1 }
0x26a0   : > { %v8233_v32 = vrot.slane %v8112_v26, %v13267_v14  ;;  %v11329_v26 = vld [vmem:[%s13181_s30 + $0x170] sm:$0xff] }
0x26a1   : > { %v12393_v33 = vpop.f32.mrf.mxu1 }
0x26a2   : > { %v12842_v33 = vpop.eup %12841  ;;  %v8234_v38 = vmul.f32 %v8233_v32, %v14295_v45  ;;  %v11327_v45 = vld [vmem:[%s13181_s30 + $0x160] sm:$0xff]  ;;  %v11341_v32 = vld [vmem:[%s13146_s27 + $0x1b8] sm:$0xff] }
0x26a3   : > { %v12398_v34 = vpop.f32.mrf.mxu0 }
0x26a4   : > { %v8223_v18 = vmul.f32 %v14411_v54, %v12398_v34 }
0x26a5   : > { %v8183_v52 = vpop.f32.mrf.mxu0 }
0x26a6   : > { %v8222_v48 = vmul.f32 %v14416_v22, %v8183_v52  ;;  %v8314_v52 = vmul.f32 %v12842_v33, %v14243_v43  ;;  %v11328_v43 = vld [vmem:[%s13181_s30 + $0x168] sm:$0xff]  ;;  %v11340_v33 = vld [vmem:[%s13146_s27 + $0x1b0] sm:$0xff] }
0x26a7   : > { %v12401_v39 = vpop.f32.mrf.mxu0 }
0x26a8   : > { %v8225_v8 = vmul.f32 %v14401_v40, %v12401_v39 }
0x26a9   : > { %v8193_v15 = vpop.f32.mrf.mxu0 }
0x26aa   : > { %v8224_v2 = vmul.f32 %v14406_v62, %v8193_v15 }
0x26ab   : > { %v12404_v11 = vpop.f32.mrf.mxu0 }
0x26ac   : > { %v8227_v44 = vmul.f32 %v14391_v3, %v12404_v11 }
0x26ad   : > { %v8203_v57 = vpop.f32.mrf.mxu0 }
0x26ae   : > { %v8226_v7 = vmul.f32 %v14396_v0, %v8203_v57  ;;  %v11330_v57 = vld [vmem:[%s13181_s30 + $0x178] sm:$0xff] }
0x26af   : > { %v12407_v13 = vpop.f32.mrf.mxu0  ;;  %12428 = vmatpush3.msra.mxu0 %v11330_v57 }
0x26b0   : > { %v8229_v46 = vmul.f32 %v14382_v59, %v12407_v13  ;;  %12429 = vmatprep.subr.mxu0 %v13033_v1  ;;  %v11326_v13 = vld [vmem:[%s13181_s30 + $0x158] sm:$0xff] }
0x26b1   : > { %v8213_v29 = vpop.f32.mrf.mxu0  ;;  %12430 = vmatpush3.msra.mxu0 %v11329_v26 }
0x26b2   : > { %v8228_v50 = vmul.f32 %v14386_v49, %v8213_v29  ;;  %12409 = vmatpush3.msra.mxu1 %v8229_v46  ;;  %12431 = vmatprep.subr.mxu0 %v13033_v1  ;;  %v11325_v46 = vld [vmem:[%s13181_s30 + $0x150] sm:$0xff]  ;;  %v11324_v29 = vld [vmem:[%s13181_s30 + $0x148] sm:$0xff] }
0x26b3   : > { %12410 = vmatprep.subr.mxu1 %v13033_v1  ;;  %12432 = vmatpush3.msra.mxu0 %v11328_v43  ;;  %v11333_v43 = vld [vmem:[%s13141_s6 + $0x6] ss:$0 sm:$0xff] }
0x26b4   : > { %12411 = vmatpush3.msra.mxu1 %v8228_v50  ;;  %12433 = vmatprep.subr.mxu0 %v13033_v1  ;;  %v11323_v50 = vld [vmem:[%s13181_s30 + $0x140] sm:$0xff] }
0x26b5   : > { %12412 = vmatprep.subr.mxu1 %v13033_v1  ;;  %12434 = vmatpush3.msra.mxu0 %v11327_v45 }
0x26b6   : > { %12413 = vmatpush3.msra.mxu1 %v8227_v44  ;;  %12435 = vmatprep.subr.mxu0 %v13033_v1 }
0x26b7   : > { %12414 = vmatprep.subr.mxu1 %v13033_v1  ;;  %12436 = vmatpush3.msra.mxu0 %v11326_v13 }
0x26b8   : > { %12415 = vmatpush3.msra.mxu1 %v8226_v7  ;;  %12437 = vmatprep.subr.mxu0 %v13033_v1 }
0x26b9   : > { %12416 = vmatprep.subr.mxu1 %v13033_v1  ;;  %12438 = vmatpush3.msra.mxu0 %v11325_v46 }
0x26ba   : > { %12417 = vmatpush3.msra.mxu1 %v8225_v8  ;;  %12439 = vmatprep.subr.mxu0 %v13033_v1 }
0x26bb   : > { %12418 = vmatprep.subr.mxu1 %v13033_v1  ;;  %12440 = vmatpush3.msra.mxu0 %v11324_v29 }
0x26bc   : > { %12419 = vmatpush3.msra.mxu1 %v8224_v2  ;;  %12441 = vmatprep.subr.mxu0 %v13033_v1 }
0x26bd   : > { %12420 = vmatprep.subr.mxu1 %v13033_v1  ;;  %12442 = vmatpush3.msra.mxu0 %v11323_v50 }
0x26be   : > { %12421 = vmatpush3.msra.mxu1 %v8223_v18  ;;  %12446 = vmatprep.subr.mxu0 %v13033_v1  ;;  %v11322_v18 = vld [vmem:[%s14836_s23 + $0x5] ss:$0 sm:$0xff] }
0x26bf   : > { %12422 = vmatprep.subr.mxu1 %v13033_v1 }
0x26c0   : > { %12423 = vmatpush3.msra.mxu1 %v8222_v48 }
0x26c1   : > { %12425 = vmatmul.mubr.msk.f32.vlgmr.msra.gmra.mxu1 %vm1721_vm6, %v7968_v30  ;;  %8469 = vmatprep.subr.mxu1 %v11341_v32 }
0x26c2   : > { %8509 = vmatprep.mubr.f32.mxu1 %v13033_v1  ;;  %8470 = vmatpush1.msra.mxu1 %v11340_v33 }
0x2781   : > { %v8304_v34 = vpop.f32.mrf.mxu1 }
0x2782   : > { %v8305_v39 = vadd.f32 %v8304_v34, %v8234_v38  ;;  %v11339_v38 = vld [vmem:[%s13146_s27 + $0x1a8] sm:$0xff]  ;;  %v11338_v34 = vld [vmem:[%s13146_s27 + $0x1a0] sm:$0xff] }
0x2783   : > { %v12426_v15 = vpop.f32.mrf.mxu1  ;;  %8471 = vmatprep.subr.mxu1 %v11339_v38 }
0x2784   : > { %v8315_v6 = vmul.f32 %v8314_v52, %v8305_v39  ;;  %v11337_v52 = vld [vmem:[%s13146_s27 + $0x198] sm:$0xff]  ;;  %v11336_v39 = vld [vmem:[%s13146_s27 + $0x190] sm:$0xff]  ;;  %8472 = vmatpush1.msra.mxu1 %v11338_v34  ;;  %v11334_v15 = vld [vmem:[%s13146_s27 + $0x180] sm:$0xff] }
0x2785   : > { %8473 = vmatprep.subr.mxu1 %v11337_v52  ;;  %v11345_v52 = vld [vmem:[%s14826_s1 + $0x18] sm:$0xf] }
0x2786   : > { %v8316_v11 = vmul.f32 %v8315_v6, %v8315_v6  ;;  %8474 = vmatpush1.msra.mxu1 %v11336_v39  ;;  %v8619_v39 = vrot.slane %v11345_v52, %v13267_v14 }
0x2788   : > { %v8317_v27 = vsel %vm1721_vm6, %v8316_v11, 0.0 }
0x2789   : > { %8318 = vadd.xlane.f32.xlu0 %v8317_v27 }
0x2812   : > { %v8319_v44 = vpop.xlane.xlu0 %8318 }
0x2813   : > { %v8320_v7 = vmul.f32 0.015625, %v8319_v44 }
0x2815   : > { %v8321_v8 = vadd.f32 1e-05, %v8320_v7 }
0x2817   : > { %12843 = vrsqrt.f32 %v8321_v8 }
0x2824   : > { %v12844_v2 = vpop.eup %12843 }
0x2825   : > { %v8323_v53 = vmul.f32 %v12844_v2, %v8315_v6  ;;  %v11344_v6 = vld [vmem:[%s13161_s12 + $0x6] ss:$0 sm:$0xff] }
0x2826   : > { %8523 = vrot.lane.b32.xlu0 %v11344_v6, %s14837_s5  ;;  %v8695_v6 = vrot.slane %v11345_v52, %v13356_v16 }
0x2827   : > { %v8332_v48 = vmul.f32 %v11322_v18, %v8323_v53 }
0x2829   : > { %12444 = vmatmul.mubr.msk.f32.vlgmr.msra.gmra.mxu0 %vm1721_vm6, %v8332_v48 }
0x282a   : > { %12448 = vmatprep.mubr.msk.f32.mxu0 %vm13034_vm1, %v13033_v1 }
0x2898   : > { %v8524_v29 = vpop.permute.xlu0 %8523 }
0x28e9   : > { %v8411_v30 = vpop.f32.mrf.mxu0 }
0x28ea   : > { %v14448_v9 = vadd.f32 %v8411_v30, %v14222_v37  ;;  %v11335_v37 = vld [vmem:[%s13146_s27 + $0x188] sm:$0xff] }
0x28eb   : > { %v12445_v60 = vpop.f32.mrf.mxu0  ;;  %8475 = vmatprep.subr.mxu1 %v11335_v37 }
0x28ec   : > { %v8416_v35 = vmul.f32 %v14448_v9, %v14448_v9  ;;  %8476 = vmatpush1.msra.mxu1 %v11334_v15  ;;  %v11352_v60 = vld [vmem:[%s14825_s28 + $0x6] sm:$0x1] }
0x28ed   : > { %12456 = vmatprep.subr.mxu1 %v13033_v1 }
0x28ee   : > { %v8417_v51 = vsel %vm1109_vm3, %v8416_v35, 0.0  ;;  %v8859_v35 = vmul.f32 1.442695, %v11352_v60 }
0x28ef   : > { %8418 = vadd.xlane.f32.xlu1 %v8417_v51 }
0x2978   : > { %v8419_v11 = vpop.xlane.xlu1 %8418 }
0x2979   : > { %v8420_v27 = vmul.f32 0.03125, %v8419_v11  ;;  %v8771_v11 = vrot.slane %v11345_v52, %v13359_v17 }
0x297b   : > { %v8421_v57 = vadd.f32 1e-05, %v8420_v27  ;;  %v11347_v27 = vld [vmem:[%s14827_s2 + $0x6] ss:$0 sm:$0xff] }
0x297d   : > { %12845 = vrsqrt.f32 %v8421_v57 }
0x298a   : > { %v12846_v26 = vpop.eup %12845 }
0x298b   : > { %v8423_v45 = vmul.f32 %v12846_v26, %v14448_v9 }
0x298d   : > { %v8432_v13 = vmul.f32 %v11333_v43, %v8423_v45 }
0x298f   : > { %11342 = vmatmul.mubr.msk.f32.vlgmr.msra.gmra.mxu1 %vm1109_vm3, %v8432_v13 }
0x2990   : > { %12458 = vmatprep.mubr.msk.f32.mxu1 %vm13034_vm1, %v13033_v1 }
0x2a4f   : > { %v8511_v46 = vpop.f32.mrf.mxu1 }
0x2a50   : > { %12447 = vmatpush3.msra.mxu0 %v8511_v46  ;;  %12457 = vmatpush3.msra.mxu1 %v8511_v46 }
0x2a51   : > { %v14469_v50 = vpop.f32.mrf.mxu1  ;;  %12449 = vmatmul.mubr.msk.f32.vlgmr.msra.gmra.mxu0 %vm1235_vm4, %v14246_v4  ;;  %12451 = vmatprep.subr.mxu0 %v13033_v1 }
0x2a52   : > { %v8526_v44 = vadd.f32 %v8524_v29, %v14469_v50  ;;  %12452 = vmatpush3.msra.mxu0 %v8511_v46  ;;  %12453 = vmatprep.mubr.msk.f32.mxu0 %vm13034_vm1, %v13033_v1 }
0x2a53   : > { %12461 = vmatprep.subr.mxu0 %v13033_v1  ;;  %12459 = vmatmul.mubr.msk.f32.vlgmr.msra.gmra.mxu1 %vm1235_vm4, %v14256_v10 }
0x2a54   : > { %v8528_v7 = vmin.f32 %v8526_v44, 20.0  ;;  %12466 = vmatprep.subr.mxu1 %v13033_v1  ;;  %12468 = vmatprep.mubr.msk.f32.mxu1 %vm13034_vm1, %v13033_v1  ;;  %vm8527_vm13 = vcmp.gt.f32.partialorder %v8526_v44, 20.0 }
0x2a55   : > { %12454 = vmatmul.mubr.msk.f32.vlgmr.msra.gmra.mxu0 %vm1235_vm4, %v14264_v47  ;;  %12467 = vmatpush3.msra.mxu1 %v14269_v5 }
0x2a56   : > { %v8529_v8 = vmul.f32 1.442695, %v8528_v7  ;;  %12462 = vmatpush3.msra.mxu0 %v8511_v46  ;;  %12463 = vmatprep.mubr.msk.f32.mxu0 %vm13034_vm1, %v13033_v1 }
0x2a57   : > { %12471 = vmatprep.subr.mxu0 %v13033_v1  ;;  %12476 = vmatprep.subr.mxu1 %v13033_v1 }
0x2a58   : > { %12847 = vpow2.f32 %v8529_v8 }
0x2a59   : > { %12464 = vmatmul.mubr.msk.f32.vlgmr.msra.gmra.mxu0 %vm1235_vm4, %v14277_v56 }
0x2a5a   : > { %12473 = vmatprep.mubr.msk.f32.mxu0 %vm13034_vm1, %v13033_v1 }
0x2a65   : > { %v12848_v2 = vpop.eup %12847 }
0x2a66   : > { %v8531_v18 = vadd.f32 1.0, %v12848_v2 }
0x2a68   : > { %12849 = vlog2.f32 %v8531_v18 }
0x2a69   : > { %12851 = vpow2.f32 %v8859_v35 }
0x2a75   : > { %v12850_v53 = vpop.eup %12849 }
0x2a76   : > { %v8533_v48 = vmul.f32 0.6931472, %v12850_v53  ;;  %v12852_v51 = vpop.eup %12851 }
0x2a77   : > { %v8861_v32 = vsub.f32 0.0, %v12852_v51 }
0x2a78   : > { %v8534_v30 = vsel %vm8527_vm13, %v8526_v44, %v8533_v48  ;;  %v8847_v44 = vrot.slane %v11345_v52, %v13364_v24 }
0x2a79   : > { %8869 = vrot.lane.b32.xlu1 %v8534_v30, %s14837_s5  ;;  %v8866_v33 = vrot.slane %v8861_v32, %v13267_v14 }
0x2aeb   : > { %v8870_v38 = vpop.permute.xlu1 %8869 }
0x2aec   : > { %v8872_v34 = vmul.f32 %v8870_v38, %v8866_v33 }
0x2aee   : > { %12469 = vmatmul.mubr.msk.f32.vlgmr.msra.gmra.mxu1 %vm1235_vm4, %v8872_v34 }
0x2aef   : > { %12478 = vmatprep.mubr.msk.f32.mxu1 %vm13034_vm1, %v13033_v1 }
0x2b11   : > { %v8612_v37 = vpop.f32.mrf.mxu0 }
0x2b12   : > { %v8620_v15 = vmul.f32 %v8619_v39, %v8612_v37 }
0x2b13   : > { %v12450_v57 = vpop.f32.mrf.mxu0  ;;  %v8764_v26 = vpop.f32.mrf.mxu1 }
0x2b14   : > { %v8621_v13 = vadd.f32 %v11347_v27, %v8620_v15  ;;  %v8772_v29 = vmul.f32 %v8771_v11, %v8764_v26 }
0x2b15   : > { %v8688_v43 = vpop.f32.mrf.mxu0  ;;  %v12460_v45 = vpop.f32.mrf.mxu1 }
0x2b16   : > { %v8696_v46 = vmul.f32 %v8695_v6, %v8688_v43 }
0x2b17   : > { %v12455_v7 = vpop.f32.mrf.mxu0 }
0x2b18   : > { %v8697_v8 = vadd.f32 %v8696_v46, %v8621_v13 }
0x2b19   : > { %v8840_v2 = vpop.f32.mrf.mxu0 }
0x2b1a   : > { %v8773_v18 = vadd.f32 %v8772_v29, %v8697_v8  ;;  %v8848_v53 = vmul.f32 %v8847_v44, %v8840_v2 }
0x2b1b   : > { %v12465_v48 = vpop.f32.mrf.mxu0 }
0x2b1c   : > { %v8849_v30 = vadd.f32 %v8848_v53, %v8773_v18 }
0x2b1e   : > { %v8850_v60 = vsub.f32 0.0, %v8849_v30 }
0x2b20   : > { %v8851_v35 = vmul.f32 1.442695, %v8850_v60 }
0x2b22   : > { %12853 = vpow2.f32 %v8851_v35 }
0x2b2f   : > { %v12854_v51 = vpop.eup %12853 }
0x2b30   : > { %v8853_v32 = vadd.f32 1.0, %v12854_v51 }
0x2b32   : > { %12855 = vrcp.f32 %v8853_v32 }
0x2b3f   : > { %v12856_v33 = vpop.eup %12855 }
0x2b40   : > { %v14506_v34 = vmul.f32 %v12856_v33, %v8849_v30 }
0x2b42   : > { %9031 = vrot.lane.b32.xlu0 %v14506_v34, %s14837_s5  ;;  %9029 = vrot.lane.b32.xlu1 %v14506_v34, %s14838_s8 }
0x2bae   : > { %v8942_v52 = vpop.f32.mrf.mxu1 }
0x2baf   : > { %12472 = vmatpush3.msra.mxu0 %v8942_v52 }
0x2bb0   : > { %v12470_v39 = vpop.f32.mrf.mxu1  ;;  %12474 = vmatmul.mubr.msk.f32.vlgmr.msra.gmra.mxu0 %vm1235_vm4, %v14302_v55  ;;  %12481 = vmatprep.subr.mxu0 %v13033_v1  ;;  %v9016_v55 = vmul.f32 %v14327_v20, %v8942_v52 }
0x2bb1   : > { %12482 = vmatpush3.msra.mxu0 %v14308_v28  ;;  %12483 = vmatprep.mubr.msk.f32.mxu0 %vm13034_vm1, %v13033_v1 }
0x2bb2   : > { %12491 = vmatprep.subr.mxu0 %v13033_v1  ;;  %v9017_v28 = vsel %vm1721_vm6, %v9016_v55, 0.0 }
0x2bb3   : > { %v9018_v6 = vrot.slane %v9017_v28, 4 }
0x2bb4   : > { %v9032_v37 = vpop.permute.xlu0 %9031  ;;  %v9030_v15 = vpop.permute.xlu1 %9029 }
0x2bb5   : > { %12477 = vmatpush3.xpose.msk.msra.mxu1 %vm1109_vm3, %v9032_v37  ;;  %v9019_v11 = vadd.f32 %v9018_v6, %v9017_v28 }
0x2bb6   : > { %12486 = vmatprep.subr.mxu1 %v13033_v1 }
0x2bb7   : > { %v9020_v27 = vrot.slane %v9019_v11, 2 }
0x2bb8   : > { %12479 = vmatmul.mubr.msk.f32.vlgmr.msra.gmra.mxu1 %vm1109_vm3, %v9030_v15 }
0x2bb9   : > { %12487 = vmatpush3.msra.mxu1 %v14149_v25  ;;  %12488 = vmatprep.mubr.msk.f32.mxu1 %vm13034_vm1, %v13033_v1  ;;  %v9021_v57 = vadd.f32 %v9020_v27, %v9019_v11 }
0x2bbb   : > { %v9022_v26 = vrot.slane %v9021_v57, 1 }
0x2bbc   : > { %12489 = vmatmul.mubr.msk.f32.vlgmr.msra.gmra.mxu1 %vm1235_vm4, %v8870_v38 }
0x2bbd   : > { %12498 = vmatprep.mubr.msk.f32.mxu1 %vm1235_vm4, %v14322_v12  ;;  %v9023_v43 = vadd.f32 %v9022_v26, %v9021_v57  ;;  %v11359_v12 = vld [vmem:[%s14833_s11 + $0x6] sm:$0x1] }
0x2c70   : > { %v9012_v45 = vpop.f32.mrf.mxu0 }
0x2c71   : > { %v9024_v13 = vsub.f32 %v9012_v45, %v9023_v43  ;;  %v11379_v43 = vld [vmem:[%s13181_s30 + $0x1b8] sm:$0xff]  ;;  %v11378_v45 = vld [vmem:[%s13181_s30 + $0x1b0] sm:$0xff] }
0x2c72   : > { %v12475_v46 = vpop.f32.mrf.mxu0 }
0x2c73   : > { %v11374_v46 = vld [vmem:[%s13181_s30 + $0x190] sm:$0xff] }
0x2c78   : > { %v9103_v29 = vpop.f32.mrf.mxu1 }
0x2c79   : > { %12484 = vmatmul.mubr.msk.f32.vlgmr.msra.gmra.mxu0 %vm1235_vm4, %v9103_v29  ;;  %v11373_v29 = vld [vmem:[%s13181_s30 + $0x188] sm:$0xff] }
0x2c7a   : > { %v12480_v38 = vpop.f32.mrf.mxu1  ;;  %12492 = vmatpush3.msra.mxu0 %v14149_v25  ;;  %12493 = vmatprep.mubr.msk.f32.mxu0 %vm13034_vm1, %v13033_v1 }
0x2c7b   : > { %12510 = vmatprep.subr.mxu0 %v13033_v1  ;;  %v11372_v38 = vld [vmem:[%s13181_s30 + $0x180] sm:$0xff] }
0x2c7c   : > { %v9249_v20 = vpop.f32.mrf.mxu1 }
0x2c7d   : > { %v9328_v44 = vmul.f32 %v9249_v20, %v14506_v34  ;;  %12494 = vmatmul.mubr.msk.f32.vlgmr.msra.gmra.mxu0 %vm1235_vm4, %v11359_v12 }
0x2c7e   : > { %v12490_v7 = vpop.f32.mrf.mxu1  ;;  %12526 = vmatprep.mubr.msk.f32.mxu0 %vm13034_vm1, %v13033_v1 }
0x2c7f   : > { %12496 = vmatprep.subr.mxu1 %v9328_v44 }
0x2c80   : > { %12497 = vmatpush3.msra.mxu1 %v9328_v44 }
0x2c81   : > { %12499 = vmatmul.mubr.msk.f32.vlgmr.msra.gmra.mxu1 %vm1235_vm4, %v14342_v23  ;;  %12529 = vmatprep.subr.mxu1 %v13033_v1 }
0x2c82   : > { %12501 = vmatprep.mubr.msk.f32.mxu1 %vm1235_vm4, %v14348_v31  ;;  %12530 = vmatpush3.msra.mxu1 %v11379_v43 }
0x2c83   : > { %12531 = vmatprep.subr.mxu1 %v13033_v1 }
0x2c84   : > { %12532 = vmatpush3.msra.mxu1 %v11378_v45 }
0x2c85   : > { %12502 = vmatmul.mubr.msk.f32.gmra.mxu1 %vm1235_vm4, %v14353_v61  ;;  %12533 = vmatprep.subr.mxu1 %v13033_v1 }
0x2c86   : > { %12504 = vmatprep.mubr.msk.f32.mxu1 %vm1235_vm4, %v14358_v63 }
0x2c89   : > { %12505 = vmatmul.mubr.msk.f32.gmra.mxu1 %vm1235_vm4, %v14363_v58  ;;  %v9025_v58 = vsel %vm1729_vm7, %v9024_v13, -1e+30  ;;  %v11375_v13 = vld [vmem:[%s13181_s30 + $0x198] sm:$0xff] }
0x2c8a   : > { %12507 = vmatprep.mubr.msk.f32.mxu1 %vm1235_vm4, %v14368_v42  ;;  %v9026_v48 = vmul.f32 1.442695, %v9025_v58  ;;  %v11390_v58 = vld [vmem:[%s13146_s27 + $0x1f8] sm:$0xff] }
0x2c8c   : > { %12857 = vpow2.f32 %v9026_v48  ;;  %v11388_v48 = vld [vmem:[%s13146_s27 + $0x1e8] sm:$0xff] }
0x2c8d   : > { %12508 = vmatmul.mubr.msk.f32.gmra.mxu1 %vm1235_vm4, %v14373_v41 }
0x2c8e   : > { %12545 = vmatprep.mubr.msk.f32.mxu1 %vm13034_vm1, %v13033_v1 }
0x2d39   : > { %v9176_v25 = vpop.f32.mrf.mxu0 }
0x2d3b   : > { %v12485_v23 = vpop.f32.mrf.mxu0 }
0x2d3d   : > { %v9324_v31 = vpop.f32.mrf.mxu0 }
0x2d3f   : > { %v12495_v8 = vpop.f32.mrf.mxu0 }
0x2d41   : > { %v12500_v61 = vpop.f32.mrf.mxu1 }
0x2d43   : > { %v9395_v2 = vpop.f32.mrf.mxu1 }
0x2d45   : > { %v12503_v18 = vpop.f32.mrf.mxu1 }
0x2d46   : > { %v9437_v33 = vmul.f32 %v14401_v40, %v12503_v18  ;;  %v9520_v40 = vsub.f32 0.0, %v14469_v50 }
0x2d47   : > { %v9405_v63 = vpop.f32.mrf.mxu1 }
0x2d49   : > { %v12506_v53 = vpop.f32.mrf.mxu1 }
0x2d4a   : > { %v9439_v51 = vmul.f32 %v14391_v3, %v12506_v53  ;;  %v12858_v3 = vpop.eup %12857  ;;  %v11389_v53 = vld [vmem:[%s13146_s27 + $0x1f0] sm:$0xff] }
0x2d4b   : > { %v9415_v42 = vpop.f32.mrf.mxu1  ;;  %v9180_v52 = vmul.f32 %v12858_v3, %v9176_v25  ;;  %v11371_v25 = vld [vmem:[%s14836_s23 + $0x6] ss:$0 sm:$0xff] }
0x2d4c   : > { %v9438_v32 = vmul.f32 %v14396_v0, %v9415_v42  ;;  %v9434_v0 = vmul.f32 %v14416_v22, %v9395_v2  ;;  %v9445_v22 = vrot.slane %v9324_v31, %v13267_v14  ;;  %v11387_v42 = vld [vmem:[%s13146_s27 + $0x1e0] sm:$0xff] }
0x2d4d   : > { %v12509_v30 = vpop.f32.mrf.mxu1 }
0x2d4e   : > { %v9441_v41 = vmul.f32 %v14382_v59, %v12509_v30  ;;  %v9436_v59 = vmul.f32 %v14406_v62, %v9405_v63  ;;  %v9521_v62 = vmul.f32 1.442695, %v9520_v40  ;;  %v9446_v15 = vmul.f32 %v9445_v22, %v14506_v34  ;;  %v11376_v34 = vld [vmem:[%s13181_s30 + $0x1a0] sm:$0xff]  ;;  %v11386_v30 = vld [vmem:[%s13146_s27 + $0x1d8] sm:$0xff] }
0x2d4f   : > { %v9425_v60 = vpop.f32.mrf.mxu1 }
0x2d50   : > { %v9440_v35 = vmul.f32 %v14386_v49, %v9425_v60  ;;  %12511 = vmatpush3.msra.mxu0 %v9441_v41  ;;  %v9435_v49 = vmul.f32 %v14411_v54, %v12500_v61  ;;  %12859 = vpow2.f32 %v9521_v62  ;;  %v11384_v41 = vld [vmem:[%s13146_s27 + $0x1c8] sm:$0xff]  ;;  %v11383_v60 = vld [vmem:[%s13146_s27 + $0x1c0] sm:$0xff] }
0x2d51   : > { %12512 = vmatprep.subr.mxu0 %v13033_v1 }
0x2d52   : > { %12513 = vmatpush3.msra.mxu0 %v9440_v35  ;;  %v11393_v35 = vld [vmem:[%s13161_s12 + $0x7] ss:$0 sm:$0xff] }
0x2d53   : > { %12514 = vmatprep.subr.mxu0 %v13033_v1 }
0x2d54   : > { %12515 = vmatpush3.msra.mxu0 %v9439_v51 }
0x2d55   : > { %12516 = vmatprep.subr.mxu0 %v13033_v1 }
0x2d56   : > { %12517 = vmatpush3.msra.mxu0 %v9438_v32 }
0x2d57   : > { %12518 = vmatprep.subr.mxu0 %v13033_v1 }
0x2d58   : > { %12519 = vmatpush3.msra.mxu0 %v9437_v33 }
0x2d59   : > { %12520 = vmatprep.subr.mxu0 %v13033_v1 }
0x2d5a   : > { %12521 = vmatpush3.msra.mxu0 %v9436_v59 }
0x2d5b   : > { %12522 = vmatprep.subr.mxu0 %v13033_v1 }
0x2d5c   : > { %12523 = vmatpush3.msra.mxu0 %v9435_v49  ;;  %v11382_v49 = vld [vmem:[%s13141_s6 + $0x7] ss:$0 sm:$0xff] }
0x2d5d   : > { %12524 = vmatprep.subr.mxu0 %v13033_v1  ;;  %v12860_v54 = vpop.eup %12859 }
0x2d5e   : > { %12525 = vmatpush3.msra.mxu0 %v9434_v0  ;;  %v9523_v39 = vadd.f32 1.0, %v12860_v54 }
0x2d5f   : > { %12527 = vmatmul.mubr.msk.f32.vlgmr.msra.gmra.mxu0 %vm1721_vm6, %v9180_v52  ;;  %9681 = vmatprep.subr.mxu0 %v11390_v58 }
0x2d60   : > { %9721 = vmatprep.mubr.f32.mxu0 %v13033_v1  ;;  %12861 = vrcp.f32 %v9523_v39  ;;  %9682 = vmatpush1.msra.mxu0 %v11389_v53 }
0x2d61   : > { %9683 = vmatprep.subr.mxu0 %v11388_v48 }
0x2d62   : > { %9684 = vmatpush1.msra.mxu0 %v11387_v42 }
0x2d63   : > { %9685 = vmatprep.subr.mxu0 %v11386_v30 }
0x2d6d   : > { %v12862_v37 = vpop.eup %12861 }
0x2d6e   : > { %v9526_v28 = vmul.f32 %v12862_v37, %v14469_v50  ;;  %v11377_v50 = vld [vmem:[%s13181_s30 + $0x1a8] sm:$0xff] }
0x2d6f   : > { %12534 = vmatpush3.msra.mxu1 %v11377_v50 }
0x2d70   : > { %12535 = vmatprep.subr.mxu1 %v13033_v1 }
0x2d71   : > { %12536 = vmatpush3.msra.mxu1 %v11376_v34 }
0x2d72   : > { %12537 = vmatprep.subr.mxu1 %v13033_v1 }
0x2d73   : > { %12538 = vmatpush3.msra.mxu1 %v11375_v13  ;;  %v11396_v13 = vld [vmem:[%s14827_s2 + $0x7] ss:$0 sm:$0xff] }
0x2d74   : > { %12539 = vmatprep.subr.mxu1 %v13033_v1 }
0x2d75   : > { %12540 = vmatpush3.msra.mxu1 %v11374_v46 }
0x2d76   : > { %12541 = vmatprep.subr.mxu1 %v13033_v1 }
0x2d77   : > { %12542 = vmatpush3.msra.mxu1 %v11373_v29 }
0x2d78   : > { %12543 = vmatprep.subr.mxu1 %v13033_v1 }
0x2d79   : > { %12544 = vmatpush3.msra.mxu1 %v11372_v38 }
0x2d7a   : > { %12548 = vmatprep.subr.mxu1 %v13033_v1 }
0x2e1f   : > { %v9516_v55 = vpop.f32.mrf.mxu0 }
0x2e20   : > { %v9517_v6 = vadd.f32 %v9516_v55, %v9446_v15  ;;  %v11401_v15 = vld [vmem:[%s14825_s28 + $0x7] sm:$0x1] }
0x2e21   : > { %v12528_v11 = vpop.f32.mrf.mxu0  ;;  %v10071_v55 = vmul.f32 1.442695, %v11401_v15 }
0x2e22   : > { %v9527_v27 = vmul.f32 %v9526_v28, %v9517_v6 }
0x2e24   : > { %v9528_v57 = vmul.f32 %v9527_v27, %v9527_v27 }
0x2e26   : > { %v9529_v26 = vsel %vm1721_vm6, %v9528_v57, 0.0  ;;  %v11394_v57 = vld [vmem:[%s14826_s1 + $0x1c] sm:$0xf] }
0x2e27   : > { %9530 = vadd.xlane.f32.xlu0 %v9529_v26  ;;  %v9831_v26 = vrot.slane %v11394_v57, %v13267_v14  ;;  %v9907_v50 = vrot.slane %v11394_v57, %v13356_v16  ;;  %v9983_v34 = vrot.slane %v11394_v57, %v13359_v17 }
0x2e3d   : > { %9735 = vrot.lane.b32.xlu0 %v11393_v35, %s14837_s5  ;;  %v12937_v35 = vld [vmem:[%s14829_s10] sm:$0xff] }
0x2eb0   : > { %v9531_v12 = vpop.xlane.xlu0 %9530 }
0x2eb1   : > { %v9532_v20 = vmul.f32 0.015625, %v9531_v12 }
0x2eb3   : > { %v9533_v44 = vadd.f32 1e-05, %v9532_v20 }
0x2eb4   : > { %v9736_v40 = vpop.permute.xlu0 %9735 }
0x2eb5   : > { %12863 = vrsqrt.f32 %v9533_v44 }
0x2ec2   : > { %v12864_v7 = vpop.eup %12863 }
0x2ec3   : > { %v9535_v23 = vmul.f32 %v12864_v7, %v9527_v27 }
0x2ec5   : > { %v9544_v31 = vmul.f32 %v11371_v25, %v9535_v23  ;;  %v10059_v25 = vrot.slane %v11394_v57, %v13364_v24  ;;  %v12945_v57 = vld [vmem:[%s14831_s22 + $0x30] sm:$0xff] }
0x2ec7   : > { %12546 = vmatmul.mubr.msk.f32.vlgmr.msra.gmra.mxu1 %vm1721_vm6, %v9544_v31 }
0x2ec8   : > { %12550 = vmatprep.mubr.msk.f32.mxu1 %vm13034_vm1, %v13033_v1 }
0x2f87   : > { %v9623_v8 = vpop.f32.mrf.mxu1 }
0x2f88   : > { %v14602_v61 = vadd.f32 %v9623_v8, %v14448_v9  ;;  %v11385_v9 = vld [vmem:[%s13146_s27 + $0x1d0] sm:$0xff] }
0x2f89   : > { %v12547_v2 = vpop.f32.mrf.mxu1  ;;  %9686 = vmatpush1.msra.mxu0 %v11385_v9 }
0x2f8a   : > { %v9628_v18 = vmul.f32 %v14602_v61, %v14602_v61  ;;  %9687 = vmatprep.subr.mxu0 %v11384_v41  ;;  %v12935_v41 = vld [vmem:[%s14828_s7] sm:$0xff] }
0x2f8b   : > { %9688 = vmatpush1.msra.mxu0 %v11383_v60  ;;  %v12936_v60 = vld [vmem:[%s14830_s18] sm:$0xff] }
0x2f8c   : > { %v9629_v63 = vsel %vm1109_vm3, %v9628_v18, 0.0  ;;  %12558 = vmatprep.subr.mxu0 %v13033_v1 }
0x2f8d   : > { %9630 = vadd.xlane.f32.xlu1 %v9629_v63 }
0x3016   : > { %v9631_v51 = vpop.xlane.xlu1 %9630 }
0x3017   : > { %v9632_v32 = vmul.f32 0.03125, %v9631_v51  ;;  %v12938_v51 = vld [vmem:[%s14831_s22] sm:$0xff] }
0x3019   : > { %v9633_v33 = vadd.f32 1e-05, %v9632_v32  ;;  %v12939_v32 = vld [vmem:[%s14832_s0] sm:$0xff] }
0x301b   : > { %12865 = vrsqrt.f32 %v9633_v33 }
0x3028   : > { %v12866_v59 = vpop.eup %12865 }
0x3029   : > { %v9635_v3 = vmul.f32 %v12866_v59, %v14602_v61 }
0x302b   : > { %v9644_v0 = vmul.f32 %v11382_v49, %v9635_v3 }
0x302d   : > { %11391 = vmatmul.mubr.msk.f32.vlgmr.msra.gmra.mxu0 %vm1109_vm3, %v9644_v0 }
0x302e   : > { %12560 = vmatprep.mubr.msk.f32.mxu0 %vm13034_vm1, %v13033_v1 }
0x30ed   : > { %v9723_v52 = vpop.f32.mrf.mxu0 }
0x30ee   : > { %12549 = vmatpush3.msra.mxu1 %v9723_v52  ;;  %12559 = vmatpush3.msra.mxu0 %v9723_v52 }
0x30ef   : > { %v14623_v62 = vpop.f32.mrf.mxu0  ;;  %12551 = vmatmul.mubr.msk.f32.vlgmr.msra.gmra.mxu1 %vm1235_vm4, %v14246_v4  ;;  %12553 = vmatprep.subr.mxu1 %v13033_v1 }
0x30f0   : > { %v9738_v54 = vadd.f32 %v9736_v40, %v14623_v62  ;;  %12554 = vmatpush3.msra.mxu1 %v9723_v52  ;;  %12555 = vmatprep.mubr.msk.f32.mxu1 %vm13034_vm1, %v13033_v1 }
0x30f1   : > { %12563 = vmatprep.subr.mxu1 %v13033_v1  ;;  %12561 = vmatmul.mubr.msk.f32.vlgmr.msra.gmra.mxu0 %vm1235_vm4, %v14256_v10 }
0x30f2   : > { %v9740_v39 = vmin.f32 %v9738_v54, 20.0  ;;  %12568 = vmatprep.subr.mxu0 %v13033_v1  ;;  %12570 = vmatprep.mubr.msk.f32.mxu0 %vm13034_vm1, %v13033_v1  ;;  %vm9739_vm14 = vcmp.gt.f32.partialorder %v9738_v54, 20.0 }
0x30f3   : > { %12556 = vmatmul.mubr.msk.f32.vlgmr.msra.gmra.mxu1 %vm1235_vm4, %v14264_v47  ;;  %12569 = vmatpush3.msra.mxu0 %v14269_v5 }
0x30f4   : > { %v9741_v4 = vmul.f32 1.442695, %v9740_v39  ;;  %12564 = vmatpush3.msra.mxu1 %v9723_v52  ;;  %12565 = vmatprep.mubr.msk.f32.mxu1 %vm13034_vm1, %v13033_v1 }
0x30f5   : > { %12573 = vmatprep.subr.mxu1 %v13033_v1  ;;  %12578 = vmatprep.subr.mxu0 %v13033_v1 }
0x30f6   : > { %12867 = vpow2.f32 %v9741_v4 }
0x30f7   : > { %12566 = vmatmul.mubr.msk.f32.vlgmr.msra.gmra.mxu1 %vm1235_vm4, %v14277_v56 }
0x30f8   : > { %12575 = vmatprep.mubr.msk.f32.mxu1 %vm13034_vm1, %v13033_v1 }
0x3103   : > { %v12868_v10 = vpop.eup %12867 }
0x3104   : > { %v9743_v47 = vadd.f32 1.0, %v12868_v10 }
0x3106   : > { %12869 = vlog2.f32 %v9743_v47 }
0x3107   : > { %12871 = vpow2.f32 %v10071_v55 }
0x3113   : > { %v12870_v5 = vpop.eup %12869 }
0x3114   : > { %v9745_v22 = vmul.f32 0.6931472, %v12870_v5  ;;  %v12872_v28 = vpop.eup %12871 }
0x3115   : > { %v10073_v6 = vsub.f32 0.0, %v12872_v28  ;;  %v12940_v28 = vld [vmem:[%s14831_s22 + $0x8] sm:$0xff] }
0x3116   : > { %v9746_v37 = vsel %vm9739_vm14, %v9738_v54, %v9745_v22  ;;  %v11408_v22 = vld [vmem:[%s14833_s11 + $0x7] sm:$0x1] }
0x3117   : > { %10081 = vrot.lane.b32.xlu1 %v9746_v37, %s14837_s5  ;;  %v10078_v56 = vrot.slane %v10073_v6, %v13267_v14  ;;  %v12941_v6 = vld [vmem:[%s14831_s22 + $0x10] sm:$0xff] }
0x3189   : > { %v10082_v11 = vpop.permute.xlu1 %10081 }
0x318a   : > { %v10084_v27 = vmul.f32 %v10082_v11, %v10078_v56  ;;  %v12942_v56 = vld [vmem:[%s14831_s22 + $0x18] sm:$0xff] }
0x318c   : > { %12571 = vmatmul.mubr.msk.f32.vlgmr.msra.gmra.mxu0 %vm1235_vm4, %v10084_v27  ;;  %v12944_v27 = vld [vmem:[%s14831_s22 + $0x28] sm:$0xff] }
0x318d   : > { %12580 = vmatprep.mubr.msk.f32.mxu0 %vm13034_vm1, %v13033_v1 }
0x31af   : > { %v9824_v43 = vpop.f32.mrf.mxu1 }
0x31b0   : > { %v9832_v45 = vmul.f32 %v9831_v26, %v9824_v43  ;;  %v12946_v26 = vld [vmem:[%s14831_s22 + $0x38] sm:$0xff] }
0x31b1   : > { %v12552_v46 = vpop.f32.mrf.mxu1  ;;  %v9976_v29 = vpop.f32.mrf.mxu0 }
0x31b2   : > { %v9833_v20 = vadd.f32 %v11396_v13, %v9832_v45  ;;  %v9984_v7 = vmul.f32 %v9983_v34, %v9976_v29 }
0x31b3   : > { %v9900_v38 = vpop.f32.mrf.mxu1  ;;  %v12562_v12 = vpop.f32.mrf.mxu0 }
0x31b4   : > { %v9908_v44 = vmul.f32 %v9907_v50, %v9900_v38 }
0x31b5   : > { %v12557_v23 = vpop.f32.mrf.mxu1 }
0x31b6   : > { %v9909_v31 = vadd.f32 %v9908_v44, %v9833_v20  ;;  %v12947_v23 = vld [vmem:[%s14835_s3 + $0x38] sm:$0xff] }
0x31b7   : > { %v10052_v8 = vpop.f32.mrf.mxu1 }
0x31b8   : > { %v9985_v2 = vadd.f32 %v9984_v7, %v9909_v31  ;;  %v10060_v18 = vmul.f32 %v10059_v25, %v10052_v8 }
0x31b9   : > { %v12567_v63 = vpop.f32.mrf.mxu1 }
0x31ba   : > { %v10061_v58 = vadd.f32 %v10060_v18, %v9985_v2  ;;  %v12948_v2 = vld [vmem:[%s14835_s3 + $0x30] sm:$0xff]  ;;  %v12949_v63 = vld [vmem:[%s14835_s3 + $0x28] sm:$0xff] }
0x31bc   : > { %v10062_v16 = vsub.f32 0.0, %v10061_v58 }
0x31be   : > { %v10063_v53 = vmul.f32 1.442695, %v10062_v16 }
0x31c0   : > { %12873 = vpow2.f32 %v10063_v53  ;;  %v12951_v53 = vld [vmem:[%s14835_s3 + $0x18] sm:$0xff] }
0x31cd   : > { %v12874_v17 = vpop.eup %12873 }
0x31ce   : > { %v10065_v48 = vadd.f32 1.0, %v12874_v17 }
0x31d0   : > { %12875 = vrcp.f32 %v10065_v48  ;;  %v12952_v48 = vld [vmem:[%s14835_s3 + $0x10] sm:$0xff] }
0x31dd   : > { %v12876_v42 = vpop.eup %12875 }
0x31de   : > { %v14660_v30 = vmul.f32 %v12876_v42, %v10061_v58  ;;  %v12950_v58 = vld [vmem:[%s14835_s3 + $0x20] sm:$0xff] }
0x31e0   : > { %10243 = vrot.lane.b32.xlu0 %v14660_v30, %s14837_s5  ;;  %10241 = vrot.lane.b32.xlu1 %v14660_v30, %s14838_s8 }
0x31e4   : > { %10840 = vrot.lane.b32.xlu1 %v13275_v19, %s14837_s5 }
0x31e8   : > { %10844 = vrot.lane.b32.xlu1 %v13279_v21, %s14837_s5  ;;  %s14839_s5 = sshll.u32 %s14841_s16, 3 }
0x31ec   : > { %10848 = vrot.lane.b32.xlu1 %v13275_v19, %s14838_s8 }
0x31f0   : > { %10852 = vrot.lane.b32.xlu1 %v13279_v21, %s14838_s8  ;;  %s952_s8 = scalar_lea.vmem %s13196_s20, %s14839_s5 }
0x324c   : > { %v10154_v24 = vpop.f32.mrf.mxu0 }
0x324d   : > { %12574 = vmatpush3.msra.mxu1 %v10154_v24  ;;  %v10228_v33 = vmul.f32 %v12939_v32, %v10154_v24  ;;  %v12953_v24 = vld [vmem:[%s14835_s3 + $0x8] sm:$0xff] }
0x324e   : > { %v12572_v9 = vpop.f32.mrf.mxu0  ;;  %12576 = vmatmul.mubr.msk.f32.vlgmr.msra.gmra.mxu1 %vm1235_vm4, %v12935_v41  ;;  %12583 = vmatprep.subr.mxu1 %v13033_v1 }
0x324f   : > { %12584 = vmatpush3.msra.mxu1 %v12936_v60  ;;  %12585 = vmatprep.mubr.msk.f32.mxu1 %vm13034_vm1, %v13033_v1  ;;  %v10229_v59 = vsel %vm1721_vm6, %v10228_v33, 0.0  ;;  %v12954_v60 = vld [vmem:[%s14835_s3] sm:$0xff] }
0x3250   : > { %12593 = vmatprep.subr.mxu1 %v13033_v1  ;;  %v10230_v49 = vrot.slane %v10229_v59, 4 }
0x3252   : > { %v10244_v19 = vpop.permute.xlu0 %10243  ;;  %v10242_v21 = vpop.permute.xlu1 %10241  ;;  %v10231_v3 = vadd.f32 %v10230_v49, %v10229_v59 }
0x3253   : > { %12579 = vmatpush3.xpose.msk.msra.mxu0 %vm1109_vm3, %v10244_v19 }
0x3254   : > { %12588 = vmatprep.subr.mxu0 %v13033_v1  ;;  %v10232_v0 = vrot.slane %v10231_v3, 2 }
0x3256   : > { %12581 = vmatmul.mubr.msk.f32.vlgmr.msra.gmra.mxu0 %vm1109_vm3, %v10242_v21  ;;  %v10233_v52 = vadd.f32 %v10232_v0, %v10231_v3 }
0x3257   : > { %12589 = vmatpush3.msra.mxu0 %v12937_v35  ;;  %12590 = vmatprep.mubr.msk.f32.mxu0 %vm13034_vm1, %v13033_v1 }
0x3258   : > { %v10234_v40 = vrot.slane %v10233_v52, 1 }
0x325a   : > { %12591 = vmatmul.mubr.msk.f32.vlgmr.msra.gmra.mxu0 %vm1235_vm4, %v10082_v11  ;;  %v10235_v54 = vadd.f32 %v10234_v40, %v10233_v52  ;;  %v12943_v11 = vld [vmem:[%s14831_s22 + $0x20] sm:$0xff] }
0x325b   : > { %12600 = vmatprep.mubr.msk.f32.mxu0 %vm1235_vm4, %v12938_v51 }
0x330e   : > { %v10224_v39 = vpop.f32.mrf.mxu1 }
0x330f   : > { %v10236_v4 = vsub.f32 %v10224_v39, %v10235_v54 }
0x3310   : > { %v12577_v10 = vpop.f32.mrf.mxu1 }
0x3311   : > { %v10237_v12 = vsel %vm1729_vm7, %v10236_v4, -1e+30 }
0x3312   : > { %v10238_v44 = vmul.f32 1.442695, %v10237_v12 }
0x3314   : > { %12877 = vpow2.f32 %v10238_v44 }
0x3316   : > { %v10315_v47 = vpop.f32.mrf.mxu0 }
0x3317   : > { %12586 = vmatmul.mubr.msk.f32.vlgmr.msra.gmra.mxu1 %vm1235_vm4, %v10315_v47  ;;  %v11428_v47 = vld [vmem:[%s13181_s30 + $0x1f8] sm:$0xff] }
0x3318   : > { %v12582_v5 = vpop.f32.mrf.mxu0  ;;  %12594 = vmatpush3.msra.mxu1 %v12937_v35  ;;  %12595 = vmatprep.mubr.msk.f32.mxu1 %vm13034_vm1, %v13033_v1  ;;  %v10732_v35 = vsub.f32 0.0, %v14623_v62 }
0x3319   : > { %12612 = vmatprep.subr.mxu1 %v13033_v1  ;;  %v11424_v5 = vld [vmem:[%s13181_s30 + $0x1d8] sm:$0xff] }
0x331a   : > { %v10461_v37 = vpop.f32.mrf.mxu0  ;;  %v10733_v51 = vmul.f32 1.442695, %v10732_v35 }
0x331b   : > { %v10540_v15 = vmul.f32 %v10461_v37, %v14660_v30  ;;  %12596 = vmatmul.mubr.msk.f32.vlgmr.msra.gmra.mxu1 %vm1235_vm4, %v11408_v22  ;;  %v11423_v22 = vld [vmem:[%s13181_s30 + $0x1d0] sm:$0xff]  ;;  %v11422_v37 = vld [vmem:[%s13181_s30 + $0x1c8] sm:$0xff] }
0x331c   : > { %v12592_v55 = vpop.f32.mrf.mxu0  ;;  %12628 = vmatprep.mubr.msk.f32.mxu1 %vm13034_vm1, %v13033_v1  ;;  %12879 = vpow2.f32 %v10733_v51 }
0x331d   : > { %12598 = vmatprep.subr.mxu0 %v10540_v15 }
0x331e   : > { %12599 = vmatpush3.msra.mxu0 %v10540_v15  ;;  %v11421_v15 = vld [vmem:[%s13181_s30 + $0x1c0] sm:$0xff] }
0x331f   : > { %12601 = vmatmul.mubr.msk.f32.vlgmr.msra.gmra.mxu0 %vm1235_vm4, %v12940_v28  ;;  %12631 = vmatprep.subr.mxu0 %v13033_v1 }
0x3320   : > { %12603 = vmatprep.mubr.msk.f32.mxu0 %vm1235_vm4, %v12941_v6  ;;  %12632 = vmatpush3.msra.mxu0 %v11428_v47 }
0x3321   : > { %v12878_v41 = vpop.eup %12877  ;;  %12633 = vmatprep.subr.mxu0 %v13033_v1 }
0x3323   : > { %12604 = vmatmul.mubr.msk.f32.gmra.mxu0 %vm1235_vm4, %v12942_v56 }
0x3324   : > { %12606 = vmatprep.mubr.msk.f32.mxu0 %vm1235_vm4, %v12943_v11  ;;  %v11420_v11 = vld [vmem:[%s14836_s23 + $0x7] ss:$0 sm:$0xff] }
0x3327   : > { %12607 = vmatmul.mubr.msk.f32.gmra.mxu0 %vm1235_vm4, %v12944_v27 }
0x3328   : > { %12609 = vmatprep.mubr.msk.f32.mxu0 %vm1235_vm4, %v12945_v57 }
0x3329   : > { %v12880_v32 = vpop.eup %12879 }
0x332a   : > { %v10735_v33 = vadd.f32 1.0, %v12880_v32 }
0x332b   : > { %12610 = vmatmul.mubr.msk.f32.gmra.mxu0 %vm1235_vm4, %v12946_v26  ;;  %v10859_v26 = vld [vmem:[%s13186_s19 + $0x18] sm:$0xff] }
0x332c   : > { %12647 = vmatprep.mubr.msk.f32.mxu0 %vm13034_vm1, %v13033_v1  ;;  %12881 = vrcp.f32 %v10735_v33 }
0x3339   : > { %v12882_v49 = vpop.eup %12881 }
0x333a   : > { %v10738_v52 = vmul.f32 %v12882_v49, %v14623_v62  ;;  %v11426_v62 = vld [vmem:[%s13181_s30 + $0x1e8] sm:$0xff] }
0x33d7   : > { %v10388_v43 = vpop.f32.mrf.mxu1 }
0x33d8   : > { %v10392_v21 = vmul.f32 %v12878_v41, %v10388_v43  ;;  %v10858_v43 = vld [vmem:[%s13186_s19 + $0x10] sm:$0xff] }
0x33d9   : > { %v12587_v45 = vpop.f32.mrf.mxu1 }
0x33da   : > { %v10857_v45 = vld [vmem:[%s13186_s19 + $0x8] sm:$0xff] }
0x33db   : > { %v10536_v50 = vpop.f32.mrf.mxu1 }
0x33dc   : > { %v10657_v59 = vrot.slane %v10536_v50, %v13267_v14  ;;  %v11427_v14 = vld [vmem:[%s13181_s30 + $0x1f0] sm:$0xff]  ;;  %v10856_v50 = vld [vmem:[%s13186_s19] sm:$0xff] }
0x33dd   : > { %v12597_v34 = vpop.f32.mrf.mxu1  ;;  %12634 = vmatpush3.msra.mxu0 %v11427_v14 }
0x33de   : > { %v10658_v3 = vmul.f32 %v10657_v59, %v14660_v30  ;;  %12635 = vmatprep.subr.mxu0 %v13033_v1  ;;  %v11425_v30 = vld [vmem:[%s13181_s30 + $0x1e0] sm:$0xff]  ;;  %v10841_v34 = vpop.permute.xlu1 %10840 }
0x33df   : > { %v12602_v13 = vpop.f32.mrf.mxu0  ;;  %12636 = vmatpush3.msra.mxu0 %v11426_v62 }
0x33e0   : > { %v10647_v9 = vmul.f32 %v12953_v24, %v12602_v13  ;;  %12637 = vmatprep.subr.mxu0 %v13033_v1 }
0x33e1   : > { %v10607_v46 = vpop.f32.mrf.mxu0  ;;  %12638 = vmatpush3.msra.mxu0 %v11425_v30 }
0x33e2   : > { %v10646_v19 = vmul.f32 %v12954_v60, %v10607_v46  ;;  %12639 = vmatprep.subr.mxu0 %v13033_v1  ;;  %v10845_v13 = vpop.permute.xlu1 %10844 }
0x33e3   : > { %v12605_v29 = vpop.f32.mrf.mxu0  ;;  %12640 = vmatpush3.msra.mxu0 %v11424_v5 }
0x33e4   : > { %v10649_v17 = vmul.f32 %v12951_v53, %v12605_v29  ;;  %12641 = vmatprep.subr.mxu0 %v13033_v1 }
0x33e5   : > { %v10617_v38 = vpop.f32.mrf.mxu0  ;;  %12642 = vmatpush3.msra.mxu0 %v11423_v22 }
0x33e6   : > { %v10648_v42 = vmul.f32 %v12952_v48, %v10617_v38  ;;  %12643 = vmatprep.subr.mxu0 %v13033_v1  ;;  %v10849_v29 = vpop.permute.xlu1 %10848 }
0x33e7   : > { %v12608_v20 = vpop.f32.mrf.mxu0  ;;  %12644 = vmatpush3.msra.mxu0 %v11422_v37 }
0x33e8   : > { %v10651_v36 = vmul.f32 %v12949_v63, %v12608_v20  ;;  %12645 = vmatprep.subr.mxu0 %v13033_v1 }
0x33e9   : > { %v10627_v7 = vpop.f32.mrf.mxu0  ;;  %12646 = vmatpush3.msra.mxu0 %v11421_v15 }
0x33ea   : > { %v10650_v16 = vmul.f32 %v12950_v58, %v10627_v7  ;;  %v10853_v7 = vpop.permute.xlu1 %10852 }
0x33eb   : > { %v12611_v25 = vpop.f32.mrf.mxu0 }
0x33ec   : > { %v10653_v31 = vmul.f32 %v12947_v23, %v12611_v25 }
0x33ed   : > { %v10637_v8 = vpop.f32.mrf.mxu0 }
0x33ee   : > { %v10652_v18 = vmul.f32 %v12948_v2, %v10637_v8  ;;  %12613 = vmatpush3.msra.mxu1 %v10653_v31  ;;  %v11430_v31 = vld [vmem:[%s13191_s4] ss:$0 sm:$0xff] }
0x33ef   : > { %12614 = vmatprep.subr.mxu1 %v13033_v1 }
0x33f0   : > { %12615 = vmatpush3.msra.mxu1 %v10652_v18 }
0x33f1   : > { %12616 = vmatprep.subr.mxu1 %v13033_v1 }
0x33f2   : > { %12617 = vmatpush3.msra.mxu1 %v10651_v36 }
0x33f3   : > { %12618 = vmatprep.subr.mxu1 %v13033_v1 }
0x33f4   : > { %12619 = vmatpush3.msra.mxu1 %v10650_v16 }
0x33f5   : > { %12620 = vmatprep.subr.mxu1 %v13033_v1 }
0x33f6   : > { %12621 = vmatpush3.msra.mxu1 %v10649_v17 }
0x33f7   : > { %12622 = vmatprep.subr.mxu1 %v13033_v1 }
0x33f8   : > { %12623 = vmatpush3.msra.mxu1 %v10648_v42 }
0x33f9   : > { %12624 = vmatprep.subr.mxu1 %v13033_v1 }
0x33fa   : > { %12625 = vmatpush3.msra.mxu1 %v10647_v9 }
0x33fb   : > { %12626 = vmatprep.subr.mxu1 %v13033_v1 }
0x33fc   : > { %12627 = vmatpush3.msra.mxu1 %v10646_v19 }
0x33fd   : > { %12629 = vmatmul.mubr.msk.f32.vlgmr.msra.gmra.mxu1 %vm1721_vm6, %v10392_v21  ;;  %12650 = vmatprep.subr.mxu1 %v13033_v1 }
0x33fe   : > { %12658 = vmatprep.mubr.msk.f32.mxu1 %vm13034_vm1, %v13033_v1  ;;  %12651 = vmatpush3.msra.mxu1 %v10859_v26 }
0x33ff   : > { %12652 = vmatprep.subr.mxu1 %v13033_v1 }
0x3400   : > { %12653 = vmatpush3.msra.mxu1 %v10858_v43 }
0x3401   : > { %12654 = vmatprep.subr.mxu1 %v13033_v1 }
0x3402   : > { %12655 = vmatpush3.msra.mxu1 %v10857_v45 }
0x3403   : > { %12656 = vmatprep.subr.mxu1 %v13033_v1 }
0x3404   : > { %12657 = vmatpush3.msra.mxu1 %v10856_v50 }
0x34bd   : > { %v10728_v0 = vpop.f32.mrf.mxu1 }
0x34be   : > { %v10729_v40 = vadd.f32 %v10728_v0, %v10658_v3 }
0x34bf   : > { %v12630_v54 = vpop.f32.mrf.mxu1 }
0x34c0   : > { %v10739_v39 = vmul.f32 %v10738_v52, %v10729_v40 }
0x34c2   : > { %v10740_v4 = vmul.f32 %v10739_v39, %v10739_v39 }
0x34c4   : > { %v10741_v10 = vsel %vm1721_vm6, %v10740_v4, 0.0 }
0x34c5   : > { %10742 = vadd.xlane.f32.xlu0 %v10741_v10 }
0x354e   : > { %v10743_v55 = vpop.xlane.xlu0 %10742 }
0x354f   : > { %v10744_v28 = vmul.f32 0.015625, %v10743_v55 }
0x3551   : > { %v10745_v6 = vadd.f32 1e-05, %v10744_v28 }
0x3553   : > { %12883 = vrsqrt.f32 %v10745_v6 }
0x3560   : > { %v12884_v56 = vpop.eup %12883 }
0x3561   : > { %v10747_v27 = vmul.f32 %v12884_v56, %v10739_v39 }
0x3563   : > { %v10756_v57 = vmul.f32 %v11420_v11, %v10747_v27 }
0x3565   : > { %12648 = vmatmul.mubr.msk.f32.vlgmr.msra.gmra.mxu0 %vm1721_vm6, %v10756_v57 }
0x3625   : > { %v10835_v46 = vpop.f32.mrf.mxu0 }
0x3626   : > { %v10839_v38 = vadd.f32 %v10835_v46, %v14602_v61 }
0x3627   : > { %v12649_v12 = vpop.f32.mrf.mxu0 }
0x3628   : > { %v10843_v20 = vmul.f32 %v10841_v34, %v10839_v38 }
0x362a   : > { %v10847_v44 = vmul.f32 %v10845_v13, %v10843_v20 }
0x362c   : > { %v10851_v25 = vadd.f32 %v10849_v29, %v10847_v44 }
0x362e   : > { %v10855_v23 = vadd.f32 %v10853_v7, %v10851_v25 }
0x3630   : > { %12659 = vmatmul.mubr.msk.f32.vlgmr.msra.gmra.mxu1 %vm1109_vm3, %v10855_v23 }
0x36f0   : > { %v10936_v8 = vpop.f32.mrf.mxu1 }
0x36f1   : > { %v10937_v1 = vadd.f32 %v11430_v31, %v10936_v8 }
0x36f2   : > { %v12660_v2 = vpop.f32.mrf.mxu1 }
0x36f3   : > { %10940 = vst.msk [vmem:[%s952_s8] sm:$0xff] %vm1007_vm2, %v10937_v1 }
0x36f4 PF: > { %s73_s15 = sadd.s32 1, %s12999_s15  }
0x36f5   : > { %p70_p5 = scmp.ge.s32.totalorder %s73_s15, 4  }
0x36f7   :  { %72 = sbr.rel (!%p70_p5) target bundleno = 53 (0x35), region = 272 }
0x36fc   :  { %10960 = vsyncpa [#allocation3], 1 }
0x36fd   :  { %10962 = vsyncpa [#allocation3 + $0x1], 1 }
0x36fe   :  { %10963 = vsyncpa [#allocation5], 1 }

</bundles_post_ra>
